<compile_context>
chip_gen: v7x
topology: tpu7x:2x2x1
jax: 0.10.0
libtpu: 0.0.40
codegen_flags: <defaults>
</compile_context>

<pallas_src>
import functools

import numpy as np
import jax
import jax.numpy as jnp
from jax.experimental import pallas as pl
from jax.experimental.pallas import tpu as pltpu

NEG_SLOPE = 0.2
CH_PAD = 8   # frames travel between steps with channels padded 3 -> 8 (lane friendly)


# ============================================================================
# init-time builders (numpy): turn every conv into
#   out = sum_di (S_di @ x) @ Wcol_di            (upsample / stride folded in)
# so the kernel only ever does plain 2-D matmuls.
# ============================================================================
def _build_conv_mats(w, bias, batch, h_in, w_in, *, stride=1, up=1):
    """w: (kh, kw, cin, cout) numpy.  Returns
       wcol : (kh, w_in*cin, w_out*cout)  banded column matrices
       srow : (kh, batch*(h_out+2), batch*(h_in+2)) row-selection matrices
       btile: (w_out*cout,) per-column bias
    Feature maps are matrices of shape (batch*(h+2), w*c): per-batch row blocks with
    one zero pad row above/below, columns j-major / channel-minor."""
    kh, kw, cin, cout = w.shape
    pad = (kh - 1) // 2
    h_up, w_up = h_in * up, w_in * up
    h_out = (h_up + 2 * pad - kh) // stride + 1
    w_out = (w_up + 2 * pad - kw) // stride + 1

    wcol = np.zeros((kh, w_in * cin, w_out * cout), np.float32)
    for di in range(kh):
        for jo in range(w_out):
            for dj in range(kw):
                ju = stride * jo + dj - pad
                if 0 <= ju < w_up:
                    ji = ju // up
                    wcol[di, ji * cin:(ji + 1) * cin, jo * cout:(jo + 1) * cout] += w[di, dj]

    r_in, r_out = batch * (h_in + 2), batch * (h_out + 2)
    srow = np.zeros((kh, r_out, r_in), np.float32)
    for di in range(kh):
        for b in range(batch):
            for io in range(h_out):
                iu = stride * io + di - pad
                if 0 <= iu < h_up:
                    ii = iu // up
                    srow[di, b * (h_out + 2) + 1 + io, b * (h_in + 2) + 1 + ii] = 1.0

    btile = np.tile(np.asarray(bias, np.float32), w_out)
    return wcol, srow, btile, h_out, w_out


def _orth(rng, shape):
    rows = int(np.prod(shape[:-1]))
    cols = int(shape[-1])
    n = max(rows, cols)
    q, _ = np.linalg.qr(rng.standard_normal((n, n)))
    return np.asarray(q[:rows, :cols], np.float32).reshape(shape)


def _spectral_normalize(w, is_conv=False, n_iters=30):
    """Divide weight by its top singular value (PyTorch SN forward semantics)."""
    if is_conv:
        w2d = np.transpose(w, (3, 0, 1, 2)).reshape(w.shape[3], -1)
    else:
        w2d = w
    u = np.ones((w2d.shape[0],), np.float64) / np.sqrt(w2d.shape[0])
    v = None
    for _ in range(n_iters):
        v = w2d.T @ u
        v = v / (np.linalg.norm(v) + 1e-12)
        u = w2d @ v
        u = u / (np.linalg.norm(u) + 1e-12)
    sigma = float(u @ (w2d @ v))
    return (w / sigma).astype(np.float32)


# ============================================================================
# in-kernel helpers
# ============================================================================
def _conv_apply(m, w_ref, s_ref, b_ref, h_out, batch, act, neg_slope):
    """m: (batch*(h_in+2), w_in*cin) bf16 value. Conv (upsample / stride folded into
    the precomputed matrices) as sum_di (S_di @ m) @ Wcol_di, + bias, activation,
    then zero the per-batch spatial pad rows."""
    kh = w_ref.shape[0]
    acc = None
    for di in range(kh):
        rows = jnp.dot(s_ref[di], m, preferred_element_type=jnp.float32)
        part = jnp.dot(rows.astype(jnp.bfloat16), w_ref[di],
                       preferred_element_type=jnp.float32)
        acc = part if acc is None else acc + part
    acc = acc + b_ref[...]
    if act == "lrelu":
        acc = jnp.where(acc >= 0, acc, neg_slope * acc)
    elif act == "relu":
        acc = jnp.maximum(acc, 0.0)
    period = h_out + 2
    r = jax.lax.broadcasted_iota(jnp.int32, acc.shape, 0)
    keep = None
    for b in range(batch):
        for pr in (b * period, b * period + period - 1):
            c = r != pr
            keep = c if keep is None else jnp.logical_and(keep, c)
    return jnp.where(keep, acc, 0.0)


# ============================================================================
# fused rollout kernel: one grid step == one Generator.proceed_step
# ============================================================================
def _rollout_kernel(warm_ref, a_ref, z_ref, x_ref, *args,
                    B, hidden, enc_h1, enc_h2, n_blocks, h0, h_outs, neg_slope):
    (haw, hab, hzw, hzb,
     e1w, e1s, e1b, e2w, e2s, e2b, clw, clb, wg, bg,
     snw, snb) = args[:16]
    idx = 16
    blocks = []
    for _ in range(n_blocks):
        blocks.append(args[idx:idx + 9])
        idx += 9
    fw, fs, fb = args[idx:idx + 3]
    idx += 3
    out_ref = args[idx]
    idx += 1
    h_scr, c_scr, x_scr, g_scr, gin_scr, x0_scr = args[idx:idx + 6]

    t = pl.program_id(0)
    bf16 = jnp.bfloat16
    lrelu = lambda u: jnp.where(u >= 0, u, neg_slope * u)
    relu = lambda u: jnp.maximum(u, 0.0)

    # --- init recurrent state on the first step ---
    @pl.when(t == 0)
    def _():
        h_scr[...] = jnp.zeros(h_scr.shape, h_scr.dtype)
        c_scr[...] = jnp.zeros(c_scr.shape, c_scr.dtype)

    # --- warmup teacher forcing: overwrite the fed-back frame with the teacher frame
    #     (t==0 always uses x_real[0]; reference falls back to x_real[0] if warmup==0)
    teach = jnp.logical_or(t == 0, t < warm_ref[0])

    @pl.when(teach)
    def _():
        x_scr[...] = x_ref[0]

    h_prev = h_scr[...]
    c_prev = c_scr[...]
    x_in = x_scr[...]

    # ---------------- DynamicsEngine.H(a, z): per-input linear + leaky-relu ----------------
    ae = lrelu(jnp.dot(a_ref[0].astype(bf16), haw[...],
                       preferred_element_type=jnp.float32) + hab[...])
    ze = lrelu(jnp.dot(z_ref[0].astype(bf16), hzw[...],
                       preferred_element_type=jnp.float32) + hzb[...])

    # ---------------- DynamicsEngine.C(x): two stride-2 convs + linear ----------------
    f1 = _conv_apply(x_in.astype(bf16), e1w, e1s, e1b, enc_h1, B, "lrelu", neg_slope)
    f2 = _conv_apply(f1.astype(bf16), e2w, e2s, e2b, enc_h2, B, "lrelu", neg_slope)
    per = enc_h2 + 2
    chunk = f2.shape[1]
    for b in range(B):
        for i in range(enc_h2):
            g_scr[b:b + 1, i * chunk:(i + 1) * chunk] = \
                f2[b * per + 1 + i: b * per + 2 + i, :].astype(bf16)
    s = lrelu(jnp.dot(g_scr[...], clw[...], preferred_element_type=jnp.float32) + clb[...])

    # ---------------- fused ActionLSTM gates: [h | H(a,z) | W_s*C(x)] @ [Wh;Wv;Ws] + b ----
    gin_scr[:, 0:hidden] = h_prev.astype(bf16)
    gin_scr[:, hidden:2 * hidden] = ae.astype(bf16)
    gin_scr[:, 2 * hidden:3 * hidden] = ze.astype(bf16)
    gin_scr[:, 3 * hidden:4 * hidden] = s.astype(bf16)
    gates = jnp.dot(gin_scr[...], wg[...], preferred_element_type=jnp.float32) + bg[...]

    i_g = jax.nn.sigmoid(gates[:, 0:hidden])
    f_g = jax.nn.sigmoid(gates[:, hidden:2 * hidden])
    o_g = jax.nn.sigmoid(gates[:, 2 * hidden:3 * hidden])
    g_g = jnp.tanh(gates[:, 3 * hidden:4 * hidden])
    c_t = f_g * c_prev + i_g * g_g
    h_t = o_g * jnp.tanh(c_t)

    # ---------------- RenderingEngine(components = h_prev)  (reference passes pre-update h)
    lin = jnp.dot(h_prev.astype(bf16), snw[...],
                  preferred_element_type=jnp.float32) + snb[...]
    x0_scr[...] = jnp.zeros(x0_scr.shape, x0_scr.dtype)
    per0 = h0 + 2
    chunk0 = x0_scr.shape[1]
    for b in range(B):
        for i in range(h0):
            x0_scr[b * per0 + 1 + i: b * per0 + 2 + i, :] = \
                lin[b:b + 1, i * chunk0:(i + 1) * chunk0]
    xcur = x0_scr[...]

    for bi in range(n_blocks):
        c1w, c1s, c1b, c2w, c2s, c2b, scw, scs, scb = blocks[bi]
        ho = h_outs[bi]
        tmp = _conv_apply(relu(xcur).astype(bf16), c1w, c1s, c1b, ho, B, "relu", neg_slope)
        tmp = _conv_apply(tmp.astype(bf16), c2w, c2s, c2b, ho, B, "none", neg_slope)
        sc = _conv_apply(xcur.astype(bf16), scw, scs, scb, ho, B, "none", neg_slope)
        xcur = tmp + sc

    y = _conv_apply(relu(xcur).astype(bf16), fw, fs, fb, h_outs[-1], B, "none", neg_slope)
    frame = jnp.tanh(y)

    # ---------------- emit this step's frame; carry state in VMEM for next step ----------
    out_ref[0] = frame
    x_scr[...] = frame
    h_scr[...] = h_t
    c_scr[...] = c_t


# ============================================================================
# pallas_call wrapper: whole rollout in one kernel, grid over time steps
# ============================================================================
def _rollout_call(p, cfg, warm, a_seq, z_seq, xr_mat):
    B = cfg["batch_size"]
    hidden = cfg["hidden_dim"]
    img = cfg["img_size"]
    mad = cfg["model_arch_dict"]
    h0, w0 = mad["first_fmap_size"]
    c0 = mad["in_channels"][0]
    ups = mad["upsample"]
    n_blocks = len(ups)
    h_outs, hh = [], h0
    for u in ups:
        hh = hh * u
        h_outs.append(hh)
    S = xr_mat.shape[0]
    rows, cols = B * (img + 2), img * CH_PAD
    h1, h2 = img // 2, img // 4

    wnames = ["Ha_w", "Ha_b", "Hz_w", "Hz_b",
              "e1_w", "e1_s", "e1_b", "e2_w", "e2_s", "e2_b",
              "cl_w", "cl_b", "wg", "bg", "snl_w", "snl_b"]
    for j in range(n_blocks):
        wnames += [f"rb{j}c1_w", f"rb{j}c1_s", f"rb{j}c1_b",
                   f"rb{j}c2_w", f"rb{j}c2_s", f"rb{j}c2_b",
                   f"rb{j}sc_w", f"rb{j}sc_s", f"rb{j}sc_b"]
    wnames += ["fin_w", "fin_s", "fin_b"]
    weights = [p[n] for n in wnames]

    def step_spec(arr):
        return pl.BlockSpec((1,) + arr.shape[1:],
                            lambda t, w, _n=arr.ndim - 1: (t,) + (0,) * _n)

    def const_spec(arr):
        return pl.BlockSpec(arr.shape, lambda t, w, _n=arr.ndim: (0,) * _n)

    in_specs = [step_spec(a_seq), step_spec(z_seq), step_spec(xr_mat)]
    in_specs += [const_spec(x) for x in weights]

    kern = functools.partial(
        _rollout_kernel, B=B, hidden=hidden, enc_h1=h1, enc_h2=h2,
        n_blocks=n_blocks, h0=h0, h_outs=tuple(h_outs), neg_slope=cfg["neg_slope"])

    return pl.pallas_call(
        kern,
        out_shape=jax.ShapeDtypeStruct((S, rows, cols), jnp.float32),
        grid_spec=pltpu.PrefetchScalarGridSpec(
            num_scalar_prefetch=1,
            grid=(S,),
            in_specs=in_specs,
            out_specs=pl.BlockSpec((1, rows, cols), lambda t, w: (t, 0, 0)),
            scratch_shapes=[
                pltpu.VMEM((B, hidden), jnp.float32),            # h_t
                pltpu.VMEM((B, hidden), jnp.float32),            # c_t
                pltpu.VMEM((rows, cols), jnp.float32),           # fed-back frame
                pltpu.VMEM((B, p["cl_w"].shape[0]), jnp.bfloat16),   # flattened C(x)
                pltpu.VMEM((B, 4 * hidden), jnp.bfloat16),       # fused gate input
                pltpu.VMEM((B * (h0 + 2), w0 * c0), jnp.float32),    # first render fmap
            ]),
        compiler_params=pltpu.CompilerParams(
            dimension_semantics=("arbitrary",)),                 # recurrent over time
    )(warm, a_seq, z_seq, xr_mat, *weights)


# ============================================================================
# parameter init (deterministic, synthetic) -> already in kernel matrix form
# ============================================================================
def init_params(cfg, seed=0):
    rng = np.random.default_rng(seed)
    B = cfg["batch_size"]
    hidden = cfg["hidden_dim"]
    z_dim = cfg["z_dim"]
    n_a = cfg["num_a_space"]
    img = cfg["img_size"]
    n_in = cfg["num_inp_channels"]
    mad = cfg["model_arch_dict"]

    bf = lambda x: jnp.asarray(x, jnp.bfloat16)
    f32 = lambda x: jnp.asarray(x, jnp.float32)
    nrm = lambda *s: (0.05 * rng.standard_normal(s)).astype(np.float32)

    p = {}

    # --- DynamicsEngine.H (synthesized: per-input linear + leaky-relu) ---
    p["Ha_w"], p["Ha_b"] = bf(nrm(n_a, hidden)), f32(np.zeros((1, hidden)))
    p["Hz_w"], p["Hz_b"] = bf(nrm(z_dim, hidden)), f32(np.zeros((1, hidden)))

    # --- DynamicsEngine.C (synthesized: 2 stride-2 convs + linear -> hidden) ---
    w1 = np.zeros((3, 3, CH_PAD, 16), np.float32)
    w1[:, :, :n_in, :] = nrm(3, 3, n_in, 16)
    e1w, e1s, e1b, h1, w1o = _build_conv_mats(w1, np.zeros(16), B, img, img, stride=2)
    w2 = nrm(3, 3, 16, 32)
    e2w, e2s, e2b, h2, w2o = _build_conv_mats(w2, np.zeros(32), B, h1, w1o, stride=2)
    p["e1_w"], p["e1_s"], p["e1_b"] = bf(e1w), bf(e1s), f32(e1b[None])
    p["e2_w"], p["e2_s"], p["e2_b"] = bf(e2w), bf(e2s), f32(e2b[None])
    p["cl_w"] = bf(nrm(h2 * w2o * 32, hidden))
    p["cl_b"] = f32(np.zeros((1, hidden)))

    # --- W_s folded into ActionLSTM gates: gates = [h | v | s] @ [Wh; Wv; Ws] + b ---
    wh = nrm(hidden, 4 * hidden)
    wv = nrm(2 * hidden, 4 * hidden)
    ws = nrm(hidden, 4 * hidden)
    p["wg"] = bf(np.concatenate([wh, wv, ws], axis=0))
    p["bg"] = f32(np.zeros((1, 4 * hidden)))   # W_s bias + lstm bias (zero init)

    # --- RenderingEngine (K=1): orthogonal init, SN on sn_linear + final conv ---
    c0 = mad["in_channels"][0]
    h0, w0 = mad["first_fmap_size"]
    snl = _spectral_normalize(_orth(rng, (hidden, c0 * h0 * w0)))
    p["snl_w"], p["snl_b"] = bf(snl), f32(np.zeros((1, c0 * h0 * w0)))

    hh, ww = h0, w0
    for j, (cin, cout, up) in enumerate(zip(mad["in_channels"], mad["out_channels"],
                                            mad["upsample"])):
        w = _orth(rng, (3, 3, cin, cout))
        cw, cs, cb, h_o, w_o = _build_conv_mats(w, np.zeros(cout), B, hh, ww, up=up)
        p[f"rb{j}c1_w"], p[f"rb{j}c1_s"], p[f"rb{j}c1_b"] = bf(cw), bf(cs), f32(cb[None])
        w = _orth(rng, (3, 3, cout, cout))
        cw, cs, cb, _, _ = _build_conv_mats(w, np.zeros(cout), B, h_o, w_o)
        p[f"rb{j}c2_w"], p[f"rb{j}c2_s"], p[f"rb{j}c2_b"] = bf(cw), bf(cs), f32(cb[None])
        w = _orth(rng, (1, 1, cin, cout))
        cw, cs, cb, _, _ = _build_conv_mats(w, np.zeros(cout), B, hh, ww, up=up)
        p[f"rb{j}sc_w"], p[f"rb{j}sc_s"], p[f"rb{j}sc_b"] = bf(cw), bf(cs), f32(cb[None])
        hh, ww = h_o, w_o

    last = mad["out_channels"][-1]
    wf = _spectral_normalize(_orth(rng, (3, 3, last, 3)), is_conv=True)
    wf_pad = np.zeros((3, 3, last, CH_PAD), np.float32)
    wf_pad[..., :3] = wf
    cw, cs, cb, _, _ = _build_conv_mats(wf_pad, np.zeros(CH_PAD), B, hh, ww)
    p["fin_w"], p["fin_s"], p["fin_b"] = bf(cw), bf(cs), f32(cb[None])
    return p


# ============================================================================
# Generator forward
# ============================================================================
def generator_forward(p, cfg, x_real, a, warmup_steps, z_key):
    B = cfg["batch_size"]
    z_dim = cfg["z_dim"]
    img = cfg["img_size"]
    T = a.shape[0]
    S = T - 1                                    # end_steps in the reference
    assert 0 <= warmup_steps <= S

    # one z per step (reference samples z in every proceed_step)
    z_seq = jax.random.normal(z_key, (S, B, z_dim), jnp.float32)

    # teacher frames -> lane-dense padded matrix layout (B*(H+2), W*CH_PAD)
    xr = x_real[:S]
    xr = jnp.pad(xr, ((0, 0), (0, 0), (1, 1), (0, 0), (0, CH_PAD - x_real.shape[-1])))
    xr_mat = xr.reshape(S, B * (img + 2), img * CH_PAD)

    warm = jnp.asarray([warmup_steps], jnp.int32)

    # single fused kernel: whole rollout (warmup + autoregressive phase)
    imgs_mat = _rollout_call(p, cfg, warm, a[:S], z_seq, xr_mat)

    imgs = imgs_mat.reshape(S, B, img + 2, img, CH_PAD)[:, :, 1:img + 1, :, :3]

    return {
        "out_imgs": [imgs[i] for i in range(S)],
        "zs": [z_seq[i] for i in range(S)],
        "alphas": [None] * S,                              # memory_dim=None path
        "fine_masks": [[] for _ in range(S)],
        "maps": [[] for _ in range(S)],
        "unmasked_base_imgs": [[] for _ in range(S)],
        "avg_alpha_loss": jnp.asarray(0.0, jnp.float32),   # memory_dim=None -> 0
        "reverse_alphas": [],
        "reverse_out_imgs": [],
        "reverse_fine_masks": [],
        "reverse_base_imgs": [],
    }


# ============================================================================
if __name__ == "__main__":
    cfg = dict(
        batch_size=2,
        z_dim=8,
        hidden_dim=32,
        num_a_space=4,
        neg_slope=NEG_SLOPE,
        img_size=16,
        num_inp_channels=3,
        memory_dim=None,  # Memory branch disabled (default of Generator.__init__)
        model_arch_dict={
            "img_size": (16, 16),
            "first_fmap_size": (4, 4),
            "in_channels": [64, 32],
            "out_channels": [32, 16],
            "upsample": [2, 2],
            "resolution": [8, 16],
            "attention": {8: False, 16: False},  # no SA blocks at these resolutions
        },
    )

    params = init_params(cfg, seed=0)

    key = jax.random.PRNGKey(0)
    k_x, k_a, k_z = jax.random.split(key, 3)
    T = 4
    warmup_steps = 2
    # x_real: (T, B, H, W, C) NHWC; a: (T, B, num_a_space)
    x_real = jax.random.normal(k_x, (T, cfg["batch_size"], 16, 16, 3), jnp.float32)
    a_seq = jax.random.normal(k_a, (T, cfg["batch_size"], cfg["num_a_space"]), jnp.float32)

    out = generator_forward(params, cfg, x_real, a_seq, warmup_steps, k_z)

    for im in out["out_imgs"]:
        jax.block_until_ready(im)
    jax.block_until_ready(out["avg_alpha_loss"])

    assert len(out["out_imgs"]) == T - 1
    assert out["out_imgs"][0].shape == (cfg["batch_size"], 16, 16, 3)
    assert all(bool(jnp.all(jnp.isfinite(im))) for im in out["out_imgs"])
    print("KERNEL_OK")
</pallas_src>

<mosaic_0001>
module attributes {stable_mosaic.version = 11 : i64} {
  func.func @_rollout_kernel(%arg0: i32, %arg1: memref<1xi32, #tpu.memory_space<smem>>, %arg2: memref<1x2x4xf32, #tpu.memory_space<vmem>>, %arg3: memref<1x2x8xf32, #tpu.memory_space<vmem>>, %arg4: memref<1x36x128xf32, #tpu.memory_space<vmem>>, %arg5: memref<4x32xbf16, #tpu.memory_space<vmem>>, %arg6: memref<1x32xf32, #tpu.memory_space<vmem>>, %arg7: memref<8x32xbf16, #tpu.memory_space<vmem>>, %arg8: memref<1x32xf32, #tpu.memory_space<vmem>>, %arg9: memref<3x128x128xbf16, #tpu.memory_space<vmem>>, %arg10: memref<3x20x36xbf16, #tpu.memory_space<vmem>>, %arg11: memref<1x128xf32, #tpu.memory_space<vmem>>, %arg12: memref<3x128x128xbf16, #tpu.memory_space<vmem>>, %arg13: memref<3x12x20xbf16, #tpu.memory_space<vmem>>, %arg14: memref<1x128xf32, #tpu.memory_space<vmem>>, %arg15: memref<512x32xbf16, #tpu.memory_space<vmem>>, %arg16: memref<1x32xf32, #tpu.memory_space<vmem>>, %arg17: memref<128x128xbf16, #tpu.memory_space<vmem>>, %arg18: memref<1x128xf32, #tpu.memory_space<vmem>>, %arg19: memref<32x1024xbf16, #tpu.memory_space<vmem>>, %arg20: memref<1x1024xf32, #tpu.memory_space<vmem>>, %arg21: memref<3x256x256xbf16, #tpu.memory_space<vmem>>, %arg22: memref<3x20x12xbf16, #tpu.memory_space<vmem>>, %arg23: memref<1x256xf32, #tpu.memory_space<vmem>>, %arg24: memref<3x256x256xbf16, #tpu.memory_space<vmem>>, %arg25: memref<3x20x20xbf16, #tpu.memory_space<vmem>>, %arg26: memref<1x256xf32, #tpu.memory_space<vmem>>, %arg27: memref<1x256x256xbf16, #tpu.memory_space<vmem>>, %arg28: memref<1x20x12xbf16, #tpu.memory_space<vmem>>, %arg29: memref<1x256xf32, #tpu.memory_space<vmem>>, %arg30: memref<3x256x256xbf16, #tpu.memory_space<vmem>>, %arg31: memref<3x36x20xbf16, #tpu.memory_space<vmem>>, %arg32: memref<1x256xf32, #tpu.memory_space<vmem>>, %arg33: memref<3x256x256xbf16, #tpu.memory_space<vmem>>, %arg34: memref<3x36x36xbf16, #tpu.memory_space<vmem>>, %arg35: memref<1x256xf32, #tpu.memory_space<vmem>>, %arg36: memref<1x256x256xbf16, #tpu.memory_space<vmem>>, %arg37: memref<1x36x20xbf16, #tpu.memory_space<vmem>>, %arg38: memref<1x256xf32, #tpu.memory_space<vmem>>, %arg39: memref<3x256x128xbf16, #tpu.memory_space<vmem>>, %arg40: memref<3x36x36xbf16, #tpu.memory_space<vmem>>, %arg41: memref<1x128xf32, #tpu.memory_space<vmem>>, %arg42: memref<1x36x128xf32, #tpu.memory_space<vmem>>, %arg43: memref<2x32xf32, #tpu.memory_space<vmem>>, %arg44: memref<2x32xf32, #tpu.memory_space<vmem>>, %arg45: memref<36x128xf32, #tpu.memory_space<vmem>>, %arg46: memref<2x512xbf16, #tpu.memory_space<vmem>>, %arg47: memref<2x128xbf16, #tpu.memory_space<vmem>>, %arg48: memref<12x256xf32, #tpu.memory_space<vmem>>) attributes {dimension_semantics = [#tpu.dimension_semantics<arbitrary>], iteration_bounds = array<i64: 3>, scalar_prefetch = 1 : i64, scratch_operands = 6 : i64, tpu.core_type = #tpu.core_type<tc>, window_params = [{transform_indices = @transform_0, window_bounds = array<i64: 1, 2, 4>}, {transform_indices = @transform_1, window_bounds = array<i64: 1, 2, 8>}, {transform_indices = @transform_2, window_bounds = array<i64: 1, 36, 128>}, {pipeline_mode = #tpu.pipeline_mode<synchronous>, transform_indices = @transform_3, window_bounds = array<i64: 4, 32>}, {pipeline_mode = #tpu.pipeline_mode<synchronous>, transform_indices = @transform_4, window_bounds = array<i64: 1, 32>}, {pipeline_mode = #tpu.pipeline_mode<synchronous>, transform_indices = @transform_5, window_bounds = array<i64: 8, 32>}, {pipeline_mode = #tpu.pipeline_mode<synchronous>, transform_indices = @transform_6, window_bounds = array<i64: 1, 32>}, {pipeline_mode = #tpu.pipeline_mode<synchronous>, transform_indices = @transform_7, window_bounds = array<i64: 3, 128, 128>}, {pipeline_mode = #tpu.pipeline_mode<synchronous>, transform_indices = @transform_8, window_bounds = array<i64: 3, 20, 36>}, {pipeline_mode = #tpu.pipeline_mode<synchronous>, transform_indices = @transform_9, window_bounds = array<i64: 1, 128>}, {pipeline_mode = #tpu.pipeline_mode<synchronous>, transform_indices = @transform_10, window_bounds = array<i64: 3, 128, 128>}, {pipeline_mode = #tpu.pipeline_mode<synchronous>, transform_indices = @transform_11, window_bounds = array<i64: 3, 12, 20>}, {pipeline_mode = #tpu.pipeline_mode<synchronous>, transform_indices = @transform_12, window_bounds = array<i64: 1, 128>}, {pipeline_mode = #tpu.pipeline_mode<synchronous>, transform_indices = @transform_13, window_bounds = array<i64: 512, 32>}, {pipeline_mode = #tpu.pipeline_mode<synchronous>, transform_indices = @transform_14, window_bounds = array<i64: 1, 32>}, {pipeline_mode = #tpu.pipeline_mode<synchronous>, transform_indices = @transform_15, window_bounds = array<i64: 128, 128>}, {pipeline_mode = #tpu.pipeline_mode<synchronous>, transform_indices = @transform_16, window_bounds = array<i64: 1, 128>}, {pipeline_mode = #tpu.pipeline_mode<synchronous>, transform_indices = @transform_17, window_bounds = array<i64: 32, 1024>}, {pipeline_mode = #tpu.pipeline_mode<synchronous>, transform_indices = @transform_18, window_bounds = array<i64: 1, 1024>}, {pipeline_mode = #tpu.pipeline_mode<synchronous>, transform_indices = @transform_19, window_bounds = array<i64: 3, 256, 256>}, {pipeline_mode = #tpu.pipeline_mode<synchronous>, transform_indices = @transform_20, window_bounds = array<i64: 3, 20, 12>}, {pipeline_mode = #tpu.pipeline_mode<synchronous>, transform_indices = @transform_21, window_bounds = array<i64: 1, 256>}, {pipeline_mode = #tpu.pipeline_mode<synchronous>, transform_indices = @transform_22, window_bounds = array<i64: 3, 256, 256>}, {pipeline_mode = #tpu.pipeline_mode<synchronous>, transform_indices = @transform_23, window_bounds = array<i64: 3, 20, 20>}, {pipeline_mode = #tpu.pipeline_mode<synchronous>, transform_indices = @transform_24, window_bounds = array<i64: 1, 256>}, {pipeline_mode = #tpu.pipeline_mode<synchronous>, transform_indices = @transform_25, window_bounds = array<i64: 1, 256, 256>}, {pipeline_mode = #tpu.pipeline_mode<synchronous>, transform_indices = @transform_26, window_bounds = array<i64: 1, 20, 12>}, {pipeline_mode = #tpu.pipeline_mode<synchronous>, transform_indices = @transform_27, window_bounds = array<i64: 1, 256>}, {pipeline_mode = #tpu.pipeline_mode<synchronous>, transform_indices = @transform_28, window_bounds = array<i64: 3, 256, 256>}, {pipeline_mode = #tpu.pipeline_mode<synchronous>, transform_indices = @transform_29, window_bounds = array<i64: 3, 36, 20>}, {pipeline_mode = #tpu.pipeline_mode<synchronous>, transform_indices = @transform_30, window_bounds = array<i64: 1, 256>}, {pipeline_mode = #tpu.pipeline_mode<synchronous>, transform_indices = @transform_31, window_bounds = array<i64: 3, 256, 256>}, {pipeline_mode = #tpu.pipeline_mode<synchronous>, transform_indices = @transform_32, window_bounds = array<i64: 3, 36, 36>}, {pipeline_mode = #tpu.pipeline_mode<synchronous>, transform_indices = @transform_33, window_bounds = array<i64: 1, 256>}, {pipeline_mode = #tpu.pipeline_mode<synchronous>, transform_indices = @transform_34, window_bounds = array<i64: 1, 256, 256>}, {pipeline_mode = #tpu.pipeline_mode<synchronous>, transform_indices = @transform_35, window_bounds = array<i64: 1, 36, 20>}, {pipeline_mode = #tpu.pipeline_mode<synchronous>, transform_indices = @transform_36, window_bounds = array<i64: 1, 256>}, {pipeline_mode = #tpu.pipeline_mode<synchronous>, transform_indices = @transform_37, window_bounds = array<i64: 3, 256, 128>}, {pipeline_mode = #tpu.pipeline_mode<synchronous>, transform_indices = @transform_38, window_bounds = array<i64: 3, 36, 36>}, {pipeline_mode = #tpu.pipeline_mode<synchronous>, transform_indices = @transform_39, window_bounds = array<i64: 1, 128>}, {transform_indices = @transform_40, window_bounds = array<i64: 1, 36, 128>}]} {
    %c0_i32 = arith.constant 0 : i32
    %0 = arith.cmpi eq, %arg0, %c0_i32 : i32
    %1 = arith.extui %0 : i1 to i32
    %c0_i32_0 = arith.constant 0 : i32
    %2 = arith.cmpi ne, %1, %c0_i32_0 : i32
    scf.if %2 {
      %cst_339 = arith.constant 0.000000e+00 : f32
      %503 = vector.broadcast %cst_339 : f32 to vector<2x32xf32>
      %c0_340 = arith.constant 0 : index
      %c0_341 = arith.constant 0 : index
      %504 = vector.load %arg43[%c0_340, %c0_341] : memref<2x32xf32, #tpu.memory_space<vmem>>, vector<2x32xf32>
      tpu.vector_store %arg43[%c0_340, %c0_341], %503 {strides = array<i32>} : memref<2x32xf32, #tpu.memory_space<vmem>>, vector<2x32xf32>,
      %cst_342 = arith.constant 0.000000e+00 : f32
      %505 = vector.broadcast %cst_342 : f32 to vector<2x32xf32>
      %c0_343 = arith.constant 0 : index
      %c0_344 = arith.constant 0 : index
      %506 = vector.load %arg44[%c0_343, %c0_344] : memref<2x32xf32, #tpu.memory_space<vmem>>, vector<2x32xf32>
      tpu.vector_store %arg44[%c0_343, %c0_344], %505 {strides = array<i32>} : memref<2x32xf32, #tpu.memory_space<vmem>>, vector<2x32xf32>,
    } else {
    }
    %c0_i32_1 = arith.constant 0 : i32
    %3 = arith.cmpi eq, %arg0, %c0_i32_1 : i32
    %c0 = arith.constant 0 : index
    %4 = memref.load %arg1[%c0] : memref<1xi32, #tpu.memory_space<smem>>
    %5 = arith.cmpi slt, %arg0, %4 : i32
    %6 = arith.ori %3, %5 : i1
    %7 = arith.extui %6 : i1 to i32
    %c0_i32_2 = arith.constant 0 : i32
    %8 = arith.cmpi ne, %7, %c0_i32_2 : i32
    scf.if %8 {
      %c0_339 = arith.constant 0 : index
      %c0_340 = arith.constant 0 : index
      %c0_341 = arith.constant 0 : index
      %503 = vector.load %arg4[%c0_339, %c0_340, %c0_341] : memref<1x36x128xf32, #tpu.memory_space<vmem>>, vector<1x36x128xf32>
      %504 = vector.shape_cast %503 : vector<1x36x128xf32> to vector<36x128xf32>
      %c0_342 = arith.constant 0 : index
      %c0_343 = arith.constant 0 : index
      %505 = vector.load %arg45[%c0_342, %c0_343] : memref<36x128xf32, #tpu.memory_space<vmem>>, vector<36x128xf32>
      tpu.vector_store %arg45[%c0_342, %c0_343], %504 {strides = array<i32>} : memref<36x128xf32, #tpu.memory_space<vmem>>, vector<36x128xf32>,
    } else {
    }
    %c0_3 = arith.constant 0 : index
    %c0_4 = arith.constant 0 : index
    %9 = vector.load %arg43[%c0_3, %c0_4] : memref<2x32xf32, #tpu.memory_space<vmem>>, vector<2x32xf32>
    %c0_5 = arith.constant 0 : index
    %c0_6 = arith.constant 0 : index
    %10 = vector.load %arg44[%c0_5, %c0_6] : memref<2x32xf32, #tpu.memory_space<vmem>>, vector<2x32xf32>
    %c0_7 = arith.constant 0 : index
    %c0_8 = arith.constant 0 : index
    %11 = vector.load %arg45[%c0_7, %c0_8] : memref<36x128xf32, #tpu.memory_space<vmem>>, vector<36x128xf32>
    %c0_9 = arith.constant 0 : index
    %c0_10 = arith.constant 0 : index
    %c0_11 = arith.constant 0 : index
    %12 = vector.load %arg2[%c0_9, %c0_10, %c0_11] : memref<1x2x4xf32, #tpu.memory_space<vmem>>, vector<1x2x4xf32>
    %13 = vector.shape_cast %12 : vector<1x2x4xf32> to vector<2x4xf32>
    %14 = arith.truncf %13 : vector<2x4xf32> to vector<2x4xbf16>
    %c0_12 = arith.constant 0 : index
    %c0_13 = arith.constant 0 : index
    %15 = vector.load %arg5[%c0_12, %c0_13] : memref<4x32xbf16, #tpu.memory_space<vmem>>, vector<4x32xbf16>
    %cst = arith.constant dense<0.000000e+00> : vector<2x32xf32>
    %16 = tpu.matmul %14, %15, %cst {dimension_numbers = #tpu.dot_dimension_numbers<[1], [0], [0], [1], [0, 0, 1, 1], [], []>} : vector<2x4xbf16>, vector<4x32xbf16>, vector<2x32xf32> -> vector<2x32xf32>
    %c0_14 = arith.constant 0 : index
    %c0_15 = arith.constant 0 : index
    %17 = vector.load %arg6[%c0_14, %c0_15] : memref<1x32xf32, #tpu.memory_space<vmem>>, vector<1x32xf32>
    %18 = vector.broadcast %17 : vector<1x32xf32> to vector<2x32xf32>
    %19 = arith.addf %16, %18 : vector<2x32xf32>
    %cst_16 = arith.constant 0.000000e+00 : f32
    %20 = vector.broadcast %cst_16 : f32 to vector<2x32xf32>
    %21 = arith.cmpf oge, %19, %20 : vector<2x32xf32>
    %cst_17 = arith.constant 2.000000e-01 : f32
    %22 = vector.broadcast %cst_17 : f32 to vector<2x32xf32>
    %23 = arith.mulf %22, %19 : vector<2x32xf32>
    %24 = arith.select %21, %19, %23 : vector<2x32xi1>, vector<2x32xf32>
    %c0_18 = arith.constant 0 : index
    %c0_19 = arith.constant 0 : index
    %c0_20 = arith.constant 0 : index
    %25 = vector.load %arg3[%c0_18, %c0_19, %c0_20] : memref<1x2x8xf32, #tpu.memory_space<vmem>>, vector<1x2x8xf32>
    %26 = vector.shape_cast %25 : vector<1x2x8xf32> to vector<2x8xf32>
    %27 = arith.truncf %26 : vector<2x8xf32> to vector<2x8xbf16>
    %c0_21 = arith.constant 0 : index
    %c0_22 = arith.constant 0 : index
    %28 = vector.load %arg7[%c0_21, %c0_22] : memref<8x32xbf16, #tpu.memory_space<vmem>>, vector<8x32xbf16>
    %cst_23 = arith.constant dense<0.000000e+00> : vector<2x32xf32>
    %29 = tpu.matmul %27, %28, %cst_23 {dimension_numbers = #tpu.dot_dimension_numbers<[1], [0], [0], [1], [0, 0, 1, 1], [], []>} : vector<2x8xbf16>, vector<8x32xbf16>, vector<2x32xf32> -> vector<2x32xf32>
    %c0_24 = arith.constant 0 : index
    %c0_25 = arith.constant 0 : index
    %30 = vector.load %arg8[%c0_24, %c0_25] : memref<1x32xf32, #tpu.memory_space<vmem>>, vector<1x32xf32>
    %31 = vector.broadcast %30 : vector<1x32xf32> to vector<2x32xf32>
    %32 = arith.addf %29, %31 : vector<2x32xf32>
    %cst_26 = arith.constant 0.000000e+00 : f32
    %33 = vector.broadcast %cst_26 : f32 to vector<2x32xf32>
    %34 = arith.cmpf oge, %32, %33 : vector<2x32xf32>
    %cst_27 = arith.constant 2.000000e-01 : f32
    %35 = vector.broadcast %cst_27 : f32 to vector<2x32xf32>
    %36 = arith.mulf %35, %32 : vector<2x32xf32>
    %37 = arith.select %34, %32, %36 : vector<2x32xi1>, vector<2x32xf32>
    %38 = arith.truncf %11 : vector<36x128xf32> to vector<36x128xbf16>
    %c0_28 = arith.constant 0 : index
    %c0_29 = arith.constant 0 : index
    %c0_30 = arith.constant 0 : index
    %39 = vector.load %arg10[%c0_28, %c0_29, %c0_30] : memref<3x20x36xbf16, #tpu.memory_space<vmem>>, vector<1x20x36xbf16>
    %40 = vector.shape_cast %39 : vector<1x20x36xbf16> to vector<20x36xbf16>
    %cst_31 = arith.constant dense<0.000000e+00> : vector<20x128xf32>
    %41 = tpu.matmul %40, %38, %cst_31 {dimension_numbers = #tpu.dot_dimension_numbers<[1], [0], [0], [1], [0, 0, 1, 1], [], []>} : vector<20x36xbf16>, vector<36x128xbf16>, vector<20x128xf32> -> vector<20x128xf32>
    %42 = arith.truncf %41 : vector<20x128xf32> to vector<20x128xbf16>
    %c0_32 = arith.constant 0 : index
    %c0_33 = arith.constant 0 : index
    %c0_34 = arith.constant 0 : index
    %43 = vector.load %arg9[%c0_32, %c0_33, %c0_34] : memref<3x128x128xbf16, #tpu.memory_space<vmem>>, vector<1x128x128xbf16>
    %44 = vector.shape_cast %43 : vector<1x128x128xbf16> to vector<128x128xbf16>
    %cst_35 = arith.constant dense<0.000000e+00> : vector<20x128xf32>
    %45 = tpu.matmul %42, %44, %cst_35 {dimension_numbers = #tpu.dot_dimension_numbers<[1], [0], [0], [1], [0, 0, 1, 1], [], []>} : vector<20x128xbf16>, vector<128x128xbf16>, vector<20x128xf32> -> vector<20x128xf32>
    %c1 = arith.constant 1 : index
    %c0_36 = arith.constant 0 : index
    %c0_37 = arith.constant 0 : index
    %46 = vector.load %arg10[%c1, %c0_36, %c0_37] : memref<3x20x36xbf16, #tpu.memory_space<vmem>>, vector<1x20x36xbf16>
    %47 = vector.shape_cast %46 : vector<1x20x36xbf16> to vector<20x36xbf16>
    %cst_38 = arith.constant dense<0.000000e+00> : vector<20x128xf32>
    %48 = tpu.matmul %47, %38, %cst_38 {dimension_numbers = #tpu.dot_dimension_numbers<[1], [0], [0], [1], [0, 0, 1, 1], [], []>} : vector<20x36xbf16>, vector<36x128xbf16>, vector<20x128xf32> -> vector<20x128xf32>
    %49 = arith.truncf %48 : vector<20x128xf32> to vector<20x128xbf16>
    %c1_39 = arith.constant 1 : index
    %c0_40 = arith.constant 0 : index
    %c0_41 = arith.constant 0 : index
    %50 = vector.load %arg9[%c1_39, %c0_40, %c0_41] : memref<3x128x128xbf16, #tpu.memory_space<vmem>>, vector<1x128x128xbf16>
    %51 = vector.shape_cast %50 : vector<1x128x128xbf16> to vector<128x128xbf16>
    %cst_42 = arith.constant dense<0.000000e+00> : vector<20x128xf32>
    %52 = tpu.matmul %49, %51, %cst_42 {dimension_numbers = #tpu.dot_dimension_numbers<[1], [0], [0], [1], [0, 0, 1, 1], [], []>} : vector<20x128xbf16>, vector<128x128xbf16>, vector<20x128xf32> -> vector<20x128xf32>
    %53 = arith.addf %45, %52 : vector<20x128xf32>
    %c2 = arith.constant 2 : index
    %c0_43 = arith.constant 0 : index
    %c0_44 = arith.constant 0 : index
    %54 = vector.load %arg10[%c2, %c0_43, %c0_44] : memref<3x20x36xbf16, #tpu.memory_space<vmem>>, vector<1x20x36xbf16>
    %55 = vector.shape_cast %54 : vector<1x20x36xbf16> to vector<20x36xbf16>
    %cst_45 = arith.constant dense<0.000000e+00> : vector<20x128xf32>
    %56 = tpu.matmul %55, %38, %cst_45 {dimension_numbers = #tpu.dot_dimension_numbers<[1], [0], [0], [1], [0, 0, 1, 1], [], []>} : vector<20x36xbf16>, vector<36x128xbf16>, vector<20x128xf32> -> vector<20x128xf32>
    %57 = arith.truncf %56 : vector<20x128xf32> to vector<20x128xbf16>
    %c2_46 = arith.constant 2 : index
    %c0_47 = arith.constant 0 : index
    %c0_48 = arith.constant 0 : index
    %58 = vector.load %arg9[%c2_46, %c0_47, %c0_48] : memref<3x128x128xbf16, #tpu.memory_space<vmem>>, vector<1x128x128xbf16>
    %59 = vector.shape_cast %58 : vector<1x128x128xbf16> to vector<128x128xbf16>
    %cst_49 = arith.constant dense<0.000000e+00> : vector<20x128xf32>
    %60 = tpu.matmul %57, %59, %cst_49 {dimension_numbers = #tpu.dot_dimension_numbers<[1], [0], [0], [1], [0, 0, 1, 1], [], []>} : vector<20x128xbf16>, vector<128x128xbf16>, vector<20x128xf32> -> vector<20x128xf32>
    %61 = arith.addf %53, %60 : vector<20x128xf32>
    %c0_50 = arith.constant 0 : index
    %c0_51 = arith.constant 0 : index
    %62 = vector.load %arg11[%c0_50, %c0_51] : memref<1x128xf32, #tpu.memory_space<vmem>>, vector<1x128xf32>
    %63 = vector.broadcast %62 : vector<1x128xf32> to vector<20x128xf32>
    %64 = arith.addf %61, %63 : vector<20x128xf32>
    %cst_52 = arith.constant 0.000000e+00 : f32
    %65 = vector.broadcast %cst_52 : f32 to vector<20x128xf32>
    %66 = arith.cmpf oge, %64, %65 : vector<20x128xf32>
    %cst_53 = arith.constant 2.000000e-01 : f32
    %67 = vector.broadcast %cst_53 : f32 to vector<20x128xf32>
    %68 = arith.mulf %67, %64 : vector<20x128xf32>
    %69 = arith.select %66, %64, %68 : vector<20x128xi1>, vector<20x128xf32>
    %70 = tpu.iota {dimensions = array<i32: 0>} : vector<20x128xi32>
    %c0_i32_54 = arith.constant 0 : i32
    %71 = vector.broadcast %c0_i32_54 : i32 to vector<20x128xi32>
    %72 = arith.cmpi ne, %70, %71 : vector<20x128xi32>
    %c9_i32 = arith.constant 9 : i32
    %73 = vector.broadcast %c9_i32 : i32 to vector<20x128xi32>
    %74 = arith.cmpi ne, %70, %73 : vector<20x128xi32>
    %75 = arith.andi %72, %74 : vector<20x128xi1>
    %c10_i32 = arith.constant 10 : i32
    %76 = vector.broadcast %c10_i32 : i32 to vector<20x128xi32>
    %77 = arith.cmpi ne, %70, %76 : vector<20x128xi32>
    %78 = arith.andi %75, %77 : vector<20x128xi1>
    %c19_i32 = arith.constant 19 : i32
    %79 = vector.broadcast %c19_i32 : i32 to vector<20x128xi32>
    %80 = arith.cmpi ne, %70, %79 : vector<20x128xi32>
    %81 = arith.andi %78, %80 : vector<20x128xi1>
    %cst_55 = arith.constant 0.000000e+00 : f32
    %82 = vector.broadcast %cst_55 : f32 to vector<20x128xf32>
    %83 = arith.select %81, %69, %82 : vector<20x128xi1>, vector<20x128xf32>
    %84 = arith.truncf %83 : vector<20x128xf32> to vector<20x128xbf16>
    %c0_56 = arith.constant 0 : index
    %c0_57 = arith.constant 0 : index
    %c0_58 = arith.constant 0 : index
    %85 = vector.load %arg13[%c0_56, %c0_57, %c0_58] : memref<3x12x20xbf16, #tpu.memory_space<vmem>>, vector<1x12x20xbf16>
    %86 = vector.shape_cast %85 : vector<1x12x20xbf16> to vector<12x20xbf16>
    %cst_59 = arith.constant dense<0.000000e+00> : vector<12x128xf32>
    %87 = tpu.matmul %86, %84, %cst_59 {dimension_numbers = #tpu.dot_dimension_numbers<[1], [0], [0], [1], [0, 0, 1, 1], [], []>} : vector<12x20xbf16>, vector<20x128xbf16>, vector<12x128xf32> -> vector<12x128xf32>
    %88 = arith.truncf %87 : vector<12x128xf32> to vector<12x128xbf16>
    %c0_60 = arith.constant 0 : index
    %c0_61 = arith.constant 0 : index
    %c0_62 = arith.constant 0 : index
    %89 = vector.load %arg12[%c0_60, %c0_61, %c0_62] : memref<3x128x128xbf16, #tpu.memory_space<vmem>>, vector<1x128x128xbf16>
    %90 = vector.shape_cast %89 : vector<1x128x128xbf16> to vector<128x128xbf16>
    %cst_63 = arith.constant dense<0.000000e+00> : vector<12x128xf32>
    %91 = tpu.matmul %88, %90, %cst_63 {dimension_numbers = #tpu.dot_dimension_numbers<[1], [0], [0], [1], [0, 0, 1, 1], [], []>} : vector<12x128xbf16>, vector<128x128xbf16>, vector<12x128xf32> -> vector<12x128xf32>
    %c1_64 = arith.constant 1 : index
    %c0_65 = arith.constant 0 : index
    %c0_66 = arith.constant 0 : index
    %92 = vector.load %arg13[%c1_64, %c0_65, %c0_66] : memref<3x12x20xbf16, #tpu.memory_space<vmem>>, vector<1x12x20xbf16>
    %93 = vector.shape_cast %92 : vector<1x12x20xbf16> to vector<12x20xbf16>
    %cst_67 = arith.constant dense<0.000000e+00> : vector<12x128xf32>
    %94 = tpu.matmul %93, %84, %cst_67 {dimension_numbers = #tpu.dot_dimension_numbers<[1], [0], [0], [1], [0, 0, 1, 1], [], []>} : vector<12x20xbf16>, vector<20x128xbf16>, vector<12x128xf32> -> vector<12x128xf32>
    %95 = arith.truncf %94 : vector<12x128xf32> to vector<12x128xbf16>
    %c1_68 = arith.constant 1 : index
    %c0_69 = arith.constant 0 : index
    %c0_70 = arith.constant 0 : index
    %96 = vector.load %arg12[%c1_68, %c0_69, %c0_70] : memref<3x128x128xbf16, #tpu.memory_space<vmem>>, vector<1x128x128xbf16>
    %97 = vector.shape_cast %96 : vector<1x128x128xbf16> to vector<128x128xbf16>
    %cst_71 = arith.constant dense<0.000000e+00> : vector<12x128xf32>
    %98 = tpu.matmul %95, %97, %cst_71 {dimension_numbers = #tpu.dot_dimension_numbers<[1], [0], [0], [1], [0, 0, 1, 1], [], []>} : vector<12x128xbf16>, vector<128x128xbf16>, vector<12x128xf32> -> vector<12x128xf32>
    %99 = arith.addf %91, %98 : vector<12x128xf32>
    %c2_72 = arith.constant 2 : index
    %c0_73 = arith.constant 0 : index
    %c0_74 = arith.constant 0 : index
    %100 = vector.load %arg13[%c2_72, %c0_73, %c0_74] : memref<3x12x20xbf16, #tpu.memory_space<vmem>>, vector<1x12x20xbf16>
    %101 = vector.shape_cast %100 : vector<1x12x20xbf16> to vector<12x20xbf16>
    %cst_75 = arith.constant dense<0.000000e+00> : vector<12x128xf32>
    %102 = tpu.matmul %101, %84, %cst_75 {dimension_numbers = #tpu.dot_dimension_numbers<[1], [0], [0], [1], [0, 0, 1, 1], [], []>} : vector<12x20xbf16>, vector<20x128xbf16>, vector<12x128xf32> -> vector<12x128xf32>
    %103 = arith.truncf %102 : vector<12x128xf32> to vector<12x128xbf16>
    %c2_76 = arith.constant 2 : index
    %c0_77 = arith.constant 0 : index
    %c0_78 = arith.constant 0 : index
    %104 = vector.load %arg12[%c2_76, %c0_77, %c0_78] : memref<3x128x128xbf16, #tpu.memory_space<vmem>>, vector<1x128x128xbf16>
    %105 = vector.shape_cast %104 : vector<1x128x128xbf16> to vector<128x128xbf16>
    %cst_79 = arith.constant dense<0.000000e+00> : vector<12x128xf32>
    %106 = tpu.matmul %103, %105, %cst_79 {dimension_numbers = #tpu.dot_dimension_numbers<[1], [0], [0], [1], [0, 0, 1, 1], [], []>} : vector<12x128xbf16>, vector<128x128xbf16>, vector<12x128xf32> -> vector<12x128xf32>
    %107 = arith.addf %99, %106 : vector<12x128xf32>
    %c0_80 = arith.constant 0 : index
    %c0_81 = arith.constant 0 : index
    %108 = vector.load %arg14[%c0_80, %c0_81] : memref<1x128xf32, #tpu.memory_space<vmem>>, vector<1x128xf32>
    %109 = vector.broadcast %108 : vector<1x128xf32> to vector<12x128xf32>
    %110 = arith.addf %107, %109 : vector<12x128xf32>
    %cst_82 = arith.constant 0.000000e+00 : f32
    %111 = vector.broadcast %cst_82 : f32 to vector<12x128xf32>
    %112 = arith.cmpf oge, %110, %111 : vector<12x128xf32>
    %cst_83 = arith.constant 2.000000e-01 : f32
    %113 = vector.broadcast %cst_83 : f32 to vector<12x128xf32>
    %114 = arith.mulf %113, %110 : vector<12x128xf32>
    %115 = arith.select %112, %110, %114 : vector<12x128xi1>, vector<12x128xf32>
    %116 = tpu.iota {dimensions = array<i32: 0>} : vector<12x128xi32>
    %c0_i32_84 = arith.constant 0 : i32
    %117 = vector.broadcast %c0_i32_84 : i32 to vector<12x128xi32>
    %118 = arith.cmpi ne, %116, %117 : vector<12x128xi32>
    %c5_i32 = arith.constant 5 : i32
    %119 = vector.broadcast %c5_i32 : i32 to vector<12x128xi32>
    %120 = arith.cmpi ne, %116, %119 : vector<12x128xi32>
    %121 = arith.andi %118, %120 : vector<12x128xi1>
    %c6_i32 = arith.constant 6 : i32
    %122 = vector.broadcast %c6_i32 : i32 to vector<12x128xi32>
    %123 = arith.cmpi ne, %116, %122 : vector<12x128xi32>
    %124 = arith.andi %121, %123 : vector<12x128xi1>
    %c11_i32 = arith.constant 11 : i32
    %125 = vector.broadcast %c11_i32 : i32 to vector<12x128xi32>
    %126 = arith.cmpi ne, %116, %125 : vector<12x128xi32>
    %127 = arith.andi %124, %126 : vector<12x128xi1>
    %cst_85 = arith.constant 0.000000e+00 : f32
    %128 = vector.broadcast %cst_85 : f32 to vector<12x128xf32>
    %129 = arith.select %127, %115, %128 : vector<12x128xi1>, vector<12x128xf32>
    %130 = vector.extract_strided_slice %129 {offsets = [1, 0], sizes = [1, 128], strides = [1, 1]} : vector<12x128xf32> to vector<1x128xf32>
    %131 = arith.truncf %130 : vector<1x128xf32> to vector<1x128xbf16>
    %c0_86 = arith.constant 0 : index
    %c0_87 = arith.constant 0 : index
    %132 = vector.load %arg46[%c0_86, %c0_87] : memref<2x512xbf16, #tpu.memory_space<vmem>>, vector<1x128xbf16>
    tpu.vector_store %arg46[%c0_86, %c0_87], %131 {strides = array<i32>} : memref<2x512xbf16, #tpu.memory_space<vmem>>, vector<1x128xbf16>,
    %133 = vector.extract_strided_slice %129 {offsets = [2, 0], sizes = [1, 128], strides = [1, 1]} : vector<12x128xf32> to vector<1x128xf32>
    %134 = arith.truncf %133 : vector<1x128xf32> to vector<1x128xbf16>
    %c0_88 = arith.constant 0 : index
    %c128 = arith.constant 128 : index
    %135 = vector.load %arg46[%c0_88, %c128] : memref<2x512xbf16, #tpu.memory_space<vmem>>, vector<1x128xbf16>
    tpu.vector_store %arg46[%c0_88, %c128], %134 {strides = array<i32>} : memref<2x512xbf16, #tpu.memory_space<vmem>>, vector<1x128xbf16>,
    %136 = vector.extract_strided_slice %129 {offsets = [3, 0], sizes = [1, 128], strides = [1, 1]} : vector<12x128xf32> to vector<1x128xf32>
    %137 = arith.truncf %136 : vector<1x128xf32> to vector<1x128xbf16>
    %c0_89 = arith.constant 0 : index
    %c256 = arith.constant 256 : index
    %138 = vector.load %arg46[%c0_89, %c256] : memref<2x512xbf16, #tpu.memory_space<vmem>>, vector<1x128xbf16>
    tpu.vector_store %arg46[%c0_89, %c256], %137 {strides = array<i32>} : memref<2x512xbf16, #tpu.memory_space<vmem>>, vector<1x128xbf16>,
    %139 = vector.extract_strided_slice %129 {offsets = [4, 0], sizes = [1, 128], strides = [1, 1]} : vector<12x128xf32> to vector<1x128xf32>
    %140 = arith.truncf %139 : vector<1x128xf32> to vector<1x128xbf16>
    %c0_90 = arith.constant 0 : index
    %c384 = arith.constant 384 : index
    %141 = vector.load %arg46[%c0_90, %c384] : memref<2x512xbf16, #tpu.memory_space<vmem>>, vector<1x128xbf16>
    tpu.vector_store %arg46[%c0_90, %c384], %140 {strides = array<i32>} : memref<2x512xbf16, #tpu.memory_space<vmem>>, vector<1x128xbf16>,
    %142 = vector.extract_strided_slice %129 {offsets = [7, 0], sizes = [1, 128], strides = [1, 1]} : vector<12x128xf32> to vector<1x128xf32>
    %143 = arith.truncf %142 : vector<1x128xf32> to vector<1x128xbf16>
    %c1_91 = arith.constant 1 : index
    %c0_92 = arith.constant 0 : index
    %144 = vector.load %arg46[%c1_91, %c0_92] : memref<2x512xbf16, #tpu.memory_space<vmem>>, vector<1x128xbf16>
    tpu.vector_store %arg46[%c1_91, %c0_92], %143 {strides = array<i32>} : memref<2x512xbf16, #tpu.memory_space<vmem>>, vector<1x128xbf16>,
    %145 = vector.extract_strided_slice %129 {offsets = [8, 0], sizes = [1, 128], strides = [1, 1]} : vector<12x128xf32> to vector<1x128xf32>
    %146 = arith.truncf %145 : vector<1x128xf32> to vector<1x128xbf16>
    %c1_93 = arith.constant 1 : index
    %c128_94 = arith.constant 128 : index
    %147 = vector.load %arg46[%c1_93, %c128_94] : memref<2x512xbf16, #tpu.memory_space<vmem>>, vector<1x128xbf16>
    tpu.vector_store %arg46[%c1_93, %c128_94], %146 {strides = array<i32>} : memref<2x512xbf16, #tpu.memory_space<vmem>>, vector<1x128xbf16>,
    %148 = vector.extract_strided_slice %129 {offsets = [9, 0], sizes = [1, 128], strides = [1, 1]} : vector<12x128xf32> to vector<1x128xf32>
    %149 = arith.truncf %148 : vector<1x128xf32> to vector<1x128xbf16>
    %c1_95 = arith.constant 1 : index
    %c256_96 = arith.constant 256 : index
    %150 = vector.load %arg46[%c1_95, %c256_96] : memref<2x512xbf16, #tpu.memory_space<vmem>>, vector<1x128xbf16>
    tpu.vector_store %arg46[%c1_95, %c256_96], %149 {strides = array<i32>} : memref<2x512xbf16, #tpu.memory_space<vmem>>, vector<1x128xbf16>,
    %151 = vector.extract_strided_slice %129 {offsets = [10, 0], sizes = [1, 128], strides = [1, 1]} : vector<12x128xf32> to vector<1x128xf32>
    %152 = arith.truncf %151 : vector<1x128xf32> to vector<1x128xbf16>
    %c1_97 = arith.constant 1 : index
    %c384_98 = arith.constant 384 : index
    %153 = vector.load %arg46[%c1_97, %c384_98] : memref<2x512xbf16, #tpu.memory_space<vmem>>, vector<1x128xbf16>
    tpu.vector_store %arg46[%c1_97, %c384_98], %152 {strides = array<i32>} : memref<2x512xbf16, #tpu.memory_space<vmem>>, vector<1x128xbf16>,
    %c0_99 = arith.constant 0 : index
    %c0_100 = arith.constant 0 : index
    %154 = vector.load %arg46[%c0_99, %c0_100] : memref<2x512xbf16, #tpu.memory_space<vmem>>, vector<2x512xbf16>
    %c0_101 = arith.constant 0 : index
    %c0_102 = arith.constant 0 : index
    %155 = vector.load %arg15[%c0_101, %c0_102] : memref<512x32xbf16, #tpu.memory_space<vmem>>, vector<512x32xbf16>
    %cst_103 = arith.constant dense<0.000000e+00> : vector<2x32xf32>
    %156 = tpu.matmul %154, %155, %cst_103 {dimension_numbers = #tpu.dot_dimension_numbers<[1], [0], [0], [1], [0, 0, 1, 1], [], []>} : vector<2x512xbf16>, vector<512x32xbf16>, vector<2x32xf32> -> vector<2x32xf32>
    %c0_104 = arith.constant 0 : index
    %c0_105 = arith.constant 0 : index
    %157 = vector.load %arg16[%c0_104, %c0_105] : memref<1x32xf32, #tpu.memory_space<vmem>>, vector<1x32xf32>
    %158 = vector.broadcast %157 : vector<1x32xf32> to vector<2x32xf32>
    %159 = arith.addf %156, %158 : vector<2x32xf32>
    %cst_106 = arith.constant 0.000000e+00 : f32
    %160 = vector.broadcast %cst_106 : f32 to vector<2x32xf32>
    %161 = arith.cmpf oge, %159, %160 : vector<2x32xf32>
    %cst_107 = arith.constant 2.000000e-01 : f32
    %162 = vector.broadcast %cst_107 : f32 to vector<2x32xf32>
    %163 = arith.mulf %162, %159 : vector<2x32xf32>
    %164 = arith.select %161, %159, %163 : vector<2x32xi1>, vector<2x32xf32>
    %165 = arith.truncf %9 : vector<2x32xf32> to vector<2x32xbf16>
    %c0_108 = arith.constant 0 : index
    %c0_109 = arith.constant 0 : index
    %166 = vector.load %arg47[%c0_108, %c0_109] : memref<2x128xbf16, #tpu.memory_space<vmem>>, vector<2x32xbf16>
    tpu.vector_store %arg47[%c0_108, %c0_109], %165 {strides = array<i32>} : memref<2x128xbf16, #tpu.memory_space<vmem>>, vector<2x32xbf16>,
    %167 = arith.truncf %24 : vector<2x32xf32> to vector<2x32xbf16>
    %c0_110 = arith.constant 0 : index
    %c32 = arith.constant 32 : index
    %168 = vector.load %arg47[%c0_110, %c32] : memref<2x128xbf16, #tpu.memory_space<vmem>>, vector<2x32xbf16>
    tpu.vector_store %arg47[%c0_110, %c32], %167 {strides = array<i32>} : memref<2x128xbf16, #tpu.memory_space<vmem>>, vector<2x32xbf16>,
    %169 = arith.truncf %37 : vector<2x32xf32> to vector<2x32xbf16>
    %c0_111 = arith.constant 0 : index
    %c64 = arith.constant 64 : index
    %170 = vector.load %arg47[%c0_111, %c64] : memref<2x128xbf16, #tpu.memory_space<vmem>>, vector<2x32xbf16>
    tpu.vector_store %arg47[%c0_111, %c64], %169 {strides = array<i32>} : memref<2x128xbf16, #tpu.memory_space<vmem>>, vector<2x32xbf16>,
    %171 = arith.truncf %164 : vector<2x32xf32> to vector<2x32xbf16>
    %c0_112 = arith.constant 0 : index
    %c96 = arith.constant 96 : index
    %172 = vector.load %arg47[%c0_112, %c96] : memref<2x128xbf16, #tpu.memory_space<vmem>>, vector<2x32xbf16>
    tpu.vector_store %arg47[%c0_112, %c96], %171 {strides = array<i32>} : memref<2x128xbf16, #tpu.memory_space<vmem>>, vector<2x32xbf16>,
    %c0_113 = arith.constant 0 : index
    %c0_114 = arith.constant 0 : index
    %173 = vector.load %arg47[%c0_113, %c0_114] : memref<2x128xbf16, #tpu.memory_space<vmem>>, vector<2x128xbf16>
    %c0_115 = arith.constant 0 : index
    %c0_116 = arith.constant 0 : index
    %174 = vector.load %arg17[%c0_115, %c0_116] : memref<128x128xbf16, #tpu.memory_space<vmem>>, vector<128x128xbf16>
    %cst_117 = arith.constant dense<0.000000e+00> : vector<2x128xf32>
    %175 = tpu.matmul %173, %174, %cst_117 {dimension_numbers = #tpu.dot_dimension_numbers<[1], [0], [0], [1], [0, 0, 1, 1], [], []>} : vector<2x128xbf16>, vector<128x128xbf16>, vector<2x128xf32> -> vector<2x128xf32>
    %c0_118 = arith.constant 0 : index
    %c0_119 = arith.constant 0 : index
    %176 = vector.load %arg18[%c0_118, %c0_119] : memref<1x128xf32, #tpu.memory_space<vmem>>, vector<1x128xf32>
    %177 = vector.broadcast %176 : vector<1x128xf32> to vector<2x128xf32>
    %178 = arith.addf %175, %177 : vector<2x128xf32>
    %179 = vector.extract_strided_slice %178 {offsets = [0, 0], sizes = [2, 32], strides = [1, 1]} : vector<2x128xf32> to vector<2x32xf32>
    %180 = arith.negf %179 : vector<2x32xf32>
    %181 = math.exp %180 : vector<2x32xf32>
    %cst_120 = arith.constant 1.000000e+00 : f32
    %182 = vector.broadcast %cst_120 : f32 to vector<2x32xf32>
    %183 = arith.addf %182, %181 : vector<2x32xf32>
    %184 = arith.divf %182, %183 : vector<2x32xf32>
    %185 = vector.extract_strided_slice %178 {offsets = [0, 32], sizes = [2, 32], strides = [1, 1]} : vector<2x128xf32> to vector<2x32xf32>
    %186 = arith.negf %185 : vector<2x32xf32>
    %187 = math.exp %186 : vector<2x32xf32>
    %cst_121 = arith.constant 1.000000e+00 : f32
    %188 = vector.broadcast %cst_121 : f32 to vector<2x32xf32>
    %189 = arith.addf %188, %187 : vector<2x32xf32>
    %190 = arith.divf %188, %189 : vector<2x32xf32>
    %191 = vector.extract_strided_slice %178 {offsets = [0, 64], sizes = [2, 32], strides = [1, 1]} : vector<2x128xf32> to vector<2x32xf32>
    %192 = arith.negf %191 : vector<2x32xf32>
    %193 = math.exp %192 : vector<2x32xf32>
    %cst_122 = arith.constant 1.000000e+00 : f32
    %194 = vector.broadcast %cst_122 : f32 to vector<2x32xf32>
    %195 = arith.addf %194, %193 : vector<2x32xf32>
    %196 = arith.divf %194, %195 : vector<2x32xf32>
    %197 = vector.extract_strided_slice %178 {offsets = [0, 96], sizes = [2, 32], strides = [1, 1]} : vector<2x128xf32> to vector<2x32xf32>
    %198 = math.tanh %197 : vector<2x32xf32>
    %199 = arith.mulf %190, %10 : vector<2x32xf32>
    %200 = arith.mulf %184, %198 : vector<2x32xf32>
    %201 = arith.addf %199, %200 : vector<2x32xf32>
    %202 = math.tanh %201 : vector<2x32xf32>
    %203 = arith.mulf %196, %202 : vector<2x32xf32>
    %204 = arith.truncf %9 : vector<2x32xf32> to vector<2x32xbf16>
    %c0_123 = arith.constant 0 : index
    %c0_124 = arith.constant 0 : index
    %205 = vector.load %arg19[%c0_123, %c0_124] : memref<32x1024xbf16, #tpu.memory_space<vmem>>, vector<32x1024xbf16>
    %cst_125 = arith.constant dense<0.000000e+00> : vector<2x1024xf32>
    %206 = tpu.matmul %204, %205, %cst_125 {dimension_numbers = #tpu.dot_dimension_numbers<[1], [0], [0], [1], [0, 0, 1, 1], [], []>} : vector<2x32xbf16>, vector<32x1024xbf16>, vector<2x1024xf32> -> vector<2x1024xf32>
    %c0_126 = arith.constant 0 : index
    %c0_127 = arith.constant 0 : index
    %207 = vector.load %arg20[%c0_126, %c0_127] : memref<1x1024xf32, #tpu.memory_space<vmem>>, vector<1x1024xf32>
    %208 = vector.broadcast %207 : vector<1x1024xf32> to vector<2x1024xf32>
    %209 = arith.addf %206, %208 : vector<2x1024xf32>
    %cst_128 = arith.constant 0.000000e+00 : f32
    %210 = vector.broadcast %cst_128 : f32 to vector<12x256xf32>
    %c0_129 = arith.constant 0 : index
    %c0_130 = arith.constant 0 : index
    %211 = vector.load %arg48[%c0_129, %c0_130] : memref<12x256xf32, #tpu.memory_space<vmem>>, vector<12x256xf32>
    tpu.vector_store %arg48[%c0_129, %c0_130], %210 {strides = array<i32>} : memref<12x256xf32, #tpu.memory_space<vmem>>, vector<12x256xf32>,
    %212 = vector.extract_strided_slice %209 {offsets = [0, 0], sizes = [1, 256], strides = [1, 1]} : vector<2x1024xf32> to vector<1x256xf32>
    %c1_131 = arith.constant 1 : index
    %c0_132 = arith.constant 0 : index
    %213 = vector.load %arg48[%c1_131, %c0_132] : memref<12x256xf32, #tpu.memory_space<vmem>>, vector<1x256xf32>
    tpu.vector_store %arg48[%c1_131, %c0_132], %212 {strides = array<i32>} : memref<12x256xf32, #tpu.memory_space<vmem>>, vector<1x256xf32>,
    %214 = vector.extract_strided_slice %209 {offsets = [0, 256], sizes = [1, 256], strides = [1, 1]} : vector<2x1024xf32> to vector<1x256xf32>
    %c2_133 = arith.constant 2 : index
    %c0_134 = arith.constant 0 : index
    %215 = vector.load %arg48[%c2_133, %c0_134] : memref<12x256xf32, #tpu.memory_space<vmem>>, vector<1x256xf32>
    tpu.vector_store %arg48[%c2_133, %c0_134], %214 {strides = array<i32>} : memref<12x256xf32, #tpu.memory_space<vmem>>, vector<1x256xf32>,
    %216 = vector.extract_strided_slice %209 {offsets = [0, 512], sizes = [1, 256], strides = [1, 1]} : vector<2x1024xf32> to vector<1x256xf32>
    %c3 = arith.constant 3 : index
    %c0_135 = arith.constant 0 : index
    %217 = vector.load %arg48[%c3, %c0_135] : memref<12x256xf32, #tpu.memory_space<vmem>>, vector<1x256xf32>
    tpu.vector_store %arg48[%c3, %c0_135], %216 {strides = array<i32>} : memref<12x256xf32, #tpu.memory_space<vmem>>, vector<1x256xf32>,
    %218 = vector.extract_strided_slice %209 {offsets = [0, 768], sizes = [1, 256], strides = [1, 1]} : vector<2x1024xf32> to vector<1x256xf32>
    %c4 = arith.constant 4 : index
    %c0_136 = arith.constant 0 : index
    %219 = vector.load %arg48[%c4, %c0_136] : memref<12x256xf32, #tpu.memory_space<vmem>>, vector<1x256xf32>
    tpu.vector_store %arg48[%c4, %c0_136], %218 {strides = array<i32>} : memref<12x256xf32, #tpu.memory_space<vmem>>, vector<1x256xf32>,
    %220 = vector.extract_strided_slice %209 {offsets = [1, 0], sizes = [1, 256], strides = [1, 1]} : vector<2x1024xf32> to vector<1x256xf32>
    %c7 = arith.constant 7 : index
    %c0_137 = arith.constant 0 : index
    %221 = vector.load %arg48[%c7, %c0_137] : memref<12x256xf32, #tpu.memory_space<vmem>>, vector<1x256xf32>
    tpu.vector_store %arg48[%c7, %c0_137], %220 {strides = array<i32>} : memref<12x256xf32, #tpu.memory_space<vmem>>, vector<1x256xf32>,
    %222 = vector.extract_strided_slice %209 {offsets = [1, 256], sizes = [1, 256], strides = [1, 1]} : vector<2x1024xf32> to vector<1x256xf32>
    %c8 = arith.constant 8 : index
    %c0_138 = arith.constant 0 : index
    %223 = vector.load %arg48[%c8, %c0_138] : memref<12x256xf32, #tpu.memory_space<vmem>>, vector<1x256xf32>
    tpu.vector_store %arg48[%c8, %c0_138], %222 {strides = array<i32>} : memref<12x256xf32, #tpu.memory_space<vmem>>, vector<1x256xf32>,
    %224 = vector.extract_strided_slice %209 {offsets = [1, 512], sizes = [1, 256], strides = [1, 1]} : vector<2x1024xf32> to vector<1x256xf32>
    %c9 = arith.constant 9 : index
    %c0_139 = arith.constant 0 : index
    %225 = vector.load %arg48[%c9, %c0_139] : memref<12x256xf32, #tpu.memory_space<vmem>>, vector<1x256xf32>
    tpu.vector_store %arg48[%c9, %c0_139], %224 {strides = array<i32>} : memref<12x256xf32, #tpu.memory_space<vmem>>, vector<1x256xf32>,
    %226 = vector.extract_strided_slice %209 {offsets = [1, 768], sizes = [1, 256], strides = [1, 1]} : vector<2x1024xf32> to vector<1x256xf32>
    %c10 = arith.constant 10 : index
    %c0_140 = arith.constant 0 : index
    %227 = vector.load %arg48[%c10, %c0_140] : memref<12x256xf32, #tpu.memory_space<vmem>>, vector<1x256xf32>
    tpu.vector_store %arg48[%c10, %c0_140], %226 {strides = array<i32>} : memref<12x256xf32, #tpu.memory_space<vmem>>, vector<1x256xf32>,
    %c0_141 = arith.constant 0 : index
    %c0_142 = arith.constant 0 : index
    %228 = vector.load %arg48[%c0_141, %c0_142] : memref<12x256xf32, #tpu.memory_space<vmem>>, vector<12x256xf32>
    %cst_143 = arith.constant 0.000000e+00 : f32
    %229 = vector.broadcast %cst_143 : f32 to vector<12x256xf32>
    %230 = arith.maximumf %228, %229 : vector<12x256xf32>
    %231 = arith.truncf %230 : vector<12x256xf32> to vector<12x256xbf16>
    %c0_144 = arith.constant 0 : index
    %c0_145 = arith.constant 0 : index
    %c0_146 = arith.constant 0 : index
    %232 = vector.load %arg22[%c0_144, %c0_145, %c0_146] : memref<3x20x12xbf16, #tpu.memory_space<vmem>>, vector<1x20x12xbf16>
    %233 = vector.shape_cast %232 : vector<1x20x12xbf16> to vector<20x12xbf16>
    %cst_147 = arith.constant dense<0.000000e+00> : vector<20x256xf32>
    %234 = tpu.matmul %233, %231, %cst_147 {dimension_numbers = #tpu.dot_dimension_numbers<[1], [0], [0], [1], [0, 0, 1, 1], [], []>} : vector<20x12xbf16>, vector<12x256xbf16>, vector<20x256xf32> -> vector<20x256xf32>
    %235 = arith.truncf %234 : vector<20x256xf32> to vector<20x256xbf16>
    %c0_148 = arith.constant 0 : index
    %c0_149 = arith.constant 0 : index
    %c0_150 = arith.constant 0 : index
    %236 = vector.load %arg21[%c0_148, %c0_149, %c0_150] : memref<3x256x256xbf16, #tpu.memory_space<vmem>>, vector<1x256x256xbf16>
    %237 = vector.shape_cast %236 : vector<1x256x256xbf16> to vector<256x256xbf16>
    %cst_151 = arith.constant dense<0.000000e+00> : vector<20x256xf32>
    %238 = tpu.matmul %235, %237, %cst_151 {dimension_numbers = #tpu.dot_dimension_numbers<[1], [0], [0], [1], [0, 0, 1, 1], [], []>} : vector<20x256xbf16>, vector<256x256xbf16>, vector<20x256xf32> -> vector<20x256xf32>
    %c1_152 = arith.constant 1 : index
    %c0_153 = arith.constant 0 : index
    %c0_154 = arith.constant 0 : index
    %239 = vector.load %arg22[%c1_152, %c0_153, %c0_154] : memref<3x20x12xbf16, #tpu.memory_space<vmem>>, vector<1x20x12xbf16>
    %240 = vector.shape_cast %239 : vector<1x20x12xbf16> to vector<20x12xbf16>
    %cst_155 = arith.constant dense<0.000000e+00> : vector<20x256xf32>
    %241 = tpu.matmul %240, %231, %cst_155 {dimension_numbers = #tpu.dot_dimension_numbers<[1], [0], [0], [1], [0, 0, 1, 1], [], []>} : vector<20x12xbf16>, vector<12x256xbf16>, vector<20x256xf32> -> vector<20x256xf32>
    %242 = arith.truncf %241 : vector<20x256xf32> to vector<20x256xbf16>
    %c1_156 = arith.constant 1 : index
    %c0_157 = arith.constant 0 : index
    %c0_158 = arith.constant 0 : index
    %243 = vector.load %arg21[%c1_156, %c0_157, %c0_158] : memref<3x256x256xbf16, #tpu.memory_space<vmem>>, vector<1x256x256xbf16>
    %244 = vector.shape_cast %243 : vector<1x256x256xbf16> to vector<256x256xbf16>
    %cst_159 = arith.constant dense<0.000000e+00> : vector<20x256xf32>
    %245 = tpu.matmul %242, %244, %cst_159 {dimension_numbers = #tpu.dot_dimension_numbers<[1], [0], [0], [1], [0, 0, 1, 1], [], []>} : vector<20x256xbf16>, vector<256x256xbf16>, vector<20x256xf32> -> vector<20x256xf32>
    %246 = arith.addf %238, %245 : vector<20x256xf32>
    %c2_160 = arith.constant 2 : index
    %c0_161 = arith.constant 0 : index
    %c0_162 = arith.constant 0 : index
    %247 = vector.load %arg22[%c2_160, %c0_161, %c0_162] : memref<3x20x12xbf16, #tpu.memory_space<vmem>>, vector<1x20x12xbf16>
    %248 = vector.shape_cast %247 : vector<1x20x12xbf16> to vector<20x12xbf16>
    %cst_163 = arith.constant dense<0.000000e+00> : vector<20x256xf32>
    %249 = tpu.matmul %248, %231, %cst_163 {dimension_numbers = #tpu.dot_dimension_numbers<[1], [0], [0], [1], [0, 0, 1, 1], [], []>} : vector<20x12xbf16>, vector<12x256xbf16>, vector<20x256xf32> -> vector<20x256xf32>
    %250 = arith.truncf %249 : vector<20x256xf32> to vector<20x256xbf16>
    %c2_164 = arith.constant 2 : index
    %c0_165 = arith.constant 0 : index
    %c0_166 = arith.constant 0 : index
    %251 = vector.load %arg21[%c2_164, %c0_165, %c0_166] : memref<3x256x256xbf16, #tpu.memory_space<vmem>>, vector<1x256x256xbf16>
    %252 = vector.shape_cast %251 : vector<1x256x256xbf16> to vector<256x256xbf16>
    %cst_167 = arith.constant dense<0.000000e+00> : vector<20x256xf32>
    %253 = tpu.matmul %250, %252, %cst_167 {dimension_numbers = #tpu.dot_dimension_numbers<[1], [0], [0], [1], [0, 0, 1, 1], [], []>} : vector<20x256xbf16>, vector<256x256xbf16>, vector<20x256xf32> -> vector<20x256xf32>
    %254 = arith.addf %246, %253 : vector<20x256xf32>
    %c0_168 = arith.constant 0 : index
    %c0_169 = arith.constant 0 : index
    %255 = vector.load %arg23[%c0_168, %c0_169] : memref<1x256xf32, #tpu.memory_space<vmem>>, vector<1x256xf32>
    %256 = vector.broadcast %255 : vector<1x256xf32> to vector<20x256xf32>
    %257 = arith.addf %254, %256 : vector<20x256xf32>
    %cst_170 = arith.constant 0.000000e+00 : f32
    %258 = vector.broadcast %cst_170 : f32 to vector<20x256xf32>
    %259 = arith.maximumf %257, %258 : vector<20x256xf32>
    %260 = tpu.iota {dimensions = array<i32: 0>} : vector<20x256xi32>
    %c0_i32_171 = arith.constant 0 : i32
    %261 = vector.broadcast %c0_i32_171 : i32 to vector<20x256xi32>
    %262 = arith.cmpi ne, %260, %261 : vector<20x256xi32>
    %c9_i32_172 = arith.constant 9 : i32
    %263 = vector.broadcast %c9_i32_172 : i32 to vector<20x256xi32>
    %264 = arith.cmpi ne, %260, %263 : vector<20x256xi32>
    %265 = arith.andi %262, %264 : vector<20x256xi1>
    %c10_i32_173 = arith.constant 10 : i32
    %266 = vector.broadcast %c10_i32_173 : i32 to vector<20x256xi32>
    %267 = arith.cmpi ne, %260, %266 : vector<20x256xi32>
    %268 = arith.andi %265, %267 : vector<20x256xi1>
    %c19_i32_174 = arith.constant 19 : i32
    %269 = vector.broadcast %c19_i32_174 : i32 to vector<20x256xi32>
    %270 = arith.cmpi ne, %260, %269 : vector<20x256xi32>
    %271 = arith.andi %268, %270 : vector<20x256xi1>
    %cst_175 = arith.constant 0.000000e+00 : f32
    %272 = vector.broadcast %cst_175 : f32 to vector<20x256xf32>
    %273 = arith.select %271, %259, %272 : vector<20x256xi1>, vector<20x256xf32>
    %274 = arith.truncf %273 : vector<20x256xf32> to vector<20x256xbf16>
    %c0_176 = arith.constant 0 : index
    %c0_177 = arith.constant 0 : index
    %c0_178 = arith.constant 0 : index
    %275 = vector.load %arg25[%c0_176, %c0_177, %c0_178] : memref<3x20x20xbf16, #tpu.memory_space<vmem>>, vector<1x20x20xbf16>
    %276 = vector.shape_cast %275 : vector<1x20x20xbf16> to vector<20x20xbf16>
    %cst_179 = arith.constant dense<0.000000e+00> : vector<20x256xf32>
    %277 = tpu.matmul %276, %274, %cst_179 {dimension_numbers = #tpu.dot_dimension_numbers<[1], [0], [0], [1], [0, 0, 1, 1], [], []>} : vector<20x20xbf16>, vector<20x256xbf16>, vector<20x256xf32> -> vector<20x256xf32>
    %278 = arith.truncf %277 : vector<20x256xf32> to vector<20x256xbf16>
    %c0_180 = arith.constant 0 : index
    %c0_181 = arith.constant 0 : index
    %c0_182 = arith.constant 0 : index
    %279 = vector.load %arg24[%c0_180, %c0_181, %c0_182] : memref<3x256x256xbf16, #tpu.memory_space<vmem>>, vector<1x256x256xbf16>
    %280 = vector.shape_cast %279 : vector<1x256x256xbf16> to vector<256x256xbf16>
    %cst_183 = arith.constant dense<0.000000e+00> : vector<20x256xf32>
    %281 = tpu.matmul %278, %280, %cst_183 {dimension_numbers = #tpu.dot_dimension_numbers<[1], [0], [0], [1], [0, 0, 1, 1], [], []>} : vector<20x256xbf16>, vector<256x256xbf16>, vector<20x256xf32> -> vector<20x256xf32>
    %c1_184 = arith.constant 1 : index
    %c0_185 = arith.constant 0 : index
    %c0_186 = arith.constant 0 : index
    %282 = vector.load %arg25[%c1_184, %c0_185, %c0_186] : memref<3x20x20xbf16, #tpu.memory_space<vmem>>, vector<1x20x20xbf16>
    %283 = vector.shape_cast %282 : vector<1x20x20xbf16> to vector<20x20xbf16>
    %cst_187 = arith.constant dense<0.000000e+00> : vector<20x256xf32>
    %284 = tpu.matmul %283, %274, %cst_187 {dimension_numbers = #tpu.dot_dimension_numbers<[1], [0], [0], [1], [0, 0, 1, 1], [], []>} : vector<20x20xbf16>, vector<20x256xbf16>, vector<20x256xf32> -> vector<20x256xf32>
    %285 = arith.truncf %284 : vector<20x256xf32> to vector<20x256xbf16>
    %c1_188 = arith.constant 1 : index
    %c0_189 = arith.constant 0 : index
    %c0_190 = arith.constant 0 : index
    %286 = vector.load %arg24[%c1_188, %c0_189, %c0_190] : memref<3x256x256xbf16, #tpu.memory_space<vmem>>, vector<1x256x256xbf16>
    %287 = vector.shape_cast %286 : vector<1x256x256xbf16> to vector<256x256xbf16>
    %cst_191 = arith.constant dense<0.000000e+00> : vector<20x256xf32>
    %288 = tpu.matmul %285, %287, %cst_191 {dimension_numbers = #tpu.dot_dimension_numbers<[1], [0], [0], [1], [0, 0, 1, 1], [], []>} : vector<20x256xbf16>, vector<256x256xbf16>, vector<20x256xf32> -> vector<20x256xf32>
    %289 = arith.addf %281, %288 : vector<20x256xf32>
    %c2_192 = arith.constant 2 : index
    %c0_193 = arith.constant 0 : index
    %c0_194 = arith.constant 0 : index
    %290 = vector.load %arg25[%c2_192, %c0_193, %c0_194] : memref<3x20x20xbf16, #tpu.memory_space<vmem>>, vector<1x20x20xbf16>
    %291 = vector.shape_cast %290 : vector<1x20x20xbf16> to vector<20x20xbf16>
    %cst_195 = arith.constant dense<0.000000e+00> : vector<20x256xf32>
    %292 = tpu.matmul %291, %274, %cst_195 {dimension_numbers = #tpu.dot_dimension_numbers<[1], [0], [0], [1], [0, 0, 1, 1], [], []>} : vector<20x20xbf16>, vector<20x256xbf16>, vector<20x256xf32> -> vector<20x256xf32>
    %293 = arith.truncf %292 : vector<20x256xf32> to vector<20x256xbf16>
    %c2_196 = arith.constant 2 : index
    %c0_197 = arith.constant 0 : index
    %c0_198 = arith.constant 0 : index
    %294 = vector.load %arg24[%c2_196, %c0_197, %c0_198] : memref<3x256x256xbf16, #tpu.memory_space<vmem>>, vector<1x256x256xbf16>
    %295 = vector.shape_cast %294 : vector<1x256x256xbf16> to vector<256x256xbf16>
    %cst_199 = arith.constant dense<0.000000e+00> : vector<20x256xf32>
    %296 = tpu.matmul %293, %295, %cst_199 {dimension_numbers = #tpu.dot_dimension_numbers<[1], [0], [0], [1], [0, 0, 1, 1], [], []>} : vector<20x256xbf16>, vector<256x256xbf16>, vector<20x256xf32> -> vector<20x256xf32>
    %297 = arith.addf %289, %296 : vector<20x256xf32>
    %c0_200 = arith.constant 0 : index
    %c0_201 = arith.constant 0 : index
    %298 = vector.load %arg26[%c0_200, %c0_201] : memref<1x256xf32, #tpu.memory_space<vmem>>, vector<1x256xf32>
    %299 = vector.broadcast %298 : vector<1x256xf32> to vector<20x256xf32>
    %300 = arith.addf %297, %299 : vector<20x256xf32>
    %301 = tpu.iota {dimensions = array<i32: 0>} : vector<20x256xi32>
    %c0_i32_202 = arith.constant 0 : i32
    %302 = vector.broadcast %c0_i32_202 : i32 to vector<20x256xi32>
    %303 = arith.cmpi ne, %301, %302 : vector<20x256xi32>
    %c9_i32_203 = arith.constant 9 : i32
    %304 = vector.broadcast %c9_i32_203 : i32 to vector<20x256xi32>
    %305 = arith.cmpi ne, %301, %304 : vector<20x256xi32>
    %306 = arith.andi %303, %305 : vector<20x256xi1>
    %c10_i32_204 = arith.constant 10 : i32
    %307 = vector.broadcast %c10_i32_204 : i32 to vector<20x256xi32>
    %308 = arith.cmpi ne, %301, %307 : vector<20x256xi32>
    %309 = arith.andi %306, %308 : vector<20x256xi1>
    %c19_i32_205 = arith.constant 19 : i32
    %310 = vector.broadcast %c19_i32_205 : i32 to vector<20x256xi32>
    %311 = arith.cmpi ne, %301, %310 : vector<20x256xi32>
    %312 = arith.andi %309, %311 : vector<20x256xi1>
    %cst_206 = arith.constant 0.000000e+00 : f32
    %313 = vector.broadcast %cst_206 : f32 to vector<20x256xf32>
    %314 = arith.select %312, %300, %313 : vector<20x256xi1>, vector<20x256xf32>
    %315 = arith.truncf %228 : vector<12x256xf32> to vector<12x256xbf16>
    %c0_207 = arith.constant 0 : index
    %c0_208 = arith.constant 0 : index
    %c0_209 = arith.constant 0 : index
    %316 = vector.load %arg28[%c0_207, %c0_208, %c0_209] : memref<1x20x12xbf16, #tpu.memory_space<vmem>>, vector<1x20x12xbf16>
    %317 = vector.shape_cast %316 : vector<1x20x12xbf16> to vector<20x12xbf16>
    %cst_210 = arith.constant dense<0.000000e+00> : vector<20x256xf32>
    %318 = tpu.matmul %317, %315, %cst_210 {dimension_numbers = #tpu.dot_dimension_numbers<[1], [0], [0], [1], [0, 0, 1, 1], [], []>} : vector<20x12xbf16>, vector<12x256xbf16>, vector<20x256xf32> -> vector<20x256xf32>
    %319 = arith.truncf %318 : vector<20x256xf32> to vector<20x256xbf16>
    %c0_211 = arith.constant 0 : index
    %c0_212 = arith.constant 0 : index
    %c0_213 = arith.constant 0 : index
    %320 = vector.load %arg27[%c0_211, %c0_212, %c0_213] : memref<1x256x256xbf16, #tpu.memory_space<vmem>>, vector<1x256x256xbf16>
    %321 = vector.shape_cast %320 : vector<1x256x256xbf16> to vector<256x256xbf16>
    %cst_214 = arith.constant dense<0.000000e+00> : vector<20x256xf32>
    %322 = tpu.matmul %319, %321, %cst_214 {dimension_numbers = #tpu.dot_dimension_numbers<[1], [0], [0], [1], [0, 0, 1, 1], [], []>} : vector<20x256xbf16>, vector<256x256xbf16>, vector<20x256xf32> -> vector<20x256xf32>
    %c0_215 = arith.constant 0 : index
    %c0_216 = arith.constant 0 : index
    %323 = vector.load %arg29[%c0_215, %c0_216] : memref<1x256xf32, #tpu.memory_space<vmem>>, vector<1x256xf32>
    %324 = vector.broadcast %323 : vector<1x256xf32> to vector<20x256xf32>
    %325 = arith.addf %322, %324 : vector<20x256xf32>
    %326 = tpu.iota {dimensions = array<i32: 0>} : vector<20x256xi32>
    %c0_i32_217 = arith.constant 0 : i32
    %327 = vector.broadcast %c0_i32_217 : i32 to vector<20x256xi32>
    %328 = arith.cmpi ne, %326, %327 : vector<20x256xi32>
    %c9_i32_218 = arith.constant 9 : i32
    %329 = vector.broadcast %c9_i32_218 : i32 to vector<20x256xi32>
    %330 = arith.cmpi ne, %326, %329 : vector<20x256xi32>
    %331 = arith.andi %328, %330 : vector<20x256xi1>
    %c10_i32_219 = arith.constant 10 : i32
    %332 = vector.broadcast %c10_i32_219 : i32 to vector<20x256xi32>
    %333 = arith.cmpi ne, %326, %332 : vector<20x256xi32>
    %334 = arith.andi %331, %333 : vector<20x256xi1>
    %c19_i32_220 = arith.constant 19 : i32
    %335 = vector.broadcast %c19_i32_220 : i32 to vector<20x256xi32>
    %336 = arith.cmpi ne, %326, %335 : vector<20x256xi32>
    %337 = arith.andi %334, %336 : vector<20x256xi1>
    %cst_221 = arith.constant 0.000000e+00 : f32
    %338 = vector.broadcast %cst_221 : f32 to vector<20x256xf32>
    %339 = arith.select %337, %325, %338 : vector<20x256xi1>, vector<20x256xf32>
    %340 = arith.addf %314, %339 : vector<20x256xf32>
    %cst_222 = arith.constant 0.000000e+00 : f32
    %341 = vector.broadcast %cst_222 : f32 to vector<20x256xf32>
    %342 = arith.maximumf %340, %341 : vector<20x256xf32>
    %343 = arith.truncf %342 : vector<20x256xf32> to vector<20x256xbf16>
    %c0_223 = arith.constant 0 : index
    %c0_224 = arith.constant 0 : index
    %c0_225 = arith.constant 0 : index
    %344 = vector.load %arg31[%c0_223, %c0_224, %c0_225] : memref<3x36x20xbf16, #tpu.memory_space<vmem>>, vector<1x36x20xbf16>
    %345 = vector.shape_cast %344 : vector<1x36x20xbf16> to vector<36x20xbf16>
    %cst_226 = arith.constant dense<0.000000e+00> : vector<36x256xf32>
    %346 = tpu.matmul %345, %343, %cst_226 {dimension_numbers = #tpu.dot_dimension_numbers<[1], [0], [0], [1], [0, 0, 1, 1], [], []>} : vector<36x20xbf16>, vector<20x256xbf16>, vector<36x256xf32> -> vector<36x256xf32>
    %347 = arith.truncf %346 : vector<36x256xf32> to vector<36x256xbf16>
    %c0_227 = arith.constant 0 : index
    %c0_228 = arith.constant 0 : index
    %c0_229 = arith.constant 0 : index
    %348 = vector.load %arg30[%c0_227, %c0_228, %c0_229] : memref<3x256x256xbf16, #tpu.memory_space<vmem>>, vector<1x256x256xbf16>
    %349 = vector.shape_cast %348 : vector<1x256x256xbf16> to vector<256x256xbf16>
    %cst_230 = arith.constant dense<0.000000e+00> : vector<36x256xf32>
    %350 = tpu.matmul %347, %349, %cst_230 {dimension_numbers = #tpu.dot_dimension_numbers<[1], [0], [0], [1], [0, 0, 1, 1], [], []>} : vector<36x256xbf16>, vector<256x256xbf16>, vector<36x256xf32> -> vector<36x256xf32>
    %c1_231 = arith.constant 1 : index
    %c0_232 = arith.constant 0 : index
    %c0_233 = arith.constant 0 : index
    %351 = vector.load %arg31[%c1_231, %c0_232, %c0_233] : memref<3x36x20xbf16, #tpu.memory_space<vmem>>, vector<1x36x20xbf16>
    %352 = vector.shape_cast %351 : vector<1x36x20xbf16> to vector<36x20xbf16>
    %cst_234 = arith.constant dense<0.000000e+00> : vector<36x256xf32>
    %353 = tpu.matmul %352, %343, %cst_234 {dimension_numbers = #tpu.dot_dimension_numbers<[1], [0], [0], [1], [0, 0, 1, 1], [], []>} : vector<36x20xbf16>, vector<20x256xbf16>, vector<36x256xf32> -> vector<36x256xf32>
    %354 = arith.truncf %353 : vector<36x256xf32> to vector<36x256xbf16>
    %c1_235 = arith.constant 1 : index
    %c0_236 = arith.constant 0 : index
    %c0_237 = arith.constant 0 : index
    %355 = vector.load %arg30[%c1_235, %c0_236, %c0_237] : memref<3x256x256xbf16, #tpu.memory_space<vmem>>, vector<1x256x256xbf16>
    %356 = vector.shape_cast %355 : vector<1x256x256xbf16> to vector<256x256xbf16>
    %cst_238 = arith.constant dense<0.000000e+00> : vector<36x256xf32>
    %357 = tpu.matmul %354, %356, %cst_238 {dimension_numbers = #tpu.dot_dimension_numbers<[1], [0], [0], [1], [0, 0, 1, 1], [], []>} : vector<36x256xbf16>, vector<256x256xbf16>, vector<36x256xf32> -> vector<36x256xf32>
    %358 = arith.addf %350, %357 : vector<36x256xf32>
    %c2_239 = arith.constant 2 : index
    %c0_240 = arith.constant 0 : index
    %c0_241 = arith.constant 0 : index
    %359 = vector.load %arg31[%c2_239, %c0_240, %c0_241] : memref<3x36x20xbf16, #tpu.memory_space<vmem>>, vector<1x36x20xbf16>
    %360 = vector.shape_cast %359 : vector<1x36x20xbf16> to vector<36x20xbf16>
    %cst_242 = arith.constant dense<0.000000e+00> : vector<36x256xf32>
    %361 = tpu.matmul %360, %343, %cst_242 {dimension_numbers = #tpu.dot_dimension_numbers<[1], [0], [0], [1], [0, 0, 1, 1], [], []>} : vector<36x20xbf16>, vector<20x256xbf16>, vector<36x256xf32> -> vector<36x256xf32>
    %362 = arith.truncf %361 : vector<36x256xf32> to vector<36x256xbf16>
    %c2_243 = arith.constant 2 : index
    %c0_244 = arith.constant 0 : index
    %c0_245 = arith.constant 0 : index
    %363 = vector.load %arg30[%c2_243, %c0_244, %c0_245] : memref<3x256x256xbf16, #tpu.memory_space<vmem>>, vector<1x256x256xbf16>
    %364 = vector.shape_cast %363 : vector<1x256x256xbf16> to vector<256x256xbf16>
    %cst_246 = arith.constant dense<0.000000e+00> : vector<36x256xf32>
    %365 = tpu.matmul %362, %364, %cst_246 {dimension_numbers = #tpu.dot_dimension_numbers<[1], [0], [0], [1], [0, 0, 1, 1], [], []>} : vector<36x256xbf16>, vector<256x256xbf16>, vector<36x256xf32> -> vector<36x256xf32>
    %366 = arith.addf %358, %365 : vector<36x256xf32>
    %c0_247 = arith.constant 0 : index
    %c0_248 = arith.constant 0 : index
    %367 = vector.load %arg32[%c0_247, %c0_248] : memref<1x256xf32, #tpu.memory_space<vmem>>, vector<1x256xf32>
    %368 = vector.broadcast %367 : vector<1x256xf32> to vector<36x256xf32>
    %369 = arith.addf %366, %368 : vector<36x256xf32>
    %cst_249 = arith.constant 0.000000e+00 : f32
    %370 = vector.broadcast %cst_249 : f32 to vector<36x256xf32>
    %371 = arith.maximumf %369, %370 : vector<36x256xf32>
    %372 = tpu.iota {dimensions = array<i32: 0>} : vector<36x256xi32>
    %c0_i32_250 = arith.constant 0 : i32
    %373 = vector.broadcast %c0_i32_250 : i32 to vector<36x256xi32>
    %374 = arith.cmpi ne, %372, %373 : vector<36x256xi32>
    %c17_i32 = arith.constant 17 : i32
    %375 = vector.broadcast %c17_i32 : i32 to vector<36x256xi32>
    %376 = arith.cmpi ne, %372, %375 : vector<36x256xi32>
    %377 = arith.andi %374, %376 : vector<36x256xi1>
    %c18_i32 = arith.constant 18 : i32
    %378 = vector.broadcast %c18_i32 : i32 to vector<36x256xi32>
    %379 = arith.cmpi ne, %372, %378 : vector<36x256xi32>
    %380 = arith.andi %377, %379 : vector<36x256xi1>
    %c35_i32 = arith.constant 35 : i32
    %381 = vector.broadcast %c35_i32 : i32 to vector<36x256xi32>
    %382 = arith.cmpi ne, %372, %381 : vector<36x256xi32>
    %383 = arith.andi %380, %382 : vector<36x256xi1>
    %cst_251 = arith.constant 0.000000e+00 : f32
    %384 = vector.broadcast %cst_251 : f32 to vector<36x256xf32>
    %385 = arith.select %383, %371, %384 : vector<36x256xi1>, vector<36x256xf32>
    %386 = arith.truncf %385 : vector<36x256xf32> to vector<36x256xbf16>
    %c0_252 = arith.constant 0 : index
    %c0_253 = arith.constant 0 : index
    %c0_254 = arith.constant 0 : index
    %387 = vector.load %arg34[%c0_252, %c0_253, %c0_254] : memref<3x36x36xbf16, #tpu.memory_space<vmem>>, vector<1x36x36xbf16>
    %388 = vector.shape_cast %387 : vector<1x36x36xbf16> to vector<36x36xbf16>
    %cst_255 = arith.constant dense<0.000000e+00> : vector<36x256xf32>
    %389 = tpu.matmul %388, %386, %cst_255 {dimension_numbers = #tpu.dot_dimension_numbers<[1], [0], [0], [1], [0, 0, 1, 1], [], []>} : vector<36x36xbf16>, vector<36x256xbf16>, vector<36x256xf32> -> vector<36x256xf32>
    %390 = arith.truncf %389 : vector<36x256xf32> to vector<36x256xbf16>
    %c0_256 = arith.constant 0 : index
    %c0_257 = arith.constant 0 : index
    %c0_258 = arith.constant 0 : index
    %391 = vector.load %arg33[%c0_256, %c0_257, %c0_258] : memref<3x256x256xbf16, #tpu.memory_space<vmem>>, vector<1x256x256xbf16>
    %392 = vector.shape_cast %391 : vector<1x256x256xbf16> to vector<256x256xbf16>
    %cst_259 = arith.constant dense<0.000000e+00> : vector<36x256xf32>
    %393 = tpu.matmul %390, %392, %cst_259 {dimension_numbers = #tpu.dot_dimension_numbers<[1], [0], [0], [1], [0, 0, 1, 1], [], []>} : vector<36x256xbf16>, vector<256x256xbf16>, vector<36x256xf32> -> vector<36x256xf32>
    %c1_260 = arith.constant 1 : index
    %c0_261 = arith.constant 0 : index
    %c0_262 = arith.constant 0 : index
    %394 = vector.load %arg34[%c1_260, %c0_261, %c0_262] : memref<3x36x36xbf16, #tpu.memory_space<vmem>>, vector<1x36x36xbf16>
    %395 = vector.shape_cast %394 : vector<1x36x36xbf16> to vector<36x36xbf16>
    %cst_263 = arith.constant dense<0.000000e+00> : vector<36x256xf32>
    %396 = tpu.matmul %395, %386, %cst_263 {dimension_numbers = #tpu.dot_dimension_numbers<[1], [0], [0], [1], [0, 0, 1, 1], [], []>} : vector<36x36xbf16>, vector<36x256xbf16>, vector<36x256xf32> -> vector<36x256xf32>
    %397 = arith.truncf %396 : vector<36x256xf32> to vector<36x256xbf16>
    %c1_264 = arith.constant 1 : index
    %c0_265 = arith.constant 0 : index
    %c0_266 = arith.constant 0 : index
    %398 = vector.load %arg33[%c1_264, %c0_265, %c0_266] : memref<3x256x256xbf16, #tpu.memory_space<vmem>>, vector<1x256x256xbf16>
    %399 = vector.shape_cast %398 : vector<1x256x256xbf16> to vector<256x256xbf16>
    %cst_267 = arith.constant dense<0.000000e+00> : vector<36x256xf32>
    %400 = tpu.matmul %397, %399, %cst_267 {dimension_numbers = #tpu.dot_dimension_numbers<[1], [0], [0], [1], [0, 0, 1, 1], [], []>} : vector<36x256xbf16>, vector<256x256xbf16>, vector<36x256xf32> -> vector<36x256xf32>
    %401 = arith.addf %393, %400 : vector<36x256xf32>
    %c2_268 = arith.constant 2 : index
    %c0_269 = arith.constant 0 : index
    %c0_270 = arith.constant 0 : index
    %402 = vector.load %arg34[%c2_268, %c0_269, %c0_270] : memref<3x36x36xbf16, #tpu.memory_space<vmem>>, vector<1x36x36xbf16>
    %403 = vector.shape_cast %402 : vector<1x36x36xbf16> to vector<36x36xbf16>
    %cst_271 = arith.constant dense<0.000000e+00> : vector<36x256xf32>
    %404 = tpu.matmul %403, %386, %cst_271 {dimension_numbers = #tpu.dot_dimension_numbers<[1], [0], [0], [1], [0, 0, 1, 1], [], []>} : vector<36x36xbf16>, vector<36x256xbf16>, vector<36x256xf32> -> vector<36x256xf32>
    %405 = arith.truncf %404 : vector<36x256xf32> to vector<36x256xbf16>
    %c2_272 = arith.constant 2 : index
    %c0_273 = arith.constant 0 : index
    %c0_274 = arith.constant 0 : index
    %406 = vector.load %arg33[%c2_272, %c0_273, %c0_274] : memref<3x256x256xbf16, #tpu.memory_space<vmem>>, vector<1x256x256xbf16>
    %407 = vector.shape_cast %406 : vector<1x256x256xbf16> to vector<256x256xbf16>
    %cst_275 = arith.constant dense<0.000000e+00> : vector<36x256xf32>
    %408 = tpu.matmul %405, %407, %cst_275 {dimension_numbers = #tpu.dot_dimension_numbers<[1], [0], [0], [1], [0, 0, 1, 1], [], []>} : vector<36x256xbf16>, vector<256x256xbf16>, vector<36x256xf32> -> vector<36x256xf32>
    %409 = arith.addf %401, %408 : vector<36x256xf32>
    %c0_276 = arith.constant 0 : index
    %c0_277 = arith.constant 0 : index
    %410 = vector.load %arg35[%c0_276, %c0_277] : memref<1x256xf32, #tpu.memory_space<vmem>>, vector<1x256xf32>
    %411 = vector.broadcast %410 : vector<1x256xf32> to vector<36x256xf32>
    %412 = arith.addf %409, %411 : vector<36x256xf32>
    %413 = tpu.iota {dimensions = array<i32: 0>} : vector<36x256xi32>
    %c0_i32_278 = arith.constant 0 : i32
    %414 = vector.broadcast %c0_i32_278 : i32 to vector<36x256xi32>
    %415 = arith.cmpi ne, %413, %414 : vector<36x256xi32>
    %c17_i32_279 = arith.constant 17 : i32
    %416 = vector.broadcast %c17_i32_279 : i32 to vector<36x256xi32>
    %417 = arith.cmpi ne, %413, %416 : vector<36x256xi32>
    %418 = arith.andi %415, %417 : vector<36x256xi1>
    %c18_i32_280 = arith.constant 18 : i32
    %419 = vector.broadcast %c18_i32_280 : i32 to vector<36x256xi32>
    %420 = arith.cmpi ne, %413, %419 : vector<36x256xi32>
    %421 = arith.andi %418, %420 : vector<36x256xi1>
    %c35_i32_281 = arith.constant 35 : i32
    %422 = vector.broadcast %c35_i32_281 : i32 to vector<36x256xi32>
    %423 = arith.cmpi ne, %413, %422 : vector<36x256xi32>
    %424 = arith.andi %421, %423 : vector<36x256xi1>
    %cst_282 = arith.constant 0.000000e+00 : f32
    %425 = vector.broadcast %cst_282 : f32 to vector<36x256xf32>
    %426 = arith.select %424, %412, %425 : vector<36x256xi1>, vector<36x256xf32>
    %427 = arith.truncf %340 : vector<20x256xf32> to vector<20x256xbf16>
    %c0_283 = arith.constant 0 : index
    %c0_284 = arith.constant 0 : index
    %c0_285 = arith.constant 0 : index
    %428 = vector.load %arg37[%c0_283, %c0_284, %c0_285] : memref<1x36x20xbf16, #tpu.memory_space<vmem>>, vector<1x36x20xbf16>
    %429 = vector.shape_cast %428 : vector<1x36x20xbf16> to vector<36x20xbf16>
    %cst_286 = arith.constant dense<0.000000e+00> : vector<36x256xf32>
    %430 = tpu.matmul %429, %427, %cst_286 {dimension_numbers = #tpu.dot_dimension_numbers<[1], [0], [0], [1], [0, 0, 1, 1], [], []>} : vector<36x20xbf16>, vector<20x256xbf16>, vector<36x256xf32> -> vector<36x256xf32>
    %431 = arith.truncf %430 : vector<36x256xf32> to vector<36x256xbf16>
    %c0_287 = arith.constant 0 : index
    %c0_288 = arith.constant 0 : index
    %c0_289 = arith.constant 0 : index
    %432 = vector.load %arg36[%c0_287, %c0_288, %c0_289] : memref<1x256x256xbf16, #tpu.memory_space<vmem>>, vector<1x256x256xbf16>
    %433 = vector.shape_cast %432 : vector<1x256x256xbf16> to vector<256x256xbf16>
    %cst_290 = arith.constant dense<0.000000e+00> : vector<36x256xf32>
    %434 = tpu.matmul %431, %433, %cst_290 {dimension_numbers = #tpu.dot_dimension_numbers<[1], [0], [0], [1], [0, 0, 1, 1], [], []>} : vector<36x256xbf16>, vector<256x256xbf16>, vector<36x256xf32> -> vector<36x256xf32>
    %c0_291 = arith.constant 0 : index
    %c0_292 = arith.constant 0 : index
    %435 = vector.load %arg38[%c0_291, %c0_292] : memref<1x256xf32, #tpu.memory_space<vmem>>, vector<1x256xf32>
    %436 = vector.broadcast %435 : vector<1x256xf32> to vector<36x256xf32>
    %437 = arith.addf %434, %436 : vector<36x256xf32>
    %438 = tpu.iota {dimensions = array<i32: 0>} : vector<36x256xi32>
    %c0_i32_293 = arith.constant 0 : i32
    %439 = vector.broadcast %c0_i32_293 : i32 to vector<36x256xi32>
    %440 = arith.cmpi ne, %438, %439 : vector<36x256xi32>
    %c17_i32_294 = arith.constant 17 : i32
    %441 = vector.broadcast %c17_i32_294 : i32 to vector<36x256xi32>
    %442 = arith.cmpi ne, %438, %441 : vector<36x256xi32>
    %443 = arith.andi %440, %442 : vector<36x256xi1>
    %c18_i32_295 = arith.constant 18 : i32
    %444 = vector.broadcast %c18_i32_295 : i32 to vector<36x256xi32>
    %445 = arith.cmpi ne, %438, %444 : vector<36x256xi32>
    %446 = arith.andi %443, %445 : vector<36x256xi1>
    %c35_i32_296 = arith.constant 35 : i32
    %447 = vector.broadcast %c35_i32_296 : i32 to vector<36x256xi32>
    %448 = arith.cmpi ne, %438, %447 : vector<36x256xi32>
    %449 = arith.andi %446, %448 : vector<36x256xi1>
    %cst_297 = arith.constant 0.000000e+00 : f32
    %450 = vector.broadcast %cst_297 : f32 to vector<36x256xf32>
    %451 = arith.select %449, %437, %450 : vector<36x256xi1>, vector<36x256xf32>
    %452 = arith.addf %426, %451 : vector<36x256xf32>
    %cst_298 = arith.constant 0.000000e+00 : f32
    %453 = vector.broadcast %cst_298 : f32 to vector<36x256xf32>
    %454 = arith.maximumf %452, %453 : vector<36x256xf32>
    %455 = arith.truncf %454 : vector<36x256xf32> to vector<36x256xbf16>
    %c0_299 = arith.constant 0 : index
    %c0_300 = arith.constant 0 : index
    %c0_301 = arith.constant 0 : index
    %456 = vector.load %arg40[%c0_299, %c0_300, %c0_301] : memref<3x36x36xbf16, #tpu.memory_space<vmem>>, vector<1x36x36xbf16>
    %457 = vector.shape_cast %456 : vector<1x36x36xbf16> to vector<36x36xbf16>
    %cst_302 = arith.constant dense<0.000000e+00> : vector<36x256xf32>
    %458 = tpu.matmul %457, %455, %cst_302 {dimension_numbers = #tpu.dot_dimension_numbers<[1], [0], [0], [1], [0, 0, 1, 1], [], []>} : vector<36x36xbf16>, vector<36x256xbf16>, vector<36x256xf32> -> vector<36x256xf32>
    %459 = arith.truncf %458 : vector<36x256xf32> to vector<36x256xbf16>
    %c0_303 = arith.constant 0 : index
    %c0_304 = arith.constant 0 : index
    %c0_305 = arith.constant 0 : index
    %460 = vector.load %arg39[%c0_303, %c0_304, %c0_305] : memref<3x256x128xbf16, #tpu.memory_space<vmem>>, vector<1x256x128xbf16>
    %461 = vector.shape_cast %460 : vector<1x256x128xbf16> to vector<256x128xbf16>
    %cst_306 = arith.constant dense<0.000000e+00> : vector<36x128xf32>
    %462 = tpu.matmul %459, %461, %cst_306 {dimension_numbers = #tpu.dot_dimension_numbers<[1], [0], [0], [1], [0, 0, 1, 1], [], []>} : vector<36x256xbf16>, vector<256x128xbf16>, vector<36x128xf32> -> vector<36x128xf32>
    %c1_307 = arith.constant 1 : index
    %c0_308 = arith.constant 0 : index
    %c0_309 = arith.constant 0 : index
    %463 = vector.load %arg40[%c1_307, %c0_308, %c0_309] : memref<3x36x36xbf16, #tpu.memory_space<vmem>>, vector<1x36x36xbf16>
    %464 = vector.shape_cast %463 : vector<1x36x36xbf16> to vector<36x36xbf16>
    %cst_310 = arith.constant dense<0.000000e+00> : vector<36x256xf32>
    %465 = tpu.matmul %464, %455, %cst_310 {dimension_numbers = #tpu.dot_dimension_numbers<[1], [0], [0], [1], [0, 0, 1, 1], [], []>} : vector<36x36xbf16>, vector<36x256xbf16>, vector<36x256xf32> -> vector<36x256xf32>
    %466 = arith.truncf %465 : vector<36x256xf32> to vector<36x256xbf16>
    %c1_311 = arith.constant 1 : index
    %c0_312 = arith.constant 0 : index
    %c0_313 = arith.constant 0 : index
    %467 = vector.load %arg39[%c1_311, %c0_312, %c0_313] : memref<3x256x128xbf16, #tpu.memory_space<vmem>>, vector<1x256x128xbf16>
    %468 = vector.shape_cast %467 : vector<1x256x128xbf16> to vector<256x128xbf16>
    %cst_314 = arith.constant dense<0.000000e+00> : vector<36x128xf32>
    %469 = tpu.matmul %466, %468, %cst_314 {dimension_numbers = #tpu.dot_dimension_numbers<[1], [0], [0], [1], [0, 0, 1, 1], [], []>} : vector<36x256xbf16>, vector<256x128xbf16>, vector<36x128xf32> -> vector<36x128xf32>
    %470 = arith.addf %462, %469 : vector<36x128xf32>
    %c2_315 = arith.constant 2 : index
    %c0_316 = arith.constant 0 : index
    %c0_317 = arith.constant 0 : index
    %471 = vector.load %arg40[%c2_315, %c0_316, %c0_317] : memref<3x36x36xbf16, #tpu.memory_space<vmem>>, vector<1x36x36xbf16>
    %472 = vector.shape_cast %471 : vector<1x36x36xbf16> to vector<36x36xbf16>
    %cst_318 = arith.constant dense<0.000000e+00> : vector<36x256xf32>
    %473 = tpu.matmul %472, %455, %cst_318 {dimension_numbers = #tpu.dot_dimension_numbers<[1], [0], [0], [1], [0, 0, 1, 1], [], []>} : vector<36x36xbf16>, vector<36x256xbf16>, vector<36x256xf32> -> vector<36x256xf32>
    %474 = arith.truncf %473 : vector<36x256xf32> to vector<36x256xbf16>
    %c2_319 = arith.constant 2 : index
    %c0_320 = arith.constant 0 : index
    %c0_321 = arith.constant 0 : index
    %475 = vector.load %arg39[%c2_319, %c0_320, %c0_321] : memref<3x256x128xbf16, #tpu.memory_space<vmem>>, vector<1x256x128xbf16>
    %476 = vector.shape_cast %475 : vector<1x256x128xbf16> to vector<256x128xbf16>
    %cst_322 = arith.constant dense<0.000000e+00> : vector<36x128xf32>
    %477 = tpu.matmul %474, %476, %cst_322 {dimension_numbers = #tpu.dot_dimension_numbers<[1], [0], [0], [1], [0, 0, 1, 1], [], []>} : vector<36x256xbf16>, vector<256x128xbf16>, vector<36x128xf32> -> vector<36x128xf32>
    %478 = arith.addf %470, %477 : vector<36x128xf32>
    %c0_323 = arith.constant 0 : index
    %c0_324 = arith.constant 0 : index
    %479 = vector.load %arg41[%c0_323, %c0_324] : memref<1x128xf32, #tpu.memory_space<vmem>>, vector<1x128xf32>
    %480 = vector.broadcast %479 : vector<1x128xf32> to vector<36x128xf32>
    %481 = arith.addf %478, %480 : vector<36x128xf32>
    %482 = tpu.iota {dimensions = array<i32: 0>} : vector<36x128xi32>
    %c0_i32_325 = arith.constant 0 : i32
    %483 = vector.broadcast %c0_i32_325 : i32 to vector<36x128xi32>
    %484 = arith.cmpi ne, %482, %483 : vector<36x128xi32>
    %c17_i32_326 = arith.constant 17 : i32
    %485 = vector.broadcast %c17_i32_326 : i32 to vector<36x128xi32>
    %486 = arith.cmpi ne, %482, %485 : vector<36x128xi32>
    %487 = arith.andi %484, %486 : vector<36x128xi1>
    %c18_i32_327 = arith.constant 18 : i32
    %488 = vector.broadcast %c18_i32_327 : i32 to vector<36x128xi32>
    %489 = arith.cmpi ne, %482, %488 : vector<36x128xi32>
    %490 = arith.andi %487, %489 : vector<36x128xi1>
    %c35_i32_328 = arith.constant 35 : i32
    %491 = vector.broadcast %c35_i32_328 : i32 to vector<36x128xi32>
    %492 = arith.cmpi ne, %482, %491 : vector<36x128xi32>
    %493 = arith.andi %490, %492 : vector<36x128xi1>
    %cst_329 = arith.constant 0.000000e+00 : f32
    %494 = vector.broadcast %cst_329 : f32 to vector<36x128xf32>
    %495 = arith.select %493, %481, %494 : vector<36x128xi1>, vector<36x128xf32>
    %496 = math.tanh %495 : vector<36x128xf32>
    %c0_330 = arith.constant 0 : index
    %c0_331 = arith.constant 0 : index
    %c0_332 = arith.constant 0 : index
    %497 = vector.load %arg42[%c0_330, %c0_331, %c0_332] : memref<1x36x128xf32, #tpu.memory_space<vmem>>, vector<1x36x128xf32>
    %498 = vector.shape_cast %497 : vector<1x36x128xf32> to vector<36x128xf32>
    %499 = vector.shape_cast %496 : vector<36x128xf32> to vector<1x36x128xf32>
    tpu.vector_store %arg42[%c0_330, %c0_331, %c0_332], %499 {strides = array<i32>} : memref<1x36x128xf32, #tpu.memory_space<vmem>>, vector<1x36x128xf32>,
    %c0_333 = arith.constant 0 : index
    %c0_334 = arith.constant 0 : index
    %500 = vector.load %arg45[%c0_333, %c0_334] : memref<36x128xf32, #tpu.memory_space<vmem>>, vector<36x128xf32>
    tpu.vector_store %arg45[%c0_333, %c0_334], %496 {strides = array<i32>} : memref<36x128xf32, #tpu.memory_space<vmem>>, vector<36x128xf32>,
    %c0_335 = arith.constant 0 : index
    %c0_336 = arith.constant 0 : index
    %501 = vector.load %arg43[%c0_335, %c0_336] : memref<2x32xf32, #tpu.memory_space<vmem>>, vector<2x32xf32>
    tpu.vector_store %arg43[%c0_335, %c0_336], %203 {strides = array<i32>} : memref<2x32xf32, #tpu.memory_space<vmem>>, vector<2x32xf32>,
    %c0_337 = arith.constant 0 : index
    %c0_338 = arith.constant 0 : index
    %502 = vector.load %arg44[%c0_337, %c0_338] : memref<2x32xf32, #tpu.memory_space<vmem>>, vector<2x32xf32>
    tpu.vector_store %arg44[%c0_337, %c0_338], %201 {strides = array<i32>} : memref<2x32xf32, #tpu.memory_space<vmem>>, vector<2x32xf32>,
    return
  }
  func.func @transform_0(%arg0: i32, %arg1: memref<1xi32, #tpu.memory_space<smem>>) -> (i32, i32, i32) {
    %c0_i32 = arith.constant 0 : i32
    %c0_i32_0 = arith.constant 0 : i32
    %c0_i32_1 = arith.constant 0 : i32
    return %arg0, %c0_i32, %c0_i32_0 : i32, i32, i32
  }
  func.func @transform_1(%arg0: i32, %arg1: memref<1xi32, #tpu.memory_space<smem>>) -> (i32, i32, i32) {
    %c0_i32 = arith.constant 0 : i32
    %c0_i32_0 = arith.constant 0 : i32
    %c0_i32_1 = arith.constant 0 : i32
    return %arg0, %c0_i32, %c0_i32_0 : i32, i32, i32
  }
  func.func @transform_2(%arg0: i32, %arg1: memref<1xi32, #tpu.memory_space<smem>>) -> (i32, i32, i32) {
    %c0_i32 = arith.constant 0 : i32
    %c0_i32_0 = arith.constant 0 : i32
    %c0_i32_1 = arith.constant 0 : i32
    return %arg0, %c0_i32, %c0_i32_0 : i32, i32, i32
  }
  func.func @transform_3(%arg0: i32, %arg1: memref<1xi32, #tpu.memory_space<smem>>) -> (i32, i32) {
    %c0_i32 = arith.constant 0 : i32
    %c0_i32_0 = arith.constant 0 : i32
    %c0_i32_1 = arith.constant 0 : i32
    return %c0_i32, %c0_i32_0 : i32, i32
  }
  func.func @transform_4(%arg0: i32, %arg1: memref<1xi32, #tpu.memory_space<smem>>) -> (i32, i32) {
    %c0_i32 = arith.constant 0 : i32
    %c0_i32_0 = arith.constant 0 : i32
    %c0_i32_1 = arith.constant 0 : i32
    return %c0_i32, %c0_i32_0 : i32, i32
  }
  func.func @transform_5(%arg0: i32, %arg1: memref<1xi32, #tpu.memory_space<smem>>) -> (i32, i32) {
    %c0_i32 = arith.constant 0 : i32
    %c0_i32_0 = arith.constant 0 : i32
    %c0_i32_1 = arith.constant 0 : i32
    return %c0_i32, %c0_i32_0 : i32, i32
  }
  func.func @transform_6(%arg0: i32, %arg1: memref<1xi32, #tpu.memory_space<smem>>) -> (i32, i32) {
    %c0_i32 = arith.constant 0 : i32
    %c0_i32_0 = arith.constant 0 : i32
    %c0_i32_1 = arith.constant 0 : i32
    return %c0_i32, %c0_i32_0 : i32, i32
  }
  func.func @transform_7(%arg0: i32, %arg1: memref<1xi32, #tpu.memory_space<smem>>) -> (i32, i32, i32) {
    %c0_i32 = arith.constant 0 : i32
    %c0_i32_0 = arith.constant 0 : i32
    %c0_i32_1 = arith.constant 0 : i32
    %c0_i32_2 = arith.constant 0 : i32
    return %c0_i32, %c0_i32_0, %c0_i32_1 : i32, i32, i32
  }
  func.func @transform_8(%arg0: i32, %arg1: memref<1xi32, #tpu.memory_space<smem>>) -> (i32, i32, i32) {
    %c0_i32 = arith.constant 0 : i32
    %c0_i32_0 = arith.constant 0 : i32
    %c0_i32_1 = arith.constant 0 : i32
    %c0_i32_2 = arith.constant 0 : i32
    return %c0_i32, %c0_i32_0, %c0_i32_1 : i32, i32, i32
  }
  func.func @transform_9(%arg0: i32, %arg1: memref<1xi32, #tpu.memory_space<smem>>) -> (i32, i32) {
    %c0_i32 = arith.constant 0 : i32
    %c0_i32_0 = arith.constant 0 : i32
    %c0_i32_1 = arith.constant 0 : i32
    return %c0_i32, %c0_i32_0 : i32, i32
  }
  func.func @transform_10(%arg0: i32, %arg1: memref<1xi32, #tpu.memory_space<smem>>) -> (i32, i32, i32) {
    %c0_i32 = arith.constant 0 : i32
    %c0_i32_0 = arith.constant 0 : i32
    %c0_i32_1 = arith.constant 0 : i32
    %c0_i32_2 = arith.constant 0 : i32
    return %c0_i32, %c0_i32_0, %c0_i32_1 : i32, i32, i32
  }
  func.func @transform_11(%arg0: i32, %arg1: memref<1xi32, #tpu.memory_space<smem>>) -> (i32, i32, i32) {
    %c0_i32 = arith.constant 0 : i32
    %c0_i32_0 = arith.constant 0 : i32
    %c0_i32_1 = arith.constant 0 : i32
    %c0_i32_2 = arith.constant 0 : i32
    return %c0_i32, %c0_i32_0, %c0_i32_1 : i32, i32, i32
  }
  func.func @transform_12(%arg0: i32, %arg1: memref<1xi32, #tpu.memory_space<smem>>) -> (i32, i32) {
    %c0_i32 = arith.constant 0 : i32
    %c0_i32_0 = arith.constant 0 : i32
    %c0_i32_1 = arith.constant 0 : i32
    return %c0_i32, %c0_i32_0 : i32, i32
  }
  func.func @transform_13(%arg0: i32, %arg1: memref<1xi32, #tpu.memory_space<smem>>) -> (i32, i32) {
    %c0_i32 = arith.constant 0 : i32
    %c0_i32_0 = arith.constant 0 : i32
    %c0_i32_1 = arith.constant 0 : i32
    return %c0_i32, %c0_i32_0 : i32, i32
  }
  func.func @transform_14(%arg0: i32, %arg1: memref<1xi32, #tpu.memory_space<smem>>) -> (i32, i32) {
    %c0_i32 = arith.constant 0 : i32
    %c0_i32_0 = arith.constant 0 : i32
    %c0_i32_1 = arith.constant 0 : i32
    return %c0_i32, %c0_i32_0 : i32, i32
  }
  func.func @transform_15(%arg0: i32, %arg1: memref<1xi32, #tpu.memory_space<smem>>) -> (i32, i32) {
    %c0_i32 = arith.constant 0 : i32
    %c0_i32_0 = arith.constant 0 : i32
    %c0_i32_1 = arith.constant 0 : i32
    return %c0_i32, %c0_i32_0 : i32, i32
  }
  func.func @transform_16(%arg0: i32, %arg1: memref<1xi32, #tpu.memory_space<smem>>) -> (i32, i32) {
    %c0_i32 = arith.constant 0 : i32
    %c0_i32_0 = arith.constant 0 : i32
    %c0_i32_1 = arith.constant 0 : i32
    return %c0_i32, %c0_i32_0 : i32, i32
  }
  func.func @transform_17(%arg0: i32, %arg1: memref<1xi32, #tpu.memory_space<smem>>) -> (i32, i32) {
    %c0_i32 = arith.constant 0 : i32
    %c0_i32_0 = arith.constant 0 : i32
    %c0_i32_1 = arith.constant 0 : i32
    return %c0_i32, %c0_i32_0 : i32, i32
  }
  func.func @transform_18(%arg0: i32, %arg1: memref<1xi32, #tpu.memory_space<smem>>) -> (i32, i32) {
    %c0_i32 = arith.constant 0 : i32
    %c0_i32_0 = arith.constant 0 : i32
    %c0_i32_1 = arith.constant 0 : i32
    return %c0_i32, %c0_i32_0 : i32, i32
  }
  func.func @transform_19(%arg0: i32, %arg1: memref<1xi32, #tpu.memory_space<smem>>) -> (i32, i32, i32) {
    %c0_i32 = arith.constant 0 : i32
    %c0_i32_0 = arith.constant 0 : i32
    %c0_i32_1 = arith.constant 0 : i32
    %c0_i32_2 = arith.constant 0 : i32
    return %c0_i32, %c0_i32_0, %c0_i32_1 : i32, i32, i32
  }
  func.func @transform_20(%arg0: i32, %arg1: memref<1xi32, #tpu.memory_space<smem>>) -> (i32, i32, i32) {
    %c0_i32 = arith.constant 0 : i32
    %c0_i32_0 = arith.constant 0 : i32
    %c0_i32_1 = arith.constant 0 : i32
    %c0_i32_2 = arith.constant 0 : i32
    return %c0_i32, %c0_i32_0, %c0_i32_1 : i32, i32, i32
  }
  func.func @transform_21(%arg0: i32, %arg1: memref<1xi32, #tpu.memory_space<smem>>) -> (i32, i32) {
    %c0_i32 = arith.constant 0 : i32
    %c0_i32_0 = arith.constant 0 : i32
    %c0_i32_1 = arith.constant 0 : i32
    return %c0_i32, %c0_i32_0 : i32, i32
  }
  func.func @transform_22(%arg0: i32, %arg1: memref<1xi32, #tpu.memory_space<smem>>) -> (i32, i32, i32) {
    %c0_i32 = arith.constant 0 : i32
    %c0_i32_0 = arith.constant 0 : i32
    %c0_i32_1 = arith.constant 0 : i32
    %c0_i32_2 = arith.constant 0 : i32
    return %c0_i32, %c0_i32_0, %c0_i32_1 : i32, i32, i32
  }
  func.func @transform_23(%arg0: i32, %arg1: memref<1xi32, #tpu.memory_space<smem>>) -> (i32, i32, i32) {
    %c0_i32 = arith.constant 0 : i32
    %c0_i32_0 = arith.constant 0 : i32
    %c0_i32_1 = arith.constant 0 : i32
    %c0_i32_2 = arith.constant 0 : i32
    return %c0_i32, %c0_i32_0, %c0_i32_1 : i32, i32, i32
  }
  func.func @transform_24(%arg0: i32, %arg1: memref<1xi32, #tpu.memory_space<smem>>) -> (i32, i32) {
    %c0_i32 = arith.constant 0 : i32
    %c0_i32_0 = arith.constant 0 : i32
    %c0_i32_1 = arith.constant 0 : i32
    return %c0_i32, %c0_i32_0 : i32, i32
  }
  func.func @transform_25(%arg0: i32, %arg1: memref<1xi32, #tpu.memory_space<smem>>) -> (i32, i32, i32) {
    %c0_i32 = arith.constant 0 : i32
    %c0_i32_0 = arith.constant 0 : i32
    %c0_i32_1 = arith.constant 0 : i32
    %c0_i32_2 = arith.constant 0 : i32
    return %c0_i32, %c0_i32_0, %c0_i32_1 : i32, i32, i32
  }
  func.func @transform_26(%arg0: i32, %arg1: memref<1xi32, #tpu.memory_space<smem>>) -> (i32, i32, i32) {
    %c0_i32 = arith.constant 0 : i32
    %c0_i32_0 = arith.constant 0 : i32
    %c0_i32_1 = arith.constant 0 : i32
    %c0_i32_2 = arith.constant 0 : i32
    return %c0_i32, %c0_i32_0, %c0_i32_1 : i32, i32, i32
  }
  func.func @transform_27(%arg0: i32, %arg1: memref<1xi32, #tpu.memory_space<smem>>) -> (i32, i32) {
    %c0_i32 = arith.constant 0 : i32
    %c0_i32_0 = arith.constant 0 : i32
    %c0_i32_1 = arith.constant 0 : i32
    return %c0_i32, %c0_i32_0 : i32, i32
  }
  func.func @transform_28(%arg0: i32, %arg1: memref<1xi32, #tpu.memory_space<smem>>) -> (i32, i32, i32) {
    %c0_i32 = arith.constant 0 : i32
    %c0_i32_0 = arith.constant 0 : i32
    %c0_i32_1 = arith.constant 0 : i32
    %c0_i32_2 = arith.constant 0 : i32
    return %c0_i32, %c0_i32_0, %c0_i32_1 : i32, i32, i32
  }
  func.func @transform_29(%arg0: i32, %arg1: memref<1xi32, #tpu.memory_space<smem>>) -> (i32, i32, i32) {
    %c0_i32 = arith.constant 0 : i32
    %c0_i32_0 = arith.constant 0 : i32
    %c0_i32_1 = arith.constant 0 : i32
    %c0_i32_2 = arith.constant 0 : i32
    return %c0_i32, %c0_i32_0, %c0_i32_1 : i32, i32, i32
  }
  func.func @transform_30(%arg0: i32, %arg1: memref<1xi32, #tpu.memory_space<smem>>) -> (i32, i32) {
    %c0_i32 = arith.constant 0 : i32
    %c0_i32_0 = arith.constant 0 : i32
    %c0_i32_1 = arith.constant 0 : i32
    return %c0_i32, %c0_i32_0 : i32, i32
  }
  func.func @transform_31(%arg0: i32, %arg1: memref<1xi32, #tpu.memory_space<smem>>) -> (i32, i32, i32) {
    %c0_i32 = arith.constant 0 : i32
    %c0_i32_0 = arith.constant 0 : i32
    %c0_i32_1 = arith.constant 0 : i32
    %c0_i32_2 = arith.constant 0 : i32
    return %c0_i32, %c0_i32_0, %c0_i32_1 : i32, i32, i32
  }
  func.func @transform_32(%arg0: i32, %arg1: memref<1xi32, #tpu.memory_space<smem>>) -> (i32, i32, i32) {
    %c0_i32 = arith.constant 0 : i32
    %c0_i32_0 = arith.constant 0 : i32
    %c0_i32_1 = arith.constant 0 : i32
    %c0_i32_2 = arith.constant 0 : i32
    return %c0_i32, %c0_i32_0, %c0_i32_1 : i32, i32, i32
  }
  func.func @transform_33(%arg0: i32, %arg1: memref<1xi32, #tpu.memory_space<smem>>) -> (i32, i32) {
    %c0_i32 = arith.constant 0 : i32
    %c0_i32_0 = arith.constant 0 : i32
    %c0_i32_1 = arith.constant 0 : i32
    return %c0_i32, %c0_i32_0 : i32, i32
  }
  func.func @transform_34(%arg0: i32, %arg1: memref<1xi32, #tpu.memory_space<smem>>) -> (i32, i32, i32) {
    %c0_i32 = arith.constant 0 : i32
    %c0_i32_0 = arith.constant 0 : i32
    %c0_i32_1 = arith.constant 0 : i32
    %c0_i32_2 = arith.constant 0 : i32
    return %c0_i32, %c0_i32_0, %c0_i32_1 : i32, i32, i32
  }
  func.func @transform_35(%arg0: i32, %arg1: memref<1xi32, #tpu.memory_space<smem>>) -> (i32, i32, i32) {
    %c0_i32 = arith.constant 0 : i32
    %c0_i32_0 = arith.constant 0 : i32
    %c0_i32_1 = arith.constant 0 : i32
    %c0_i32_2 = arith.constant 0 : i32
    return %c0_i32, %c0_i32_0, %c0_i32_1 : i32, i32, i32
  }
  func.func @transform_36(%arg0: i32, %arg1: memref<1xi32, #tpu.memory_space<smem>>) -> (i32, i32) {
    %c0_i32 = arith.constant 0 : i32
    %c0_i32_0 = arith.constant 0 : i32
    %c0_i32_1 = arith.constant 0 : i32
    return %c0_i32, %c0_i32_0 : i32, i32
  }
  func.func @transform_37(%arg0: i32, %arg1: memref<1xi32, #tpu.memory_space<smem>>) -> (i32, i32, i32) {
    %c0_i32 = arith.constant 0 : i32
    %c0_i32_0 = arith.constant 0 : i32
    %c0_i32_1 = arith.constant 0 : i32
    %c0_i32_2 = arith.constant 0 : i32
    return %c0_i32, %c0_i32_0, %c0_i32_1 : i32, i32, i32
  }
  func.func @transform_38(%arg0: i32, %arg1: memref<1xi32, #tpu.memory_space<smem>>) -> (i32, i32, i32) {
    %c0_i32 = arith.constant 0 : i32
    %c0_i32_0 = arith.constant 0 : i32
    %c0_i32_1 = arith.constant 0 : i32
    %c0_i32_2 = arith.constant 0 : i32
    return %c0_i32, %c0_i32_0, %c0_i32_1 : i32, i32, i32
  }
  func.func @transform_39(%arg0: i32, %arg1: memref<1xi32, #tpu.memory_space<smem>>) -> (i32, i32) {
    %c0_i32 = arith.constant 0 : i32
    %c0_i32_0 = arith.constant 0 : i32
    %c0_i32_1 = arith.constant 0 : i32
    return %c0_i32, %c0_i32_0 : i32, i32
  }
  func.func @transform_40(%arg0: i32, %arg1: memref<1xi32, #tpu.memory_space<smem>>) -> (i32, i32, i32) {
    %c0_i32 = arith.constant 0 : i32
    %c0_i32_0 = arith.constant 0 : i32
    %c0_i32_1 = arith.constant 0 : i32
    return %arg0, %c0_i32, %c0_i32_0 : i32, i32, i32
  }
}

</mosaic_0001>

<bundles_post_ra>
// kernel: tpu_custom_call.1
= control target key start
LH: loop header
LB: loop body
LE: loop exit
PB: predicated region body
PF: predicated region fallthrough
CT: control target
= control target key end

     0   :  { %s14002_s6 = smov 1   ;;  %s14003_s10 = smov 2   ;;  %s15982_s0 = inlined_call_operand.smem [shape: u32[42], index: -1, kind: input, shape index: {}] }
   0x1   :  { %s14098_s5 = sld [smem:[%s15982_s0]]   ;;  %s14004_s14 = smov 3  }
   0x2   :  { %s14103_s9 = sld [smem:[%s15982_s0 + %s14002_s6]]   ;;  %s14005_s18 = smov 4  }
   0x3   :  { %s14108_s13 = sld [smem:[%s15982_s0 + %s14003_s10]]   ;;  %s14006_s22 = smov 5  }
   0x4   :  { %s14113_s17 = sld [smem:[%s15982_s0 + %s14004_s14]]   ;;  %s14007_s26 = smov 6  }
   0x5   :  { %s14118_s21 = sld [smem:[%s15982_s0 + %s14005_s18]]   ;;  %s14008_s30 = smov 7  }
   0x6   :  { %s14123_s25 = sld [smem:[%s15982_s0 + %s14006_s22]]   ;;  %s14009_s4 = smov 8  }
   0x7   :  { %s14128_s29 = sld [smem:[%s15982_s0 + %s14007_s26]]   ;;  %s14010_s10 = smov 9  }
   0x8   :  { %16044 = sst [smem:[#allocation73_spill]] %s14103_s9  ;;  %s14011_s15 = smov 10  }
   0x9   :  { %16045 = sst [smem:[#allocation74_spill]] %s14108_s13  ;;  %s14012_s20 = smov 11  }
   0xa   :  { %16046 = sst [smem:[#allocation75_spill]] %s14113_s17  ;;  %s14013_s26 = smov 12  }
   0xb   :  { %16047 = sst [smem:[#allocation76_spill]] %s14118_s21  ;;  %s14014_s1 = smov 13  }
   0xc   :  { %16048 = sst [smem:[#allocation77_spill]] %s14123_s25  ;;  %s14015_s7 = smov 14  }
   0xd   :  { %16049 = sst [smem:[#allocation78_spill]] %s14128_s29  ;;  %s14017_s22 = smov 16  }
   0xe   :  { %s14133_s3 = sld [smem:[%s15982_s0 + %s14008_s30]]   ;;  %s14018_s28 = smov 17  }
   0xf   :  { %s14138_s8 = sld [smem:[%s15982_s0 + %s14009_s4]]  }
  0x10   :  { %s14143_s14 = sld [smem:[%s15982_s0 + %s14010_s10]]  }
  0x11   :  { %s14148_s19 = sld [smem:[%s15982_s0 + %s14011_s15]]   ;;  %s14016_s15 = smov 15  }
  0x12   :  { %s14153_s24 = sld [smem:[%s15982_s0 + %s14012_s20]]  }
  0x13   :  { %s14158_s30 = sld [smem:[%s15982_s0 + %s14013_s26]]  }
  0x14   :  { %16050 = sst [smem:[#allocation79_spill]] %s14133_s3 }
  0x15   :  { %16051 = sst [smem:[#allocation80_spill]] %s14138_s8 }
  0x16   :  { %16052 = sst [smem:[#allocation81_spill]] %s14143_s14 }
  0x17   :  { %16053 = sst [smem:[#allocation82_spill]] %s14148_s19 }
  0x18   :  { %16054 = sst [smem:[#allocation83_spill]] %s14153_s24 }
  0x19   :  { %16055 = sst [smem:[#allocation84_spill]] %s14158_s30 }
  0x1a   :  { %s14163_s6 = sld [smem:[%s15982_s0 + %s14014_s1]]  }
  0x1b   :  { %s14168_s12 = sld [smem:[%s15982_s0 + %s14015_s7]]   ;;  %s14019_s7 = smov 18  }
  0x1c   :  { %s14173_s20 = sld [smem:[%s15982_s0 + %s14016_s15]]   ;;  %s14020_s15 = smov 19  }
  0x1d   :  { %s14178_s27 = sld [smem:[%s15982_s0 + %s14017_s22]]   ;;  %s14021_s22 = smov 20  }
  0x1e   :  { %s14183_s4 = sld [smem:[%s15982_s0 + %s14018_s28]]   ;;  %s14022_s28 = smov 21  }
  0x1f   :  { %s14193_s30 = sld [smem:[%s15982_s0 + %s14020_s15]]   ;;  %s14024_s15 = smov 23  }
  0x20   :  { %16056 = sst [smem:[#allocation85_spill]] %s14163_s6 }
  0x21   :  { %16057 = sst [smem:[#allocation86_spill]] %s14168_s12 }
  0x22   :  { %16058 = sst [smem:[#allocation87_spill]] %s14173_s20 }
  0x23   :  { %16059 = sst [smem:[#allocation88_spill]] %s14178_s27 }
  0x24   :  { %16060 = sst [smem:[#allocation89_spill]] %s14183_s4 }
  0x25   :  { %s14188_s12 = sld [smem:[%s15982_s0 + %s14019_s7]]   ;;  %s14023_s7 = smov 22  }
  0x26   :  { %16062 = sst [smem:[#allocation91_spill]] %s14193_s30 }
  0x27   :  { %s14198_s25 = sld [smem:[%s15982_s0 + %s14021_s22]]   ;;  %s14025_s22 = smov 24  }
  0x28   :  { %s14203_s9 = sld [smem:[%s15982_s0 + %s14022_s28]]   ;;  %s14026_s28 = smov 25  }
  0x29   :  { %s14208_s17 = sld [smem:[%s15982_s0 + %s14023_s7]]   ;;  %s14027_s7 = smov 26  }
  0x2a   :  { %s14213_s13 = sld [smem:[%s15982_s0 + %s14024_s15]]   ;;  %s14028_s15 = smov 27  }
  0x2b   :  { %16061 = sst [smem:[#allocation90_spill]] %s14188_s12 }
  0x2c   :  { %s14218_s30 = sld [smem:[%s15982_s0 + %s14025_s22]]   ;;  %s14029_s22 = smov 28  }
  0x2d   :  { %16063 = sst [smem:[#allocation92_spill]] %s14198_s25 }
  0x2e   :  { %16064 = sst [smem:[#allocation93_spill]] %s14203_s9 }
  0x2f   :  { %16065 = sst [smem:[#allocation94_spill]] %s14208_s17 }
  0x30   :  { %16066 = sst [smem:[#allocation95_spill]] %s14213_s13 }
  0x31   :  { %s14223_s9 = sld [smem:[%s15982_s0 + %s14026_s28]]   ;;  %s14030_s28 = smov 29  }
  0x32   :  { %16067 = sst [smem:[#allocation96_spill]] %s14218_s30 }
  0x33   :  { %s14228_s17 = sld [smem:[%s15982_s0 + %s14027_s7]]   ;;  %s14031_s7 = smov 30  }
  0x34   :  { %s14233_s4 = sld [smem:[%s15982_s0 + %s14028_s15]]   ;;  %s14032_s15 = smov 31  }
  0x35   :  { %s14238_s30 = sld [smem:[%s15982_s0 + %s14029_s22]]   ;;  %s14033_s22 = smov 32  }
  0x36   :  { %s14243_s20 = sld [smem:[%s15982_s0 + %s14030_s28]]   ;;  %s14034_s28 = smov 33  }
  0x37   :  { %16068 = sst [smem:[#allocation97_spill]] %s14223_s9 }
  0x38   :  { %s14263_s24 = sld [smem:[%s15982_s0 + %s14034_s28]]   ;;  %s14038_s28 = smov 37  }
  0x39   :  { %16069 = sst [smem:[#allocation98_spill]] %s14228_s17 }
  0x3a   :  { %16070 = sst [smem:[#allocation99_spill]] %s14233_s4 }
  0x3b   :  { %16071 = sst [smem:[#allocation100_spill]] %s14238_s30 }
  0x3c   :  { %16072 = sst [smem:[#allocation101_spill]] %s14243_s20 }
  0x3d   :  { %s14248_s17 = sld [smem:[%s15982_s0 + %s14031_s7]]   ;;  %s14035_s7 = smov 34  }
  0x3e   :  { %s14253_s4 = sld [smem:[%s15982_s0 + %s14032_s15]]   ;;  %s14036_s15 = smov 35  }
  0x3f   :  { %s14258_s30 = sld [smem:[%s15982_s0 + %s14033_s22]]   ;;  %s14037_s22 = smov 36  }
  0x40   :  { %16075 = sst [smem:[#allocation104_spill]] %s14263_s24  ;;  %s14042_s24 = smov 41  }
  0x41   :  { %s14268_s16 = sld [smem:[%s15982_s0 + %s14035_s7]]   ;;  %s14039_s7 = smov 38  }
  0x42   :  { %s14273_s23 = sld [smem:[%s15982_s0 + %s14036_s15]]  }
  0x43   :  { %16073 = sst [smem:[#allocation102_spill]] %s14248_s17  ;;  %s14040_s17 = smov 39  }
  0x44   :  { %16074 = sst [smem:[#allocation103_spill]] %s14253_s4  ;;  %s14041_s4 = smov 40  }
  0x45   :  { %s14278_s1 = sld [smem:[%s15982_s0 + %s14037_s22]]  }
  0x46   :  { %s14283_s10 = sld [smem:[%s15982_s0 + %s14038_s28]]  }
  0x47   :  { %16076 = sst [smem:[#allocation105_spill]] %s14268_s16 }
  0x48   :  { %16077 = sst [smem:[#allocation106_spill]] %s14273_s23 }
  0x49   :  { %s14288_s3 = sld [smem:[%s15982_s0 + %s14039_s7]]  }
  0x4a   :  { %s14293_s23 = sld [smem:[%s15982_s0 + %s14040_s17]]  }
  0x4b   :  { %16078 = sst [smem:[#allocation107_spill]] %s14278_s1 }
  0x4c   :  { %16079 = sst [smem:[#allocation108_spill]] %s14283_s10 }
  0x4d   :  { %s14298_s1 = sld [smem:[%s15982_s0 + %s14041_s4]]  }
  0x4e   :  { %s14303_s10 = sld [smem:[%s15982_s0 + %s14042_s24]]  }
  0x4f   :  { %88 = sst [smem:[#allocation9]] %s14098_s5 }
  0x50   :  { %16080 = sst [smem:[#allocation109_spill]] %s14293_s23 }
  0x54   :  { %16081 = sst [smem:[#allocation110_spill]] %s14303_s10 }
  0x55   :  { %89 = vsyncpa [#allocation11], 0 }
  0x56   :  { %91 = vsyncpa [#allocation11 + $0x1], 0 }
  0x57   :  { %92 = vsyncpa [#allocation14], 0 }
  0x58   :  { %94 = vsyncpa [#allocation14 + $0x1], 0 }
  0x59   :  { %95 = vsyncpa [#allocation17], 0 }
  0x5a   :  { %96 = vsyncpa [#allocation20], 0 }
  0x5b   :  { %97 = vsyncpa [#allocation23], 0 }
  0x5c   :  { %98 = vsyncpa [#allocation26], 0 }
  0x5d   :  { %99 = vsyncpa [#allocation29], 0 }
  0x5e   :  { %100 = vsyncpa [#allocation32], 0 }
  0x5f   :  { %101 = vsyncpa [#allocation35], 0 }
  0x60   :  { %102 = vsyncpa [#allocation38], 0 }
  0x61   :  { %103 = vsyncpa [#allocation41], 0 }
  0x62   :  { %104 = vsyncpa [#allocation44], 0 }
  0x63   :  { %105 = vsyncpa [#allocation47], 0 }
  0x64   :  { %106 = vsyncpa [#allocation50], 0 }
  0x65   :  { %107 = vsyncpa [#allocation53], 0 }
  0x66   :  { %108 = vsyncpa [#allocation12], 0 }
  0x67   :  { %110 = vsyncpa [#allocation12 + $0x1], 0  ;;  %s14306_s0 = smov 0   ;;  %s14308_s5 = smov 0  }
  0x68   :  { %s14310_s14 = smov 0   ;;  %s14312_s7 = smov 0  }
  0x69 LB: > { %s16082_s27 = sld [smem:[#allocation88_spill]]  ;;  %s16083_s25 = sld [smem:[#allocation92_spill]]  ;;  %s13988_s0 = sphi %s14306_s0, %s16179_s0   ;;  %s14000_s7 = sphi %s14312_s7, %s16182_s7   ;;  %s13996_s14 = sphi %s14310_s14, %s16181_s14   ;;  %s13992_s5 = sphi %s14308_s5, %s16180_s5  }
  0x6a   : > { %s16084_s23 = sld [smem:[#allocation109_spill]]  ;;  %s16086_s19 = sld [smem:[#allocation82_spill]] }
  0x6b   : > { %s16085_s20 = sld [smem:[#allocation101_spill]]  ;;  %s16087_s16 = sld [smem:[#allocation105_spill]] }
  0x6c   : > { %s16088_s13 = sld [smem:[#allocation95_spill]]  ;;  %s16089_s12 = sld [smem:[#allocation90_spill]] }
  0x6d   : > { %s16090_s9 = sld [smem:[#allocation97_spill]]  ;;  %s16091_s8 = sld [smem:[#allocation80_spill]] }
  0x6e   : > { %s16092_s6 = sld [smem:[#allocation85_spill]]  ;;  %s16093_s29 = sld [smem:[#allocation78_spill]] }
  0x6f   : > { %s16094_s21 = sld [smem:[#allocation76_spill]]  ;;  %s14043_s11 = smov [#allocation15]  }
  0x70   : > { %s1015_s17 = sshll.u32 %s14043_s11, 4  ;;  %s14327_s15 = sadd.s32 4294967295, %s14000_s7   ;;  %s1016_s17 = int_to_ptr.vmem [resolvable:$true] %s1015_s17 }
  0x71   : > { %p10344_p0 = scmp.ge.s32.totalorder %s14000_s7, 1  ;;  %p16005_p1 = scmp.eq.s32.totalorder %s14327_s15, 0 }
  0x72   : > { %p1002_p2 = scmp.lt.s32.totalorder %s14000_s7, 4  ;;  %s14044_s4 = smov [#allocation16]  }
  0x73   : > { %s1029_s22 = sshll.u32 %s14044_s4, 4  ;;  %s14045_s26 = smov [#allocation19]   ;;  %s14339_s22 = int_to_ptr.vmem [resolvable:$true] %s1029_s22 }
  0x74   : > { %p14333_p4 = pnand %p10344_p0, %p1002_p2  ;;  %s1050_s24 = sshll.u32 %s14045_s26, 4  ;;  %s14347_s24 = int_to_ptr.vmem [resolvable:$true] %s1050_s24 }
  0x75   : > { %s13058_s2 = scalar_lea.hbm %s16094_s21, 32 }
  0x76   : > { %s16095_s18 = scalar_select %p14333_p4, 1, 0 }
  0x77   : > { %p11912_p5 = pneg %p14333_p4  ;;  %p13059_p7 = scmp.ne.s32.totalorder %s16094_s21, %s13058_s2 }
  0x78   : > { %p13065_p11 = scmp.lt.u32.totalorder %s13058_s2, %s16094_s21 }
  0x79   : > { %p14343_p6 = pnand %p11912_p5, %p16005_p1 }
  0x7b   : > { %p14353_p8 = pneg %p14343_p6 }
  0x7d   : > { %p13061_p9 = pnand %p14353_p8, %p13059_p7 }
  0x7f   : > { %p13062_p10 = pneg %p13061_p9 }
  0x81   : > { %p13067_p12 = pnand %p13065_p11, %p13062_p10 }
  0x83   : > { %13070 = shalt.err (!%p13067_p12)
}
  0x84   : > { %s13071_s4 = scalar_lea.vmem %s1016_s17, 32  ;;  %p13079_p5 = scmp.lt.s32.totalorder %s1016_s17, %s1016_s17 }
  0x85   : > { %p13072_p13 = scmp.ne.s32.totalorder %s1016_s17, %s13071_s4  ;;  %p13080_p3 = scmp.lt.s32.totalorder %s13071_s4, %s13071_s4 }
  0x87   : > { %p13074_p0 = pnand %p13072_p13, %p14353_p8  ;;  %p13081_p1 = por %p13080_p3, %p13079_p5 }
  0x89   : > { %p13075_p2 = pneg %p13074_p0 }
  0x8b   : > { %p13082_p4 = pnand %p13081_p1, %p13075_p2 }
  0x8d   : > { %13085 = shalt.err (!%p13082_p4)
}
  0x8e   : > { %11915 = dma.hbm_to_vmem [thread:$0]  (!%p14343_p6), %s16094_s21, 32, %s1016_s17, [#allocation14]  }
  0x8f   : > { %s13086_s26 = scalar_lea.hbm %s16093_s29, 64 }
  0x90   : > { %p13087_p7 = scmp.ne.s32.totalorder %s16093_s29, %s13086_s26  ;;  %p13093_p11 = scmp.lt.u32.totalorder %s13086_s26, %s16093_s29 }
  0x92   : > { %p13089_p9 = pnand %p13087_p7, %p14353_p8 }
  0x94   : > { %p13090_p10 = pneg %p13089_p9 }
  0x96   : > { %p13095_p12 = pnand %p13093_p11, %p13090_p10 }
  0x98   : > { %13098 = shalt.err (!%p13095_p12)
}
  0x99   : > { %s13099_s2 = scalar_lea.vmem %s14339_s22, 64  ;;  %p13107_p13 = scmp.lt.s32.totalorder %s14339_s22, %s14339_s22 }
  0x9a   : > { %p13100_p1 = scmp.ne.s32.totalorder %s14339_s22, %s13099_s2  ;;  %p13108_p0 = scmp.lt.s32.totalorder %s13099_s2, %s13099_s2 }
  0x9c   : > { %p13102_p3 = pnand %p13100_p1, %p14353_p8  ;;  %p13109_p2 = por %p13108_p0, %p13107_p13 }
  0x9e   : > { %p13103_p4 = pneg %p13102_p3 }
  0xa0   : > { %p13110_p5 = pnand %p13109_p2, %p13103_p4 }
  0xa2   : > { %13113 = shalt.err (!%p13110_p5)
}
  0xa3   : > { %11918 = dma.hbm_to_vmem [thread:$0]  (!%p14343_p6), %s16093_s29, 64, %s14339_s22, [#allocation17]  }
  0xa4   : > { %s13114_s17 = scalar_lea.hbm %s16091_s8, 3072 }
  0xa5   : > { %p13115_p7 = scmp.ne.s32.totalorder %s16091_s8, %s13114_s17  ;;  %p13121_p11 = scmp.lt.u32.totalorder %s13114_s17, %s16091_s8 }
  0xa7   : > { %p13117_p9 = pnand %p13115_p7, %p14353_p8 }
  0xa9   : > { %p13118_p10 = pneg %p13117_p9 }
  0xab   : > { %p13123_p12 = pnand %p13121_p11, %p13118_p10 }
  0xad   : > { %13126 = shalt.err (!%p13123_p12)
}
  0xae   : > { %s13127_s4 = scalar_lea.vmem %s14347_s24, 3072  ;;  %p13135_p13 = scmp.lt.s32.totalorder %s14347_s24, %s14347_s24 }
  0xaf   : > { %p13128_p1 = scmp.ne.s32.totalorder %s14347_s24, %s13127_s4  ;;  %p13136_p0 = scmp.lt.s32.totalorder %s13127_s4, %s13127_s4 }
  0xb1   : > { %p13130_p3 = pnand %p13128_p1, %p14353_p8  ;;  %p13137_p2 = por %p13136_p0, %p13135_p13 }
  0xb3   : > { %p13131_p4 = pneg %p13130_p3 }
  0xb5   : > { %p13138_p5 = pnand %p13137_p2, %p13131_p4 }
  0xb7   : > { %13141 = shalt.err (!%p13138_p5)
}
  0xb8   : > { %s16010_s22 = smov 64   ;;  %s16012_s26 = smov 4  }
  0xb9   : > { %11924 = dma.hbm_to_vmem [thread:$0]  (!%p14343_p6), %s16091_s8, 3072, %s14347_s24, [#allocation20], %s16010_s22, %s16010_s22, %s16012_s26  }
  0xba   : > { %s14048_s2 = smov [#allocation22]   ;;  %s14049_s4 = smov [#allocation25]  }
  0xbb   : > { %s1077_s17 = sshll.u32 %s14048_s2, 4  ;;  %s1104_s21 = sshll.u32 %s14049_s4, 4  ;;  %s1078_s17 = int_to_ptr.vmem [resolvable:$true] %s1077_s17  ;;  %s1105_s21 = int_to_ptr.vmem [resolvable:$true] %s1104_s21 }
  0xbc   : > { %s13142_s29 = scalar_lea.hbm %s16086_s19, 16 }
  0xbd   : > { %p13143_p7 = scmp.ne.s32.totalorder %s16086_s19, %s13142_s29  ;;  %p13149_p11 = scmp.lt.u32.totalorder %s13142_s29, %s16086_s19 }
  0xbf   : > { %p13145_p9 = pnand %p13143_p7, %p14353_p8 }
  0xc1   : > { %p13146_p10 = pneg %p13145_p9 }
  0xc3   : > { %p13151_p12 = pnand %p13149_p11, %p13146_p10 }
  0xc5   : > { %13154 = shalt.err (!%p13151_p12)
}
  0xc6   : > { %s13155_s10 = scalar_lea.vmem %s1078_s17, 16  ;;  %s13162_s24 = scalar_lea.vmem %s1078_s17, 32 }
  0xc7   : > { %p13156_p1 = scmp.ne.s32.totalorder %s1078_s17, %s13155_s10  ;;  %p13163_p13 = scmp.lt.s32.totalorder %s1078_s17, %s1078_s17 }
  0xc8   : > { %p13164_p0 = scmp.lt.s32.totalorder %s13162_s24, %s13155_s10 }
  0xc9   : > { %p13158_p3 = pnand %p13156_p1, %p14353_p8 }
  0xca   : > { %p13165_p2 = por %p13164_p0, %p13163_p13 }
  0xcb   : > { %p13159_p4 = pneg %p13158_p3 }
  0xcd   : > { %p13166_p5 = pnand %p13165_p2, %p13159_p4 }
  0xcf   : > { %13169 = shalt.err (!%p13166_p5)
}
  0xd0   : > { %11930 = dma.hbm_to_vmem [thread:$0]  (!%p14343_p6), %s16086_s19, 16, %s1078_s17, [#allocation23]  }
  0xd1   : > { %s13170_s29 = scalar_lea.hbm %s16092_s6, 16 }
  0xd2   : > { %p13171_p7 = scmp.ne.s32.totalorder %s16092_s6, %s13170_s29  ;;  %p13177_p11 = scmp.lt.u32.totalorder %s13170_s29, %s16092_s6 }
  0xd4   : > { %p13173_p9 = pnand %p13171_p7, %p14353_p8 }
  0xd6   : > { %p13174_p10 = pneg %p13173_p9 }
  0xd8   : > { %p13179_p12 = pnand %p13177_p11, %p13174_p10 }
  0xda   : > { %13182 = shalt.err (!%p13179_p12)
}
  0xdb   : > { %s13183_s10 = scalar_lea.vmem %s1105_s21, 16  ;;  %s13190_s2 = scalar_lea.vmem %s1105_s21, 32 }
  0xdc   : > { %p13184_p1 = scmp.ne.s32.totalorder %s1105_s21, %s13183_s10  ;;  %p13191_p13 = scmp.lt.s32.totalorder %s1105_s21, %s1105_s21 }
  0xdd   : > { %p13192_p0 = scmp.lt.s32.totalorder %s13190_s2, %s13183_s10 }
  0xde   : > { %p13186_p3 = pnand %p13184_p1, %p14353_p8 }
  0xdf   : > { %p13193_p2 = por %p13192_p0, %p13191_p13 }
  0xe0   : > { %p13187_p4 = pneg %p13186_p3 }
  0xe2   : > { %p13194_p5 = pnand %p13193_p2, %p13187_p4 }
  0xe4   : > { %13197 = shalt.err (!%p13194_p5)
}
  0xe5   : > { %11936 = dma.hbm_to_vmem [thread:$0]  (!%p14343_p6), %s16092_s6, 16, %s1105_s21, [#allocation26]  }
  0xe6   : > { %s14050_s17 = smov [#allocation28]   ;;  %s14051_s24 = smov [#allocation31]  }
  0xe7   : > { %s1128_s4 = sshll.u32 %s14050_s17, 4  ;;  %s1152_s29 = sshll.u32 %s14051_s24, 4  ;;  %s1129_s4 = int_to_ptr.vmem [resolvable:$true] %s1128_s4  ;;  %s1153_s29 = int_to_ptr.vmem [resolvable:$true] %s1152_s29 }
  0xe8   : > { %s13198_s22 = scalar_lea.hbm %s16082_s27, 1024 }
  0xe9   : > { %p13199_p7 = scmp.ne.s32.totalorder %s16082_s27, %s13198_s22  ;;  %p13205_p11 = scmp.lt.u32.totalorder %s13198_s22, %s16082_s27 }
  0xeb   : > { %p13201_p9 = pnand %p13199_p7, %p14353_p8 }
  0xed   : > { %p13202_p10 = pneg %p13201_p9 }
  0xef   : > { %p13207_p12 = pnand %p13205_p11, %p13202_p10 }
  0xf1   : > { %13210 = shalt.err (!%p13207_p12)
}
  0xf2   : > { %s13211_s10 = scalar_lea.vmem %s1129_s4, 1024  ;;  %p13219_p13 = scmp.lt.s32.totalorder %s1129_s4, %s1129_s4 }
  0xf3   : > { %p13212_p1 = scmp.ne.s32.totalorder %s1129_s4, %s13211_s10  ;;  %p13220_p0 = scmp.lt.s32.totalorder %s13211_s10, %s13211_s10 }
  0xf5   : > { %p13214_p3 = pnand %p13212_p1, %p14353_p8  ;;  %p13221_p2 = por %p13220_p0, %p13219_p13 }
  0xf7   : > { %p13215_p4 = pneg %p13214_p3 }
  0xf9   : > { %p13222_p5 = pnand %p13221_p2, %p13215_p4 }
  0xfb   : > { %13225 = shalt.err (!%p13222_p5)
}
  0xfc   : > { %s16098_s21 = smov 64   ;;  %s13226_s22 = scalar_lea.hbm %s16089_s12, 2048 }
  0xfd   : > { %11942 = dma.hbm_to_vmem [thread:$0]  (!%p14343_p6), %s16082_s27, 1024, %s1129_s4, [#allocation29], %s16098_s21, %s16098_s21, %s16012_s26  }
  0xfe   : > { %p13227_p7 = scmp.ne.s32.totalorder %s16089_s12, %s13226_s22  ;;  %p13233_p11 = scmp.lt.u32.totalorder %s13226_s22, %s16089_s12 }
 0x100   : > { %p13229_p9 = pnand %p13227_p7, %p14353_p8 }
 0x102   : > { %p13230_p10 = pneg %p13229_p9 }
 0x104   : > { %p13235_p12 = pnand %p13233_p11, %p13230_p10 }
 0x106   : > { %13238 = shalt.err (!%p13235_p12)
}
 0x107   : > { %s13239_s2 = scalar_lea.vmem %s1153_s29, 2048  ;;  %p13247_p13 = scmp.lt.s32.totalorder %s1153_s29, %s1153_s29 }
 0x108   : > { %p13240_p1 = scmp.ne.s32.totalorder %s1153_s29, %s13239_s2  ;;  %p13248_p0 = scmp.lt.s32.totalorder %s13239_s2, %s13239_s2 }
 0x10a   : > { %p13242_p3 = pnand %p13240_p1, %p14353_p8  ;;  %p13249_p2 = por %p13248_p0, %p13247_p13 }
 0x10c   : > { %p13243_p4 = pneg %p13242_p3 }
 0x10e   : > { %p13250_p5 = pnand %p13249_p2, %p13243_p4 }
 0x110   : > { %13253 = shalt.err (!%p13250_p5)
}
 0x111   : > { %s14052_s17 = smov 512   ;;  %s14053_s4 = smov 32  }
 0x112   : > { %11948 = dma.hbm_to_vmem [thread:$0]  (!%p14343_p6), %s16089_s12, 2048, %s1153_s29, [#allocation32], %s14052_s17, %s14052_s17, %s14053_s4  }
 0x113   : > { %s14054_s24 = smov [#allocation34]   ;;  %s13254_s22 = scalar_lea.hbm %s16083_s25, 12288 }
 0x114   : > { %s1176_s10 = sshll.u32 %s14054_s24, 4  ;;  %p13255_p7 = scmp.ne.s32.totalorder %s16083_s25, %s13254_s22  ;;  %s1177_s10 = int_to_ptr.vmem [resolvable:$true] %s1176_s10 }
 0x115   : > { %p13261_p11 = scmp.lt.u32.totalorder %s13254_s22, %s16083_s25 }
 0x116   : > { %p13257_p9 = pnand %p13255_p7, %p14353_p8 }
 0x118   : > { %p13258_p10 = pneg %p13257_p9 }
 0x11a   : > { %p13263_p12 = pnand %p13261_p11, %p13258_p10 }
 0x11c   : > { %13266 = shalt.err (!%p13263_p12)
}
 0x11d   : > { %s13267_s2 = scalar_lea.vmem %s1177_s10, 12288  ;;  %p13275_p13 = scmp.lt.s32.totalorder %s1177_s10, %s1177_s10 }
 0x11e   : > { %p13268_p1 = scmp.ne.s32.totalorder %s1177_s10, %s13267_s2  ;;  %p13276_p0 = scmp.lt.s32.totalorder %s13267_s2, %s13267_s2 }
 0x120   : > { %p13270_p3 = pnand %p13268_p1, %p14353_p8  ;;  %p13277_p2 = por %p13276_p0, %p13275_p13 }
 0x122   : > { %p13271_p4 = pneg %p13270_p3 }
 0x124   : > { %p13278_p5 = pnand %p13277_p2, %p13271_p4 }
 0x126   : > { %13281 = shalt.err (!%p13278_p5)
}
 0x127   : > { %s16015_s29 = smov 128   ;;  %s16017_s17 = smov 8  }
 0x128   : > { %11954 = dma.hbm_to_vmem [thread:$0]  (!%p14343_p6), %s16083_s25, 12288, %s1177_s10, [#allocation35], %s16015_s29, %s16015_s29, %s16017_s17  }
 0x129   : > { %s14057_s4 = smov [#allocation37]   ;;  %s14058_s22 = smov [#allocation40]  }
 0x12a   : > { %s1203_s24 = sshll.u32 %s14057_s4, 4  ;;  %s1230_s2 = sshll.u32 %s14058_s22, 4  ;;  %s1204_s24 = int_to_ptr.vmem [resolvable:$true] %s1203_s24  ;;  %s14454_s2 = int_to_ptr.vmem [resolvable:$true] %s1230_s2 }
 0x12b   : > { %s13282_s26 = scalar_lea.hbm %s16088_s13, 12288 }
 0x12c   : > { %p13283_p7 = scmp.ne.s32.totalorder %s16088_s13, %s13282_s26  ;;  %p13289_p11 = scmp.lt.u32.totalorder %s13282_s26, %s16088_s13 }
 0x12e   : > { %p13285_p9 = pnand %p13283_p7, %p14353_p8 }
 0x130   : > { %p13286_p10 = pneg %p13285_p9 }
 0x132   : > { %p13291_p12 = pnand %p13289_p11, %p13286_p10 }
 0x134   : > { %13294 = shalt.err (!%p13291_p12)
}
 0x135   : > { %s13295_s6 = scalar_lea.vmem %s1204_s24, 12288  ;;  %p13303_p13 = scmp.lt.s32.totalorder %s1204_s24, %s1204_s24 }
 0x136   : > { %p13296_p1 = scmp.ne.s32.totalorder %s1204_s24, %s13295_s6  ;;  %p13304_p0 = scmp.lt.s32.totalorder %s13295_s6, %s13295_s6 }
 0x138   : > { %p13298_p3 = pnand %p13296_p1, %p14353_p8  ;;  %p13305_p2 = por %p13304_p0, %p13303_p13 }
 0x13a   : > { %p13299_p4 = pneg %p13298_p3 }
 0x13c   : > { %p13306_p5 = pnand %p13305_p2, %p13299_p4 }
 0x13e   : > { %13309 = shalt.err (!%p13306_p5)
}
 0x13f   : > { %11960 = dma.hbm_to_vmem [thread:$0]  (!%p14343_p6), %s16088_s13, 12288, %s1204_s24, [#allocation38], %s16015_s29, %s16015_s29, %s16017_s17  }
 0x140   : > { %s13310_s26 = scalar_lea.hbm %s16090_s9, 32 }
 0x141   : > { %p13311_p7 = scmp.ne.s32.totalorder %s16090_s9, %s13310_s26  ;;  %p13317_p11 = scmp.lt.u32.totalorder %s13310_s26, %s16090_s9 }
 0x143   : > { %p13313_p9 = pnand %p13311_p7, %p14353_p8 }
 0x145   : > { %p13314_p10 = pneg %p13313_p9 }
 0x147   : > { %p13319_p12 = pnand %p13317_p11, %p13314_p10 }
 0x149   : > { %13322 = shalt.err (!%p13319_p12)
}
 0x14a   : > { %s13323_s6 = scalar_lea.vmem %s14454_s2, 32  ;;  %p13331_p13 = scmp.lt.s32.totalorder %s14454_s2, %s14454_s2 }
 0x14b   : > { %p13324_p1 = scmp.ne.s32.totalorder %s14454_s2, %s13323_s6  ;;  %p13332_p0 = scmp.lt.s32.totalorder %s13323_s6, %s13323_s6 }
 0x14d   : > { %p13326_p3 = pnand %p13324_p1, %p14353_p8  ;;  %p13333_p2 = por %p13332_p0, %p13331_p13 }
 0x14f   : > { %p13327_p4 = pneg %p13326_p3 }
 0x151   : > { %p13334_p5 = pnand %p13333_p2, %p13327_p4 }
 0x153   : > { %13337 = shalt.err (!%p13334_p5)
}
 0x154   : > { %11966 = dma.hbm_to_vmem [thread:$0]  (!%p14343_p6), %s16090_s9, 32, %s14454_s2, [#allocation41]  }
 0x155   : > { %s14059_s10 = smov [#allocation43]   ;;  %s14060_s24 = smov [#allocation46]  }
 0x156   : > { %s1257_s4 = sshll.u32 %s14059_s10, 4  ;;  %s1284_s22 = sshll.u32 %s14060_s24, 4  ;;  %s1258_s4 = int_to_ptr.vmem [resolvable:$true] %s1257_s4  ;;  %s14484_s22 = int_to_ptr.vmem [resolvable:$true] %s1284_s22 }
 0x157   : > { %s13338_s26 = scalar_lea.hbm %s16085_s20, 12288 }
 0x158   : > { %p13339_p7 = scmp.ne.s32.totalorder %s16085_s20, %s13338_s26  ;;  %p13345_p11 = scmp.lt.u32.totalorder %s13338_s26, %s16085_s20 }
 0x15a   : > { %p13341_p9 = pnand %p13339_p7, %p14353_p8 }
 0x15c   : > { %p13342_p10 = pneg %p13341_p9 }
 0x15e   : > { %p13347_p12 = pnand %p13345_p11, %p13342_p10 }
 0x160   : > { %13350 = shalt.err (!%p13347_p12)
}
 0x161   : > { %s13351_s6 = scalar_lea.vmem %s1258_s4, 12288  ;;  %p13359_p13 = scmp.lt.s32.totalorder %s1258_s4, %s1258_s4 }
 0x162   : > { %p13352_p1 = scmp.ne.s32.totalorder %s1258_s4, %s13351_s6  ;;  %p13360_p0 = scmp.lt.s32.totalorder %s13351_s6, %s13351_s6 }
 0x164   : > { %p13354_p3 = pnand %p13352_p1, %p14353_p8  ;;  %p13361_p2 = por %p13360_p0, %p13359_p13 }
 0x166   : > { %p13355_p4 = pneg %p13354_p3 }
 0x168   : > { %p13362_p5 = pnand %p13361_p2, %p13355_p4 }
 0x16a   : > { %13365 = shalt.err (!%p13362_p5)
}
 0x16b   : > { %11972 = dma.hbm_to_vmem [thread:$0]  (!%p14343_p6), %s16085_s20, 12288, %s1258_s4, [#allocation44], %s16015_s29, %s16015_s29, %s16017_s17  }
 0x16c   : > { %s13366_s2 = scalar_lea.hbm %s14258_s30, 12288 }
 0x16d   : > { %p13367_p7 = scmp.ne.s32.totalorder %s14258_s30, %s13366_s2  ;;  %p13373_p11 = scmp.lt.u32.totalorder %s13366_s2, %s14258_s30 }
 0x16f   : > { %p13369_p9 = pnand %p13367_p7, %p14353_p8 }
 0x171   : > { %p13370_p10 = pneg %p13369_p9 }
 0x173   : > { %p13375_p12 = pnand %p13373_p11, %p13370_p10 }
 0x175   : > { %13378 = shalt.err (!%p13375_p12)
}
 0x176   : > { %s13379_s10 = scalar_lea.vmem %s14484_s22, 12288  ;;  %p13387_p13 = scmp.lt.s32.totalorder %s14484_s22, %s14484_s22 }
 0x177   : > { %p13380_p1 = scmp.ne.s32.totalorder %s14484_s22, %s13379_s10  ;;  %p13388_p0 = scmp.lt.s32.totalorder %s13379_s10, %s13379_s10 }
 0x179   : > { %p13382_p3 = pnand %p13380_p1, %p14353_p8  ;;  %p13389_p2 = por %p13388_p0, %p13387_p13 }
 0x17b   : > { %p13383_p4 = pneg %p13382_p3 }
 0x17d   : > { %p13390_p5 = pnand %p13389_p2, %p13383_p4 }
 0x17f   : > { %13393 = shalt.err (!%p13390_p5)
}
 0x180   : > { %11978 = dma.hbm_to_vmem [thread:$0]  (!%p14343_p6), %s14258_s30, 12288, %s14484_s22, [#allocation47], %s16015_s29, %s16015_s29, %s16017_s17  }
 0x181   : > { %s14061_s4 = smov [#allocation49]   ;;  %s14062_s26 = smov [#allocation52]  }
 0x182   : > { %s1311_s24 = sshll.u32 %s14061_s4, 4  ;;  %s1338_s6 = sshll.u32 %s14062_s26, 4  ;;  %s1312_s24 = int_to_ptr.vmem [resolvable:$true] %s1311_s24  ;;  %s14517_s6 = int_to_ptr.vmem [resolvable:$true] %s1338_s6 }
 0x183   : > { %s13394_s2 = scalar_lea.hbm %s16087_s16, 32 }
 0x184   : > { %p13395_p7 = scmp.ne.s32.totalorder %s16087_s16, %s13394_s2  ;;  %p13401_p11 = scmp.lt.u32.totalorder %s13394_s2, %s16087_s16 }
 0x186   : > { %p13397_p9 = pnand %p13395_p7, %p14353_p8 }
 0x188   : > { %p13398_p10 = pneg %p13397_p9 }
 0x18a   : > { %p13403_p12 = pnand %p13401_p11, %p13398_p10 }
 0x18c   : > { %13406 = shalt.err (!%p13403_p12)
}
 0x18d   : > { %s13407_s10 = scalar_lea.vmem %s1312_s24, 32  ;;  %p13415_p13 = scmp.lt.s32.totalorder %s1312_s24, %s1312_s24 }
 0x18e   : > { %p13408_p1 = scmp.ne.s32.totalorder %s1312_s24, %s13407_s10  ;;  %p13416_p0 = scmp.lt.s32.totalorder %s13407_s10, %s13407_s10 }
 0x190   : > { %p13410_p3 = pnand %p13408_p1, %p14353_p8  ;;  %p13417_p2 = por %p13416_p0, %p13415_p13 }
 0x192   : > { %p13411_p4 = pneg %p13410_p3 }
 0x194   : > { %p13418_p5 = pnand %p13417_p2, %p13411_p4 }
 0x196   : > { %13421 = shalt.err (!%p13418_p5)
}
 0x197   : > { %s16099_s22 = sld [smem:[#allocation108_spill]] }
 0x198   : > { %11984 = dma.hbm_to_vmem [thread:$0]  (!%p14343_p6), %s16087_s16, 32, %s1312_s24, [#allocation50]  }
 0x19d   : > { %s13422_s4 = scalar_lea.hbm %s16099_s22, 32 }
 0x19e   : > { %p13423_p7 = scmp.ne.s32.totalorder %s16099_s22, %s13422_s4  ;;  %p13429_p11 = scmp.lt.u32.totalorder %s13422_s4, %s16099_s22 }
 0x1a0   : > { %p13425_p9 = pnand %p13423_p7, %p14353_p8 }
 0x1a2   : > { %p13426_p10 = pneg %p13425_p9 }
 0x1a4   : > { %p13431_p12 = pnand %p13429_p11, %p13426_p10 }
 0x1a6   : > { %13434 = shalt.err (!%p13431_p12)
}
 0x1a7   : > { %s13435_s26 = scalar_lea.vmem %s14517_s6, 32  ;;  %p13443_p13 = scmp.lt.s32.totalorder %s14517_s6, %s14517_s6 }
 0x1a8   : > { %p13436_p1 = scmp.ne.s32.totalorder %s14517_s6, %s13435_s26  ;;  %p13444_p0 = scmp.lt.s32.totalorder %s13435_s26, %s13435_s26 }
 0x1aa   : > { %p13438_p3 = pnand %p13436_p1, %p14353_p8  ;;  %p13445_p2 = por %p13444_p0, %p13443_p13 }
 0x1ac   : > { %p13439_p4 = pneg %p13438_p3 }
 0x1ae   : > { %p13446_p5 = pnand %p13445_p2, %p13439_p4 }
 0x1b0   : > { %13449 = shalt.err (!%p13446_p5)
}
 0x1b1   : > { %s16100_s24 = sld [smem:[#allocation79_spill]]  ;;  %s14063_s2 = smov [#allocation18]  }
 0x1b2   : > { %11990 = dma.hbm_to_vmem [thread:$0]  (!%p14343_p6), %s16099_s22, 32, %s14517_s6, [#allocation53]  }
 0x1b3   : > { %s1040_s10 = sshll.u32 %s14063_s2, 4  ;;  %s14064_s4 = smov [#allocation21]   ;;  %s1041_s10 = int_to_ptr.vmem [resolvable:$true] %s1040_s10 }
 0x1b4   : > { %s1063_s29 = sshll.u32 %s14064_s4, 4  ;;  %s14544_s29 = int_to_ptr.vmem [resolvable:$true] %s1063_s29 }
 0x1b7   : > { %s13450_s26 = scalar_lea.hbm %s16100_s24, 16 }
 0x1b8   : > { %p13451_p7 = scmp.ne.s32.totalorder %s16100_s24, %s13450_s26  ;;  %p13457_p11 = scmp.lt.u32.totalorder %s13450_s26, %s16100_s24 }
 0x1ba   : > { %p13453_p9 = pnand %p13451_p7, %p14353_p8 }
 0x1bc   : > { %p13454_p10 = pneg %p13453_p9 }
 0x1be   : > { %p13459_p12 = pnand %p13457_p11, %p13454_p10 }
 0x1c0   : > { %13462 = shalt.err (!%p13459_p12)
}
 0x1c1   : > { %s13463_s17 = scalar_lea.vmem %s1041_s10, 16  ;;  %s13470_s6 = scalar_lea.vmem %s1041_s10, 32 }
 0x1c2   : > { %p13464_p1 = scmp.ne.s32.totalorder %s1041_s10, %s13463_s17  ;;  %p13471_p13 = scmp.lt.s32.totalorder %s1041_s10, %s1041_s10 }
 0x1c3   : > { %p13472_p0 = scmp.lt.s32.totalorder %s13470_s6, %s13463_s17 }
 0x1c4   : > { %p13466_p3 = pnand %p13464_p1, %p14353_p8 }
 0x1c5   : > { %p13473_p2 = por %p13472_p0, %p13471_p13 }
 0x1c6   : > { %p13467_p4 = pneg %p13466_p3 }
 0x1c8   : > { %p13474_p5 = pnand %p13473_p2, %p13467_p4 }
 0x1ca   : > { %13477 = shalt.err (!%p13474_p5)
}
 0x1cb   : > { %s16101_s2 = sld [smem:[#allocation81_spill]] }
 0x1cc   : > { %11921 = dma.hbm_to_vmem [thread:$0]  (!%p14343_p6), %s16100_s24, 16, %s1041_s10, [#allocation17]  }
 0x1d1   : > { %s13478_s4 = scalar_lea.hbm %s16101_s2, 576 }
 0x1d2   : > { %p13479_p7 = scmp.ne.s32.totalorder %s16101_s2, %s13478_s4  ;;  %p13485_p11 = scmp.lt.u32.totalorder %s13478_s4, %s16101_s2 }
 0x1d4   : > { %p13481_p9 = pnand %p13479_p7, %p14353_p8 }
 0x1d6   : > { %p13482_p10 = pneg %p13481_p9 }
 0x1d8   : > { %p13487_p12 = pnand %p13485_p11, %p13482_p10 }
 0x1da   : > { %13490 = shalt.err (!%p13487_p12)
}
 0x1db   : > { %s13491_s17 = scalar_lea.vmem %s14544_s29, 576  ;;  %p13499_p13 = scmp.lt.s32.totalorder %s14544_s29, %s14544_s29 }
 0x1dc   : > { %p13492_p1 = scmp.ne.s32.totalorder %s14544_s29, %s13491_s17  ;;  %p13500_p0 = scmp.lt.s32.totalorder %s13491_s17, %s13491_s17 }
 0x1de   : > { %p13494_p3 = pnand %p13492_p1, %p14353_p8  ;;  %p13501_p2 = por %p13500_p0, %p13499_p13 }
 0x1e0   : > { %p13495_p4 = pneg %p13494_p3 }
 0x1e2   : > { %p13502_p5 = pnand %p13501_p2, %p13495_p4 }
 0x1e4   : > { %13505 = shalt.err (!%p13502_p5)
}
 0x1e5   : > { %s16102_s10 = smov 4   ;;  %s16103_s26 = sld [smem:[#allocation83_spill]] }
 0x1e6   : > { %11927 = dma.hbm_to_vmem [thread:$0]  (!%p14343_p6), %s16101_s2, 576, %s14544_s29, [#allocation20], %s16098_s21, %s16098_s21, %s16102_s10  }
 0x1e7   : > { %s14065_s6 = smov [#allocation24]   ;;  %s14066_s8 = smov [#allocation27]  }
 0x1e8   : > { %s1087_s4 = sshll.u32 %s14065_s6, 4  ;;  %s1118_s9 = sshll.u32 %s14066_s8, 4  ;;  %s1088_s4 = int_to_ptr.vmem [resolvable:$true] %s1087_s4  ;;  %s14574_s9 = int_to_ptr.vmem [resolvable:$true] %s1118_s9 }
 0x1eb   : > { %s13506_s17 = scalar_lea.hbm %s16103_s26, 3072 }
 0x1ec   : > { %p13507_p7 = scmp.ne.s32.totalorder %s16103_s26, %s13506_s17  ;;  %p13513_p11 = scmp.lt.u32.totalorder %s13506_s17, %s16103_s26 }
 0x1ee   : > { %p13509_p9 = pnand %p13507_p7, %p14353_p8 }
 0x1f0   : > { %p13510_p10 = pneg %p13509_p9 }
 0x1f2   : > { %p13515_p12 = pnand %p13513_p11, %p13510_p10 }
 0x1f4   : > { %13518 = shalt.err (!%p13515_p12)
}
 0x1f5   : > { %s13519_s12 = scalar_lea.vmem %s1088_s4, 3072  ;;  %p13527_p13 = scmp.lt.s32.totalorder %s1088_s4, %s1088_s4 }
 0x1f6   : > { %p13520_p1 = scmp.ne.s32.totalorder %s1088_s4, %s13519_s12  ;;  %p13528_p0 = scmp.lt.s32.totalorder %s13519_s12, %s13519_s12 }
 0x1f8   : > { %p13522_p3 = pnand %p13520_p1, %p14353_p8  ;;  %p13529_p2 = por %p13528_p0, %p13527_p13 }
 0x1fa   : > { %p13523_p4 = pneg %p13522_p3 }
 0x1fc   : > { %p13530_p5 = pnand %p13529_p2, %p13523_p4 }
 0x1fe   : > { %13533 = shalt.err (!%p13530_p5)
}
 0x1ff   : > { %s16104_s8 = sld [smem:[#allocation87_spill]] }
 0x200   : > { %11933 = dma.hbm_to_vmem [thread:$0]  (!%p14343_p6), %s16103_s26, 3072, %s1088_s4, [#allocation23], %s16098_s21, %s16098_s21, %s16102_s10  }
 0x205   : > { %s13534_s29 = scalar_lea.hbm %s16104_s8, 16 }
 0x206   : > { %p13535_p7 = scmp.ne.s32.totalorder %s16104_s8, %s13534_s29  ;;  %p13541_p11 = scmp.lt.u32.totalorder %s13534_s29, %s16104_s8 }
 0x208   : > { %p13537_p9 = pnand %p13535_p7, %p14353_p8 }
 0x20a   : > { %p13538_p10 = pneg %p13537_p9 }
 0x20c   : > { %p13543_p12 = pnand %p13541_p11, %p13538_p10 }
 0x20e   : > { %13546 = shalt.err (!%p13543_p12)
}
 0x20f   : > { %s13547_s12 = scalar_lea.vmem %s14574_s9, 16  ;;  %s13554_s6 = scalar_lea.vmem %s14574_s9, 32 }
 0x210   : > { %p13548_p1 = scmp.ne.s32.totalorder %s14574_s9, %s13547_s12  ;;  %p13555_p13 = scmp.lt.s32.totalorder %s14574_s9, %s14574_s9 }
 0x211   : > { %p13556_p0 = scmp.lt.s32.totalorder %s13554_s6, %s13547_s12 }
 0x212   : > { %p13550_p3 = pnand %p13548_p1, %p14353_p8 }
 0x213   : > { %p13557_p2 = por %p13556_p0, %p13555_p13 }
 0x214   : > { %p13551_p4 = pneg %p13550_p3 }
 0x216   : > { %p13558_p5 = pnand %p13557_p2, %p13551_p4 }
 0x218   : > { %13561 = shalt.err (!%p13558_p5)
}
 0x219   : > { %s16105_s4 = sld [smem:[#allocation89_spill]]  ;;  %s14067_s17 = smov [#allocation30]  }
 0x21a   : > { %11939 = dma.hbm_to_vmem [thread:$0]  (!%p14343_p6), %s16104_s8, 16, %s14574_s9, [#allocation26]  }
 0x21b   : > { %s1142_s29 = sshll.u32 %s14067_s17, 4  ;;  %s14068_s2 = smov [#allocation33]   ;;  %s1143_s29 = int_to_ptr.vmem [resolvable:$true] %s1142_s29 }
 0x21c   : > { %s1166_s13 = sshll.u32 %s14068_s2, 4  ;;  %s14605_s13 = int_to_ptr.vmem [resolvable:$true] %s1166_s13 }
 0x21f   : > { %s13562_s12 = scalar_lea.hbm %s16105_s4, 16 }
 0x220   : > { %p13563_p7 = scmp.ne.s32.totalorder %s16105_s4, %s13562_s12  ;;  %p13569_p11 = scmp.lt.u32.totalorder %s13562_s12, %s16105_s4 }
 0x222   : > { %p13565_p9 = pnand %p13563_p7, %p14353_p8 }
 0x224   : > { %p13566_p10 = pneg %p13565_p9 }
 0x226   : > { %p13571_p12 = pnand %p13569_p11, %p13566_p10 }
 0x228   : > { %13574 = shalt.err (!%p13571_p12)
}
 0x229   : > { %s13575_s6 = scalar_lea.vmem %s1143_s29, 16  ;;  %s13582_s9 = scalar_lea.vmem %s1143_s29, 32 }
 0x22a   : > { %p13576_p1 = scmp.ne.s32.totalorder %s1143_s29, %s13575_s6  ;;  %p13583_p13 = scmp.lt.s32.totalorder %s1143_s29, %s1143_s29 }
 0x22b   : > { %p13584_p0 = scmp.lt.s32.totalorder %s13582_s9, %s13575_s6 }
 0x22c   : > { %p13578_p3 = pnand %p13576_p1, %p14353_p8 }
 0x22d   : > { %p13585_p2 = por %p13584_p0, %p13583_p13 }
 0x22e   : > { %p13579_p4 = pneg %p13578_p3 }
 0x230   : > { %p13586_p5 = pnand %p13585_p2, %p13579_p4 }
 0x232   : > { %13589 = shalt.err (!%p13586_p5)
}
 0x233   : > { %s16106_s2 = sld [smem:[#allocation91_spill]] }
 0x234   : > { %11945 = dma.hbm_to_vmem [thread:$0]  (!%p14343_p6), %s16105_s4, 16, %s1143_s29, [#allocation29]  }
 0x239   : > { %s13590_s17 = scalar_lea.hbm %s16106_s2, 128 }
 0x23a   : > { %p13591_p7 = scmp.ne.s32.totalorder %s16106_s2, %s13590_s17  ;;  %p13597_p11 = scmp.lt.u32.totalorder %s13590_s17, %s16106_s2 }
 0x23c   : > { %p13593_p9 = pnand %p13591_p7, %p14353_p8 }
 0x23e   : > { %p13594_p10 = pneg %p13593_p9 }
 0x240   : > { %p13599_p12 = pnand %p13597_p11, %p13594_p10 }
 0x242   : > { %13602 = shalt.err (!%p13599_p12)
}
 0x243   : > { %s13603_s12 = scalar_lea.vmem %s14605_s13, 128  ;;  %p13611_p13 = scmp.lt.s32.totalorder %s14605_s13, %s14605_s13 }
 0x244   : > { %p13604_p1 = scmp.ne.s32.totalorder %s14605_s13, %s13603_s12  ;;  %p13612_p0 = scmp.lt.s32.totalorder %s13603_s12, %s13603_s12 }
 0x246   : > { %p13606_p3 = pnand %p13604_p1, %p14353_p8  ;;  %p13613_p2 = por %p13612_p0, %p13611_p13 }
 0x248   : > { %p13607_p4 = pneg %p13606_p3 }
 0x24a   : > { %p13614_p5 = pnand %p13613_p2, %p13607_p4 }
 0x24c   : > { %13617 = shalt.err (!%p13614_p5)
}
 0x24d   : > { %s16107_s29 = sld [smem:[#allocation94_spill]]  ;;  %s14069_s6 = smov [#allocation36]  }
 0x24e   : > { %11951 = dma.hbm_to_vmem [thread:$0]  (!%p14343_p6), %s16106_s2, 128, %s14605_s13, [#allocation32]  }
 0x24f   : > { %s1193_s9 = sshll.u32 %s14069_s6, 4  ;;  %s14070_s17 = smov [#allocation39]   ;;  %s1194_s9 = int_to_ptr.vmem [resolvable:$true] %s1193_s9 }
 0x250   : > { %s1216_s4 = sshll.u32 %s14070_s17, 4  ;;  %s14632_s4 = int_to_ptr.vmem [resolvable:$true] %s1216_s4 }
 0x253   : > { %s13618_s12 = scalar_lea.hbm %s16107_s29, 32 }
 0x254   : > { %p13619_p7 = scmp.ne.s32.totalorder %s16107_s29, %s13618_s12  ;;  %p13625_p11 = scmp.lt.u32.totalorder %s13618_s12, %s16107_s29 }
 0x256   : > { %p13621_p9 = pnand %p13619_p7, %p14353_p8 }
 0x258   : > { %p13622_p10 = pneg %p13621_p9 }
 0x25a   : > { %p13627_p12 = pnand %p13625_p11, %p13622_p10 }
 0x25c   : > { %13630 = shalt.err (!%p13627_p12)
}
 0x25d   : > { %s13631_s8 = scalar_lea.vmem %s1194_s9, 32  ;;  %p13639_p13 = scmp.lt.s32.totalorder %s1194_s9, %s1194_s9 }
 0x25e   : > { %p13632_p1 = scmp.ne.s32.totalorder %s1194_s9, %s13631_s8  ;;  %p13640_p0 = scmp.lt.s32.totalorder %s13631_s8, %s13631_s8 }
 0x260   : > { %p13634_p3 = pnand %p13632_p1, %p14353_p8  ;;  %p13641_p2 = por %p13640_p0, %p13639_p13 }
 0x262   : > { %p13635_p4 = pneg %p13634_p3 }
 0x264   : > { %p13642_p5 = pnand %p13641_p2, %p13635_p4 }
 0x266   : > { %13645 = shalt.err (!%p13642_p5)
}
 0x267   : > { %s16108_s13 = sld [smem:[#allocation96_spill]] }
 0x268   : > { %11957 = dma.hbm_to_vmem [thread:$0]  (!%p14343_p6), %s16107_s29, 32, %s1194_s9, [#allocation35]  }
 0x26d   : > { %s13646_s6 = scalar_lea.hbm %s16108_s13, 576 }
 0x26e   : > { %p13647_p7 = scmp.ne.s32.totalorder %s16108_s13, %s13646_s6  ;;  %p13653_p11 = scmp.lt.u32.totalorder %s13646_s6, %s16108_s13 }
 0x270   : > { %p13649_p9 = pnand %p13647_p7, %p14353_p8 }
 0x272   : > { %p13650_p10 = pneg %p13649_p9 }
 0x274   : > { %p13655_p12 = pnand %p13653_p11, %p13650_p10 }
 0x276   : > { %13658 = shalt.err (!%p13655_p12)
}
 0x277   : > { %s13659_s8 = scalar_lea.vmem %s14632_s4, 576  ;;  %p13667_p13 = scmp.lt.s32.totalorder %s14632_s4, %s14632_s4 }
 0x278   : > { %p13660_p1 = scmp.ne.s32.totalorder %s14632_s4, %s13659_s8  ;;  %p13668_p0 = scmp.lt.s32.totalorder %s13659_s8, %s13659_s8 }
 0x27a   : > { %p13662_p3 = pnand %p13660_p1, %p14353_p8  ;;  %p13669_p2 = por %p13668_p0, %p13667_p13 }
 0x27c   : > { %p13663_p4 = pneg %p13662_p3 }
 0x27e   : > { %p13670_p5 = pnand %p13669_p2, %p13663_p4 }
 0x280   : > { %13673 = shalt.err (!%p13670_p5)
}
 0x281   : > { %s16109_s9 = sld [smem:[#allocation100_spill]]  ;;  %s14071_s17 = smov [#allocation42]  }
 0x282   : > { %11963 = dma.hbm_to_vmem [thread:$0]  (!%p14343_p6), %s16108_s13, 576, %s14632_s4, [#allocation38], %s16098_s21, %s16098_s21, %s16102_s10  }
 0x283   : > { %s1247_s12 = sshll.u32 %s14071_s17, 4  ;;  %s14072_s6 = smov [#allocation45]   ;;  %s1248_s12 = int_to_ptr.vmem [resolvable:$true] %s1247_s12 }
 0x284   : > { %s1274_s2 = sshll.u32 %s14072_s6, 4  ;;  %s14662_s2 = int_to_ptr.vmem [resolvable:$true] %s1274_s2 }
 0x287   : > { %s13674_s8 = scalar_lea.hbm %s16109_s9, 32 }
 0x288   : > { %p13675_p7 = scmp.ne.s32.totalorder %s16109_s9, %s13674_s8  ;;  %p13681_p11 = scmp.lt.u32.totalorder %s13674_s8, %s16109_s9 }
 0x28a   : > { %p13677_p9 = pnand %p13675_p7, %p14353_p8 }
 0x28c   : > { %p13678_p10 = pneg %p13677_p9 }
 0x28e   : > { %p13683_p12 = pnand %p13681_p11, %p13678_p10 }
 0x290   : > { %13686 = shalt.err (!%p13683_p12)
}
 0x291   : > { %s13687_s16 = scalar_lea.vmem %s1248_s12, 32  ;;  %p13695_p13 = scmp.lt.s32.totalorder %s1248_s12, %s1248_s12 }
 0x292   : > { %p13688_p1 = scmp.ne.s32.totalorder %s1248_s12, %s13687_s16  ;;  %p13696_p0 = scmp.lt.s32.totalorder %s13687_s16, %s13687_s16 }
 0x294   : > { %p13690_p3 = pnand %p13688_p1, %p14353_p8  ;;  %p13697_p2 = por %p13696_p0, %p13695_p13 }
 0x296   : > { %p13691_p4 = pneg %p13690_p3 }
 0x298   : > { %p13698_p5 = pnand %p13697_p2, %p13691_p4 }
 0x29a   : > { %13701 = shalt.err (!%p13698_p5)
}
 0x29b   : > { %s16110_s4 = sld [smem:[#allocation103_spill]] }
 0x29c   : > { %11969 = dma.hbm_to_vmem [thread:$0]  (!%p14343_p6), %s16109_s9, 32, %s1248_s12, [#allocation41]  }
 0x2a1   : > { %s13702_s17 = scalar_lea.hbm %s16110_s4, 32 }
 0x2a2   : > { %p13703_p7 = scmp.ne.s32.totalorder %s16110_s4, %s13702_s17  ;;  %p13709_p11 = scmp.lt.u32.totalorder %s13702_s17, %s16110_s4 }
 0x2a4   : > { %p13705_p9 = pnand %p13703_p7, %p14353_p8 }
 0x2a6   : > { %p13706_p10 = pneg %p13705_p9 }
 0x2a8   : > { %p13711_p12 = pnand %p13709_p11, %p13706_p10 }
 0x2aa   : > { %13714 = shalt.err (!%p13711_p12)
}
 0x2ab   : > { %s13715_s16 = scalar_lea.vmem %s14662_s2, 32  ;;  %p13723_p13 = scmp.lt.s32.totalorder %s14662_s2, %s14662_s2 }
 0x2ac   : > { %p13716_p1 = scmp.ne.s32.totalorder %s14662_s2, %s13715_s16  ;;  %p13724_p0 = scmp.lt.s32.totalorder %s13715_s16, %s13715_s16 }
 0x2ae   : > { %p13718_p3 = pnand %p13716_p1, %p14353_p8  ;;  %p13725_p2 = por %p13724_p0, %p13723_p13 }
 0x2b0   : > { %p13719_p4 = pneg %p13718_p3 }
 0x2b2   : > { %p13726_p5 = pnand %p13725_p2, %p13719_p4 }
 0x2b4   : > { %13729 = shalt.err (!%p13726_p5)
}
 0x2b5   : > { %s16111_s12 = sld [smem:[#allocation104_spill]]  ;;  %s14073_s6 = smov [#allocation48]  }
 0x2b6   : > { %11975 = dma.hbm_to_vmem [thread:$0]  (!%p14343_p6), %s16110_s4, 32, %s14662_s2, [#allocation44]  }
 0x2b7   : > { %s1297_s8 = sshll.u32 %s14073_s6, 4  ;;  %s14074_s17 = smov [#allocation51]   ;;  %s1298_s8 = int_to_ptr.vmem [resolvable:$true] %s1297_s8 }
 0x2b8   : > { %s1321_s9 = sshll.u32 %s14074_s17, 4  ;;  %s14689_s9 = int_to_ptr.vmem [resolvable:$true] %s1321_s9 }
 0x2bb   : > { %s13730_s16 = scalar_lea.hbm %s16111_s12, 960 }
 0x2bc   : > { %p13731_p7 = scmp.ne.s32.totalorder %s16111_s12, %s13730_s16  ;;  %p13737_p11 = scmp.lt.u32.totalorder %s13730_s16, %s16111_s12 }
 0x2be   : > { %p13733_p9 = pnand %p13731_p7, %p14353_p8 }
 0x2c0   : > { %p13734_p10 = pneg %p13733_p9 }
 0x2c2   : > { %p13739_p12 = pnand %p13737_p11, %p13734_p10 }
 0x2c4   : > { %13742 = shalt.err (!%p13739_p12)
}
 0x2c5   : > { %s13743_s13 = scalar_lea.vmem %s1298_s8, 960  ;;  %p13751_p13 = scmp.lt.s32.totalorder %s1298_s8, %s1298_s8 }
 0x2c6   : > { %p13744_p1 = scmp.ne.s32.totalorder %s1298_s8, %s13743_s13  ;;  %p13752_p0 = scmp.lt.s32.totalorder %s13743_s13, %s13743_s13 }
 0x2c8   : > { %p13746_p3 = pnand %p13744_p1, %p14353_p8  ;;  %p13753_p2 = por %p13752_p0, %p13751_p13 }
 0x2ca   : > { %p13747_p4 = pneg %p13746_p3 }
 0x2cc   : > { %p13754_p5 = pnand %p13753_p2, %p13747_p4 }
 0x2ce   : > { %13757 = shalt.err (!%p13754_p5)
}
 0x2cf   : > { %s16112_s2 = sld [smem:[#allocation106_spill]] }
 0x2d0   : > { %11981 = dma.hbm_to_vmem [thread:$0]  (!%p14343_p6), %s16111_s12, 960, %s1298_s8, [#allocation47], %s16098_s21, %s16098_s21, %s16102_s10  }
 0x2d5   : > { %s13758_s6 = scalar_lea.hbm %s16112_s2, 4096 }
 0x2d6   : > { %p13759_p7 = scmp.ne.s32.totalorder %s16112_s2, %s13758_s6  ;;  %p13765_p11 = scmp.lt.u32.totalorder %s13758_s6, %s16112_s2 }
 0x2d8   : > { %p13761_p9 = pnand %p13759_p7, %p14353_p8 }
 0x2da   : > { %p13762_p10 = pneg %p13761_p9 }
 0x2dc   : > { %p13767_p12 = pnand %p13765_p11, %p13762_p10 }
 0x2de   : > { %13770 = shalt.err (!%p13767_p12)
}
 0x2df   : > { %s13771_s13 = scalar_lea.vmem %s14689_s9, 4096  ;;  %p13779_p13 = scmp.lt.s32.totalorder %s14689_s9, %s14689_s9 }
 0x2e0   : > { %p13772_p1 = scmp.ne.s32.totalorder %s14689_s9, %s13771_s13  ;;  %p13780_p0 = scmp.lt.s32.totalorder %s13771_s13, %s13771_s13 }
 0x2e2   : > { %p13774_p3 = pnand %p13772_p1, %p14353_p8  ;;  %p13781_p2 = por %p13780_p0, %p13779_p13 }
 0x2e4   : > { %p13775_p4 = pneg %p13774_p3 }
 0x2e6   : > { %p13782_p5 = pnand %p13781_p2, %p13775_p4 }
 0x2e8   : > { %13785 = shalt.err (!%p13782_p5)
}
 0x2e9   : > { %s16113_s8 = smov 8   ;;  %s16114_s17 = smov 128  }
 0x2ea   : > { %11987 = dma.hbm_to_vmem [thread:$0]  (!%p14343_p6), %s16112_s2, 4096, %s14689_s9, [#allocation50], %s16114_s17, %s16114_s17, %s16113_s8  }
 0x2eb   : > { %s14075_s16 = smov [#allocation54]   ;;  %s13786_s4 = scalar_lea.hbm %s16084_s23, 960 }
 0x2ec   : > { %s1351_s6 = sshll.u32 %s14075_s16, 4  ;;  %p13787_p7 = scmp.ne.s32.totalorder %s16084_s23, %s13786_s4  ;;  %s1352_s6 = int_to_ptr.vmem [resolvable:$true] %s1351_s6 }
 0x2ed   : > { %p13793_p11 = scmp.lt.u32.totalorder %s13786_s4, %s16084_s23 }
 0x2ee   : > { %p13789_p9 = pnand %p13787_p7, %p14353_p8 }
 0x2f0   : > { %p13790_p10 = pneg %p13789_p9 }
 0x2f2   : > { %p13795_p12 = pnand %p13793_p11, %p13790_p10 }
 0x2f4   : > { %13798 = shalt.err (!%p13795_p12)
}
 0x2f5   : > { %s13799_s13 = scalar_lea.vmem %s1352_s6, 960  ;;  %p13807_p13 = scmp.lt.s32.totalorder %s1352_s6, %s1352_s6 }
 0x2f6   : > { %p13800_p1 = scmp.ne.s32.totalorder %s1352_s6, %s13799_s13  ;;  %p13808_p0 = scmp.lt.s32.totalorder %s13799_s13, %s13799_s13 }
 0x2f8   : > { %p13802_p3 = pnand %p13800_p1, %p14353_p8  ;;  %p13809_p2 = por %p13808_p0, %p13807_p13 }
 0x2fa   : > { %p13803_p4 = pneg %p13802_p3 }
 0x2fc   : > { %p13810_p5 = pnand %p13809_p2, %p13803_p4 }
 0x2fe   : > { %13813 = shalt.err (!%p13810_p5)
}
 0x2ff   : > { %11993 = dma.hbm_to_vmem [thread:$0]  (!%p14343_p6), %s16084_s23, 960, %s1352_s6, [#allocation53], %s16098_s21, %s16098_s21, %s16102_s10  }
 0x300   : > { %s10343_s28 = sadd.s32 4294967294, %s14000_s7   ;;  %s14737_s11 = sadd.s32 1, %s14000_s7  }
 0x301   : > { %s149_s9 = sadd.s32 1, %s13996_s14  ;;  %s146_s4 = ssub.s32 %s14000_s7, %s14737_s11 }
 0x302   : > { %s16115_s16 = sld [smem:[#allocation74_spill]]  ;;  %p156_p8 = scmp.ne.s32.totalorder %s13996_s14, %s13992_s5 }
 0x303   : > { %p147_p7 = scmp.eq.s32.totalorder %s146_s4, 0  ;;  %p157_p9 = scmp.eq.s32.totalorder %s14000_s7, 0 }
 0x304   : > { %p162_p10 = scmp.ne.s32.totalorder %s13992_s5, %s13988_s0  ;;  %p989_p11 = scmp.eq.s32.totalorder %s14327_s15, 2 }
 0x305   : > { %s14749_s13 = scalar_select %p147_p7, %s13996_s14, %s149_s9  }
 0x306   : > { %p158_p12 = por %p157_p9, %p156_p8  ;;  %p16116_p1 = scmp.eq.s32.totalorder %s14327_s15, 0 }
 0x307   : > { %p14757_p3 = por %p989_p11, %p156_p8  ;;  %p995_p4 = scmp.eq.s32.totalorder %s10343_s28, 2 }
 0x308   : > { %p14753_p6 = por %p16116_p1, %p162_p10  ;;  %p12032_p13 = scmp.lt.s32.totalorder %s14000_s7, 3 }
 0x309   : > { %s16118_s10 = scalar_select %p14757_p3, 1, 0 }
 0x30a   : > { %s16117_s21 = scalar_select %p14753_p6, 1, 0 }
 0x30b   : > { %s14763_s6 = sand.u32 1, %s13996_s14   ;;  %p14765_p0 = por %p995_p4, %p162_p10 }
 0x30c   : > { %s10373_s4 = sshll.u32 %s14763_s6, 1  ;;  %s10374_s2 = sshll.u32 %s14000_s7, 5 }
 0x30d   : > { %s16119_s9 = scalar_select %p14765_p0, 1, 0 }
 0x30e   : > { %s14772_s12 = scalar_lea.hbm %s16115_s16, %s10374_s2  ;;  %s1379_s28 = scalar_lea.vmem [#allocation10], %s10373_s4 }
 0x30f   : > { %s1386_s19 = sshll.u32 %s1379_s28, 4  ;;  %p14774_p2 = pnand %p12032_p13, %p158_p12  ;;  %s14778_s19 = int_to_ptr.vmem [resolvable:$true] %s1386_s19 }
 0x310   : > { %s1376_s24 = scalar_lea.sflag [#allocation11], %s14763_s6  ;;  %s13814_s25 = scalar_lea.hbm %s14772_s12, 32 }
 0x311   : > { %p13815_p5 = scmp.ne.s32.totalorder %s14772_s12, %s13814_s25  ;;  %p13816_p8 = pneg %p14774_p2 }
 0x312   : > { %s13819_s2 = scalar_lea.hbm %s16115_s16, 96  ;;  %p13820_p10 = scmp.lt.u32.totalorder %s14772_s12, %s16115_s16 }
 0x313   : > { %p13817_p7 = pnand %p13816_p8, %p13815_p5  ;;  %p13821_p11 = scmp.lt.u32.totalorder %s13819_s2, %s13814_s25 }
 0x314   : > { %p13823_p1 = scmp.lt.u32.totalorder %s13814_s25, %s14772_s12 }
 0x315   : > { %p13818_p9 = pneg %p13817_p7  ;;  %p13822_p12 = por %p13821_p11, %p13820_p10 }
 0x317   : > { %p13824_p4 = por %p13823_p1, %p13822_p12 }
 0x319   : > { %p13825_p13 = pnand %p13824_p4, %p13818_p9 }
 0x31b   : > { %13828 = shalt.err (!%p13825_p13)
}
 0x31c   : > { %s13829_s4 = scalar_lea.vmem %s14778_s19, 32  ;;  %s14076_s28 = smov [#allocation10]  }
 0x31d   : > { %p13830_p0 = scmp.ne.s32.totalorder %s14778_s19, %s13829_s4  ;;  %s13834_s23 = sshll.u32 %s14076_s28, 4  ;;  %s13835_s23 = int_to_ptr.vmem [resolvable:$false] %s13834_s23 }
 0x31e   : > { %s13836_s22 = scalar_lea.vmem %s13835_s23, 64  ;;  %p13837_p5 = scmp.lt.s32.totalorder %s14778_s19, %s13835_s23 }
 0x31f   : > { %p13832_p3 = pnand %p13830_p0, %p13816_p8  ;;  %p13838_p7 = scmp.lt.s32.totalorder %s13836_s22, %s13829_s4 }
 0x321   : > { %p13833_p6 = pneg %p13832_p3  ;;  %p13839_p10 = por %p13838_p7, %p13837_p5 }
 0x323   : > { %p13840_p11 = pnand %p13839_p10, %p13833_p6 }
 0x325   : > { %13843 = shalt.err (!%p13840_p11)
}
 0x326   : > { %s16121_s25 = sld [smem:[#allocation75_spill]]  ;;  %s16122_s2 = smul.u32 40, %s14763_s6 }
 0x327   : > { %11997 = dma.hbm_to_vmem [thread:$0]  (!%p14774_p2), %s14772_s12, 32, %s14778_s19, %s1376_s24  }
 0x328   : > { %s1397_s28 = scalar_lea.vmem [#allocation13], %s16122_s2  ;;  %s11795_s23 = smul.u32 640, %s14000_s7 }
 0x329   : > { %s1404_s16 = sshll.u32 %s1397_s28, 4  ;;  %s16123_s4 = sand.u32 1, %s14000_s7   ;;  %s14807_s16 = int_to_ptr.vmem [resolvable:$true] %s1404_s16 }
 0x32a   : > { %s14814_s26 = scalar_lea.sflag [#allocation14], %s16123_s4 }
 0x32c   : > { %s14810_s22 = scalar_lea.hbm %s16121_s25, %s11795_s23  ;;  %s13849_s19 = scalar_lea.hbm %s16121_s25, 1920 }
 0x32d   : > { %s13844_s27 = scalar_lea.hbm %s14810_s22, 640  ;;  %p13850_p9 = scmp.lt.u32.totalorder %s14810_s22, %s16121_s25 }
 0x32e   : > { %p13845_p6 = scmp.ne.s32.totalorder %s14810_s22, %s13844_s27  ;;  %p13851_p12 = scmp.lt.u32.totalorder %s13849_s19, %s13844_s27 }
 0x32f   : > { %p13853_p4 = scmp.lt.u32.totalorder %s13844_s27, %s14810_s22 }
 0x330   : > { %p13847_p3 = pnand %p13845_p6, %p13816_p8  ;;  %p13852_p1 = por %p13851_p12, %p13850_p9 }
 0x332   : > { %p13848_p0 = pneg %p13847_p3  ;;  %p13854_p13 = por %p13853_p4, %p13852_p1 }
 0x334   : > { %p13855_p5 = pnand %p13854_p13, %p13848_p0 }
 0x336   : > { %13858 = shalt.err (!%p13855_p5)
}
 0x337   : > { %s13859_s24 = scalar_lea.vmem %s14807_s16, 640  ;;  %s14077_s12 = smov [#allocation13]  }
 0x338   : > { %p13860_p7 = scmp.ne.s32.totalorder %s14807_s16, %s13859_s24  ;;  %s13864_s6 = sshll.u32 %s14077_s12, 4  ;;  %s13865_s6 = int_to_ptr.vmem [resolvable:$false] %s13864_s6 }
 0x339   : > { %s13866_s2 = scalar_lea.vmem %s13865_s6, 1280  ;;  %p13867_p6 = scmp.lt.s32.totalorder %s14807_s16, %s13865_s6 }
 0x33a   : > { %p13862_p10 = pnand %p13860_p7, %p13816_p8  ;;  %p13868_p3 = scmp.lt.s32.totalorder %s13866_s2, %s13859_s24 }
 0x33c   : > { %p13863_p11 = pneg %p13862_p10  ;;  %p13869_p9 = por %p13868_p3, %p13867_p6 }
 0x33e   : > { %p13870_p12 = pnand %p13869_p9, %p13863_p11 }
 0x340   : > { %13873 = shalt.err (!%p13870_p12)
}
 0x341   : > { %12000 = dma.hbm_to_vmem [thread:$0]  (!%p14774_p2), %s14810_s22, 640, %s14807_s16, %s14814_s26, %s16114_s17, %s16114_s17, %s16113_s8  }
 0x342   : > { %p16124_p8 = scmp.ne.s32.totalorder %s16095_s18, 0 }
 0x343   : > { %s14842_s27 = sand.u32 (!%p16124_p8), 1, %s13992_s5   ;;  %p16125_p0 = scmp.ne.s32.totalorder (!%p16124_p8), %s16117_s21, 0 }
 0x344   : > { %1416 = sbr.rel (%p16124_p8) target bundleno = 6229 (0x1855), region = 180  ;;  %s10377_s28 = sshll.u32 (!%p16124_p8), %s14842_s27, 1 }
 0x345   : > { %s1419_s23 = scalar_lea.sflag (!%p16124_p8), [#allocation11], %s14842_s27  ;;  %s14846_s4 = scalar_lea.vmem (!%p16124_p8), [#allocation10], %s10377_s28 }
 0x34b   : > { %13919 = dma.done.wait (%p16125_p0), %s1419_s23, 32  }
 0x34c   : > { %13921 = vsyncadd (%p16125_p0), %s1419_s23, 4294967264  ;;  %s1427_s20 = sand.u32 1, %s14327_s15   ;;  %s11796_s18 = smul.u32 40, %s14842_s27 }
 0x34d   : > { %s1428_s26 = scalar_lea.sflag [#allocation14], %s1427_s20 }
 0x34e   : > { %s14856_s8 = scalar_lea.vmem [#allocation13], %s11796_s18 }
 0x34f   : > { %13923 = dma.done.wait (%p16125_p0), %s1428_s26, 640  }
 0x350   : > { %13925 = vsyncadd (%p16125_p0), %s1428_s26, 4294966656  ;;  %p16126_p2 = scmp.eq.s32.totalorder %s14327_s15, 0 }
 0x352   : > { %13927 = dma.done.wait (%p16126_p2), [#allocation14], 32   ;;  %p16127_p1 = pmov %p16126_p2 }
 0x354   : > { %13929 = vsyncadd (%p16127_p1), [#allocation14], 4294967264  ;;  %p16128_p4 = pmov %p16127_p1 }
 0x355   : > { %p16129_p13 = pmov %p16127_p1 }
 0x356   : > { %13931 = dma.done.wait (%p16128_p4), [#allocation17], 80  }
 0x357   : > { %13933 = vsyncadd (%p16129_p13), [#allocation17], 4294967216  ;;  %p16130_p5 = pmov %p16127_p1 }
 0x358   : > { %p16131_p7 = pmov %p16127_p1 }
 0x359   : > { %13935 = dma.done.wait (%p16130_p5), [#allocation20], 3648  }
 0x35a   : > { %13937 = vsyncadd (%p16131_p7), [#allocation20], 4294963648  ;;  %p16132_p10 = pmov %p16127_p1 }
 0x35b   : > { %p16133_p11 = pmov %p16127_p1 }
 0x35c   : > { %13939 = dma.done.wait (%p16132_p10), [#allocation23], 3088  }
 0x35d   : > { %13941 = vsyncadd (%p16133_p11), [#allocation23], 4294964208  ;;  %p16134_p6 = pmov %p16127_p1 }
 0x35e   : > { %p16135_p3 = pmov %p16127_p1 }
 0x35f   : > { %13943 = dma.done.wait (%p16134_p6), [#allocation26], 32  }
 0x360   : > { %13945 = vsyncadd (%p16135_p3), [#allocation26], 4294967264  ;;  %p16136_p9 = pmov %p16127_p1 }
 0x361   : > { %p16137_p12 = pmov %p16127_p1 }
 0x362   : > { %13947 = dma.done.wait (%p16136_p9), [#allocation29], 1040  }
 0x363   : > { %13949 = vsyncadd (%p16137_p12), [#allocation29], 4294966256  ;;  %p16138_p8 = pmov %p16127_p1 }
 0x364   : > { %p16139_p0 = pmov %p16127_p1 }
 0x365   : > { %13951 = dma.done.wait (%p16138_p8), [#allocation32], 2176  }
 0x366   : > { %13953 = vsyncadd (%p16139_p0), [#allocation32], 4294965120  ;;  %p16140_p2 = pmov %p16139_p0 }
 0x367   : > { %p16141_p1 = pmov %p16139_p0 }
 0x368   : > { %13955 = dma.done.wait (%p16140_p2), [#allocation35], 12320  }
 0x369   : > { %13957 = vsyncadd (%p16141_p1), [#allocation35], 4294954976  ;;  %p16142_p4 = pmov %p16139_p0 }
 0x36a   : > { %p16143_p13 = pmov %p16139_p0 }
 0x36b   : > { %13959 = dma.done.wait (%p16142_p4), [#allocation38], 12864  }
 0x36c   : > { %13961 = vsyncadd (%p16143_p13), [#allocation38], 4294954432  ;;  %p16144_p5 = pmov %p16139_p0 }
 0x36d   : > { %p16145_p7 = pmov %p16139_p0 }
 0x36e   : > { %13963 = dma.done.wait (%p16144_p5), [#allocation41], 64  }
 0x36f   : > { %13965 = vsyncadd (%p16145_p7), [#allocation41], 4294967232  ;;  %p16146_p10 = pmov %p16139_p0 }
 0x370   : > { %p16147_p11 = pmov %p16139_p0 }
 0x371   : > { %13967 = dma.done.wait (%p16146_p10), [#allocation44], 12320  }
 0x372   : > { %13969 = vsyncadd (%p16147_p11), [#allocation44], 4294954976  ;;  %p16148_p6 = pmov %p16139_p0 }
 0x373   : > { %p16149_p3 = pmov %p16139_p0 }
 0x374   : > { %13971 = dma.done.wait (%p16148_p6), [#allocation47], 13248  }
 0x375   : > { %13973 = vsyncadd (%p16149_p3), [#allocation47], 4294954048  ;;  %p16150_p9 = pmov %p16139_p0 }
 0x376   : > { %p16151_p12 = pmov %p16139_p0 }
 0x377   : > { %13975 = dma.done.wait (%p16150_p9), [#allocation50], 4128  }
 0x378   : > { %13977 = vsyncadd (%p16151_p12), [#allocation50], 4294963168  ;;  %p16152_p8 = pmov %p16139_p0 }
 0x37a   : > { %13979 = dma.done.wait (%p16152_p8), [#allocation53], 992  }
 0x37b   : > { %13981 = vsyncadd (%p16139_p0), [#allocation53], 4294966304  ;;  %s16153_s17 = sld [smem:[#allocation73_spill]]  ;;  %p1645_p2 = scmp.lt.s32.totalorder %s14327_s15, 2 }
 0x37c   : > { %s14925_s19 = scalar_lea.vmem [#allocation55], %s11796_s18  ;;  %p16154_p1 = scmp.ne.s32.totalorder %s14327_s15, 0 }
 0x37d   : > { %s1646_s16 = scalar_select %p1645_p2, %s14327_s15, 2 }
 0x37e   : > { %1653 = sbr.rel (%p16154_p1) target bundleno = 901 (0x385), region = 300  ;;  %vm1654_vm0 = vcmask (!%p16154_p1), 254976   ;;  %v14078_v0 = vmov (!%p16154_p1), 0.0  }
 0x37f   : > { %s10405_s21 = sshll.u32 %s1646_s16, 1  ;;  %1655 = vst.msk [vmem:[#allocation2] sm:$0x3] (!%p16154_p1), %vm1654_vm0, %v14078_v0  ;;  %1656 = vst.msk [vmem:[#allocation3] sm:$0x3] (!%p16154_p1), %vm1654_vm0, %v14078_v0 }
 0x381   : > { %s14921_s22 = scalar_lea.vmem %s16153_s17, %s10405_s21 }
 0x385 PF: > { %s1657_s24 = sld [smem:[#allocation9]]  ;;  %p16155_p13 = scmp.eq.s32.totalorder %s14327_s15, 0 }
 0x38b   : > { %p1658_p4 = scmp.lt.s32.totalorder %s14327_s15, %s1657_s24 }
 0x38d   : > { %p1659_p5 = por %p1658_p4, %p16155_p13 }
 0x38e   : > { %v1663_v1 = vld [vmem:[%s14856_s8] sm:$0xff] (%p1659_p5)  ;;  %v1664_v2 = vld [vmem:[%s14856_s8 + $0x8] sm:$0xff] (%p1659_p5)  ;;  %v1665_v3 = vld [vmem:[%s14856_s8 + $0x10] sm:$0xff] (%p1659_p5) }
 0x38f   : > { %1662 = sbr.rel (!%p1659_p5) target bundleno = 918 (0x396), region = 304  ;;  %1668 = vst [vmem:[#allocation4] sm:$0xff] (%p1659_p5), %v1663_v1  ;;  %1669 = vst [vmem:[#allocation4 + $0x8] sm:$0xff] (%p1659_p5), %v1664_v2  ;;  %v1666_v4 = vld [vmem:[%s14856_s8 + $0x18] sm:$0xff] (%p1659_p5)  ;;  %v1667_v5 = vld [vmem:[%s14856_s8 + $0x20] sm:$0xf] (%p1659_p5) }
 0x390   : > { %1670 = vst [vmem:[#allocation4 + $0x10] sm:$0xff] (%p1659_p5), %v1665_v3  ;;  %1671 = vst [vmem:[#allocation4 + $0x18] sm:$0xff] (%p1659_p5), %v1666_v4 }
 0x391   : > { %1672 = vst [vmem:[#allocation4 + $0x20] sm:$0xf] (%p1659_p5), %v1667_v5 }
 0x396 PF: > { %v1682_v6 = vld [vmem:[#allocation15] sm:$0x3]  ;;  %vm1694_vm1 = vcmask 1041408   ;;  %v14079_v7 = vmov 0.0   ;;  %vm14080_vm2 = vmmov 0   ;;  %v1676_v11 = vld [vmem:[#allocation4 + $0x8] sm:$0xff]  ;;  %v2372_v45 = vlaneseq }
 0x397   : > { %11537 = vmatprep.subr.bf16.mxu0 %v14079_v7  ;;  %3902 = vst [vmem:[#allocation7] sm:$0xff] %v14079_v7  ;;  %3903 = vst [vmem:[#allocation7 + $0x8] sm:$0xff] %v14079_v7  ;;  %v1696_v8 = vsel %vm1694_vm1, %v1682_v6, 0  ;;  %11539 = vmatprep.mubr.msk.bf16.mxu0 %vm14080_vm2, %v14079_v7  ;;  %v1680_v9 = vld [vmem:[%s14921_s22] sm:$0x3]  ;;  %v1675_v10 = vld [vmem:[#allocation4] sm:$0xff] }
 0x398   : > { %3904 = vst [vmem:[#allocation7 + $0x10] sm:$0xf] %v14079_v7  ;;  %3905 = vst [vmem:[#allocation7 + $0x18] sm:$0xf] %v14079_v7  ;;  %11538 = vmatpush3.bf16.msra.mxu0 %v1696_v8  ;;  %v1681_v12 = vpack.c.bf16 %v1680_v9, %v1680_v9  ;;  %vm1690_vm3 = vcmask 31744   ;;  %v14940_v13 = vpack.c.bf16 %v1676_v11, %v1675_v10  ;;  %v1677_v14 = vld [vmem:[#allocation4 + $0x10] sm:$0xff]  ;;  %11543 = vmatprep.subr.bf16.mxu1 %v14079_v7 }
 0x399   : > { %v1678_v15 = vld [vmem:[#allocation4 + $0x18] sm:$0xff]  ;;  %v12178_v17 = vld [vmem:[#allocation21] sm:$0xff]   ;;  %vm1816_vm4 = vcmask 293888   ;;  %11545 = vmatprep.mubr.msk.bf16.mxu1 %vm14080_vm2, %v14079_v7  ;;  %v1679_v18 = vld [vmem:[#allocation4 + $0x20] sm:$0xf]  ;;  %vm1755_vm5 = vcmask 1043456  }
 0x39a   : > { %v14942_v16 = vpack.c.bf16 %v1678_v15, %v1677_v14  ;;  %11549 = vmatprep.subr.bf16.mxu0 %v14940_v13  ;;  %v12182_v19 = vld [vmem:[#allocation19] sm:$0xff]   ;;  %v14949_v20 = vpack.c.bf16 %v1679_v18, %v1679_v18  ;;  %v1743_v21 = vld [vmem:[#allocation16] sm:$0xf]  ;;  %vm1751_vm6 = vcmask 64512   ;;  %v12183_v25 = vld [vmem:[#allocation19 + $0x8] sm:$0xff]   ;;  %s16156_s12 = sld [smem:[#allocation77_spill]] }
 0x39b   : > { %11540 = vmatmul.mubr.msk.bf16.vlgmr.msra.gmra.mrb[0].mxu0 %vm1690_vm3, %v1681_v12  ;;  %v1757_v22 = vsel %vm1755_vm5, %v1743_v21, 0  ;;  %v1741_v23 = vld [vmem:[%s14846_s4] sm:$0x3]  ;;  %v12179_v27 = vld [vmem:[#allocation21 + $0x8] ss:$0 sps:$4 sm:$0x33]  }
 0x39c   : > { %11550 = vmatpush3.bf16.msra.mxu0 %v14940_v13  ;;  %11555 = vmatprep.mubr.msk.bf16.mxu0 %vm1816_vm4, %v12178_v17  ;;  %v1742_v24 = vpack.c.bf16 %v1741_v23, %v1741_v23  ;;  %v14957_v26 = vsel %vm1694_vm1, %v14949_v20, 0  ;;  %v12180_v28 = vld [vmem:[#allocation21 + $0xc] sm:$0xff]   ;;  %v12186_v30 = vld [vmem:[#allocation19 + $0x18] sm:$0xff]   ;;  %v12185_v31 = vld [vmem:[#allocation19 + $0x40] sm:$0xff]   ;;  %v14081_v46 = vmov 1966171168  }
 0x39d   : > { %11551 = vmatprep.subr.bf16.mxu0 %v14942_v16  ;;  %11544 = vmatpush3.bf16.msra.mxu1 %v1757_v22  ;;  %v12184_v29 = vld [vmem:[#allocation19 + $0x10] sm:$0xff]   ;;  %v12187_v33 = vld [vmem:[#allocation19 + $0x48] sm:$0xff]   ;;  %v12188_v34 = vld [vmem:[#allocation19 + $0x20] sm:$0xff]   ;;  %v2915_v47 = vunpack.c.l.s4 %v14081_v46  ;;  %vm3391_vm7 = vcmask 253952   ;;  %v14976_v52 = vshrl.u32 %v2372_v45, 7  ;;  %s14082_s6 = smov 32  }
 0x39e   : > { %11589 = vmatprep.subr.bf16.mxu1 %v12182_v19  ;;  %v12181_v32 = vld [vmem:[#allocation21 + $0x14] ss:$0 sps:$4 sm:$0x33]   ;;  %v12190_v36 = vld [vmem:[#allocation19 + $0x28] sm:$0xff]   ;;  %v12191_v37 = vld [vmem:[#allocation19 + $0x58] sm:$0xff]   ;;  %vm3412_vm10 = vcmask 516352  }
 0x39f   : > { %v12189_v35 = vld [vmem:[#allocation19 + $0x50] sm:$0xff]   ;;  %v12193_v39 = vld [vmem:[#allocation19 + $0x60] sm:$0xff]   ;;  %v12194_v40 = vld [vmem:[#allocation19 + $0x38] sm:$0xff]   ;;  %v2916_v53 = vunpack.c.0.s8 %v2915_v47  ;;  %s14083_s2 = smov 64   ;;  %vm3433_vm11 = vcmask 778752   ;;  %s16157_s28 = sld [smem:[#allocation84_spill]] }
 0x3a0   : > { %11552 = vmatpush3.bf16.msra.mxu0 %v14942_v16  ;;  %11546 = vmatmul.mubr.msk.bf16.vlgmr.msra.gmra.mrb[0].mxu1 %vm1751_vm6, %v1742_v24  ;;  %v12192_v38 = vld [vmem:[#allocation19 + $0x30] sm:$0xff]   ;;  %v12195_v41 = vld [vmem:[#allocation19 + $0x68] sm:$0xff]   ;;  %v12197_v43 = vld [vmem:[#allocation19 + $0x78] sm:$0xff]   ;;  %vm2376_vm3 = vcmp.ne.s32.totalorder %v14976_v52, 0  ;;  %s16162_s23 = sld [smem:[#allocation86_spill]]  ;;  %s14085_s4 = smov 96  }
 0x3a1   : > { %11791 = vmatprep.subr.msk.bf16.mxu0 %vm1694_vm1, %v14949_v20  ;;  %11590 = vmatpush3.bf16.msra.mxu1 %v12182_v19  ;;  %v12196_v42 = vld [vmem:[#allocation19 + $0x70] sm:$0xff]   ;;  %v12200_v50 = vld [vmem:[#allocation19 + $0x80] sm:$0xff]   ;;  %v14979_v59 = vsub.s32 %v2916_v53, %v14976_v52  ;;  %v12198_v14 = vld [vmem:[#allocation21 + $0x18] sm:$0xff]   ;;  %s16165_s20 = sld [smem:[#allocation93_spill]]  ;;  %s16166_s18 = sld [smem:[#allocation99_spill]] }
 0x3a2   : > { %11591 = vmatprep.subr.bf16.mxu1 %v12183_v25  ;;  %v10407_v44 = vld [vmem:[%s16156_s12] ss:$0 sm:$0xff]  ;;  %v12199_v19 = vld [vmem:[#allocation21 + $0x20] ss:$0 sps:$4 sm:$0x33]   ;;  %v14991_v21 = vld [vmem:[#allocation7] sm:$0xff] }
 0x3a3   : > { %v1673_v48 = vld [vmem:[#allocation2] sm:$0x3]  ;;  %v12204_v23 = vld [vmem:[#allocation19 + $0xa0] sm:$0xff]   ;;  %s16167_s26 = sld [smem:[#allocation98_spill]]  ;;  %s16168_s8 = sld [smem:[#allocation102_spill]] }
 0x3a4   : > { %11554 = vmatpush3.bf16.msra.mxu0 %v14957_v26  ;;  %v14972_v49 = vpack.c.bf16 %v1673_v48, %v1673_v48  ;;  %v12202_v22 = vld [vmem:[#allocation19 + $0x90] sm:$0xff]   ;;  %s16175_s17 = sld [smem:[#allocation107_spill]]  ;;  %s16176_s16 = sld [smem:[#allocation110_spill]] }
 0x3a5   : > { %11559 = vmatprep.subr.bf16.mxu0 %v14940_v13  ;;  %11592 = vmatpush3.bf16.msra.mxu1 %v12183_v25  ;;  %v12205_v25 = vld [vmem:[#allocation19 + $0xa8] sm:$0xff]   ;;  %s11797_s21 = smul.u32 640, %s14327_s15  ;;  %s9938_s22 = sshll.u32 %s14925_s19, 4  ;;  %s15942_s22 = int_to_ptr.vmem [resolvable:$true] %s9938_s22 }
 0x3a6   : > { %11593 = vmatprep.subr.bf16.mxu1 %v12184_v29  ;;  %3392 = vst.msk [vmem:[#allocation6] sm:$0x1] %vm3391_vm7, %v14972_v49  ;;  %s9925_s12 = scalar_lea.sflag [#allocation12], %s14842_s27  ;;  %p16177_p10 = scmp.ne.s32.totalorder %s16118_s10, 0 }
 0x3a7   : > { %11556 = vmatmul.mubr.msk.bf16.vlgmr.msra.gmra.mrb[4].mxu0 %vm1816_vm4, %v12179_v27 }
 0x3a8   : > { %11560 = vmatpush3.bf16.msra.mxu0 %v14940_v13  ;;  %11565 = vmatprep.mubr.msk.bf16.mxu0 %vm1816_vm4, %v12180_v28 }
 0x3a9   : > { %11561 = vmatprep.subr.bf16.mxu0 %v14942_v16  ;;  %11594 = vmatpush3.bf16.msra.mxu1 %v12184_v29 }
 0x3aa   : > { %11595 = vmatprep.subr.bf16.mxu1 %v12186_v30  ;;  %s15940_s24 = scalar_lea.hbm %s16176_s16, %s11797_s21 }
 0x3ac   : > { %11562 = vmatpush3.bf16.msra.mxu0 %v14942_v16 }
 0x3ad   : > { %11792 = vmatprep.subr.msk.bf16.mxu0 %vm1694_vm1, %v14949_v20  ;;  %11596 = vmatpush3.bf16.msra.mxu1 %v12186_v30  ;;  %v12207_v30 = vld [vmem:[#allocation19 + $0xb8] sm:$0xff]  }
 0x3ae   : > { %11597 = vmatprep.subr.bf16.mxu1 %v12188_v34 }
 0x3b0   : > { %11564 = vmatpush3.bf16.msra.mxu0 %v14957_v26 }
 0x3b1   : > { %11569 = vmatprep.subr.bf16.mxu0 %v12185_v31  ;;  %11598 = vmatpush3.bf16.msra.mxu1 %v12188_v34 }
 0x3b2   : > { %11599 = vmatprep.subr.bf16.mxu1 %v12190_v36 }
 0x3b3   : > { %11566 = vmatmul.mubr.msk.bf16.vlgmr.msra.gmra.mrb[8].mxu0 %vm1816_vm4, %v12181_v32 }
 0x3b4   : > { %11570 = vmatpush3.bf16.msra.mxu0 %v12185_v31 }
 0x3b5   : > { %11571 = vmatprep.subr.bf16.mxu0 %v12187_v33  ;;  %11600 = vmatpush3.bf16.msra.mxu1 %v12190_v36 }
 0x3b6   : > { %11601 = vmatprep.subr.bf16.mxu1 %v12192_v38 }
 0x3b8   : > { %11572 = vmatpush3.bf16.msra.mxu0 %v12187_v33 }
 0x3b9   : > { %11573 = vmatprep.subr.bf16.mxu0 %v12189_v35  ;;  %11602 = vmatpush3.bf16.msra.mxu1 %v12192_v38 }
 0x3ba   : > { %11603 = vmatprep.subr.bf16.mxu1 %v12194_v40 }
 0x3bc   : > { %11574 = vmatpush3.bf16.msra.mxu0 %v12189_v35 }
 0x3bd   : > { %11575 = vmatprep.subr.bf16.mxu0 %v12191_v37  ;;  %11604 = vmatpush3.bf16.msra.mxu1 %v12194_v40 }
 0x3be   : > { %11619 = vmatprep.subr.bf16.mxu1 %v12200_v50 }
 0x3c0   : > { %11576 = vmatpush3.bf16.msra.mxu0 %v12191_v37 }
 0x3c1   : > { %11577 = vmatprep.subr.bf16.mxu0 %v12193_v39 }
 0x3c4   : > { %11578 = vmatpush3.bf16.msra.mxu0 %v12193_v39 }
 0x3c5   : > { %11579 = vmatprep.subr.bf16.mxu0 %v12195_v41 }
 0x3c8   : > { %11580 = vmatpush3.bf16.msra.mxu0 %v12195_v41 }
 0x3c9   : > { %11581 = vmatprep.subr.bf16.mxu0 %v12196_v42 }
 0x3cc   : > { %11582 = vmatpush3.bf16.msra.mxu0 %v12196_v42 }
 0x3cd   : > { %11583 = vmatprep.subr.bf16.mxu0 %v12197_v43 }
 0x3d0   : > { %11584 = vmatpush3.bf16.msra.mxu0 %v12197_v43 }
 0x3d1   : > { %11609 = vmatprep.subr.bf16.mxu0 %v14940_v13 }
 0x46e   : > { %v1732_v51 = vpop.f32.mrb[0].mxu0 }
 0x46f   : > { %v1733_v54 = vadd.f32 %v10407_v44, %v1732_v51  ;;  %v11541_v55 = vpop.f32.mrb[1].mxu0 }
 0x470   : > { %v1735_v56 = vpop.f32.mrb[2].mxu0  ;;  %v12210_v55 = vld [vmem:[#allocation24] sm:$0xff]  }
 0x471   : > { %vm1738_vm8 = vcmp.ge.f32.partialorder %v1733_v54, 0.0  ;;  %v1739_v57 = vmul.f32 0.2, %v1733_v54  ;;  %v11542_v58 = vpop.f32.mrb[3].mxu0  ;;  %v12211_v56 = vld [vmem:[#allocation24 + $0x8] sm:$0xff]  }
 0x472   : > { %v12215_v58 = vld [vmem:[#allocation24 + $0x18] sm:$0xff]  }
 0x473   : > { %v1740_v60 = vsel %vm1738_vm8, %v1733_v54, %v1739_v57  ;;  %v1793_v62 = vpop.f32.mrb[0].mxu1  ;;  %v12213_v57 = vld [vmem:[#allocation24 + $0x10] sm:$0xff]   ;;  %vm2409_vm8 = vcmask 162816  }
 0x474   : > { %v3393_v61 = vpack.c.bf16 %v1740_v60, %v1740_v60  ;;  %v11547_v0 = vpop.f32.mrb[1].mxu1  ;;  %v12217_v60 = vld [vmem:[#allocation24 + $0x20] sm:$0xff]  }
 0x475   : > { %v1796_v1 = vpop.f32.mrb[2].mxu1  ;;  %v10447_v0 = vld [vmem:[#allocation22] ss:$0 sm:$0xff] }
 0x476   : > { %v3401_v63 = vrot.slane %v3393_v61, %v14979_v59  ;;  %v11548_v3 = vpop.f32.mrb[3].mxu1  ;;  %v12219_v61 = vld [vmem:[#allocation24 + $0x28] sm:$0xff]   ;;  %v15011_v1 = vadd.s32 8, %v14976_v52 }
 0x478   : > { %v3408_v2 = vrot.slane %v3401_v63, %v14979_v59  ;;  %vm2380_vm12 = vcmp.ne.s32.totalorder %v15011_v1, 9  ;;  %vm2386_vm13 = vcmp.ne.s32.totalorder %v15011_v1, 10 }
 0x479   : > { %vm15020_vm5 = vmand %vm2380_vm12, %vm2386_vm13 }
 0x47a   : > { %3409 = vrot.lane.b32.xlu0 %v3408_v2, %s14082_s6  ;;  %v11557_v4 = vpop.f32.mrb[4].mxu0  ;;  %vm15030_vm7 = vmpackc.low %vm15020_vm5, %vm2376_vm3 }
 0x47b   : > { %v1860_v5 = vpop.f32.mrb[5].mxu0  ;;  %v1875_v9 = vpack.c.bf16 %v11557_v4, %v11557_v4 }
 0x47c   : > { %v11558_v6 = vpop.f32.mrb[6].mxu0 }
 0x47d   : > { %v1863_v7 = vpop.f32.mrb[7].mxu0  ;;  %v15014_v6 = vadd.s32 16, %v14976_v52 }
 0x47e   : > { %v1874_v8 = vpack.c.bf16 %v1863_v7, %v1860_v5 }
 0x47f   : > { %vm2393_vm15 = vcmp.ne.s32.totalorder %v15014_v6, 19 }
 0x480   : > { %11605 = vmatprep.mubr.bf16.mxu1 %v1874_v8 }
 0x481   : > { %11606 = vmatmul.mubr.bf16.vlgmr.msra.gmra.mrb[4].mxu1 %v1875_v9 }
 0x482   : > { %11620 = vmatpush3.bf16.msra.mxu1 %v12200_v50 }
 0x486   : > { %v11567_v10 = vpop.f32.mrb[8].mxu0 }
 0x487   : > { %v1944_v11 = vpop.f32.mrb[9].mxu0  ;;  %v1959_v18 = vpack.c.bf16 %v11567_v10, %v11567_v10 }
 0x488   : > { %v11568_v12 = vpop.f32.mrb[10].mxu0 }
 0x489   : > { %v1947_v15 = vpop.f32.mrb[11].mxu0 }
 0x48a   : > { %v1958_v17 = vpack.c.bf16 %v1947_v15, %v1944_v11 }
 0x48c   : > { %11585 = vmatprep.mubr.bf16.mxu0 %v1958_v17 }
 0x48d   : > { %11586 = vmatmul.mubr.bf16.vlgmr.msra.gmra.mrb[12].mxu0 %v1959_v18 }
 0x48e   : > { %11610 = vmatpush3.bf16.msra.mxu0 %v14940_v13  ;;  %11615 = vmatprep.mubr.msk.bf16.mxu0 %vm1816_vm4, %v12198_v14  ;;  %v12201_v13 = vld [vmem:[#allocation19 + $0x88] sm:$0xff]  }
 0x48f   : > { %11611 = vmatprep.subr.bf16.mxu0 %v14942_v16  ;;  %11621 = vmatprep.subr.bf16.mxu1 %v12201_v13 }
 0x490   : > { %11622 = vmatpush3.bf16.msra.mxu1 %v12201_v13 }
 0x491   : > { %11623 = vmatprep.subr.bf16.mxu1 %v12202_v22 }
 0x492   : > { %11612 = vmatpush3.bf16.msra.mxu0 %v14942_v16  ;;  %v12203_v16 = vld [vmem:[#allocation19 + $0x98] sm:$0xff]  }
 0x493   : > { %11793 = vmatprep.subr.msk.bf16.mxu0 %vm1694_vm1, %v14949_v20  ;;  %v10409_v20 = vld [vmem:[#allocation18] ss:$0 sm:$0xff] }
 0x494   : > { %11624 = vmatpush3.bf16.msra.mxu1 %v12202_v22  ;;  %v1794_v24 = vadd.f32 %v10409_v20, %v1793_v62  ;;  %v12221_v62 = vld [vmem:[#allocation24 + $0x30] sm:$0xff]  }
 0x495   : > { %11625 = vmatprep.subr.bf16.mxu1 %v12203_v16 }
 0x496   : > { %11614 = vmatpush3.bf16.msra.mxu0 %v14957_v26  ;;  %v12206_v26 = vld [vmem:[#allocation19 + $0xb0] sm:$0xff]   ;;  %v1800_v27 = vmul.f32 0.2, %v1794_v24  ;;  %vm1799_vm9 = vcmp.ge.f32.partialorder %v1794_v24, 0.0 }
 0x497   : > { %11639 = vmatprep.subr.bf16.mxu0 %v14991_v21 }
 0x498   : > { %11626 = vmatpush3.bf16.msra.mxu1 %v12203_v16  ;;  %v1801_v29 = vsel %vm1799_vm9, %v1794_v24, %v1800_v27  ;;  %v12212_v27 = vld [vmem:[#allocation24 + $0x40] sm:$0xff]   ;;  %vm2898_vm9 = vcmp.ne.s32.totalorder %v14976_v52, 5 }
 0x499   : > { %11616 = vmatmul.mubr.msk.bf16.vlgmr.msra.gmra.mrb[16].mxu0 %vm1816_vm4, %v12199_v19  ;;  %11627 = vmatprep.subr.bf16.mxu1 %v12204_v23  ;;  %v3414_v31 = vpack.c.bf16 %v1801_v29, %v1801_v29  ;;  %v12216_v29 = vld [vmem:[#allocation24 + $0x50] sm:$0xff]   ;;  %v12541_v16 = vld [vmem:[#allocation37 + $0x210] ss:$8 sps:$4 sm:$0xff]  }
 0x49a   : > { %11643 = vmatprep.mubr.msk.bf16.mxu0 %vm14080_vm2, %v14991_v21 }
 0x49b   : > { %v3422_v32 = vrot.slane %v3414_v31, %v14979_v59  ;;  %v12220_v31 = vld [vmem:[#allocation24 + $0x60] sm:$0xff]  }
 0x49c   : > { %11628 = vmatpush3.bf16.msra.mxu1 %v12204_v23 }
 0x49d   : > { %11629 = vmatprep.subr.bf16.mxu1 %v12205_v25  ;;  %v3429_v33 = vrot.slane %v3422_v32, %v14979_v59  ;;  %v12222_v32 = vld [vmem:[#allocation24 + $0x68] sm:$0xff]  }
 0x49f   : > { %3430 = vrot.lane.b32.xlu0 %v3429_v33, %s14083_s2  ;;  %v12223_v33 = vld [vmem:[#allocation24 + $0x38] sm:$0xff]  }
 0x4a0   : > { %11630 = vmatpush3.bf16.msra.mxu1 %v12205_v25  ;;  %v12208_v25 = vld [vmem:[%s16157_s28] sm:$0x3f]  }
 0x4a1   : > { %11631 = vmatprep.subr.bf16.mxu1 %v12206_v26 }
 0x4a4   : > { %11632 = vmatpush3.bf16.msra.mxu1 %v12206_v26  ;;  %v12209_v26 = vld [vmem:[%s16157_s28 + $0x8] sm:$0x3f]  }
 0x4a5   : > { %11633 = vmatprep.subr.bf16.mxu1 %v12207_v30 }
 0x4a8   : > { %11634 = vmatpush3.bf16.msra.mxu1 %v12207_v30  ;;  %v12218_v30 = vld [vmem:[#allocation24 + $0x58] sm:$0xff]  }
 0x4a9   : > { %11675 = vmatprep.subr.bf16.mxu1 %v14991_v21 }
 0x4ec   : > { %v3410_v28 = vpop.permute.xlu0 %3409 }
 0x4ed   : > { %3413 = vst.msk [vmem:[#allocation6] sm:$0x1] %vm3412_vm10, %v3410_v28  ;;  %v12214_v28 = vld [vmem:[#allocation24 + $0x48] sm:$0xff]   ;;  %vm2900_vm10 = vmand %vm2376_vm3, %vm2898_vm9  ;;  %vm2935_vm9 = vsmask.f32 256 }
 0x511   : > { %v3431_v54 = vpop.permute.xlu0 %3430 }
 0x512   : > { %3434 = vst.msk [vmem:[#allocation6] sm:$0x1] %vm3433_vm11, %v3431_v54  ;;  %v12231_v54 = vld [vmem:[#allocation24 + $0xa0] sm:$0xff]   ;;  %vm2902_vm11 = vcmp.ne.s32.totalorder %v14976_v52, 6 }
 0x513   : > { %vm2904_vm13 = vmand %vm2900_vm10, %vm2902_vm11  ;;  %vm2968_vm11 = vsmask.f32 7938 }
 0x554   : > { %v11607_v34 = vpop.f32.mrb[4].mxu1 }
 0x555   : > { %v2155_v35 = vpop.f32.mrb[5].mxu1 }
 0x556   : > { %v11608_v36 = vpop.f32.mrb[6].mxu1 }
 0x557   : > { %v2158_v37 = vpop.f32.mrb[7].mxu1 }
 0x560   : > { %v11587_v38 = vpop.f32.mrb[12].mxu0 }
 0x561   : > { %v2164_v39 = vadd.f32 %v11607_v34, %v11587_v38  ;;  %v2059_v40 = vpop.f32.mrb[13].mxu0  ;;  %v12224_v34 = vld [vmem:[#allocation24 + $0x70] sm:$0xff]  }
 0x562   : > { %v2156_v41 = vadd.f32 %v2155_v35, %v2059_v40  ;;  %v11588_v42 = vpop.f32.mrb[14].mxu0  ;;  %v12225_v35 = vld [vmem:[#allocation24 + $0x78] sm:$0xff]  }
 0x563   : > { %v2062_v43 = vpop.f32.mrb[15].mxu0  ;;  %v12228_v42 = vld [vmem:[#allocation24 + $0x88] sm:$0xff]  }
 0x564   : > { %v2159_v44 = vadd.f32 %v2158_v37, %v2062_v43 }
 0x56c   : > { %v11617_v46 = vpop.f32.mrb[16].mxu0 }
 0x56d   : > { %v2221_v47 = vpop.f32.mrb[17].mxu0  ;;  %v2236_v53 = vpack.c.bf16 %v11617_v46, %v11617_v46 }
 0x56e   : > { %v11618_v48 = vpop.f32.mrb[18].mxu0 }
 0x56f   : > { %v2224_v50 = vpop.f32.mrb[19].mxu0 }
 0x570   : > { %v2235_v51 = vpack.c.bf16 %v2224_v50, %v2221_v47  ;;  %v12229_v50 = vld [vmem:[#allocation24 + $0x90] sm:$0xff]  }
 0x572   : > { %11635 = vmatprep.mubr.bf16.mxu1 %v2235_v51  ;;  %v12226_v51 = vld [vmem:[%s16157_s28 + $0x10] sm:$0x3f]  }
 0x573   : > { %11636 = vmatmul.mubr.bf16.vlgmr.msra.gmra.mrb[8].mxu1 %v2236_v53  ;;  %v12230_v53 = vld [vmem:[#allocation24 + $0x98] sm:$0xff]  }
 0x574   : > { %11691 = vmatprep.mubr.msk.bf16.mxu1 %vm14080_vm2, %v14991_v21  ;;  %11676 = vmatpush3.bf16.msra.mxu1 %v12210_v55  ;;  %v12232_v55 = vld [vmem:[#allocation24 + $0xa8] sm:$0xff]  }
 0x575   : > { %11677 = vmatprep.subr.bf16.mxu1 %v14991_v21 }
 0x578   : > { %11678 = vmatpush3.bf16.msra.mxu1 %v12211_v56  ;;  %v12233_v56 = vld [vmem:[#allocation24 + $0xb0] sm:$0xff]  }
 0x579   : > { %11679 = vmatprep.subr.bf16.mxu1 %v14991_v21 }
 0x57c   : > { %11680 = vmatpush3.bf16.msra.mxu1 %v12213_v57  ;;  %v12234_v57 = vld [vmem:[#allocation24 + $0xb8] sm:$0xff]  }
 0x57d   : > { %11681 = vmatprep.subr.bf16.mxu1 %v14991_v21 }
 0x580   : > { %11682 = vmatpush3.bf16.msra.mxu1 %v12215_v58 }
 0x581   : > { %11683 = vmatprep.subr.bf16.mxu1 %v14991_v21 }
 0x584   : > { %11684 = vmatpush3.bf16.msra.mxu1 %v12217_v60 }
 0x585   : > { %11685 = vmatprep.subr.bf16.mxu1 %v14991_v21 }
 0x588   : > { %11686 = vmatpush3.bf16.msra.mxu1 %v12219_v61 }
 0x589   : > { %11687 = vmatprep.subr.bf16.mxu1 %v14991_v21 }
 0x58c   : > { %11688 = vmatpush3.bf16.msra.mxu1 %v12221_v62 }
 0x58d   : > { %11689 = vmatprep.subr.bf16.mxu1 %v14991_v21 }
 0x590   : > { %11690 = vmatpush3.bf16.msra.mxu1 %v12223_v33  ;;  %v12253_v33 = vld [vmem:[%s16162_s23 + $0xe0] sm:$0xff]  }
 0x591   : > { %11703 = vmatprep.subr.bf16.mxu1 %v14991_v21 }
 0x646   : > { %v11637_v63 = vpop.f32.mrb[8].mxu1 }
 0x647   : > { %v2352_v2 = vadd.f32 %v11637_v63, %v2164_v39  ;;  %v2336_v3 = vpop.f32.mrb[9].mxu1  ;;  %v12227_v39 = vld [vmem:[#allocation24 + $0x80] sm:$0xff]  }
 0x648   : > { %v2350_v4 = vadd.f32 %v2336_v3, %v2156_v41  ;;  %v11638_v5 = vpop.f32.mrb[10].mxu1 }
 0x649   : > { %v2362_v7 = vadd.f32 %v10447_v0, %v2352_v2  ;;  %v2339_v8 = vpop.f32.mrb[11].mxu1 }
 0x64a   : > { %v2360_v9 = vadd.f32 %v10447_v0, %v2350_v4  ;;  %v2351_v10 = vadd.f32 %v2339_v8, %v2159_v44 }
 0x64b   : > { %vm2365_vm14 = vcmp.ge.f32.partialorder %v2362_v7, 0.0  ;;  %v2368_v11 = vmul.f32 0.2, %v2362_v7 }
 0x64c   : > { %v2366_v12 = vmul.f32 0.2, %v2360_v9  ;;  %v2361_v14 = vadd.f32 %v10447_v0, %v2351_v10  ;;  %vm2363_vm0 = vcmp.ge.f32.partialorder %v2360_v9, 0.0 }
 0x64d   : > { %v2371_v17 = vsel %vm2365_vm14, %v2362_v7, %v2368_v11 }
 0x64e   : > { %vm2364_vm6 = vcmp.ge.f32.partialorder %v2361_v14, 0.0  ;;  %v2367_v18 = vmul.f32 0.2, %v2361_v14  ;;  %v2399_v19 = vsel %vm2393_vm15, %v2371_v17, 0.0  ;;  %v2369_v13 = vsel %vm2363_vm0, %v2360_v9, %v2366_v12  ;;  %v12235_v12 = vld [vmem:[%s16162_s23 + $0x40] sm:$0xff]  }
 0x64f   : > { %v2401_v23 = vpack.c.bf16 %v2399_v19, %v2399_v19  ;;  %v12237_v17 = vld [vmem:[%s16162_s23 + $0xc0] sm:$0xff]   ;;  %v12239_v19 = vld [vmem:[%s16162_s23 + $0x48] sm:$0xff]   ;;  %vm2907_vm0 = vcmp.ne.s32.totalorder %v15011_v1, 11 }
 0x650   : > { %v2370_v22 = vsel %vm2364_vm6, %v2361_v14, %v2367_v18  ;;  %v12236_v14 = vld [vmem:[%s16162_s23] sm:$0xff]   ;;  %vm2934_vm6 = vcmask 1040384  }
 0x651   : > { %v15034_v20 = vpack.c.bf16 %v2370_v22, %v2369_v13  ;;  %v15041_v24 = vsel %vm1694_vm1, %v2401_v23, 0  ;;  %v12238_v18 = vld [vmem:[%s16162_s23 + $0x80] sm:$0xff]   ;;  %v12240_v13 = vld [vmem:[%s16162_s23 + $0x8] sm:$0xff]   ;;  %v12243_v23 = vld [vmem:[%s16162_s23 + $0x50] sm:$0xff]  }
 0x652   : > { %v12241_v22 = vld [vmem:[%s16162_s23 + $0xc8] sm:$0xff]   ;;  %vm2936_vm10 = vmand %vm2934_vm6, %vm2935_vm9  ;;  %vm4063_vm9 = vcmask 97280  }
 0x653   : > { %11640 = vmatpush3.bf16.msk.msra.mxu0 %vm15030_vm7, %v15034_v20 }
 0x654   : > { %11641 = vmatprep.subr.bf16.mxu0 %v14991_v21 }
 0x657   : > { %11642 = vmatpush3.bf16.msra.mxu0 %v15041_v24 }
 0x658   : > { %11647 = vmatprep.subr.bf16.mxu0 %v14991_v21 }
 0x65a   : > { %11644 = vmatmul.mubr.msk.bf16.vlgmr.msra.gmra.mrb[20].mxu0 %vm2409_vm8, %v12208_v25  ;;  %v12245_v25 = vld [vmem:[%s16162_s23 + $0xd0] sm:$0xff]  }
 0x65b   : > { %11648 = vmatpush3.bf16.msk.msra.mxu0 %vm15030_vm7, %v15034_v20  ;;  %11651 = vmatprep.mubr.msk.bf16.mxu0 %vm14080_vm2, %v14991_v21 }
 0x65c   : > { %11649 = vmatprep.subr.bf16.mxu0 %v14991_v21 }
 0x65f   : > { %11650 = vmatpush3.bf16.msra.mxu0 %v15041_v24 }
 0x660   : > { %11655 = vmatprep.subr.bf16.mxu0 %v14991_v21 }
 0x662   : > { %11652 = vmatmul.mubr.msk.bf16.vlgmr.msra.gmra.mrb[24].mxu0 %vm2409_vm8, %v12209_v26  ;;  %v12246_v26 = vld [vmem:[%s16162_s23 + $0x90] sm:$0xff]  }
 0x663   : > { %11656 = vmatpush3.bf16.msra.mxu0 %v12212_v27  ;;  %11671 = vmatprep.mubr.msk.bf16.mxu0 %vm14080_vm2, %v14991_v21  ;;  %v12247_v27 = vld [vmem:[%s16162_s23 + $0x58] sm:$0xff]  }
 0x664   : > { %11657 = vmatprep.subr.bf16.mxu0 %v14991_v21 }
 0x667   : > { %11658 = vmatpush3.bf16.msra.mxu0 %v12214_v28  ;;  %v12248_v28 = vld [vmem:[%s16162_s23 + $0x18] sm:$0xff]  }
 0x668   : > { %11659 = vmatprep.subr.bf16.mxu0 %v14991_v21 }
 0x66b   : > { %11660 = vmatpush3.bf16.msra.mxu0 %v12216_v29  ;;  %v12249_v29 = vld [vmem:[%s16162_s23 + $0xd8] sm:$0xff]  }
 0x66c   : > { %11661 = vmatprep.subr.bf16.mxu0 %v14991_v21 }
 0x66f   : > { %11662 = vmatpush3.bf16.msra.mxu0 %v12218_v30  ;;  %v12250_v30 = vld [vmem:[%s16162_s23 + $0x98] sm:$0xff]  }
 0x670   : > { %11663 = vmatprep.subr.bf16.mxu0 %v14991_v21 }
 0x673   : > { %11664 = vmatpush3.bf16.msra.mxu0 %v12220_v31  ;;  %v12251_v31 = vld [vmem:[%s16162_s23 + $0x60] sm:$0xff]  }
 0x674   : > { %11665 = vmatprep.subr.bf16.mxu0 %v14991_v21 }
 0x677   : > { %11666 = vmatpush3.bf16.msra.mxu0 %v12222_v32  ;;  %v12252_v32 = vld [vmem:[%s16162_s23 + $0x20] sm:$0xff]  }
 0x678   : > { %11667 = vmatprep.subr.bf16.mxu0 %v14991_v21 }
 0x67b   : > { %11668 = vmatpush3.bf16.msra.mxu0 %v12224_v34  ;;  %v12254_v34 = vld [vmem:[%s16162_s23 + $0xa0] sm:$0xff]  }
 0x67c   : > { %11669 = vmatprep.subr.bf16.mxu0 %v14991_v21 }
 0x67f   : > { %11670 = vmatpush3.bf16.msra.mxu0 %v12225_v35  ;;  %v12255_v35 = vld [vmem:[%s16162_s23 + $0x68] sm:$0xff]  }
 0x680   : > { %11695 = vmatprep.subr.bf16.mxu0 %v14991_v21 }
 0x72d   : > { %v2450_v36 = vpop.f32.mrb[20].mxu0 }
 0x72e   : > { %v11645_v37 = vpop.f32.mrb[21].mxu0 }
 0x72f   : > { %v2453_v38 = vpop.f32.mrb[22].mxu0  ;;  %v12257_v37 = vld [vmem:[%s16162_s23 + $0xe8] sm:$0xff]  }
 0x730   : > { %v2457_v40 = vpack.c.bf16 %v2453_v38, %v2450_v36  ;;  %v11646_v41 = vpop.f32.mrb[23].mxu0  ;;  %v12256_v36 = vld [vmem:[%s16162_s23 + $0x28] sm:$0xff]  }
 0x731   : > { %v12258_v38 = vld [vmem:[%s16162_s23 + $0xa8] sm:$0xff]   ;;  %v12260_v41 = vld [vmem:[%s16162_s23 + $0x30] sm:$0xff]  }
 0x732   : > { %11692 = vmatmul.mubr.bf16.vlgmr.msra.gmra.mrb[12].mxu1 %v2457_v40  ;;  %v12261_v40 = vld [vmem:[%s16162_s23 + $0xf0] sm:$0xff]  }
 0x733   : > { %11704 = vmatpush3.bf16.msra.mxu1 %v12227_v39  ;;  %11719 = vmatprep.mubr.msk.bf16.mxu1 %vm14080_vm2, %v14991_v21  ;;  %v12259_v39 = vld [vmem:[%s16162_s23 + $0x70] sm:$0xff]  }
 0x734   : > { %11705 = vmatprep.subr.bf16.mxu1 %v14991_v21 }
 0x735   : > { %v2519_v43 = vpop.f32.mrb[24].mxu0 }
 0x736   : > { %v11653_v44 = vpop.f32.mrb[25].mxu0 }
 0x737   : > { %v2522_v46 = vpop.f32.mrb[26].mxu0  ;;  %11706 = vmatpush3.bf16.msra.mxu1 %v12228_v42  ;;  %v12262_v42 = vld [vmem:[%s16162_s23 + $0xb0] sm:$0xff]   ;;  %v12265_v44 = vld [vmem:[%s16162_s23 + $0xf8] sm:$0xff]  }
 0x738   : > { %v2526_v47 = vpack.c.bf16 %v2522_v46, %v2519_v43  ;;  %v11654_v48 = vpop.f32.mrb[27].mxu0  ;;  %11707 = vmatprep.subr.bf16.mxu1 %v14991_v21  ;;  %v12263_v43 = vld [vmem:[%s16162_s23 + $0x78] sm:$0xff]  }
 0x739   : > { %v12264_v46 = vld [vmem:[%s16162_s23 + $0x38] sm:$0xff]  }
 0x73a   : > { %11672 = vmatmul.mubr.bf16.vlgmr.msra.gmra.mrb[28].mxu0 %v2526_v47  ;;  %v12266_v47 = vld [vmem:[%s16162_s23 + $0xb8] sm:$0xff]  }
 0x73b   : > { %11696 = vmatpush3.bf16.msk.msra.mxu0 %vm15030_vm7, %v15034_v20  ;;  %11699 = vmatprep.mubr.msk.bf16.mxu0 %vm14080_vm2, %v14991_v21  ;;  %v12242_v20 = vld [vmem:[%s16162_s23 + $0x88] sm:$0xff]  }
 0x73c   : > { %11697 = vmatprep.subr.bf16.mxu0 %v14991_v21  ;;  %11708 = vmatpush3.bf16.msra.mxu1 %v12229_v50  ;;  %v10491_v50 = vld [vmem:[#allocation25] ss:$0 sm:$0xff] }
 0x73d   : > { %11709 = vmatprep.subr.bf16.mxu1 %v14991_v21 }
 0x73f   : > { %11698 = vmatpush3.bf16.msra.mxu0 %v15041_v24  ;;  %v12244_v24 = vld [vmem:[%s16162_s23 + $0x10] sm:$0xff]  }
 0x740   : > { %11710 = vmatpush3.bf16.msra.mxu1 %v12230_v53  ;;  %11382 = vmatprep.subr.bf16.mxu0 %v12235_v12 }
 0x741   : > { %11711 = vmatprep.subr.bf16.mxu1 %v14991_v21 }
 0x742   : > { %11700 = vmatmul.mubr.msk.bf16.vlgmr.msra.gmra.mrb[32].mxu0 %vm2409_vm8, %v12226_v51 }
 0x743   : > { %11383 = vmatpush3.bf16.msra.mxu0 %v12236_v14 }
 0x744   : > { %11712 = vmatpush3.bf16.msra.mxu1 %v12231_v54  ;;  %11384 = vmatprep.subr.bf16.mxu0 %v12239_v19 }
 0x745   : > { %11713 = vmatprep.subr.bf16.mxu1 %v14991_v21 }
 0x747   : > { %11385 = vmatpush3.bf16.msra.mxu0 %v12240_v13 }
 0x748   : > { %11714 = vmatpush3.bf16.msra.mxu1 %v12232_v55  ;;  %11386 = vmatprep.subr.bf16.mxu0 %v12243_v23 }
 0x749   : > { %11715 = vmatprep.subr.bf16.mxu1 %v14991_v21 }
 0x74b   : > { %11387 = vmatpush3.bf16.msra.mxu0 %v12244_v24 }
 0x74c   : > { %11716 = vmatpush3.bf16.msra.mxu1 %v12233_v56  ;;  %11388 = vmatprep.subr.bf16.mxu0 %v12247_v27 }
 0x74d   : > { %11717 = vmatprep.subr.bf16.mxu1 %v14991_v21 }
 0x74f   : > { %11389 = vmatpush3.bf16.msra.mxu0 %v12248_v28 }
 0x750   : > { %11718 = vmatpush3.bf16.msra.mxu1 %v12234_v57  ;;  %11390 = vmatprep.subr.bf16.mxu0 %v12251_v31 }
 0x751   : > { %11404 = vmatprep.subr.bf16.mxu1 %v12237_v17  ;;  %v2963_v17 = vld [vmem:[#allocation5 + $0x3] sm:$0x1] }
 0x753   : > { %11391 = vmatpush3.bf16.msra.mxu0 %v12252_v32 }
 0x754   : > { %11392 = vmatprep.subr.bf16.mxu0 %v12255_v35 }
 0x757   : > { %11393 = vmatpush3.bf16.msra.mxu0 %v12256_v36 }
 0x758   : > { %11394 = vmatprep.subr.bf16.mxu0 %v12259_v39 }
 0x75b   : > { %11395 = vmatpush3.bf16.msra.mxu0 %v12260_v41 }
 0x75c   : > { %11396 = vmatprep.subr.bf16.mxu0 %v12263_v43 }
 0x75f   : > { %11397 = vmatpush3.bf16.msra.mxu0 %v12264_v46  ;;  %v12268_v46 = vld [vmem:[#allocation28 + $0x8] sm:$0xff]  }
 0x760   : > { %11723 = vmatprep.subr.bf16.mxu0 %v14991_v21 }
 0x805   : > { %v2715_v58 = vpop.f32.mrb[12].mxu1 }
 0x806   : > { %v11693_v60 = vpop.f32.mrb[13].mxu1 }
 0x807   : > { %v2718_v61 = vpop.f32.mrb[14].mxu1 }
 0x808   : > { %v11694_v62 = vpop.f32.mrb[15].mxu1 }
 0x80d   : > { %v2626_v63 = vpop.f32.mrb[28].mxu0 }
 0x80e   : > { %v15086_v0 = vadd.f32 %v2715_v58, %v2626_v63  ;;  %v11673_v2 = vpop.f32.mrb[29].mxu0 }
 0x80f   : > { %v2629_v3 = vpop.f32.mrb[30].mxu0 }
 0x810   : > { %v15088_v4 = vadd.f32 %v2718_v61, %v2629_v3  ;;  %v11674_v5 = vpop.f32.mrb[31].mxu0 }
 0x815   : > { %v2767_v7 = vpop.f32.mrb[32].mxu0 }
 0x816   : > { %v11701_v8 = vpop.f32.mrb[33].mxu0 }
 0x817   : > { %v2770_v9 = vpop.f32.mrb[34].mxu0 }
 0x818   : > { %v2774_v10 = vpack.c.bf16 %v2770_v9, %v2767_v7  ;;  %v11702_v11 = vpop.f32.mrb[35].mxu0 }
 0x819   : > { %v2949_v11 = vld [vmem:[#allocation5 + $0x1] sm:$0x1] }
 0x81a   : > { %11720 = vmatmul.mubr.bf16.vlgmr.msra.gmra.mrb[16].mxu1 %v2774_v10  ;;  %v2937_v10 = vld [vmem:[#allocation5] sm:$0x1] }
 0x81b   : > { %11405 = vmatpush3.bf16.msra.mxu1 %v12238_v18  ;;  %v2958_v18 = vld [vmem:[#allocation5 + $0x2] sm:$0x1] }
 0x81c   : > { %11406 = vmatprep.subr.bf16.mxu1 %v12241_v22 }
 0x81f   : > { %11407 = vmatpush3.bf16.msra.mxu1 %v12242_v20 }
 0x820   : > { %11408 = vmatprep.subr.bf16.mxu1 %v12245_v25 }
 0x823   : > { %11409 = vmatpush3.bf16.msra.mxu1 %v12246_v26 }
 0x824   : > { %11410 = vmatprep.subr.bf16.mxu1 %v12249_v29 }
 0x827   : > { %11411 = vmatpush3.bf16.msra.mxu1 %v12250_v30 }
 0x828   : > { %11412 = vmatprep.subr.bf16.mxu1 %v12253_v33 }
 0x82b   : > { %11413 = vmatpush3.bf16.msra.mxu1 %v12254_v34 }
 0x82c   : > { %11414 = vmatprep.subr.bf16.mxu1 %v12257_v37 }
 0x82f   : > { %11415 = vmatpush3.bf16.msra.mxu1 %v12258_v38 }
 0x830   : > { %11416 = vmatprep.subr.bf16.mxu1 %v12261_v40 }
 0x833   : > { %11417 = vmatpush3.bf16.msra.mxu1 %v12262_v42 }
 0x834   : > { %11418 = vmatprep.subr.bf16.mxu1 %v12265_v44  ;;  %v12267_v44 = vld [vmem:[#allocation28] sm:$0xff]  }
 0x837   : > { %11419 = vmatpush3.bf16.msra.mxu1 %v12266_v47  ;;  %v12269_v47 = vld [vmem:[#allocation28 + $0x10] sm:$0xff]  }
 0x8ed   : > { %v2874_v48 = vpop.f32.mrb[16].mxu1 }
 0x8ee   : > { %v2881_v51 = vadd.f32 %v2874_v48, %v15086_v0  ;;  %v11721_v53 = vpop.f32.mrb[17].mxu1  ;;  %v12270_v48 = vld [vmem:[#allocation28 + $0x18] sm:$0xff]  }
 0x8ef   : > { %v2877_v54 = vpop.f32.mrb[18].mxu1 }
 0x8f0   : > { %v2890_v55 = vadd.f32 %v10491_v50, %v2881_v51  ;;  %v2882_v56 = vadd.f32 %v2877_v54, %v15088_v4  ;;  %v11722_v57 = vpop.f32.mrb[19].mxu1  ;;  %v12272_v51 = vld [vmem:[#allocation28 + $0x28] sm:$0xff]   ;;  %v10494_v54 = vld [vmem:[#allocation27] ss:$0 sm:$0xff] }
 0x8f2   : > { %vm2892_vm12 = vcmp.ge.f32.partialorder %v2890_v55, 0.0  ;;  %v2894_v58 = vmul.f32 0.2, %v2890_v55  ;;  %v2891_v60 = vadd.f32 %v10491_v50, %v2882_v56  ;;  %v12271_v50 = vld [vmem:[#allocation28 + $0x20] sm:$0xff]  }
 0x8f4   : > { %v2896_v61 = vsel %vm2892_vm12, %v2890_v55, %v2894_v58  ;;  %vm2893_vm14 = vcmp.ge.f32.partialorder %v2891_v60, 0.0  ;;  %v2895_v62 = vmul.f32 0.2, %v2891_v60  ;;  %vm2969_vm12 = vmand %vm2934_vm6, %vm2968_vm11  ;;  %vm4070_vm6 = vcmask 1045504  }
 0x8f5   : > { %v2910_v63 = vsel %vm2904_vm13, %v2896_v61, 0.0  ;;  %vm3734_vm13 = vcmask 261120   ;;  %vm7500_vm11 = vcmp.ne.s32.totalorder %v15014_v6, 18 }
 0x8f6   : > { %v2912_v0 = vpack.c.bf16 %v2910_v63, %v2910_v63  ;;  %v2897_v2 = vsel %vm2893_vm14, %v2891_v60, %v2895_v62  ;;  %vm3454_vm14 = vcmask 1041152  }
 0x8f7   : > { %v2911_v3 = vsel %vm2907_vm0, %v2897_v2, 0.0  ;;  %v12273_v2 = vld [vmem:[#allocation28 + $0x30] sm:$0xff]   ;;  %vm15180_vm0 = vcmp.lt.s32.totalorder %v2372_v45, 256 }
 0x8f8   : > { %v2920_v5 = vrot.slane %v2912_v0, %v14979_v59  ;;  %v2973_v7 = vpack.c.bf16 %v2911_v3, %v2911_v3  ;;  %v3596_v3 = vld [vmem:[#allocation31] sm:$0xff] }
 0x8fa   : > { %v2927_v4 = vrot.slane %v2920_v5, %v14979_v59  ;;  %v2940_v8 = vcombine.high %v2920_v5, %v2920_v5  ;;  %v2981_v9 = vrot.slane %v2973_v7, %v14979_v59 }
 0x8fc   : > { %v2929_v12 = vshrl.u32 %v2927_v4, 16  ;;  %v2947_v1 = vrot.slane %v2940_v8, %v14979_v59  ;;  %v2961_v14 = vcombine.high %v2927_v4, %v2927_v4  ;;  %v2999_v20 = vcombine.high %v2981_v9, %v2981_v9  ;;  %v12274_v8 = vld [vmem:[#allocation28 + $0x38] sm:$0xff]  }
 0x8fd   : > { %v2988_v25 = vrot.slane %v2981_v9, %v14979_v59 }
 0x8fe   : > { %v2953_v19 = vshrl.u32 %v2947_v1, 16  ;;  %v2938_v13 = vsel %vm2936_vm10, %v2929_v12, %v2937_v10  ;;  %v2950_v22 = vsel %vm2936_vm10, %v2947_v1, %v2949_v11  ;;  %v2964_v23 = vsel %vm2936_vm10, %v2961_v14, %v2963_v17  ;;  %v3601_v14 = vld [vmem:[#allocation31 + $0x28] sm:$0xff] }
 0x8ff   : > { %2939 = vst [vmem:[#allocation5] sm:$0x1] %v2938_v13  ;;  %2951 = vst [vmem:[#allocation5 + $0x1] sm:$0x1] %v2950_v22  ;;  %v3006_v26 = vrot.slane %v2999_v20, %v14979_v59  ;;  %v2966_v27 = vcombine.high %v2947_v1, %v2947_v1  ;;  %v2990_v28 = vshll.u32 %v2988_v25, 16  ;;  %v3597_v1 = vld [vmem:[#allocation31 + $0x8] sm:$0xff] }
 0x900   : > { %v2959_v24 = vsel %vm2936_vm10, %v2953_v19, %v2958_v18  ;;  %2965 = vst [vmem:[#allocation5 + $0x3] sm:$0x1] %v2964_v23  ;;  %v10541_v18 = vcombine.high %v3597_v1, %v3601_v14  ;;  %v3604_v19 = vld [vmem:[#allocation31 + $0x40] sm:$0xff]  ;;  %v10540_v22 = vcombine.low %v3597_v1, %v3601_v14  ;;  %vm9917_vm10 = vcmask 254976  }
 0x901   : > { %2960 = vst [vmem:[#allocation5 + $0x2] sm:$0x1] %v2959_v24  ;;  %v3008_v31 = vshll.u32 %v3006_v26, 16  ;;  %v3608_v13 = vld [vmem:[#allocation31 + $0x60] sm:$0xff]  ;;  %v3598_v26 = vld [vmem:[#allocation31 + $0x10] sm:$0xff] }
 0x902   : > { %v10546_v20 = vcombine.low %v3604_v19, %v3608_v13  ;;  %v10547_v23 = vcombine.high %v3604_v19, %v3608_v13 }
 0x906   : > { %v2970_v29 = vld [vmem:[#allocation5] sm:$0x1]  ;;  %v2993_v30 = vld [vmem:[#allocation5 + $0x1] sm:$0x1] }
 0x907   : > { %v2971_v32 = vsel %vm2969_vm12, %v2966_v27, %v2970_v29  ;;  %v2994_v33 = vsel %vm2969_vm12, %v2990_v28, %v2993_v30  ;;  %v3011_v34 = vld [vmem:[#allocation5 + $0x3] sm:$0x1] }
 0x908   : > { %2972 = vst [vmem:[#allocation5] sm:$0x1] %v2971_v32  ;;  %2995 = vst [vmem:[#allocation5 + $0x1] sm:$0x1] %v2994_v33  ;;  %v2996_v35 = vld [vmem:[#allocation5 + $0x2] sm:$0x1]  ;;  %v3012_v36 = vsel %vm2969_vm12, %v3008_v31, %v3011_v34 }
 0x909   : > { %v2997_v37 = vsel %vm2969_vm12, %v2973_v7, %v2996_v35  ;;  %3013 = vst [vmem:[#allocation5 + $0x3] sm:$0x1] %v3012_v36  ;;  %v3600_v7 = vld [vmem:[#allocation31 + $0x20] sm:$0xff]  ;;  %v3602_v27 = vld [vmem:[#allocation31 + $0x30] sm:$0xff]  ;;  %v1674_v34 = vld [vmem:[#allocation3] sm:$0x3] }
 0x90a   : > { %2998 = vst [vmem:[#allocation5 + $0x2] sm:$0x1] %v2997_v37  ;;  %v10538_v9 = vcombine.low %v3596_v3, %v3600_v7  ;;  %v10539_v10 = vcombine.high %v3596_v3, %v3600_v7  ;;  %v10543_v28 = vcombine.high %v3598_v26, %v3602_v27  ;;  %v10542_v29 = vcombine.low %v3598_v26, %v3602_v27  ;;  %v3606_v30 = vld [vmem:[#allocation31 + $0x50] sm:$0xff]  ;;  %v3605_v36 = vld [vmem:[#allocation31 + $0x48] sm:$0xff] }
 0x90b   : > { %v3610_v31 = vld [vmem:[#allocation31 + $0x70] sm:$0xff]  ;;  %3576 = vrot.lane.b32.xlu0 %v1674_v34, %s14082_s6  ;;  %v3609_v37 = vld [vmem:[#allocation31 + $0x68] sm:$0xff]  ;;  %v3624_v27 = vsub.s32 2, %v14976_v52 }
 0x90c   : > { %3738 = vmatprep.subr.bf16.mxu1 %v10539_v10  ;;  %v10550_v32 = vcombine.low %v3606_v30, %v3610_v31  ;;  %v10551_v33 = vcombine.high %v3606_v30, %v3610_v31 }
 0x911   : > { %v10495_v38 = vld.sshfl [vmem:[#allocation5] sm:$0x33 pattern:$0x75316420] }
 0x912   : > { %v3094_v39 = vcombine.high %v10495_v38, %v10495_v38  ;;  %v3101_v40 = vrot.slane %v10495_v38, %v14979_v59  ;;  %v10549_v38 = vcombine.high %v3605_v36, %v3609_v37 }
 0x914   : > { %v3108_v41 = vrot.slane %v3094_v39, %v14979_v59  ;;  %v3109_v43 = vcombine.high %v3101_v40, %v3101_v40 }
 0x916   : > { %3339 = vmatprep.mubr.bf16.mxu0 %v3108_v41  ;;  %v3110_v42 = vcombine.high %v3108_v41, %v3108_v41  ;;  %v3603_v41 = vld [vmem:[#allocation31 + $0x38] sm:$0xff] }
 0x917   : > { %3340 = vmatmul.mubr.bf16.vlgmr.msra.gmra.mrb[36].mxu0 %v3101_v40  ;;  %v3599_v40 = vld [vmem:[#allocation31 + $0x18] sm:$0xff] }
 0x918   : > { %3379 = vmatprep.mubr.bf16.mxu1 %v3110_v42  ;;  %11739 = vmatprep.mubr.msk.bf16.mxu0 %vm14080_vm2, %v14991_v21  ;;  %v10548_v42 = vcombine.low %v3605_v36, %v3609_v37  ;;  %v3640_v36 = vsub.s32 6, %v14976_v52 }
 0x919   : > { %3380 = vmatmul.mubr.bf16.vlgmr.msra.gmra.mrb[20].mxu1 %v3109_v43  ;;  %11724 = vmatpush3.bf16.msra.mxu0 %v12267_v44  ;;  %v10545_v43 = vcombine.high %v3599_v40, %v3603_v41  ;;  %v3607_v44 = vld [vmem:[#allocation31 + $0x58] sm:$0xff] }
 0x91a   : > { %11725 = vmatprep.subr.bf16.mxu0 %v14991_v21  ;;  %3739 = vmatpush1.bf16.msra.mxu1 %v10538_v9 }
 0x91b   : > { %3740 = vmatprep.subr.bf16.mxu1 %v10547_v23  ;;  %v10528_v23 = vld [vmem:[#allocation30] ss:$0 sm:$0xff] }
 0x91d   : > { %11726 = vmatpush3.bf16.msra.mxu0 %v12268_v46  ;;  %v3611_v46 = vld [vmem:[#allocation31 + $0x78] sm:$0xff] }
 0x91e   : > { %11727 = vmatprep.subr.bf16.mxu0 %v14991_v21  ;;  %3741 = vmatpush1.bf16.msra.mxu1 %v10546_v20 }
 0x91f   : > { %3820 = vmatprep.subr.bf16.mxu1 %v10543_v28 }
 0x921   : > { %11728 = vmatpush3.bf16.msra.mxu0 %v12269_v47  ;;  %v10544_v47 = vcombine.low %v3599_v40, %v3603_v41 }
 0x922   : > { %11729 = vmatprep.subr.bf16.mxu0 %v14991_v21 }
 0x925   : > { %11730 = vmatpush3.bf16.msra.mxu0 %v12270_v48  ;;  %v10553_v48 = vcombine.high %v3607_v44, %v3611_v46 }
 0x926   : > { %11731 = vmatprep.subr.bf16.mxu0 %v14991_v21 }
 0x929   : > { %11732 = vmatpush3.bf16.msra.mxu0 %v12271_v50  ;;  %v10552_v50 = vcombine.low %v3607_v44, %v3611_v46 }
 0x92a   : > { %11733 = vmatprep.subr.bf16.mxu0 %v14991_v21 }
 0x92d   : > { %11734 = vmatpush3.bf16.msra.mxu0 %v12272_v51  ;;  %v15168_v51 = vsub.s32 0, %v14976_v52 }
 0x92e   : > { %11735 = vmatprep.subr.bf16.mxu0 %v14991_v21 }
 0x931   : > { %11736 = vmatpush3.bf16.msra.mxu0 %v12273_v2  ;;  %v3632_v2 = vsub.s32 4, %v14976_v52 }
 0x932   : > { %11737 = vmatprep.subr.bf16.mxu0 %v14991_v21  ;;  %v14084_v21 = vmov 0  }
 0x933   : > { %3770 = vmatprep.mubr.bf16.mxu1 %v14084_v21 }
 0x934   : > { %10554 = vmatmul.mubr.msk.bf16.vlgmr.msra.gmra.mrb[24].mxu1 %vm3734_vm13, %v14972_v49 }
 0x935   : > { %11738 = vmatpush3.bf16.msra.mxu0 %v12274_v8  ;;  %3821 = vmatpush1.bf16.msra.mxu1 %v10542_v29  ;;  %v3628_v29 = vsub.s32 3, %v14976_v52 }
 0x936   : > { %3779 = vmatprep.subr.bf16.mxu0 %v10541_v18  ;;  %3852 = vmatprep.mubr.bf16.mxu1 %v14084_v21 }
 0x937   : > { %3822 = vmatprep.subr.bf16.mxu1 %v10551_v33 }
 0x939   : > { %3823 = vmatpush1.bf16.msra.mxu1 %v10550_v32 }
 0x93c   : > { %10556 = vmatmul.mubr.msk.bf16.vlgmr.msra.gmra.mrb[28].mxu1 %vm3734_vm13, %v14972_v49 }
 0x93d   : > { %4109 = vmatprep.mubr.bf16.mxu1 %v14084_v21 }
 0x9ea   : > { %v11398_v53 = vpop.f32.mrb[36].mxu0 }
 0x9eb   : > { %v11399_v55 = vpop.f32.mrb[37].mxu0 }
 0x9ec   : > { %v11400_v56 = vadd.f32 %v11399_v55, %v11398_v53  ;;  %v11401_v57 = vpop.f32.mrb[38].mxu0  ;;  %v11420_v58 = vpop.f32.mrb[20].mxu1  ;;  %v3612_v55 = vld [vmem:[#allocation33] sm:$0xff] }
 0x9ed   : > { %v11402_v60 = vpop.f32.mrb[39].mxu0  ;;  %v11421_v61 = vpop.f32.mrb[21].mxu1  ;;  %v3617_v57 = vrot.slane %v3612_v55, %v15168_v51  ;;  %v3633_v9 = vrot.slane %v3612_v55, %v3632_v2  ;;  %v3625_v31 = vrot.slane %v3612_v55, %v3624_v27  ;;  %v3629_v32 = vrot.slane %v3612_v55, %v3628_v29  ;;  %v12292_v27 = vld [vmem:[#allocation34 + $0x134] ss:$8 sps:$4 sm:$0xff]   ;;  %v12295_v29 = vld [vmem:[#allocation34 + $0x144] ss:$8 sps:$4 sm:$0xff]  }
 0x9ee   : > { %v3342_v62 = vadd.f32 %v11400_v56, %v10494_v54  ;;  %v11422_v63 = vadd.f32 %v11421_v61, %v11420_v58  ;;  %v11423_v0 = vpop.f32.mrb[22].mxu1  ;;  %v15171_v54 = vsub.s32 1, %v14976_v52 }
 0x9ef   : > { %v11424_v5 = vpop.f32.mrb[23].mxu1 }
 0x9f0   : > { %v3382_v4 = vadd.f32 %v11422_v63, %v3342_v62  ;;  %v3621_v58 = vrot.slane %v3612_v55, %v15171_v54  ;;  %v3636_v5 = vsub.s32 5, %v14976_v52 }
 0x9f2   : > { %vm3387_vm2 = vcmp.ge.f32.partialorder %v3382_v4, 0.0  ;;  %v3388_v11 = vmul.f32 0.2, %v3382_v4  ;;  %v3637_v10 = vrot.slane %v3612_v55, %v3636_v5 }
 0x9f4   : > { %v3389_v12 = vsel %vm3387_vm2, %v3382_v4, %v3388_v11 }
 0x9f5   : > { %v3435_v17 = vpack.c.bf16 %v3389_v12, %v3389_v12 }
 0x9f7   : > { %v3443_v24 = vrot.slane %v3435_v17, %v14979_v59 }
 0x9f9   : > { %v3450_v25 = vrot.slane %v3443_v24, %v14979_v59 }
 0x9fb   : > { %3451 = vrot.lane.b32.xlu1 %v3450_v25, %s14085_s4 }
 0xa07   : > { %v3772_v53 = vpop.f32.mrb[24].mxu1 }
 0xa08   : > { %v3774_v56 = vpop.f32.mrb[25].mxu1  ;;  %v3773_v62 = vadd.f32 %v3772_v53, %v3617_v57 }
 0xa09   : > { %v3776_v60 = vpop.f32.mrb[26].mxu1  ;;  %v3775_v63 = vadd.f32 %v3774_v56, %v3621_v58 }
 0xa0a   : > { %v3777_v61 = vpop.f32.mrb[27].mxu1 }
 0xa0f   : > { %v3854_v3 = vpop.f32.mrb[28].mxu1 }
 0xa10   : > { %v3856_v7 = vpop.f32.mrb[29].mxu1  ;;  %v3855_v17 = vadd.f32 %v3854_v3, %v3633_v9 }
 0xa11   : > { %v3858_v11 = vpop.f32.mrb[30].mxu1  ;;  %v3857_v18 = vadd.f32 %v3856_v7, %v3637_v10 }
 0xa12   : > { %v3859_v1 = vpop.f32.mrb[31].mxu1 }
 0xa13   : > { %v3954_v19 = vcombine.low %v3855_v17, %v3857_v18  ;;  %v12275_v18 = vld [vmem:[%s16165_s20 + $0xc] sm:$0xff]  }
 0xa15   : > { %v3961_v13 = vrot.slane %v3954_v19, %v14979_v59  ;;  %v12277_v19 = vld [vmem:[%s16165_s20] sm:$0xff]  }
 0xa17   : > { %v4018_v45 = vcombine.high %v3961_v13, %v3961_v13 }
 0xa19   : > { %v4025_v20 = vrot.slane %v4018_v45, %v14979_v59  ;;  %v12284_v45 = vld [vmem:[#allocation34 + $0x110] ss:$8 sps:$4 sm:$0xff]  }
 0xa1b   : > { %4028 = vst.msk [vmem:[#allocation7 + $0x11] ss:$8 sm:$0x3] %vm15180_vm0, %v4025_v20  ;;  %v12289_v20 = vld [vmem:[#allocation34 + $0x124] ss:$8 sps:$4 sm:$0xff]  }
 0xa6d   : > { %v3452_v35 = vpop.permute.xlu1 %3451 }
 0xa6e   : > { %3455 = vst.msk [vmem:[#allocation6] sm:$0x1] %vm3454_vm14, %v3452_v35 }
 0xa75   : > { %v3456_v39 = vld [vmem:[#allocation6] sm:$0x1] }
 0xa76   : > { %11740 = vmatmul.mubr.bf16.vlgmr.msra.gmra.mrb[40].mxu0 %v3456_v39  ;;  %v3644_v39 = vsub.s32 7, %v14976_v52 }
 0xa77   : > { %3780 = vmatpush1.bf16.msra.mxu0 %v10540_v22  ;;  %3811 = vmatprep.mubr.bf16.mxu0 %v14084_v21  ;;  %v3968_v22 = vrot.slane %v3961_v13, %v14979_v59  ;;  %v12281_v13 = vld [vmem:[#allocation34 + $0x100] ss:$8 sps:$4 sm:$0xff]  }
 0xa78   : > { %3781 = vmatprep.subr.bf16.mxu0 %v10549_v38  ;;  %v3645_v46 = vrot.slane %v3612_v55, %v3644_v39  ;;  %v12307_v39 = vld [vmem:[#allocation34 + $0x184] ss:$8 sps:$4 sm:$0xff]  }
 0xa79   : > { %3971 = vst.msk [vmem:[#allocation7 + $0x3] ss:$8 sm:$0x3] %vm15180_vm0, %v3968_v22  ;;  %v12286_v22 = vld [vmem:[#allocation34 + $0x114] ss:$8 sps:$4 sm:$0xff]  }
 0xa7b   : > { %3782 = vmatpush1.bf16.msra.mxu0 %v10548_v42 }
 0xa7c   : > { %3861 = vmatprep.subr.bf16.mxu0 %v10545_v43  ;;  %v3641_v43 = vrot.slane %v3612_v55, %v3640_v36  ;;  %v12299_v36 = vld [vmem:[#allocation34 + $0x160] ss:$8 sps:$4 sm:$0xff]  }
 0xa7e   : > { %10555 = vmatmul.mubr.msk.bf16.vlgmr.msra.gmra.mrb[44].mxu0 %vm3734_vm13, %v14972_v49 }
 0xa7f   : > { %3862 = vmatpush1.bf16.msra.mxu0 %v10544_v47  ;;  %3893 = vmatprep.mubr.bf16.mxu0 %v14084_v21 }
 0xa80   : > { %3863 = vmatprep.subr.bf16.mxu0 %v10553_v48 }
 0xa83   : > { %3864 = vmatpush1.bf16.msra.mxu0 %v10552_v50 }
 0xa86   : > { %10557 = vmatmul.mubr.msk.bf16.vlgmr.msra.gmra.mrb[48].mxu0 %vm3734_vm13, %v14972_v49  ;;  %v3908_v49 = vcombine.low %v3773_v62, %v3775_v63 }
 0xa87   : > { %4214 = vmatprep.mubr.bf16.mxu0 %v14084_v21 }
 0xa88   : > { %v3915_v0 = vrot.slane %v3908_v49, %v14979_v59 }
 0xa8a   : > { %v3922_v4 = vrot.slane %v3915_v0, %v14979_v59  ;;  %v3994_v8 = vcombine.high %v3915_v0, %v3915_v0 }
 0xa8c   : > { %3929 = vst.msk [vmem:[#allocation7 + $0x1] ss:$8 sm:$0x3] %vm15180_vm0, %v3922_v4  ;;  %v4001_v14 = vrot.slane %v3994_v8, %v14979_v59 }
 0xa8e   : > { %4004 = vst.msk [vmem:[#allocation7 + $0x7] ss:$8 sm:$0x3] %vm15180_vm0, %v4001_v14  ;;  %v12283_v14 = vld [vmem:[#allocation34 + $0x104] ss:$8 sps:$4 sm:$0xff]  }
 0xb49   : > { %v3562_v24 = vpop.f32.mrb[40].mxu0 }
 0xb4a   : > { %v15196_v25 = vadd.f32 %v10528_v23, %v3562_v24  ;;  %v11741_v26 = vpop.f32.mrb[41].mxu0  ;;  %v12276_v23 = vld [vmem:[%s16165_s20 + $0x14] ss:$0 sps:$4 sm:$0x33]  }
 0xb4b   : > { %v3565_v28 = vpop.f32.mrb[42].mxu0  ;;  %v12278_v24 = vld [vmem:[%s16165_s20 + $0x8] ss:$0 sps:$4 sm:$0x33]   ;;  %v12287_v26 = vld [vmem:[#allocation34 + $0x120] ss:$8 sps:$4 sm:$0xff]  }
 0xb4c   : > { %13039 = vtanh.f32 %v15196_v25  ;;  %v11742_v30 = vpop.f32.mrb[43].mxu0  ;;  %v12290_v28 = vld [vmem:[#allocation34 + $0x130] ss:$8 sps:$4 sm:$0xff]  }
 0xb4d   : > { %v12279_v30 = vld [vmem:[%s16165_s20 + $0x18] sm:$0xff]  }
 0xb51   : > { %v3813_v33 = vpop.f32.mrb[44].mxu0 }
 0xb52   : > { %v3814_v34 = vadd.f32 %v3813_v33, %v3625_v31  ;;  %v3815_v35 = vpop.f32.mrb[45].mxu0  ;;  %v12293_v31 = vld [vmem:[#allocation34 + $0x140] ss:$8 sps:$4 sm:$0xff]   ;;  %v12296_v33 = vld [vmem:[#allocation34 + $0x150] ss:$8 sps:$4 sm:$0xff]  }
 0xb53   : > { %v3816_v37 = vadd.f32 %v3815_v35, %v3629_v32  ;;  %v3817_v38 = vpop.f32.mrb[46].mxu0  ;;  %v12298_v32 = vld [vmem:[#allocation34 + $0x154] ss:$8 sps:$4 sm:$0xff]  }
 0xb54   : > { %v3818_v40 = vpop.f32.mrb[47].mxu0  ;;  %v12280_v35 = vld [vmem:[%s16165_s20 + $0x20] ss:$0 sps:$4 sm:$0x33]   ;;  %v12302_v38 = vld [vmem:[#allocation34 + $0x170] ss:$8 sps:$4 sm:$0xff]  }
 0xb55   : > { %v3933_v41 = vcombine.low %v3814_v34, %v3816_v37  ;;  %v12301_v34 = vld [vmem:[#allocation34 + $0x164] ss:$8 sps:$4 sm:$0xff]   ;;  %v12304_v37 = vld [vmem:[#allocation34 + $0x174] ss:$8 sps:$4 sm:$0xff]   ;;  %v12305_v40 = vld [vmem:[#allocation34 + $0x180] ss:$8 sps:$4 sm:$0xff]  }
 0xb56   : > { %v13040_v42 = vpop.eup %13039 }
 0xb57   : > { %v3940_v44 = vrot.slane %v3933_v41, %v14979_v59  ;;  %3581 = vrot.lane.b32.xlu1 %v13040_v42, %s14082_s6  ;;  %v12310_v41 = vld [vmem:[#allocation34 + $0x194] ss:$8 sps:$4 sm:$0xff]   ;;  %v12308_v42 = vld [vmem:[#allocation34 + $0x190] ss:$8 sps:$4 sm:$0xff]  }
 0xb59   : > { %v3947_v47 = vrot.slane %v3940_v44, %v14979_v59  ;;  %v4006_v48 = vcombine.high %v3940_v44, %v3940_v44  ;;  %v3895_v50 = vpop.f32.mrb[48].mxu0  ;;  %v12311_v44 = vld [vmem:[#allocation34 + $0x1a0] ss:$8 sps:$4 sm:$0xff]  }
 0xb5a   : > { %v3896_v53 = vadd.f32 %v3895_v50, %v3641_v43  ;;  %v3897_v56 = vpop.f32.mrb[49].mxu0  ;;  %v12313_v43 = vld [vmem:[#allocation34 + $0x1a4] ss:$8 sps:$4 sm:$0xff]  }
 0xb5b   : > { %3950 = vst.msk [vmem:[#allocation7 + $0x2] ss:$8 sm:$0x3] %vm15180_vm0, %v3947_v47  ;;  %v4013_v57 = vrot.slane %v4006_v48, %v14979_v59  ;;  %v3898_v58 = vadd.f32 %v3897_v56, %v3645_v46  ;;  %v3899_v60 = vpop.f32.mrb[50].mxu0  ;;  %v12316_v46 = vld [vmem:[#allocation34 + $0x1b4] ss:$8 sps:$4 sm:$0xff]  }
 0xb5c   : > { %v3900_v61 = vpop.f32.mrb[51].mxu0  ;;  %v12314_v47 = vld [vmem:[#allocation34 + $0x1b0] ss:$8 sps:$4 sm:$0xff]   ;;  %v10537_v48 = vmul.f32 -1.442695, %v15196_v25 }
 0xb5d   : > { %4016 = vst.msk [vmem:[#allocation7 + $0x10] ss:$8 sm:$0x3] %vm15180_vm0, %v4013_v57  ;;  %v3975_v62 = vcombine.low %v3896_v53, %v3898_v58  ;;  %v12319_v56 = vld [vmem:[#allocation34 + $0x1c4] ss:$8 sps:$4 sm:$0xff]  }
 0xb5e   : > { %13041 = vpow2.f32 %v10537_v48  ;;  %v12317_v57 = vld [vmem:[#allocation34 + $0x1c0] ss:$8 sps:$4 sm:$0xff]   ;;  %v12320_v58 = vld [vmem:[#allocation34 + $0x1d0] ss:$8 sps:$4 sm:$0xff]   ;;  %v12322_v60 = vld [vmem:[#allocation34 + $0x1d4] ss:$8 sps:$4 sm:$0xff]  }
 0xb5f   : > { %v3982_v55 = vrot.slane %v3975_v62, %v14979_v59  ;;  %v12325_v61 = vld [vmem:[#allocation34 + $0x1e4] ss:$8 sps:$4 sm:$0xff]   ;;  %v12323_v62 = vld [vmem:[#allocation34 + $0x1e0] ss:$8 sps:$4 sm:$0xff]   ;;  %v12328_v25 = vld [vmem:[#allocation34 + $0x1f4] ss:$8 sps:$4 sm:$0xff]  }
 0xb61   : > { %v3989_v63 = vrot.slane %v3982_v55, %v14979_v59  ;;  %v4030_v49 = vcombine.high %v3982_v55, %v3982_v55 }
 0xb63   : > { %3992 = vst.msk [vmem:[#allocation7 + $0x4] ss:$8 sm:$0x3] %vm15180_vm0, %v3989_v63  ;;  %v4037_v0 = vrot.slane %v4030_v49, %v14979_v59 }
 0xb65   : > { %4040 = vst.msk [vmem:[#allocation7 + $0x12] ss:$8 sm:$0x3] %vm15180_vm0, %v4037_v0  ;;  %v12326_v0 = vld [vmem:[#allocation34 + $0x1f0] ss:$8 sps:$4 sm:$0xff]  }
 0xb68   : > { %v13042_v50 = vpop.eup %13041 }
 0xb69   : > { %v3571_v53 = vadd.f32 1.0, %v13042_v50 }
 0xb6a   : > { %v15218_v2 = vld [vmem:[#allocation7 + $0x8] sm:$0xff]  ;;  %v15220_v3 = vld [vmem:[#allocation7] sm:$0xff] }
 0xb6b   : > { %v4047_v7 = vmax.f32 %v15218_v2, 0.0  ;;  %v4046_v8 = vmax.f32 %v15220_v3, 0.0  ;;  %13043 = vrcp.f32 %v3571_v53 }
 0xb6c   : > { %v15222_v5 = vld [vmem:[#allocation7 + $0x18] sm:$0xf]  ;;  %v15225_v4 = vld [vmem:[#allocation7 + $0x10] sm:$0xf] }
 0xb6d   : > { %v4049_v9 = vmax.f32 %v15222_v5, 0.0  ;;  %v4048_v59 = vmax.f32 %v15225_v4, 0.0  ;;  %v6035_v10 = vpack.c.bf16 %v15222_v5, %v15218_v2  ;;  %v6034_v11 = vpack.c.bf16 %v15225_v4, %v15220_v3 }
 0xb6f   : > { %v4051_v12 = vpack.c.bf16 %v4049_v9, %v4047_v7  ;;  %v4050_v1 = vpack.c.bf16 %v4048_v59, %v4046_v8  ;;  %v12331_v7 = vld [vmem:[#allocation34 + $0x4] ss:$8 sps:$4 sm:$0xff]   ;;  %v3577_v8 = vpop.permute.xlu0 %3576 }
 0xb71   : > { %10560 = vmatprep.subr.msk.bf16.mxu1 %vm4070_vm6, %v4051_v12  ;;  %10568 = vmatprep.subr.msk.bf16.mxu0 %vm4070_vm6, %v4051_v12  ;;  %v4072_v17 = vsel %vm4070_vm6, %v4050_v1, 0 }
 0xb72   : > { %4078 = vmatpush1.bf16.msra.mxu1 %v4072_v17  ;;  %4183 = vmatpush1.bf16.msra.mxu0 %v4072_v17 }
 0xb73   : > { %10640 = vmatprep.subr.msk.bf16.mxu0 %vm4070_vm6, %v4051_v12  ;;  %4430 = vmatprep.subr.bf16.mxu1 %v12283_v14 }
 0xb75   : > { %10569 = vmatmul.mubr.msk.bf16.vlgmr.msra.gmra.mrb[52].mxu0 %vm4063_vm9, %v12275_v18  ;;  %10561 = vmatmul.mubr.msk.bf16.vlgmr.msra.gmra.mrb[32].mxu1 %vm4063_vm9, %v12277_v19  ;;  %v15256_v55 = vpop.eup %13043 }
 0xb76   : > { %4711 = vmatpush1.bf16.msra.mxu0 %v4072_v17  ;;  %4224 = vmatprep.mubr.bf16.mxu0 %v14084_v21  ;;  %v3579_v9 = vmul.f32 %v15256_v55, %v3577_v8  ;;  %v12352_v8 = vld [vmem:[#allocation34 + $0x74] ss:$8 sps:$4 sm:$0xff]  }
 0xb77   : > { %4119 = vmatprep.mubr.bf16.mxu1 %v14084_v21  ;;  %4431 = vmatpush1.bf16.msra.mxu1 %v12281_v13 }
 0xb78   : > { %4432 = vmatprep.subr.bf16.mxu1 %v12286_v22 }
 0xb7b   : > { %4433 = vmatpush1.bf16.msra.mxu1 %v12284_v45 }
 0xb7c   : > { %4434 = vmatprep.subr.bf16.mxu1 %v12289_v20 }
 0xb7d   : > { %10570 = vmatmul.mubr.msk.bf16.gmra.mrb[56].mxu0 %vm4063_vm9, %v12276_v23  ;;  %10562 = vmatmul.mubr.msk.bf16.gmra.mrb[36].mxu1 %vm4063_vm9, %v12278_v24 }
 0xb7e   : > { %4742 = vmatprep.mubr.bf16.mxu0 %v14084_v21 }
 0xb7f   : > { %4435 = vmatpush1.bf16.msra.mxu1 %v12287_v26 }
 0xb80   : > { %4436 = vmatprep.subr.bf16.mxu1 %v12292_v27  ;;  %v12329_v27 = vld [vmem:[#allocation34] ss:$8 sps:$4 sm:$0xff]  }
 0xb83   : > { %4437 = vmatpush1.bf16.msra.mxu1 %v12290_v28 }
 0xb84   : > { %4438 = vmatprep.subr.bf16.mxu1 %v12295_v29  ;;  %v12334_v29 = vld [vmem:[#allocation34 + $0x14] ss:$8 sps:$4 sm:$0xff]  }
 0xb85   : > { %10641 = vmatmul.mubr.msk.bf16.vlgmr.msra.gmra.mrb[60].mxu0 %vm4063_vm9, %v12279_v30  ;;  %v12332_v30 = vld [vmem:[#allocation34 + $0x10] ss:$8 sps:$4 sm:$0xff]  }
 0xb86   : > { %4752 = vmatprep.mubr.bf16.mxu0 %v14084_v21 }
 0xb87   : > { %4439 = vmatpush1.bf16.msra.mxu1 %v12293_v31 }
 0xb88   : > { %4440 = vmatprep.subr.bf16.mxu1 %v12298_v32 }
 0xb8b   : > { %4441 = vmatpush1.bf16.msra.mxu1 %v12296_v33  ;;  %v12337_v33 = vld [vmem:[#allocation34 + $0x24] ss:$8 sps:$4 sm:$0xff]  }
 0xb8c   : > { %4442 = vmatprep.subr.bf16.mxu1 %v12301_v34 }
 0xb8d   : > { %10642 = vmatmul.mubr.msk.bf16.gmra.mrb[64].mxu0 %vm4063_vm9, %v12280_v35 }
 0xb8e   : > { %5104 = vmatprep.mubr.bf16.mxu0 %v14084_v21 }
 0xb8f   : > { %4443 = vmatpush1.bf16.msra.mxu1 %v12299_v36 }
 0xb90   : > { %4444 = vmatprep.subr.bf16.mxu1 %v12304_v37 }
 0xb93   : > { %4445 = vmatpush1.bf16.msra.mxu1 %v12302_v38 }
 0xb94   : > { %4446 = vmatprep.subr.bf16.mxu1 %v12307_v39 }
 0xb97   : > { %4447 = vmatpush1.bf16.msra.mxu1 %v12305_v40 }
 0xb98   : > { %4448 = vmatprep.subr.bf16.mxu1 %v12310_v41 }
 0xb9b   : > { %4449 = vmatpush1.bf16.msra.mxu1 %v12308_v42  ;;  %v12335_v42 = vld [vmem:[#allocation34 + $0x20] ss:$8 sps:$4 sm:$0xff]  }
 0xb9c   : > { %4450 = vmatprep.subr.bf16.mxu1 %v12313_v43  ;;  %v12340_v43 = vld [vmem:[#allocation34 + $0x34] ss:$8 sps:$4 sm:$0xff]  }
 0xb9f   : > { %4451 = vmatpush1.bf16.msra.mxu1 %v12311_v44  ;;  %v12338_v44 = vld [vmem:[#allocation34 + $0x30] ss:$8 sps:$4 sm:$0xff]  }
 0xba0   : > { %4452 = vmatprep.subr.bf16.mxu1 %v12316_v46 }
 0xba3   : > { %4453 = vmatpush1.bf16.msra.mxu1 %v12314_v47  ;;  %v12343_v47 = vld [vmem:[#allocation34 + $0x44] ss:$8 sps:$4 sm:$0xff]  }
 0xba4   : > { %4454 = vmatprep.subr.bf16.mxu1 %v12319_v56 }
 0xba7   : > { %4455 = vmatpush1.bf16.msra.mxu1 %v12317_v57  ;;  %v12341_v57 = vld [vmem:[#allocation34 + $0x40] ss:$8 sps:$4 sm:$0xff]  }
 0xba8   : > { %4456 = vmatprep.subr.bf16.mxu1 %v12322_v60  ;;  %v12346_v60 = vld [vmem:[#allocation34 + $0x54] ss:$8 sps:$4 sm:$0xff]  }
 0xbab   : > { %4457 = vmatpush1.bf16.msra.mxu1 %v12320_v58 }
 0xbac   : > { %4458 = vmatprep.subr.bf16.mxu1 %v12325_v61  ;;  %v12344_v61 = vld [vmem:[#allocation34 + $0x50] ss:$8 sps:$4 sm:$0xff]  }
 0xbaf   : > { %4459 = vmatpush1.bf16.msra.mxu1 %v12323_v62 }
 0xbb0   : > { %4460 = vmatprep.subr.bf16.mxu1 %v12328_v25 }
 0xbb3   : > { %4461 = vmatpush1.bf16.msra.mxu1 %v12326_v0 }
 0xbb4   : > { %4641 = vmatprep.subr.bf16.mxu1 %v12331_v7  ;;  %v12347_v7 = vld [vmem:[#allocation34 + $0x60] ss:$8 sps:$4 sm:$0xff]  }
 0xbc9   : > { %v3582_v63 = vpop.permute.xlu1 %3581 }
 0xbca   : > { %v3584_v49 = vmul.f32 %v15256_v55, %v3582_v63  ;;  %v12349_v63 = vld [vmem:[#allocation34 + $0x64] ss:$8 sps:$4 sm:$0xff]  }
 0xbcc   : > { %3586 = vrot.lane.b32.xlu1 %v3584_v49, %s14082_s6 }
 0xc3e   : > { %v3587_v59 = vpop.permute.xlu1 %3586 }
 0xc3f   : > { %v3589_v12 = vadd.f32 %v3587_v59, %v3579_v9  ;;  %v12350_v9 = vld [vmem:[#allocation34 + $0x70] ss:$8 sps:$4 sm:$0xff]   ;;  %v12355_v59 = vld [vmem:[#allocation34 + $0x84] ss:$8 sps:$4 sm:$0xff]  }
 0xc41   : > { %13045 = vtanh.f32 %v3589_v12 }
 0xc48   : > { %v4216_v1 = vpop.f32.mrb[52].mxu0  ;;  %v15261_v14 = vpop.f32.mrb[32].mxu1 }
 0xc49   : > { %v4218_v17 = vpop.f32.mrb[53].mxu0  ;;  %v4113_v18 = vpop.f32.mrb[33].mxu1 }
 0xc4a   : > { %v4220_v19 = vpop.f32.mrb[54].mxu0  ;;  %v15263_v13 = vpop.f32.mrb[34].mxu1 }
 0xc4b   : > { %v13046_v22 = vpop.eup %13045  ;;  %v4233_v45 = vpack.c.bf16 %v4220_v19, %v4216_v1  ;;  %v4222_v20 = vpop.f32.mrb[55].mxu0  ;;  %v4128_v23 = vpack.c.bf16 %v15263_v13, %v15261_v14  ;;  %v12358_v1 = vld [vmem:[#allocation34 + $0x94] ss:$8 sps:$4 sm:$0xff]   ;;  %v12359_v19 = vld [vmem:[#allocation34 + $0xa0] ss:$8 sps:$4 sm:$0xff]  }
 0xc4c   : > { %v4117_v24 = vpop.f32.mrb[35].mxu1  ;;  %v4234_v26 = vpack.c.bf16 %v4222_v20, %v4218_v17  ;;  %3592 = vrot.lane.b32.xlu0 %v13046_v22, %s14082_s6  ;;  %v12356_v17 = vld [vmem:[#allocation34 + $0x90] ss:$8 sps:$4 sm:$0xff]   ;;  %v12364_v22 = vld [vmem:[#allocation34 + $0xb4] ss:$8 sps:$4 sm:$0xff]   ;;  %s13874_s6 = scalar_lea.vmem %s15942_s22, 640 }
 0xc4d   : > { %v4129_v28 = vpack.c.bf16 %v4117_v24, %v4113_v18  ;;  %v12361_v18 = vld [vmem:[#allocation34 + $0xa4] ss:$8 sps:$4 sm:$0xff]   ;;  %v12365_v24 = vld [vmem:[#allocation34 + $0xc0] ss:$8 sps:$4 sm:$0xff]   ;;  %p13875_p7 = scmp.ne.s32.totalorder %s15942_s22, %s13874_s6 }
 0xc4e   : > { %4462 = vmatprep.mubr.bf16.mxu1 %v4234_v26  ;;  %v12367_v20 = vld [vmem:[#allocation34 + $0xc4] ss:$8 sps:$4 sm:$0xff]   ;;  %v12370_v26 = vld [vmem:[#allocation34 + $0xd4] ss:$8 sps:$4 sm:$0xff]   ;;  %v12389_v13 = vld [vmem:[#allocation34 + $0x240] ss:$8 sps:$4 sm:$0xff]  }
 0xc4f   : > { %4463 = vmatmul.mubr.bf16.vlgmr.msra.gmra.mrb[40].mxu1 %v4233_v45  ;;  %v12362_v45 = vld [vmem:[#allocation34 + $0xb0] ss:$8 sps:$4 sm:$0xff]   ;;  %v12391_v14 = vld [vmem:[#allocation34 + $0x244] ss:$8 sps:$4 sm:$0xff]   ;;  %p13876_p11 = pnand %p13875_p7, %p16177_p10 }
 0xc50   : > { %4642 = vmatpush1.bf16.msra.mxu1 %v12329_v27  ;;  %9920 = vrot.lane.b32.xlu0 %v3589_v12, %s14085_s4  ;;  %v4226_v31 = vpop.f32.mrb[56].mxu0  ;;  %v15269_v32 = vpop.f32.mrb[36].mxu1  ;;  %v12353_v12 = vld [vmem:[#allocation34 + $0x80] ss:$8 sps:$4 sm:$0xff]   ;;  %v12368_v27 = vld [vmem:[#allocation34 + $0xd0] ss:$8 sps:$4 sm:$0xff]  }
 0xc51   : > { %4643 = vmatprep.subr.bf16.mxu1 %v12334_v29  ;;  %v4228_v34 = vpop.f32.mrb[57].mxu0  ;;  %v15271_v35 = vpop.f32.mrb[37].mxu1  ;;  %v4235_v39 = vpack.c.bf16 %v4226_v31, %v4226_v31  ;;  %v12371_v29 = vld [vmem:[#allocation34 + $0xe0] ss:$8 sps:$4 sm:$0xff]   ;;  %v12374_v31 = vld [vmem:[#allocation34 + $0xf0] ss:$8 sps:$4 sm:$0xff]   ;;  %p13877_p6 = pneg %p13876_p11 }
 0xc52   : > { %v4236_v36 = vpack.c.bf16 %v4228_v34, %v4228_v34  ;;  %v4230_v37 = vpop.f32.mrb[58].mxu0  ;;  %v4125_v38 = vpop.f32.mrb[38].mxu1  ;;  %v12377_v34 = vld [vmem:[#allocation34 + $0x200] ss:$8 sps:$4 sm:$0xff]  }
 0xc53   : > { %v4231_v40 = vpop.f32.mrb[59].mxu0  ;;  %v4126_v41 = vpop.f32.mrb[39].mxu1  ;;  %v12382_v37 = vld [vmem:[#allocation34 + $0x214] ss:$8 sps:$4 sm:$0xff]   ;;  %v12380_v38 = vld [vmem:[#allocation34 + $0x210] ss:$8 sps:$4 sm:$0xff]  }
 0xc54   : > { %4644 = vmatpush1.bf16.msra.mxu1 %v12332_v30  ;;  %4472 = vmatprep.mubr.bf16.mxu1 %v4236_v36  ;;  %v12376_v30 = vld [vmem:[#allocation34 + $0xf4] ss:$8 sps:$4 sm:$0xff]   ;;  %v4131_v36 = vpack.c.bf16 %v15271_v35, %v15271_v35  ;;  %v4130_v40 = vpack.c.bf16 %v15269_v32, %v15269_v32  ;;  %v12383_v41 = vld [vmem:[#allocation34 + $0x220] ss:$8 sps:$4 sm:$0xff]   ;;  %v12386_v35 = vld [vmem:[#allocation34 + $0x230] ss:$8 sps:$4 sm:$0xff]  }
 0xc55   : > { %4645 = vmatprep.subr.bf16.mxu1 %v12337_v33  ;;  %v12379_v33 = vld [vmem:[#allocation34 + $0x204] ss:$8 sps:$4 sm:$0xff]  }
 0xc56   : > { %v12397_v32 = vld [vmem:[#allocation34 + $0x264] ss:$8 sps:$4 sm:$0xff]  }
 0xc57   : > { %4473 = vmatmul.mubr.bf16.gmra.mrb[44].mxu1 %v4235_v39  ;;  %v12385_v39 = vld [vmem:[#allocation34 + $0x224] ss:$8 sps:$4 sm:$0xff]  }
 0xc58   : > { %4646 = vmatpush1.bf16.msra.mxu1 %v12335_v42  ;;  %4673 = vmatprep.mubr.bf16.mxu1 %v4129_v28  ;;  %v15273_v46 = vpop.f32.mrb[60].mxu0  ;;  %v12373_v28 = vld [vmem:[#allocation34 + $0xe4] ss:$8 sps:$4 sm:$0xff]   ;;  %v12388_v42 = vld [vmem:[#allocation34 + $0x234] ss:$8 sps:$4 sm:$0xff]  }
 0xc59   : > { %4647 = vmatprep.subr.bf16.mxu1 %v12340_v43  ;;  %v15275_v48 = vpop.f32.mrb[61].mxu0  ;;  %v12392_v43 = vld [vmem:[#allocation34 + $0x250] ss:$8 sps:$4 sm:$0xff]  }
 0xc5a   : > { %v15277_v50 = vpop.f32.mrb[62].mxu0 }
 0xc5b   : > { %v4761_v53 = vpack.c.bf16 %v15277_v50, %v15273_v46  ;;  %v15281_v56 = vpop.f32.mrb[63].mxu0 }
 0xc5c   : > { %4648 = vmatpush1.bf16.msra.mxu1 %v12338_v44  ;;  %v4762_v58 = vpack.c.bf16 %v15281_v56, %v15275_v48  ;;  %v12395_v44 = vld [vmem:[#allocation34 + $0x260] ss:$8 sps:$4 sm:$0xff]   ;;  %v12406_v56 = vld [vmem:[#allocation34 + $0x294] ss:$8 sps:$4 sm:$0xff]  }
 0xc5d   : > { %4649 = vmatprep.subr.bf16.mxu1 %v12343_v47  ;;  %v12400_v47 = vld [vmem:[#allocation34 + $0x274] ss:$8 sps:$4 sm:$0xff]   ;;  %v12401_v48 = vld [vmem:[#allocation34 + $0x280] ss:$8 sps:$4 sm:$0xff]  }
 0xc60   : > { %4650 = vmatpush1.bf16.msra.mxu1 %v12341_v57  ;;  %v15285_v62 = vpop.f32.mrb[64].mxu0  ;;  %v12398_v57 = vld [vmem:[#allocation34 + $0x270] ss:$8 sps:$4 sm:$0xff]  }
 0xc61   : > { %4651 = vmatprep.subr.bf16.mxu1 %v12346_v60  ;;  %v15287_v25 = vpop.f32.mrb[65].mxu0  ;;  %v12403_v60 = vld [vmem:[#allocation34 + $0x284] ss:$8 sps:$4 sm:$0xff]  }
 0xc62   : > { %v4758_v49 = vpop.f32.mrb[66].mxu0 }
 0xc63   : > { %v4759_v0 = vpop.f32.mrb[67].mxu0  ;;  %v12412_v49 = vld [vmem:[#allocation34 + $0x2b4] ss:$8 sps:$4 sm:$0xff]  }
 0xc64   : > { %4652 = vmatpush1.bf16.msra.mxu1 %v12344_v61  ;;  %v12409_v61 = vld [vmem:[#allocation34 + $0x2a4] ss:$8 sps:$4 sm:$0xff]   ;;  %v12410_v0 = vld [vmem:[#allocation34 + $0x2b0] ss:$8 sps:$4 sm:$0xff]  }
 0xc65   : > { %4653 = vmatprep.subr.bf16.mxu1 %v12349_v63  ;;  %v12407_v63 = vld [vmem:[#allocation34 + $0x2a0] ss:$8 sps:$4 sm:$0xff]  }
 0xc68   : > { %4654 = vmatpush1.bf16.msra.mxu1 %v12347_v7  ;;  %v12415_v7 = vld [vmem:[#allocation34 + $0x2c4] ss:$8 sps:$4 sm:$0xff]  }
 0xc69   : > { %4655 = vmatprep.subr.bf16.mxu1 %v12352_v8  ;;  %v12413_v8 = vld [vmem:[#allocation34 + $0x2c0] ss:$8 sps:$4 sm:$0xff]  }
 0xc6c   : > { %4656 = vmatpush1.bf16.msra.mxu1 %v12350_v9  ;;  %v12418_v9 = vld [vmem:[#allocation34 + $0x2d4] ss:$8 sps:$4 sm:$0xff]  }
 0xc6d   : > { %4657 = vmatprep.subr.bf16.mxu1 %v12355_v59 }
 0xc70   : > { %4658 = vmatpush1.bf16.msra.mxu1 %v12353_v12 }
 0xc71   : > { %4659 = vmatprep.subr.bf16.mxu1 %v12358_v1  ;;  %v12416_v1 = vld [vmem:[#allocation34 + $0x2d0] ss:$8 sps:$4 sm:$0xff]  }
 0xc74   : > { %4660 = vmatpush1.bf16.msra.mxu1 %v12356_v17  ;;  %v12421_v17 = vld [vmem:[#allocation34 + $0x2e4] ss:$8 sps:$4 sm:$0xff]  }
 0xc75   : > { %4661 = vmatprep.subr.bf16.mxu1 %v12361_v18 }
 0xc78   : > { %4662 = vmatpush1.bf16.msra.mxu1 %v12359_v19  ;;  %v12419_v19 = vld [vmem:[#allocation34 + $0x2e0] ss:$8 sps:$4 sm:$0xff]  }
 0xc79   : > { %4663 = vmatprep.subr.bf16.mxu1 %v12364_v22  ;;  %v12424_v22 = vld [vmem:[#allocation34 + $0x2f4] ss:$8 sps:$4 sm:$0xff]  }
 0xc7c   : > { %4664 = vmatpush1.bf16.msra.mxu1 %v12362_v45  ;;  %v12422_v45 = vld [vmem:[#allocation34 + $0x2f0] ss:$8 sps:$4 sm:$0xff]  }
 0xc7d   : > { %4665 = vmatprep.subr.bf16.mxu1 %v12367_v20  ;;  %v6054_v20 = vsel %vm4070_vm6, %v6034_v11, 0 }
 0xc80   : > { %4666 = vmatpush1.bf16.msra.mxu1 %v12365_v24  ;;  %v4763_v24 = vpack.c.bf16 %v15285_v62, %v15285_v62 }
 0xc81   : > { %4667 = vmatprep.subr.bf16.mxu1 %v12370_v26 }
 0xc84   : > { %4668 = vmatpush1.bf16.msra.mxu1 %v12368_v27  ;;  %v5015_v27 = vld [vmem:[#allocation36] sm:$0x3] }
 0xc85   : > { %4669 = vmatprep.subr.bf16.mxu1 %v12373_v28  ;;  %v5020_v28 = vrot.slane %v5015_v27, %v15168_v51  ;;  %v5024_v62 = vrot.slane %v5015_v27, %v15171_v54  ;;  %v12459_v27 = vld [vmem:[#allocation37 + $0x1a0] ss:$8 sps:$4 sm:$0xff]  }
 0xc88   : > { %4670 = vmatpush1.bf16.msra.mxu1 %v12371_v29 }
 0xc89   : > { %4671 = vmatprep.subr.bf16.mxu1 %v12376_v30 }
 0xc8c   : > { %4672 = vmatpush1.bf16.msra.mxu1 %v12374_v31 }
 0xc8d   : > { %4958 = vmatprep.subr.bf16.mxu1 %v12379_v33 }
 0xc8f   : > { %4674 = vmatmul.mubr.bf16.vlgmr.msra.gmra.mrb[40].mxu1 %v4128_v23  ;;  %v12394_v23 = vld [vmem:[#allocation34 + $0x254] ss:$8 sps:$4 sm:$0xff]  }
 0xc90   : > { %4959 = vmatpush1.bf16.msra.mxu1 %v12377_v34  ;;  %4683 = vmatprep.mubr.bf16.mxu1 %v4131_v36 }
 0xc91   : > { %4960 = vmatprep.subr.bf16.mxu1 %v12382_v37 }
 0xc94   : > { %4961 = vmatpush1.bf16.msra.mxu1 %v12380_v38 }
 0xc95   : > { %4962 = vmatprep.subr.bf16.mxu1 %v12385_v39 }
 0xc97   : > { %4684 = vmatmul.mubr.bf16.gmra.mrb[48].mxu1 %v4130_v40 }
 0xc98   : > { %4963 = vmatpush1.bf16.msra.mxu1 %v12383_v41  ;;  %4990 = vmatprep.mubr.bf16.mxu1 %v4762_v58  ;;  %v12404_v58 = vld [vmem:[#allocation34 + $0x290] ss:$8 sps:$4 sm:$0xff]  }
 0xc99   : > { %4964 = vmatprep.subr.bf16.mxu1 %v12388_v42 }
 0xc9c   : > { %4965 = vmatpush1.bf16.msra.mxu1 %v12386_v35 }
 0xc9d   : > { %4966 = vmatprep.subr.bf16.mxu1 %v12391_v14 }
 0xca0   : > { %4967 = vmatpush1.bf16.msra.mxu1 %v12389_v13 }
 0xca1   : > { %4968 = vmatprep.subr.bf16.mxu1 %v12394_v23 }
 0xca4   : > { %4969 = vmatpush1.bf16.msra.mxu1 %v12392_v43 }
 0xca5   : > { %4970 = vmatprep.subr.bf16.mxu1 %v12397_v32 }
 0xca8   : > { %4971 = vmatpush1.bf16.msra.mxu1 %v12395_v44 }
 0xca9   : > { %4972 = vmatprep.subr.bf16.mxu1 %v12400_v47 }
 0xcac   : > { %4973 = vmatpush1.bf16.msra.mxu1 %v12398_v57 }
 0xcad   : > { %4974 = vmatprep.subr.bf16.mxu1 %v12403_v60 }
 0xcb0   : > { %4975 = vmatpush1.bf16.msra.mxu1 %v12401_v48 }
 0xcb1   : > { %4976 = vmatprep.subr.bf16.mxu1 %v12406_v56 }
 0xcb4   : > { %4977 = vmatpush1.bf16.msra.mxu1 %v12404_v58 }
 0xcb5   : > { %4978 = vmatprep.subr.bf16.mxu1 %v12409_v61 }
 0xcb8   : > { %4979 = vmatpush1.bf16.msra.mxu1 %v12407_v63 }
 0xcb9   : > { %4980 = vmatprep.subr.bf16.mxu1 %v12412_v49 }
 0xcbc   : > { %4981 = vmatpush1.bf16.msra.mxu1 %v12410_v0 }
 0xcbd   : > { %4982 = vmatprep.subr.bf16.mxu1 %v12415_v7  ;;  %v12425_v7 = vld [vmem:[#allocation39] sm:$0xff]  }
 0xcbe   : > { %v3593_v59 = vpop.permute.xlu0 %3592 }
 0xcbf   : > { %v3595_v12 = vmul.f32 %v15256_v55, %v3593_v59  ;;  %v4764_v55 = vpack.c.bf16 %v15287_v25, %v15287_v25  ;;  %v12427_v59 = vld [vmem:[#allocation39 + $0xc] sm:$0xff]  }
 0xcc0   : > { %4983 = vmatpush1.bf16.msra.mxu1 %v12413_v8  ;;  %v12431_v8 = vld [vmem:[#allocation37 + $0x104] ss:$8 sps:$4 sm:$0xff]  }
 0xcc1   : > { %9914 = vrot.lane.b32.xlu1 %v3595_v12, %s14083_s2  ;;  %4984 = vmatprep.subr.bf16.mxu1 %v12418_v9  ;;  %v12426_v9 = vld [vmem:[#allocation39 + $0x8] ss:$0 sps:$4 sm:$0x33]   ;;  %s14087_s2 = smov [#allocation55]  }
 0xcc2   : > { %v9921_v18 = vpop.permute.xlu0 %9920  ;;  %v12429_v12 = vld [vmem:[#allocation37 + $0x100] ss:$8 sps:$4 sm:$0xff]   ;;  %s13878_s4 = sshll.u32 %s14087_s2, 4  ;;  %s13879_s4 = int_to_ptr.vmem [resolvable:$false] %s13878_s4 }
 0xcc3   : > { %9923 = vst.msk [vmem:[#allocation3] sm:$0x3] %vm9917_vm10, %v9921_v18  ;;  %v12437_v18 = vld [vmem:[#allocation37 + $0x124] ss:$8 sps:$4 sm:$0xff]   ;;  %s13880_s15 = scalar_lea.vmem %s13879_s4, 1280  ;;  %p13881_p3 = scmp.lt.s32.totalorder %s15942_s22, %s13879_s4 }
 0xcc4   : > { %4985 = vmatpush1.bf16.msra.mxu1 %v12416_v1  ;;  %v12434_v1 = vld [vmem:[#allocation37 + $0x114] ss:$8 sps:$4 sm:$0xff]   ;;  %p13882_p9 = scmp.lt.s32.totalorder %s13880_s15, %s13874_s6 }
 0xcc5   : > { %4986 = vmatprep.subr.bf16.mxu1 %v12421_v17  ;;  %v12432_v17 = vld [vmem:[#allocation37 + $0x110] ss:$8 sps:$4 sm:$0xff]  }
 0xcc6   : > { %p13883_p12 = por %p13882_p9, %p13881_p3 }
 0xcc8   : > { %4987 = vmatpush1.bf16.msra.mxu1 %v12419_v19  ;;  %v12428_v19 = vld [vmem:[#allocation39 + $0x14] ss:$0 sps:$4 sm:$0x33]   ;;  %p13884_p8 = pnand %p13883_p12, %p13877_p6 }
 0xcc9   : > { %4988 = vmatprep.subr.bf16.mxu1 %v12424_v22  ;;  %v12435_v22 = vld [vmem:[#allocation37 + $0x120] ss:$8 sps:$4 sm:$0xff]  }
 0xccc   : > { %4989 = vmatpush1.bf16.msra.mxu1 %v12422_v45  ;;  %v12440_v45 = vld [vmem:[#allocation37 + $0x134] ss:$8 sps:$4 sm:$0xff]  }
 0xccd   : > { %10806 = vmatprep.subr.msk.bf16.mxu1 %vm4070_vm6, %v6035_v10 }
 0xccf   : > { %4991 = vmatmul.mubr.bf16.vlgmr.msra.gmra.mrb[40].mxu1 %v4761_v53 }
 0xcd0   : > { %6060 = vmatpush1.bf16.msra.mxu1 %v6054_v20  ;;  %5000 = vmatprep.mubr.bf16.mxu1 %v4764_v55  ;;  %v12438_v55 = vld [vmem:[#allocation37 + $0x130] ss:$8 sps:$4 sm:$0xff]   ;;  %v12443_v20 = vld [vmem:[#allocation37 + $0x144] ss:$8 sps:$4 sm:$0xff]  }
 0xcd7   : > { %5001 = vmatmul.mubr.bf16.gmra.mrb[52].mxu1 %v4763_v24  ;;  %v12441_v24 = vld [vmem:[#allocation37 + $0x140] ss:$8 sps:$4 sm:$0xff]  }
 0xcd8   : > { %6091 = vmatprep.mubr.bf16.mxu1 %v14084_v21 }
 0xd2a   : > { %v4474_v2 = vpop.f32.mrb[44].mxu1 }
 0xd2b   : > { %v4476_v5 = vpop.f32.mrb[45].mxu1 }
 0xd2c   : > { %v4478_v10 = vpop.f32.mrb[46].mxu1 }
 0xd2d   : > { %v4479_v25 = vpop.f32.mrb[47].mxu1  ;;  %v12449_v10 = vld [vmem:[#allocation37 + $0x164] ss:$8 sps:$4 sm:$0xff]  }
 0xd2e   : > { %v12447_v25 = vld [vmem:[#allocation37 + $0x160] ss:$8 sps:$4 sm:$0xff]  }
 0xd33   : > { %v9915_v26 = vpop.permute.xlu1 %9914 }
 0xd34   : > { %9918 = vst.msk [vmem:[#allocation2] sm:$0x3] %vm9917_vm10, %v9915_v26  ;;  %v12452_v26 = vld [vmem:[#allocation37 + $0x174] ss:$8 sps:$4 sm:$0xff]  }
 0xd6a   : > { %v4685_v46 = vpop.f32.mrb[48].mxu1 }
 0xd6b   : > { %v4686_v50 = vadd.f32 %v4685_v46, %v4474_v2  ;;  %v4687_v3 = vpop.f32.mrb[49].mxu1  ;;  %v12446_v2 = vld [vmem:[#allocation37 + $0x154] ss:$8 sps:$4 sm:$0xff]   ;;  %v12450_v46 = vld [vmem:[#allocation37 + $0x170] ss:$8 sps:$4 sm:$0xff]  }
 0xd6c   : > { %v4688_v4 = vadd.f32 %v4687_v3, %v4476_v5  ;;  %v4689_v11 = vpop.f32.mrb[50].mxu1  ;;  %v12444_v5 = vld [vmem:[#allocation37 + $0x150] ss:$8 sps:$4 sm:$0xff]   ;;  %v12453_v3 = vld [vmem:[#allocation37 + $0x180] ss:$8 sps:$4 sm:$0xff]  }
 0xd6d   : > { %v4690_v53 = vpop.f32.mrb[51].mxu1  ;;  %v12456_v11 = vld [vmem:[#allocation37 + $0x190] ss:$8 sps:$4 sm:$0xff]  }
 0xd6e   : > { %v12461_v53 = vld [vmem:[#allocation37 + $0x1a4] ss:$8 sps:$4 sm:$0xff]  }
 0xda2   : > { %v4992_v29 = vpop.f32.mrb[40].mxu1 }
 0xda3   : > { %v5027_v30 = vadd.f32 %v5020_v28, %v4992_v29  ;;  %v4994_v31 = vpop.f32.mrb[41].mxu1  ;;  %v12465_v29 = vld [vmem:[#allocation37 + $0x1c0] ss:$8 sps:$4 sm:$0xff]  }
 0xda4   : > { %v5028_v33 = vadd.f32 %v5024_v62, %v4994_v31  ;;  %v4996_v34 = vpop.f32.mrb[42].mxu1  ;;  %v12470_v31 = vld [vmem:[#allocation37 + $0x1d4] ss:$8 sps:$4 sm:$0xff]  }
 0xda5   : > { %v5029_v36 = vadd.f32 %v5020_v28, %v4996_v34  ;;  %v4998_v37 = vpop.f32.mrb[43].mxu1  ;;  %v5033_v39 = vmax.f32 %v5027_v30, 0.0  ;;  %v12467_v30 = vld [vmem:[#allocation37 + $0x1c4] ss:$8 sps:$4 sm:$0xff]   ;;  %v12471_v34 = vld [vmem:[#allocation37 + $0x1e0] ss:$8 sps:$4 sm:$0xff]  }
 0xda6   : > { %v5030_v38 = vadd.f32 %v5024_v62, %v4998_v37  ;;  %v5034_v41 = vmax.f32 %v5028_v33, 0.0  ;;  %v12468_v33 = vld [vmem:[#allocation37 + $0x1d0] ss:$8 sps:$4 sm:$0xff]   ;;  %v12476_v37 = vld [vmem:[#allocation37 + $0x1f4] ss:$8 sps:$4 sm:$0xff]  }
 0xda7   : > { %v5035_v40 = vmax.f32 %v5029_v36, 0.0  ;;  %v12473_v36 = vld [vmem:[#allocation37 + $0x1e4] ss:$8 sps:$4 sm:$0xff]  }
 0xda8   : > { %v5036_v42 = vmax.f32 %v5030_v38, 0.0  ;;  %v12474_v38 = vld [vmem:[#allocation37 + $0x1f0] ss:$8 sps:$4 sm:$0xff]  }
 0xda9   : > { %v15321_v35 = vpack.c.bf16 %v5035_v40, %v5033_v39  ;;  %v12479_v39 = vld [vmem:[#allocation37 + $0x4] ss:$8 sps:$4 sm:$0xff]  }
 0xdaa   : > { %v15323_v14 = vpack.c.bf16 %v5036_v42, %v5034_v41  ;;  %v5002_v13 = vpop.f32.mrb[52].mxu1  ;;  %v12525_v40 = vld [vmem:[%s16166_s18] sm:$0xff]   ;;  %v12527_v41 = vld [vmem:[%s16166_s18 + $0x8] ss:$0 sps:$4 sm:$0x33]  }
 0xdab   : > { %v5013_v23 = vadd.f32 %v5002_v13, %v4686_v50  ;;  %v5004_v43 = vpop.f32.mrb[53].mxu1  ;;  %v12455_v50 = vld [vmem:[#allocation37 + $0x184] ss:$8 sps:$4 sm:$0xff]   ;;  %10807 = vmatmul.mubr.msk.bf16.vlgmr.msra.gmra.mrb[56].mxu1 %vm4063_vm9, %v12525_v40 }
 0xdac   : > { %v5014_v32 = vadd.f32 %v5004_v43, %v4688_v4  ;;  %v5006_v44 = vpop.f32.mrb[54].mxu1  ;;  %10679 = vmatprep.subr.msk.bf16.mxu0 %vm15030_vm7, %v15323_v14  ;;  %v12458_v4 = vld [vmem:[#allocation37 + $0x194] ss:$8 sps:$4 sm:$0xff]   ;;  %6101 = vmatprep.mubr.bf16.mxu1 %v14084_v21  ;;  %v12531_v13 = vld [vmem:[%s16167_s26 + $0x4] ss:$8 sps:$4 sm:$0xff]  }
 0xdad   : > { %v5031_v47 = vadd.f32 %v5020_v28, %v5013_v23  ;;  %v5007_v57 = vpop.f32.mrb[55].mxu1  ;;  %10682 = vmatpush1.bf16.msk.msra.mxu0 %vm15030_vm7, %v15321_v35  ;;  %v12464_v28 = vld [vmem:[#allocation37 + $0x1b4] ss:$8 sps:$4 sm:$0xff]   ;;  %6318 = vmatprep.subr.bf16.mxu1 %v12531_v13  ;;  %v12497_v40 = vld [vmem:[#allocation37 + $0x64] ss:$8 sps:$4 sm:$0xff]  }
 0xdae   : > { %v5032_v60 = vadd.f32 %v5024_v62, %v5014_v32  ;;  %v12462_v62 = vld [vmem:[#allocation37 + $0x1b0] ss:$8 sps:$4 sm:$0xff]   ;;  %v12529_v42 = vld [vmem:[%s16167_s26] ss:$8 sps:$4 sm:$0xff]   ;;  %v12540_v32 = vld [vmem:[%s16167_s26 + $0x24] ss:$8 sps:$4 sm:$0xff]  }
 0xdaf   : > { %v5037_v48 = vmax.f32 %v5031_v47, 0.0  ;;  %v12534_v23 = vld [vmem:[%s16167_s26 + $0x14] ss:$8 sps:$4 sm:$0xff]   ;;  %6319 = vmatpush1.bf16.msra.mxu1 %v12529_v42  ;;  %v12532_v43 = vld [vmem:[%s16167_s26 + $0x10] ss:$8 sps:$4 sm:$0xff]  }
 0xdb0   : > { %v5038_v56 = vmax.f32 %v5032_v60, 0.0  ;;  %6320 = vmatprep.subr.bf16.mxu1 %v12534_v23  ;;  %v12538_v44 = vld [vmem:[%s16167_s26 + $0x20] ss:$8 sps:$4 sm:$0xff]   ;;  %v12546_v47 = vld [vmem:[%s16167_s26 + $0x34] ss:$8 sps:$4 sm:$0xff]  }
 0xdb1   : > { %v5043_v58 = vsel %vm2393_vm15, %v5037_v48, 0.0  ;;  %v12544_v57 = vld [vmem:[%s16167_s26 + $0x30] ss:$8 sps:$4 sm:$0xff]   ;;  %v12552_v60 = vld [vmem:[%s16167_s26 + $0x44] ss:$8 sps:$4 sm:$0xff]  }
 0xdb2   : > { %v5047_v61 = vpack.c.bf16 %v5043_v58, %v5043_v58  ;;  %v5044_v63 = vsel %vm2393_vm15, %v5038_v56, 0.0  ;;  %v12550_v48 = vld [vmem:[%s16167_s26 + $0x40] ss:$8 sps:$4 sm:$0xff]   ;;  %v12558_v56 = vld [vmem:[%s16167_s26 + $0x54] ss:$8 sps:$4 sm:$0xff]  }
 0xdb3   : > { %v15335_v49 = vpack.c.bf16 %v5044_v63, %v5044_v63  ;;  %10808 = vmatmul.mubr.msk.bf16.gmra.mrb[60].mxu1 %vm4063_vm9, %v12527_v41  ;;  %v12495_v41 = vld [vmem:[#allocation37 + $0x60] ss:$8 sps:$4 sm:$0xff]   ;;  %v12500_v42 = vld [vmem:[#allocation37 + $0x74] ss:$8 sps:$4 sm:$0xff]   ;;  %v12498_v13 = vld [vmem:[#allocation37 + $0x70] ss:$8 sps:$4 sm:$0xff]  }
 0xdb4   : > { %v15338_v0 = vsel %vm1694_vm1, %v5047_v61, 0  ;;  %6321 = vmatpush1.bf16.msra.mxu1 %v12532_v43  ;;  %v12503_v23 = vld [vmem:[#allocation37 + $0x84] ss:$8 sps:$4 sm:$0xff]   ;;  %v12501_v43 = vld [vmem:[#allocation37 + $0x80] ss:$8 sps:$4 sm:$0xff]  }
 0xdb5   : > { %10683 = vmatprep.subr.msk.bf16.mxu0 %vm1694_vm1, %v15335_v49  ;;  %6322 = vmatprep.subr.bf16.mxu1 %v12540_v32  ;;  %v12506_v32 = vld [vmem:[#allocation37 + $0x94] ss:$8 sps:$4 sm:$0xff]  }
 0xdb6   : > { %5075 = vmatpush1.bf16.msra.mxu0 %v15338_v0 }
 0xdb7   : > { %10690 = vmatprep.subr.msk.bf16.mxu0 %vm15030_vm7, %v15323_v14 }
 0xdb8   : > { %6323 = vmatpush1.bf16.msra.mxu1 %v12538_v44  ;;  %v12504_v44 = vld [vmem:[#allocation37 + $0x90] ss:$8 sps:$4 sm:$0xff]  }
 0xdb9   : > { %10684 = vmatmul.mubr.msk.bf16.vlgmr.msra.gmra.mrb[68].mxu0 %vm2409_vm8, %v12425_v7  ;;  %6324 = vmatprep.subr.bf16.mxu1 %v12546_v47  ;;  %v12556_v7 = vld [vmem:[%s16167_s26 + $0x50] ss:$8 sps:$4 sm:$0xff]  }
 0xdba   : > { %10693 = vmatpush1.bf16.msk.msra.mxu0 %vm15030_vm7, %v15321_v35  ;;  %5114 = vmatprep.mubr.bf16.mxu0 %v14084_v21  ;;  %v12509_v47 = vld [vmem:[#allocation37 + $0xa4] ss:$8 sps:$4 sm:$0xff]  }
 0xdbb   : > { %10694 = vmatprep.subr.msk.bf16.mxu0 %vm1694_vm1, %v15335_v49 }
 0xdbc   : > { %6325 = vmatpush1.bf16.msra.mxu1 %v12544_v57  ;;  %v12507_v57 = vld [vmem:[#allocation37 + $0xa0] ss:$8 sps:$4 sm:$0xff]  }
 0xdbd   : > { %6326 = vmatprep.subr.bf16.mxu1 %v12552_v60  ;;  %v12512_v60 = vld [vmem:[#allocation37 + $0xb4] ss:$8 sps:$4 sm:$0xff]  }
 0xdbe   : > { %5180 = vmatpush1.bf16.msra.mxu0 %v15338_v0 }
 0xdbf   : > { %5425 = vmatprep.subr.bf16.mxu0 %v12431_v8 }
 0xdc0   : > { %6327 = vmatpush1.bf16.msra.mxu1 %v12550_v48  ;;  %v12510_v48 = vld [vmem:[#allocation37 + $0xb0] ss:$8 sps:$4 sm:$0xff]  }
 0xdc1   : > { %10685 = vmatmul.mubr.msk.bf16.gmra.mrb[72].mxu0 %vm2409_vm8, %v12426_v9  ;;  %6328 = vmatprep.subr.bf16.mxu1 %v12558_v56  ;;  %v12515_v56 = vld [vmem:[#allocation37 + $0xc4] ss:$8 sps:$4 sm:$0xff]  }
 0xdc2   : > { %5209 = vmatprep.mubr.bf16.mxu0 %v14084_v21 }
 0xdc4   : > { %6329 = vmatpush1.bf16.msra.mxu1 %v12556_v7  ;;  %v12518_v7 = vld [vmem:[#allocation37 + $0xd4] ss:$8 sps:$4 sm:$0xff]  }
 0xdc9   : > { %10695 = vmatmul.mubr.msk.bf16.vlgmr.msra.gmra.mrb[76].mxu0 %vm2409_vm8, %v12427_v59  ;;  %v12564_v59 = vld [vmem:[%s16167_s26 + $0x64] ss:$8 sps:$4 sm:$0xff]  }
 0xdca   : > { %5219 = vmatprep.mubr.bf16.mxu0 %v14084_v21  ;;  %5426 = vmatpush1.bf16.msra.mxu0 %v12429_v12 }
 0xdcb   : > { %5427 = vmatprep.subr.bf16.mxu0 %v12434_v1  ;;  %v12562_v1 = vld [vmem:[%s16167_s26 + $0x60] ss:$8 sps:$4 sm:$0xff]   ;;  %6330 = vmatprep.subr.bf16.mxu1 %v12564_v59 }
 0xdcc   : > { %6331 = vmatpush1.bf16.msra.mxu1 %v12562_v1  ;;  %v12521_v59 = vld [vmem:[#allocation37 + $0xe4] ss:$8 sps:$4 sm:$0xff]   ;;  %v12524_v1 = vld [vmem:[#allocation37 + $0xf4] ss:$8 sps:$4 sm:$0xff]  }
 0xdce   : > { %5428 = vmatpush1.bf16.msra.mxu0 %v12432_v17  ;;  %v12570_v17 = vld [vmem:[%s16167_s26 + $0x74] ss:$8 sps:$4 sm:$0xff]  }
 0xdcf   : > { %5429 = vmatprep.subr.bf16.mxu0 %v12437_v18  ;;  %6332 = vmatprep.subr.bf16.mxu1 %v12570_v17  ;;  %v12522_v17 = vld [vmem:[#allocation37 + $0xf0] ss:$8 sps:$4 sm:$0xff]  }
 0xdd1   : > { %10696 = vmatmul.mubr.msk.bf16.gmra.mrb[80].mxu0 %vm2409_vm8, %v12428_v19 }
 0xdd2   : > { %5430 = vmatpush1.bf16.msra.mxu0 %v12435_v22 }
 0xdd3   : > { %5431 = vmatprep.subr.bf16.mxu0 %v12440_v45  ;;  %v12568_v45 = vld [vmem:[%s16167_s26 + $0x70] ss:$8 sps:$4 sm:$0xff]  }
 0xdd4   : > { %6333 = vmatpush1.bf16.msra.mxu1 %v12568_v45  ;;  %v12537_v45 = vld [vmem:[#allocation37 + $0x204] ss:$8 sps:$4 sm:$0xff]  }
 0xdd6   : > { %5432 = vmatpush1.bf16.msra.mxu0 %v12438_v55 }
 0xdd7   : > { %5433 = vmatprep.subr.bf16.mxu0 %v12443_v20  ;;  %v12576_v20 = vld [vmem:[%s16167_s26 + $0x84] ss:$8 sps:$4 sm:$0xff]  }
 0xdd8   : > { %6334 = vmatprep.subr.bf16.mxu1 %v12576_v20  ;;  %v12580_v20 = vld [vmem:[%s16167_s26 + $0x90] ss:$8 sps:$4 sm:$0xff]  }
 0xdda   : > { %5434 = vmatpush1.bf16.msra.mxu0 %v12441_v24  ;;  %v12574_v24 = vld [vmem:[%s16167_s26 + $0x80] ss:$8 sps:$4 sm:$0xff]  }
 0xddb   : > { %5435 = vmatprep.subr.bf16.mxu0 %v12446_v2  ;;  %6335 = vmatpush1.bf16.msra.mxu1 %v12574_v24  ;;  %v12582_v24 = vld [vmem:[%s16167_s26 + $0x94] ss:$8 sps:$4 sm:$0xff]  }
 0xddc   : > { %6336 = vmatprep.subr.bf16.mxu1 %v12582_v24 }
 0xdde   : > { %5436 = vmatpush1.bf16.msra.mxu0 %v12444_v5 }
 0xddf   : > { %5437 = vmatprep.subr.bf16.mxu0 %v12449_v10  ;;  %6337 = vmatpush1.bf16.msra.mxu1 %v12580_v20 }
 0xde2   : > { %5438 = vmatpush1.bf16.msra.mxu0 %v12447_v25 }
 0xde3   : > { %5439 = vmatprep.subr.bf16.mxu0 %v12452_v26 }
 0xde6   : > { %5440 = vmatpush1.bf16.msra.mxu0 %v12450_v46 }
 0xde7   : > { %5441 = vmatprep.subr.bf16.mxu0 %v12455_v50  ;;  %v12477_v50 = vld [vmem:[#allocation37] ss:$8 sps:$4 sm:$0xff]  }
 0xdea   : > { %5442 = vmatpush1.bf16.msra.mxu0 %v12453_v3  ;;  %v12482_v3 = vld [vmem:[#allocation37 + $0x14] ss:$8 sps:$4 sm:$0xff]  }
 0xdeb   : > { %5443 = vmatprep.subr.bf16.mxu0 %v12458_v4 }
 0xdee   : > { %5444 = vmatpush1.bf16.msra.mxu0 %v12456_v11  ;;  %v12480_v11 = vld [vmem:[#allocation37 + $0x10] ss:$8 sps:$4 sm:$0xff]  }
 0xdef   : > { %5445 = vmatprep.subr.bf16.mxu0 %v12461_v53 }
 0xdf2   : > { %5446 = vmatpush1.bf16.msra.mxu0 %v12459_v27  ;;  %v12485_v27 = vld [vmem:[#allocation37 + $0x24] ss:$8 sps:$4 sm:$0xff]  }
 0xdf3   : > { %5447 = vmatprep.subr.bf16.mxu0 %v12464_v28 }
 0xdf6   : > { %5448 = vmatpush1.bf16.msra.mxu0 %v12462_v62 }
 0xdf7   : > { %5449 = vmatprep.subr.bf16.mxu0 %v12467_v30 }
 0xdfa   : > { %5450 = vmatpush1.bf16.msra.mxu0 %v12465_v29 }
 0xdfb   : > { %5451 = vmatprep.subr.bf16.mxu0 %v12470_v31  ;;  %v12483_v31 = vld [vmem:[#allocation37 + $0x20] ss:$8 sps:$4 sm:$0xff]  }
 0xdfe   : > { %5452 = vmatpush1.bf16.msra.mxu0 %v12468_v33  ;;  %v12488_v33 = vld [vmem:[#allocation37 + $0x34] ss:$8 sps:$4 sm:$0xff]  }
 0xdff   : > { %5453 = vmatprep.subr.bf16.mxu0 %v12473_v36  ;;  %v12491_v36 = vld [vmem:[#allocation37 + $0x44] ss:$8 sps:$4 sm:$0xff]  }
 0xe02   : > { %5454 = vmatpush1.bf16.msra.mxu0 %v12471_v34  ;;  %v12486_v34 = vld [vmem:[#allocation37 + $0x30] ss:$8 sps:$4 sm:$0xff]  }
 0xe03   : > { %5455 = vmatprep.subr.bf16.mxu0 %v12476_v37  ;;  %v12489_v37 = vld [vmem:[#allocation37 + $0x40] ss:$8 sps:$4 sm:$0xff]  }
 0xe06   : > { %5456 = vmatpush1.bf16.msra.mxu0 %v12474_v38  ;;  %v12494_v38 = vld [vmem:[#allocation37 + $0x54] ss:$8 sps:$4 sm:$0xff]  }
 0xe07   : > { %5636 = vmatprep.subr.bf16.mxu0 %v12479_v39  ;;  %v12492_v39 = vld [vmem:[#allocation37 + $0x50] ss:$8 sps:$4 sm:$0xff]  }
 0xe8c   : > { %v15375_v58 = vpop.f32.mrb[68].mxu0 }
 0xe8d   : > { %v5108_v61 = vpop.f32.mrb[69].mxu0 }
 0xe8e   : > { %v15377_v63 = vpop.f32.mrb[70].mxu0 }
 0xe8f   : > { %v5123_v8 = vpack.c.bf16 %v15377_v63, %v15375_v58  ;;  %v5112_v9 = vpop.f32.mrb[71].mxu0  ;;  %v12526_v58 = vld [vmem:[#allocation39 + $0x18] sm:$0xff]   ;;  %v12535_v63 = vld [vmem:[#allocation37 + $0x200] ss:$8 sps:$4 sm:$0xff]  }
 0xe90   : > { %v5124_v12 = vpack.c.bf16 %v5112_v9, %v5108_v61  ;;  %v12513_v61 = vld [vmem:[#allocation37 + $0xc0] ss:$8 sps:$4 sm:$0xff]   ;;  %v12516_v9 = vld [vmem:[#allocation37 + $0xd0] ss:$8 sps:$4 sm:$0xff]  }
 0xe94   : > { %v15385_v18 = vpop.f32.mrb[72].mxu0 }
 0xe95   : > { %v15387_v19 = vpop.f32.mrb[73].mxu0 }
 0xe96   : > { %v5120_v22 = vpop.f32.mrb[74].mxu0 }
 0xe97   : > { %v5121_v55 = vpop.f32.mrb[75].mxu0  ;;  %v5126_v22 = vpack.c.bf16 %v15387_v19, %v15387_v19  ;;  %v12553_v19 = vld [vmem:[#allocation37 + $0x230] ss:$8 sps:$4 sm:$0xff]  }
 0xe98   : > { %v12561_v55 = vld [vmem:[#allocation37 + $0x244] ss:$8 sps:$4 sm:$0xff]  }
 0xe9c   : > { %v5211_v2 = vpop.f32.mrb[76].mxu0 }
 0xe9d   : > { %v5213_v5 = vpop.f32.mrb[77].mxu0 }
 0xe9e   : > { %v5215_v10 = vpop.f32.mrb[78].mxu0 }
 0xe9f   : > { %v5228_v25 = vpack.c.bf16 %v5215_v10, %v5211_v2  ;;  %v5217_v26 = vpop.f32.mrb[79].mxu0  ;;  %v12559_v2 = vld [vmem:[#allocation37 + $0x240] ss:$8 sps:$4 sm:$0xff]  }
 0xea0   : > { %v5229_v46 = vpack.c.bf16 %v5217_v26, %v5213_v5  ;;  %v12567_v5 = vld [vmem:[#allocation37 + $0x254] ss:$8 sps:$4 sm:$0xff]  }
 0xea1   : > { %v12586_v10 = vld [vmem:[%s16167_s26 + $0xa0] ss:$8 sps:$4 sm:$0xff]   ;;  %v12594_v26 = vld [vmem:[%s16167_s26 + $0xb4] ss:$8 sps:$4 sm:$0xff]  }
 0xea2   : > { %5457 = vmatprep.mubr.bf16.mxu0 %v5229_v46  ;;  %v12565_v46 = vld [vmem:[#allocation37 + $0x250] ss:$8 sps:$4 sm:$0xff]  }
 0xea3   : > { %5458 = vmatmul.mubr.bf16.vlgmr.msra.gmra.mrb[84].mxu0 %v5228_v25  ;;  %v12588_v25 = vld [vmem:[%s16167_s26 + $0xa4] ss:$8 sps:$4 sm:$0xff]  }
 0xea4   : > { %5637 = vmatpush1.bf16.msra.mxu0 %v12477_v50  ;;  %v5221_v4 = vpop.f32.mrb[80].mxu0  ;;  %6338 = vmatprep.subr.bf16.mxu1 %v12588_v25  ;;  %v12573_v50 = vld [vmem:[#allocation37 + $0x264] ss:$8 sps:$4 sm:$0xff]  }
 0xea5   : > { %5638 = vmatprep.subr.bf16.mxu0 %v12482_v3  ;;  %v5223_v53 = vpop.f32.mrb[81].mxu0  ;;  %v5230_v29 = vpack.c.bf16 %v5221_v4, %v5221_v4  ;;  %6339 = vmatpush1.bf16.msra.mxu1 %v12586_v10  ;;  %v12592_v3 = vld [vmem:[%s16167_s26 + $0xb0] ss:$8 sps:$4 sm:$0xff]   ;;  %v12600_v4 = vld [vmem:[%s16167_s26 + $0xc4] ss:$8 sps:$4 sm:$0xff]  }
 0xea6   : > { %v5231_v28 = vpack.c.bf16 %v5223_v53, %v5223_v53  ;;  %v5225_v62 = vpop.f32.mrb[82].mxu0  ;;  %6340 = vmatprep.subr.bf16.mxu1 %v12594_v26  ;;  %v12579_v53 = vld [vmem:[#allocation37 + $0x274] ss:$8 sps:$4 sm:$0xff]  }
 0xea7   : > { %v5226_v30 = vpop.f32.mrb[83].mxu0  ;;  %v12577_v62 = vld [vmem:[#allocation37 + $0x270] ss:$8 sps:$4 sm:$0xff]  }
 0xea8   : > { %5639 = vmatpush1.bf16.msra.mxu0 %v12480_v11  ;;  %5467 = vmatprep.mubr.bf16.mxu0 %v5231_v28  ;;  %v12571_v11 = vld [vmem:[#allocation37 + $0x260] ss:$8 sps:$4 sm:$0xff]   ;;  %v12606_v28 = vld [vmem:[%s16167_s26 + $0xd4] ss:$8 sps:$4 sm:$0xff]   ;;  %v12604_v30 = vld [vmem:[%s16167_s26 + $0xd0] ss:$8 sps:$4 sm:$0xff]  }
 0xea9   : > { %5640 = vmatprep.subr.bf16.mxu0 %v12485_v27  ;;  %6341 = vmatpush1.bf16.msra.mxu1 %v12592_v3  ;;  %v12598_v27 = vld [vmem:[%s16167_s26 + $0xc0] ss:$8 sps:$4 sm:$0xff]  }
 0xeaa   : > { %6342 = vmatprep.subr.bf16.mxu1 %v12600_v4 }
 0xeab   : > { %5468 = vmatmul.mubr.bf16.gmra.mrb[88].mxu0 %v5230_v29  ;;  %v12585_v29 = vld [vmem:[#allocation37 + $0x284] ss:$8 sps:$4 sm:$0xff]  }
 0xeac   : > { %5641 = vmatpush1.bf16.msra.mxu0 %v12483_v31  ;;  %5668 = vmatprep.mubr.bf16.mxu0 %v5124_v12  ;;  %v12519_v12 = vld [vmem:[#allocation37 + $0xe0] ss:$8 sps:$4 sm:$0xff]  }
 0xead   : > { %5642 = vmatprep.subr.bf16.mxu0 %v12488_v33  ;;  %6343 = vmatpush1.bf16.msra.mxu1 %v12598_v27  ;;  %v12583_v31 = vld [vmem:[#allocation37 + $0x280] ss:$8 sps:$4 sm:$0xff]   ;;  %v12591_v33 = vld [vmem:[#allocation37 + $0x294] ss:$8 sps:$4 sm:$0xff]  }
 0xeae   : > { %6344 = vmatprep.subr.bf16.mxu1 %v12606_v28 }
 0xeb0   : > { %5643 = vmatpush1.bf16.msra.mxu0 %v12486_v34  ;;  %v12589_v34 = vld [vmem:[#allocation37 + $0x290] ss:$8 sps:$4 sm:$0xff]  }
 0xeb1   : > { %5644 = vmatprep.subr.bf16.mxu0 %v12491_v36  ;;  %6345 = vmatpush1.bf16.msra.mxu1 %v12604_v30  ;;  %v12597_v36 = vld [vmem:[#allocation37 + $0x2a4] ss:$8 sps:$4 sm:$0xff]  }
 0xeb4   : > { %5645 = vmatpush1.bf16.msra.mxu0 %v12489_v37  ;;  %v12595_v37 = vld [vmem:[#allocation37 + $0x2a0] ss:$8 sps:$4 sm:$0xff]  }
 0xeb5   : > { %5646 = vmatprep.subr.bf16.mxu0 %v12494_v38  ;;  %v12603_v38 = vld [vmem:[#allocation37 + $0x2b4] ss:$8 sps:$4 sm:$0xff]  }
 0xeb8   : > { %5647 = vmatpush1.bf16.msra.mxu0 %v12492_v39  ;;  %v12601_v39 = vld [vmem:[#allocation37 + $0x2b0] ss:$8 sps:$4 sm:$0xff]  }
 0xeb9   : > { %5648 = vmatprep.subr.bf16.mxu0 %v12497_v40  ;;  %v12609_v40 = vld [vmem:[#allocation37 + $0x2c4] ss:$8 sps:$4 sm:$0xff]  }
 0xebc   : > { %5649 = vmatpush1.bf16.msra.mxu0 %v12495_v41  ;;  %v12607_v41 = vld [vmem:[#allocation37 + $0x2c0] ss:$8 sps:$4 sm:$0xff]  }
 0xebd   : > { %5650 = vmatprep.subr.bf16.mxu0 %v12500_v42  ;;  %v12612_v42 = vld [vmem:[%s16167_s26 + $0xe4] ss:$8 sps:$4 sm:$0xff]  }
 0xebe   : > { %6346 = vmatprep.subr.bf16.mxu1 %v12612_v42 }
 0xec0   : > { %5651 = vmatpush1.bf16.msra.mxu0 %v12498_v13  ;;  %v12610_v13 = vld [vmem:[%s16167_s26 + $0xe0] ss:$8 sps:$4 sm:$0xff]  }
 0xec1   : > { %5652 = vmatprep.subr.bf16.mxu0 %v12503_v23  ;;  %v12615_v23 = vld [vmem:[#allocation37 + $0x2d4] ss:$8 sps:$4 sm:$0xff]   ;;  %6347 = vmatpush1.bf16.msra.mxu1 %v12610_v13 }
 0xec4   : > { %5653 = vmatpush1.bf16.msra.mxu0 %v12501_v43  ;;  %v6093_v43 = vpop.f32.mrb[56].mxu1 }
 0xec5   : > { %5654 = vmatprep.subr.bf16.mxu0 %v12506_v32  ;;  %v12613_v32 = vld [vmem:[#allocation37 + $0x2d0] ss:$8 sps:$4 sm:$0xff]  }
 0xec8   : > { %5655 = vmatpush1.bf16.msra.mxu0 %v12504_v44  ;;  %v6095_v44 = vpop.f32.mrb[57].mxu1 }
 0xec9   : > { %5656 = vmatprep.subr.bf16.mxu0 %v12509_v47  ;;  %v12616_v47 = vld [vmem:[%s16167_s26 + $0xf0] ss:$8 sps:$4 sm:$0xff]  }
 0xecc   : > { %5657 = vmatpush1.bf16.msra.mxu0 %v12507_v57  ;;  %v12618_v57 = vld [vmem:[%s16167_s26 + $0xf4] ss:$8 sps:$4 sm:$0xff]  }
 0xecd   : > { %5658 = vmatprep.subr.bf16.mxu0 %v12512_v60  ;;  %v6097_v60 = vpop.f32.mrb[58].mxu1  ;;  %6348 = vmatprep.subr.bf16.mxu1 %v12618_v57 }
 0xece   : > { %6349 = vmatpush1.bf16.msra.mxu1 %v12616_v47 }
 0xed0   : > { %5659 = vmatpush1.bf16.msra.mxu0 %v12510_v48  ;;  %v12619_v48 = vld [vmem:[#allocation37 + $0x2e0] ss:$8 sps:$4 sm:$0xff]  }
 0xed1   : > { %5660 = vmatprep.subr.bf16.mxu0 %v12515_v56  ;;  %v12621_v56 = vld [vmem:[#allocation37 + $0x2e4] ss:$8 sps:$4 sm:$0xff]  }
 0xed4   : > { %5661 = vmatpush1.bf16.msra.mxu0 %v12513_v61  ;;  %v6110_v61 = vpack.c.bf16 %v6097_v60, %v6093_v43 }
 0xed5   : > { %5662 = vmatprep.subr.bf16.mxu0 %v12518_v7  ;;  %v6099_v7 = vpop.f32.mrb[59].mxu1 }
 0xed8   : > { %5663 = vmatpush1.bf16.msra.mxu0 %v12516_v9  ;;  %v6111_v9 = vpack.c.bf16 %v6099_v7, %v6095_v44 }
 0xed9   : > { %5664 = vmatprep.subr.bf16.mxu0 %v12521_v59  ;;  %v12624_v59 = vld [vmem:[#allocation37 + $0x2f4] ss:$8 sps:$4 sm:$0xff]  }
 0xeda   : > { %6350 = vmatprep.mubr.bf16.mxu1 %v6111_v9 }
 0xedb   : > { %6351 = vmatmul.mubr.bf16.vlgmr.msra.gmra.mrb[64].mxu1 %v6110_v61 }
 0xedc   : > { %5665 = vmatpush1.bf16.msra.mxu0 %v12519_v12  ;;  %v12622_v12 = vld [vmem:[#allocation37 + $0x2f0] ss:$8 sps:$4 sm:$0xff]  }
 0xedd   : > { %5666 = vmatprep.subr.bf16.mxu0 %v12524_v1  ;;  %v6103_v1 = vpop.f32.mrb[60].mxu1 }
 0xee0   : > { %5667 = vmatpush1.bf16.msra.mxu0 %v12522_v17  ;;  %v6112_v17 = vpack.c.bf16 %v6103_v1, %v6103_v1 }
 0xee1   : > { %10765 = vmatprep.subr.msk.bf16.mxu0 %vm15030_vm7, %v15323_v14  ;;  %v5125_v14 = vpack.c.bf16 %v15385_v18, %v15385_v18  ;;  %v12555_v18 = vld [vmem:[#allocation37 + $0x234] ss:$8 sps:$4 sm:$0xff]  }
 0xee3   : > { %5669 = vmatmul.mubr.bf16.vlgmr.msra.gmra.mrb[84].mxu0 %v5123_v8  ;;  %v12543_v8 = vld [vmem:[#allocation37 + $0x214] ss:$8 sps:$4 sm:$0xff]  }
 0xee4   : > { %5678 = vmatprep.mubr.bf16.mxu0 %v5126_v22  ;;  %10768 = vmatpush1.bf16.msk.msra.mxu0 %vm15030_vm7, %v15321_v35  ;;  %v12549_v35 = vld [vmem:[#allocation37 + $0x224] ss:$8 sps:$4 sm:$0xff]   ;;  %v6105_v22 = vpop.f32.mrb[61].mxu1  ;;  %vm7490_vm7 = vcmp.ne.s32.totalorder %v15014_v6, 17 }
 0xee5   : > { %10769 = vmatprep.subr.msk.bf16.mxu0 %vm1694_vm1, %v15335_v49  ;;  %v12528_v49 = vld [vmem:[#allocation39 + $0x20] ss:$0 sps:$4 sm:$0x33]   ;;  %vm15613_vm12 = vmand %vm7490_vm7, %vm7500_vm11 }
 0xee8   : > { %5708 = vmatpush1.bf16.msra.mxu0 %v15338_v0  ;;  %v12547_v0 = vld [vmem:[#allocation37 + $0x220] ss:$8 sps:$4 sm:$0xff]  }
 0xee9   : > { %5953 = vmatprep.subr.bf16.mxu0 %v12537_v45  ;;  %v6113_v45 = vpack.c.bf16 %v6105_v22, %v6105_v22 }
 0xeeb   : > { %5679 = vmatmul.mubr.bf16.gmra.mrb[92].mxu0 %v5125_v14  ;;  %v6107_v14 = vpop.f32.mrb[62].mxu1  ;;  %6360 = vmatprep.mubr.bf16.mxu1 %v6113_v45 }
 0xeec   : > { %5737 = vmatprep.mubr.bf16.mxu0 %v14084_v21  ;;  %6361 = vmatmul.mubr.bf16.gmra.mrb[68].mxu1 %v6112_v17 }
 0xeed   : > { %6583 = vmatprep.mubr.bf16.mxu1 %v14084_v21 }
 0xef3   : > { %10770 = vmatmul.mubr.msk.bf16.vlgmr.msra.gmra.mrb[96].mxu0 %vm2409_vm8, %v12526_v58  ;;  %v6108_v58 = vpop.f32.mrb[63].mxu1 }
 0xef4   : > { %5747 = vmatprep.mubr.bf16.mxu0 %v14084_v21  ;;  %5954 = vmatpush1.bf16.msra.mxu0 %v12535_v63 }
 0xef5   : > { %5955 = vmatprep.subr.bf16.mxu0 %v12543_v8 }
 0xef8   : > { %5956 = vmatpush1.bf16.msra.mxu0 %v12541_v16 }
 0xef9   : > { %5957 = vmatprep.subr.bf16.mxu0 %v12549_v35 }
 0xefb   : > { %10771 = vmatmul.mubr.msk.bf16.gmra.mrb[100].mxu0 %vm2409_vm8, %v12528_v49 }
 0xefc   : > { %5958 = vmatpush1.bf16.msra.mxu0 %v12547_v0 }
 0xefd   : > { %5959 = vmatprep.subr.bf16.mxu0 %v12555_v18 }
 0xf00   : > { %5960 = vmatpush1.bf16.msra.mxu0 %v12553_v19 }
 0xf01   : > { %5961 = vmatprep.subr.bf16.mxu0 %v12561_v55 }
 0xf04   : > { %5962 = vmatpush1.bf16.msra.mxu0 %v12559_v2 }
 0xf05   : > { %5963 = vmatprep.subr.bf16.mxu0 %v12567_v5 }
 0xf08   : > { %5964 = vmatpush1.bf16.msra.mxu0 %v12565_v46 }
 0xf09   : > { %5965 = vmatprep.subr.bf16.mxu0 %v12573_v50 }
 0xf0c   : > { %5966 = vmatpush1.bf16.msra.mxu0 %v12571_v11 }
 0xf0d   : > { %5967 = vmatprep.subr.bf16.mxu0 %v12579_v53 }
 0xf10   : > { %5968 = vmatpush1.bf16.msra.mxu0 %v12577_v62 }
 0xf11   : > { %5969 = vmatprep.subr.bf16.mxu0 %v12585_v29 }
 0xf14   : > { %5970 = vmatpush1.bf16.msra.mxu0 %v12583_v31 }
 0xf15   : > { %5971 = vmatprep.subr.bf16.mxu0 %v12591_v33 }
 0xf18   : > { %5972 = vmatpush1.bf16.msra.mxu0 %v12589_v34 }
 0xf19   : > { %5973 = vmatprep.subr.bf16.mxu0 %v12597_v36  ;;  %v6146_v36 = vld [vmem:[#allocation42] sm:$0x3] }
 0xf1c   : > { %5974 = vmatpush1.bf16.msra.mxu0 %v12595_v37  ;;  %v6010_v37 = vld [vmem:[#allocation40] sm:$0x3] }
 0xf1d   : > { %5975 = vmatprep.subr.bf16.mxu0 %v12603_v38  ;;  %v6151_v38 = vrot.slane %v6146_v36, %v15168_v51 }
 0xf20   : > { %5976 = vmatpush1.bf16.msra.mxu0 %v12601_v39  ;;  %v6155_v39 = vrot.slane %v6146_v36, %v15171_v54 }
 0xf21   : > { %5977 = vmatprep.subr.bf16.mxu0 %v12609_v40  ;;  %v6015_v40 = vrot.slane %v6010_v37, %v15168_v51 }
 0xf24   : > { %5978 = vmatpush1.bf16.msra.mxu0 %v12607_v41  ;;  %v6019_v41 = vrot.slane %v6010_v37, %v15171_v54  ;;  %v12625_v37 = vld [vmem:[%s16168_s8 + $0x14] sm:$0xff]  }
 0xf25   : > { %5979 = vmatprep.subr.bf16.mxu0 %v12615_v23 }
 0xf28   : > { %5980 = vmatpush1.bf16.msra.mxu0 %v12613_v32 }
 0xf29   : > { %5981 = vmatprep.subr.bf16.mxu0 %v12621_v56 }
 0xf2c   : > { %5982 = vmatpush1.bf16.msra.mxu0 %v12619_v48 }
 0xf2d   : > { %5983 = vmatprep.subr.bf16.mxu0 %v12624_v59 }
 0xf30   : > { %5984 = vmatpush1.bf16.msra.mxu0 %v12622_v12 }
 0xf7e   : > { %v5469_v63 = vpop.f32.mrb[88].mxu0 }
 0xf7f   : > { %v5471_v8 = vpop.f32.mrb[89].mxu0 }
 0xf80   : > { %v5473_v16 = vpop.f32.mrb[90].mxu0 }
 0xf81   : > { %v5474_v35 = vpop.f32.mrb[91].mxu0 }
 0xfae   : > { %v6352_v27 = vpop.f32.mrb[64].mxu1 }
 0xfaf   : > { %v6354_v28 = vpop.f32.mrb[65].mxu1  ;;  %v6353_v42 = vadd.f32 %v6352_v27, %v6151_v38 }
 0xfb0   : > { %v6356_v62 = vpop.f32.mrb[66].mxu1  ;;  %v6355_v13 = vadd.f32 %v6354_v28, %v6155_v39 }
 0xfb1   : > { %v6358_v29 = vpop.f32.mrb[67].mxu1  ;;  %v6357_v43 = vadd.f32 %v6356_v62, %v6151_v38  ;;  %v6369_v48 = vsel %vm2376_vm3, %v6353_v42, 0.0  ;;  %v12626_v42 = vld [vmem:[%s16168_s8 + $0x1c] sm:$0xff]  }
 0xfb2   : > { %v6359_v47 = vadd.f32 %v6358_v29, %v6155_v39  ;;  %v6370_v9 = vsel %vm2376_vm3, %v6355_v13, 0.0  ;;  %v12629_v13 = vld [vmem:[%s16168_s8 + $0x8] sm:$0xff]  }
 0xfb3   : > { %v6371_v17 = vsel %vm15020_vm5, %v6357_v43, 0.0  ;;  %v12640_v43 = vld [vmem:[#allocation43 + $0x120] ss:$8 sps:$4 sm:$0xff]  }
 0xfb4   : > { %v6372_v14 = vsel %vm15020_vm5, %v6359_v47, 0.0  ;;  %v12627_v47 = vld [vmem:[%s16168_s8 + $0x24] ss:$0 sps:$4 sm:$0x33]  }
 0xfbe   : > { %v5680_v49 = vpop.f32.mrb[92].mxu0 }
 0xfbf   : > { %v15427_v0 = vadd.f32 %v5680_v49, %v5469_v63  ;;  %v5682_v18 = vpop.f32.mrb[93].mxu0  ;;  %v6362_v30 = vpop.f32.mrb[68].mxu1 }
 0xfc0   : > { %v15429_v19 = vadd.f32 %v5682_v18, %v5471_v8  ;;  %v5684_v55 = vpop.f32.mrb[94].mxu0  ;;  %v6364_v31 = vpop.f32.mrb[69].mxu1  ;;  %v6363_v18 = vadd.f32 %v6362_v30, %v6151_v38  ;;  %v12628_v38 = vld [vmem:[%s16168_s8] sm:$0xff]  }
 0xfc1   : > { %v5685_v20 = vpop.f32.mrb[95].mxu0  ;;  %v6366_v33 = vpop.f32.mrb[70].mxu1 }
 0xfc2   : > { %v6367_v34 = vpop.f32.mrb[71].mxu1 }
 0xfc3   : > { %v12636_v34 = vld [vmem:[#allocation43 + $0x104] ss:$8 sps:$4 sm:$0xff]  }
 0xfc6   : > { %v5739_v24 = vpop.f32.mrb[96].mxu0 }
 0xfc7   : > { %v5741_v2 = vpop.f32.mrb[97].mxu0 }
 0xfc8   : > { %v5743_v5 = vpop.f32.mrb[98].mxu0 }
 0xfc9   : > { %v5756_v10 = vpack.c.bf16 %v5743_v5, %v5739_v24  ;;  %v5745_v25 = vpop.f32.mrb[99].mxu0 }
 0xfca   : > { %v5757_v26 = vpack.c.bf16 %v5745_v25, %v5741_v2 }
 0xfcc   : > { %5985 = vmatprep.mubr.bf16.mxu0 %v5757_v26 }
 0xfcd   : > { %5986 = vmatmul.mubr.bf16.vlgmr.msra.gmra.mrb[84].mxu0 %v5756_v10  ;;  %v6365_v10 = vadd.f32 %v6364_v31, %v6155_v39  ;;  %v12634_v39 = vld [vmem:[#allocation43 + $0x100] ss:$8 sps:$4 sm:$0xff]  }
 0xfce   : > { %v5749_v46 = vpop.f32.mrb[100].mxu0 }
 0xfcf   : > { %v5751_v50 = vpop.f32.mrb[101].mxu0  ;;  %v5758_v53 = vpack.c.bf16 %v5749_v46, %v5749_v46 }
 0xfd0   : > { %v5759_v3 = vpack.c.bf16 %v5751_v50, %v5751_v50  ;;  %v5753_v4 = vpop.f32.mrb[102].mxu0 }
 0xfd1   : > { %v5754_v11 = vpop.f32.mrb[103].mxu0 }
 0xfd2   : > { %5995 = vmatprep.mubr.bf16.mxu0 %v5759_v3 }
 0xfd5   : > { %5996 = vmatmul.mubr.bf16.gmra.mrb[104].mxu0 %v5758_v53  ;;  %v6373_v53 = vsel %vm2393_vm15, %v6363_v18, 0.0  ;;  %v12633_v18 = vld [vmem:[%s16168_s8 + $0x38] ss:$0 sps:$4 sm:$0x33]  }
 0xfd6   : > { %6456 = vmatprep.mubr.bf16.mxu0 %v14084_v21 }
0x10a0   : > { %v5987_v23 = vpop.f32.mrb[84].mxu0 }
0x10a1   : > { %v6022_v32 = vadd.f32 %v6015_v40, %v5987_v23  ;;  %v5989_v44 = vpop.f32.mrb[85].mxu0  ;;  %v12642_v23 = vld [vmem:[#allocation43 + $0x124] ss:$8 sps:$4 sm:$0xff]  }
0x10a2   : > { %v6023_v57 = vadd.f32 %v6019_v41, %v5989_v44  ;;  %v5991_v60 = vpop.f32.mrb[86].mxu0  ;;  %v12643_v44 = vld [vmem:[#allocation43 + $0x130] ss:$8 sps:$4 sm:$0xff]  }
0x10a3   : > { %v6028_v56 = vsel %vm2376_vm3, %v6022_v32, 0.0  ;;  %v6024_v61 = vadd.f32 %v6015_v40, %v5991_v60  ;;  %v5993_v7 = vpop.f32.mrb[87].mxu0  ;;  %v12645_v32 = vld [vmem:[#allocation43 + $0x134] ss:$8 sps:$4 sm:$0xff]   ;;  %v12648_v60 = vld [vmem:[#allocation43 + $0x144] ss:$8 sps:$4 sm:$0xff]  }
0x10a4   : > { %v15442_v59 = vadd.f32 %v6369_v48, %v6028_v56  ;;  %v6029_v12 = vsel %vm2376_vm3, %v6023_v57, 0.0  ;;  %v6025_v1 = vadd.f32 %v6019_v41, %v5993_v7  ;;  %v12630_v57 = vld [vmem:[%s16168_s8 + $0x10] ss:$0 sps:$4 sm:$0x33]   ;;  %v12646_v48 = vld [vmem:[#allocation43 + $0x140] ss:$8 sps:$4 sm:$0xff]  }
0x10a5   : > { %v15448_v22 = vadd.f32 %v6370_v9, %v6029_v12  ;;  %v6030_v45 = vsel %vm15020_vm5, %v6024_v61, 0.0  ;;  %v12651_v56 = vld [vmem:[#allocation43 + $0x154] ss:$8 sps:$4 sm:$0xff]   ;;  %v12649_v61 = vld [vmem:[#allocation43 + $0x150] ss:$8 sps:$4 sm:$0xff]  }
0x10a6   : > { %v15454_v58 = vadd.f32 %v6371_v17, %v6030_v45  ;;  %v6031_v63 = vsel %vm15020_vm5, %v6025_v1, 0.0  ;;  %v6381_v16 = vmax.f32 %v15442_v59, 0.0  ;;  %v12631_v7 = vld [vmem:[%s16168_s8 + $0x28] sm:$0xff]   ;;  %v12655_v17 = vld [vmem:[#allocation43 + $0x170] ss:$8 sps:$4 sm:$0xff]   ;;  %v12632_v45 = vld [vmem:[%s16168_s8 + $0x30] sm:$0xff]  }
0x10a7   : > { %v15458_v8 = vadd.f32 %v6372_v14, %v6031_v63  ;;  %v6382_v20 = vmax.f32 %v15448_v22, 0.0  ;;  %v12654_v9 = vld [vmem:[#allocation43 + $0x164] ss:$8 sps:$4 sm:$0xff]   ;;  %v12652_v12 = vld [vmem:[#allocation43 + $0x160] ss:$8 sps:$4 sm:$0xff]  }
0x10a8   : > { %v6383_v35 = vmax.f32 %v15454_v58, 0.0  ;;  %v8627_v49 = vpack.c.bf16 %v15454_v58, %v15442_v59  ;;  %v5997_v55 = vpop.f32.mrb[104].mxu0  ;;  %v12657_v1 = vld [vmem:[#allocation43 + $0x174] ss:$8 sps:$4 sm:$0xff]   ;;  %v12660_v14 = vld [vmem:[#allocation43 + $0x184] ss:$8 sps:$4 sm:$0xff]  }
0x10a9   : > { %v6384_v24 = vmax.f32 %v15458_v8, 0.0  ;;  %v6008_v2 = vadd.f32 %v5997_v55, %v15427_v0  ;;  %v5999_v5 = vpop.f32.mrb[105].mxu0  ;;  %v8628_v15 = vpack.c.bf16 %v15458_v8, %v15448_v22  ;;  %v6374_v0 = vsel %vm2393_vm15, %v6365_v10, 0.0  ;;  %v12658_v63 = vld [vmem:[#allocation43 + $0x180] ss:$8 sps:$4 sm:$0xff]  }
0x10aa   : > { %v6009_v25 = vadd.f32 %v5999_v5, %v15429_v19  ;;  %v6001_v26 = vpop.f32.mrb[106].mxu0  ;;  %v6387_v46 = vpack.c.bf16 %v6383_v35, %v6381_v16  ;;  %v12663_v16 = vld [vmem:[#allocation43 + $0x194] ss:$8 sps:$4 sm:$0xff]   ;;  %v12661_v35 = vld [vmem:[#allocation43 + $0x190] ss:$8 sps:$4 sm:$0xff]  }
0x10ab   : > { %v6026_v50 = vadd.f32 %v6015_v40, %v6008_v2  ;;  %v6002_v3 = vpop.f32.mrb[107].mxu0  ;;  %v6388_v4 = vpack.c.bf16 %v6384_v24, %v6382_v20  ;;  %v12639_v40 = vld [vmem:[#allocation43 + $0x114] ss:$8 sps:$4 sm:$0xff]   ;;  %v12666_v55 = vld [vmem:[#allocation43 + $0x1a4] ss:$8 sps:$4 sm:$0xff]  }
0x10ac   : > { %v6027_v11 = vadd.f32 %v6019_v41, %v6009_v25  ;;  %v12637_v41 = vld [vmem:[#allocation43 + $0x110] ss:$8 sps:$4 sm:$0xff]   ;;  %v12664_v20 = vld [vmem:[#allocation43 + $0x1a0] ss:$8 sps:$4 sm:$0xff]   ;;  %v12669_v24 = vld [vmem:[#allocation43 + $0x1b4] ss:$8 sps:$4 sm:$0xff]  }
0x10ad   : > { %v6032_v27 = vsel %vm2393_vm15, %v6026_v50, 0.0  ;;  %6424 = vmatprep.subr.bf16.mxu0 %v6388_v4  ;;  %6551 = vmatprep.subr.bf16.mxu1 %v6388_v4  ;;  %v12667_v2 = vld [vmem:[#allocation43 + $0x1b0] ss:$8 sps:$4 sm:$0xff]   ;;  %v12672_v5 = vld [vmem:[#allocation43 + $0x1c4] ss:$8 sps:$4 sm:$0xff]  }
0x10ae   : > { %v15476_v19 = vadd.f32 %v6373_v53, %v6032_v27  ;;  %v6033_v28 = vsel %vm2393_vm15, %v6027_v11, 0.0  ;;  %6425 = vmatpush1.bf16.msra.mxu0 %v6387_v46  ;;  %6552 = vmatpush1.bf16.msra.mxu1 %v6387_v46  ;;  %v12670_v10 = vld [vmem:[#allocation43 + $0x1c0] ss:$8 sps:$4 sm:$0xff]   ;;  %v12675_v25 = vld [vmem:[#allocation43 + $0x1d4] ss:$8 sps:$4 sm:$0xff]   ;;  %vm14086_vm15 = vmmov 1  }
0x10af   : > { %v15480_v62 = vadd.f32 %v6374_v0, %v6033_v28  ;;  %v12673_v26 = vld [vmem:[#allocation43 + $0x1d0] ss:$8 sps:$4 sm:$0xff]   ;;  %v12676_v50 = vld [vmem:[#allocation43 + $0x1e0] ss:$8 sps:$4 sm:$0xff]   ;;  %v12681_v3 = vld [vmem:[#allocation43 + $0x1f4] ss:$8 sps:$4 sm:$0xff]  }
0x10b0   : > { %v6385_v29 = vmax.f32 %v15476_v19, 0.0  ;;  %v12684_v11 = vld [vmem:[#allocation43 + $0x4] ss:$8 sps:$4 sm:$0xff]   ;;  %vm15599_vm5 = vmpackc.low %vm14086_vm15, %vm2376_vm3  ;;  %v12781_v58 = vld [vmem:[#allocation48 + $0x10] ss:$0 sps:$4 sm:$0x33]  }
0x10b1   : > { %v6386_v30 = vmax.f32 %v15480_v62, 0.0  ;;  %vm15620_vm2 = vmpackc.low %vm14086_vm15, %vm15613_vm12  ;;  %v12780_v8 = vld [vmem:[#allocation48 + $0x8] sm:$0xff]  }
0x10b2   : > { %v6389_v31 = vpack.c.bf16 %v6385_v29, %v6385_v29  ;;  %v12792_v59 = vld [vmem:[#allocation46 + $0x104] ss:$8 sps:$4 sm:$0xff]  }
0x10b3   : > { %v6390_v33 = vpack.c.bf16 %v6386_v30, %v6386_v30 }
0x10b4   : > { %v6419_v36 = vsel %vm1694_vm1, %v6389_v31, 0 }
0x10b5   : > { %10844 = vmatprep.subr.msk.bf16.mxu0 %vm1694_vm1, %v6390_v33  ;;  %10856 = vmatprep.subr.msk.bf16.mxu1 %vm1694_vm1, %v6390_v33 }
0x10b6   : > { %6427 = vmatpush1.bf16.msra.mxu0 %v6419_v36  ;;  %6554 = vmatpush1.bf16.msra.mxu1 %v6419_v36 }
0x10b7   : > { %7121 = vmatprep.subr.bf16.mxu1 %v6388_v4  ;;  %6811 = vmatprep.subr.bf16.mxu0 %v12636_v34  ;;  %v12679_v4 = vld [vmem:[#allocation43 + $0x1f0] ss:$8 sps:$4 sm:$0xff]  }
0x10b9   : > { %10857 = vmatmul.mubr.msk.bf16.vlgmr.msra.gmra.mrb[72].mxu1 %vm2409_vm8, %v12625_v37  ;;  %10845 = vmatmul.mubr.msk.bf16.vlgmr.msra.gmra.mrb[108].mxu0 %vm2409_vm8, %v12628_v38  ;;  %v12682_v38 = vld [vmem:[#allocation43] ss:$8 sps:$4 sm:$0xff]  }
0x10ba   : > { %7122 = vmatpush1.bf16.msra.mxu1 %v6387_v46  ;;  %6593 = vmatprep.mubr.bf16.mxu1 %v14084_v21  ;;  %v12678_v46 = vld [vmem:[#allocation43 + $0x1e4] ss:$8 sps:$4 sm:$0xff]  }
0x10bb   : > { %10932 = vmatprep.subr.msk.bf16.mxu1 %vm1694_vm1, %v6390_v33  ;;  %6466 = vmatprep.mubr.bf16.mxu0 %v14084_v21 }
0x10bc   : > { %6812 = vmatpush1.bf16.msra.mxu0 %v12634_v39 }
0x10bd   : > { %6813 = vmatprep.subr.bf16.mxu0 %v12639_v40  ;;  %v12687_v40 = vld [vmem:[#allocation43 + $0x14] ss:$8 sps:$4 sm:$0xff]  }
0x10be   : > { %7124 = vmatpush1.bf16.msra.mxu1 %v6419_v36 }
0x10c0   : > { %6814 = vmatpush1.bf16.msra.mxu0 %v12637_v41  ;;  %v12685_v41 = vld [vmem:[#allocation43 + $0x10] ss:$8 sps:$4 sm:$0xff]  }
0x10c1   : > { %10858 = vmatmul.mubr.msk.bf16.gmra.mrb[76].mxu1 %vm2409_vm8, %v12626_v42  ;;  %10846 = vmatmul.mubr.msk.bf16.gmra.mrb[112].mxu0 %vm2409_vm8, %v12629_v13 }
0x10c2   : > { %6603 = vmatprep.mubr.bf16.mxu1 %v14084_v21  ;;  %6476 = vmatprep.mubr.bf16.mxu0 %v14084_v21 }
0x10c3   : > { %6815 = vmatprep.subr.bf16.mxu0 %v12642_v23  ;;  %v12690_v23 = vld [vmem:[#allocation43 + $0x24] ss:$8 sps:$4 sm:$0xff]  }
0x10c4   : > { %6816 = vmatpush1.bf16.msra.mxu0 %v12640_v43 }
0x10c5   : > { %6817 = vmatprep.subr.bf16.mxu0 %v12645_v32 }
0x10c8   : > { %6818 = vmatpush1.bf16.msra.mxu0 %v12643_v44 }
0x10c9   : > { %10859 = vmatmul.mubr.msk.bf16.gmra.mrb[80].mxu1 %vm2409_vm8, %v12627_v47  ;;  %10847 = vmatmul.mubr.msk.bf16.gmra.mrb[116].mxu0 %vm2409_vm8, %v12630_v57 }
0x10ca   : > { %7153 = vmatprep.mubr.bf16.mxu1 %v14084_v21  ;;  %6819 = vmatprep.subr.bf16.mxu0 %v12648_v60 }
0x10cc   : > { %6820 = vmatpush1.bf16.msra.mxu0 %v12646_v48 }
0x10cd   : > { %6821 = vmatprep.subr.bf16.mxu0 %v12651_v56 }
0x10d0   : > { %6822 = vmatpush1.bf16.msra.mxu0 %v12649_v61  ;;  %v12688_v61 = vld [vmem:[#allocation43 + $0x20] ss:$8 sps:$4 sm:$0xff]  }
0x10d1   : > { %10933 = vmatmul.mubr.msk.bf16.vlgmr.msra.gmra.mrb[84].mxu1 %vm2409_vm8, %v12631_v7  ;;  %6823 = vmatprep.subr.bf16.mxu0 %v12654_v9 }
0x10d2   : > { %7163 = vmatprep.mubr.bf16.mxu1 %v14084_v21 }
0x10d4   : > { %6824 = vmatpush1.bf16.msra.mxu0 %v12652_v12  ;;  %v12693_v12 = vld [vmem:[#allocation43 + $0x34] ss:$8 sps:$4 sm:$0xff]  }
0x10d5   : > { %6825 = vmatprep.subr.bf16.mxu0 %v12657_v1  ;;  %v12691_v1 = vld [vmem:[#allocation43 + $0x30] ss:$8 sps:$4 sm:$0xff]  }
0x10d8   : > { %6826 = vmatpush1.bf16.msra.mxu0 %v12655_v17 }
0x10d9   : > { %10934 = vmatmul.mubr.msk.bf16.gmra.mrb[88].mxu1 %vm2409_vm8, %v12632_v45  ;;  %6827 = vmatprep.subr.bf16.mxu0 %v12660_v14  ;;  %v12696_v14 = vld [vmem:[#allocation43 + $0x44] ss:$8 sps:$4 sm:$0xff]  }
0x10da   : > { %7173 = vmatprep.mubr.bf16.mxu1 %v14084_v21 }
0x10dc   : > { %6828 = vmatpush1.bf16.msra.mxu0 %v12658_v63 }
0x10dd   : > { %6829 = vmatprep.subr.bf16.mxu0 %v12663_v16 }
0x10e0   : > { %6830 = vmatpush1.bf16.msra.mxu0 %v12661_v35 }
0x10e1   : > { %10935 = vmatmul.mubr.msk.bf16.gmra.mrb[92].mxu1 %vm2409_vm8, %v12633_v18  ;;  %6831 = vmatprep.subr.bf16.mxu0 %v12666_v55 }
0x10e2   : > { %7599 = vmatprep.mubr.bf16.mxu1 %v14084_v21 }
0x10e4   : > { %6832 = vmatpush1.bf16.msra.mxu0 %v12664_v20 }
0x10e5   : > { %6833 = vmatprep.subr.bf16.mxu0 %v12669_v24 }
0x10e8   : > { %6834 = vmatpush1.bf16.msra.mxu0 %v12667_v2 }
0x10e9   : > { %6835 = vmatprep.subr.bf16.mxu0 %v12672_v5  ;;  %v12694_v5 = vld [vmem:[#allocation43 + $0x40] ss:$8 sps:$4 sm:$0xff]  }
0x10ec   : > { %6836 = vmatpush1.bf16.msra.mxu0 %v12670_v10  ;;  %v12699_v10 = vld [vmem:[#allocation43 + $0x54] ss:$8 sps:$4 sm:$0xff]  }
0x10ed   : > { %6837 = vmatprep.subr.bf16.mxu0 %v12675_v25  ;;  %v12697_v25 = vld [vmem:[#allocation43 + $0x50] ss:$8 sps:$4 sm:$0xff]  }
0x10f0   : > { %6838 = vmatpush1.bf16.msra.mxu0 %v12673_v26 }
0x10f1   : > { %6839 = vmatprep.subr.bf16.mxu0 %v12678_v46  ;;  %v12702_v46 = vld [vmem:[#allocation43 + $0x64] ss:$8 sps:$4 sm:$0xff]  }
0x10f4   : > { %6840 = vmatpush1.bf16.msra.mxu0 %v12676_v50 }
0x10f5   : > { %6841 = vmatprep.subr.bf16.mxu0 %v12681_v3 }
0x10f8   : > { %6842 = vmatpush1.bf16.msra.mxu0 %v12679_v4 }
0x10f9   : > { %7032 = vmatprep.subr.bf16.mxu0 %v12684_v11 }
0x118c   : > { %v6585_v53 = vpop.f32.mrb[72].mxu1  ;;  %v15514_v27 = vpop.f32.mrb[108].mxu0 }
0x118d   : > { %v6587_v0 = vpop.f32.mrb[73].mxu1  ;;  %v6460_v28 = vpop.f32.mrb[109].mxu0 }
0x118e   : > { %v6589_v29 = vpop.f32.mrb[74].mxu1  ;;  %v15516_v30 = vpop.f32.mrb[110].mxu0 }
0x118f   : > { %v6612_v31 = vpack.c.bf16 %v6589_v29, %v6585_v53  ;;  %v6591_v33 = vpop.f32.mrb[75].mxu1  ;;  %v6485_v34 = vpack.c.bf16 %v15516_v30, %v15514_v27  ;;  %v6464_v36 = vpop.f32.mrb[111].mxu0  ;;  %v12700_v53 = vld [vmem:[#allocation43 + $0x60] ss:$8 sps:$4 sm:$0xff]   ;;  %v12703_v29 = vld [vmem:[#allocation43 + $0x70] ss:$8 sps:$4 sm:$0xff]  }
0x1190   : > { %v6613_v37 = vpack.c.bf16 %v6591_v33, %v6587_v0  ;;  %v6486_v39 = vpack.c.bf16 %v6464_v36, %v6460_v28  ;;  %v12705_v28 = vld [vmem:[#allocation43 + $0x74] ss:$8 sps:$4 sm:$0xff]   ;;  %v12708_v33 = vld [vmem:[#allocation43 + $0x84] ss:$8 sps:$4 sm:$0xff]   ;;  %v12739_v27 = vld [vmem:[#allocation43 + $0x230] ss:$8 sps:$4 sm:$0xff]  }
0x1191   : > { %v12744_v30 = vld [vmem:[#allocation43 + $0x244] ss:$8 sps:$4 sm:$0xff]  }
0x1192   : > { %6843 = vmatprep.mubr.bf16.mxu0 %v6613_v37 }
0x1193   : > { %6844 = vmatmul.mubr.bf16.vlgmr.msra.gmra.mrb[120].mxu0 %v6612_v31 }
0x1194   : > { %7033 = vmatpush1.bf16.msra.mxu0 %v12682_v38  ;;  %v6595_v42 = vpop.f32.mrb[76].mxu1  ;;  %v15520_v13 = vpop.f32.mrb[112].mxu0 }
0x1195   : > { %7034 = vmatprep.subr.bf16.mxu0 %v12687_v40  ;;  %v6597_v43 = vpop.f32.mrb[77].mxu1  ;;  %v15522_v32 = vpop.f32.mrb[113].mxu0  ;;  %v12706_v40 = vld [vmem:[#allocation43 + $0x80] ss:$8 sps:$4 sm:$0xff]  }
0x1196   : > { %v6599_v44 = vpop.f32.mrb[78].mxu1  ;;  %v15524_v47 = vpop.f32.mrb[114].mxu0 }
0x1197   : > { %v6614_v57 = vpack.c.bf16 %v6599_v44, %v6595_v42  ;;  %v6601_v60 = vpop.f32.mrb[79].mxu1  ;;  %v6487_v48 = vpack.c.bf16 %v15524_v47, %v15520_v13  ;;  %v15528_v56 = vpop.f32.mrb[115].mxu0  ;;  %v12711_v42 = vld [vmem:[#allocation43 + $0x94] ss:$8 sps:$4 sm:$0xff]   ;;  %v12714_v44 = vld [vmem:[#allocation43 + $0xa4] ss:$8 sps:$4 sm:$0xff]  }
0x1198   : > { %7035 = vmatpush1.bf16.msra.mxu0 %v12685_v41  ;;  %v6615_v7 = vpack.c.bf16 %v6601_v60, %v6597_v43  ;;  %v6488_v9 = vpack.c.bf16 %v15528_v56, %v15522_v32  ;;  %v12742_v32 = vld [vmem:[#allocation43 + $0x240] ss:$8 sps:$4 sm:$0xff]   ;;  %v12747_v56 = vld [vmem:[#allocation43 + $0x254] ss:$8 sps:$4 sm:$0xff]   ;;  %v12750_v13 = vld [vmem:[#allocation43 + $0x264] ss:$8 sps:$4 sm:$0xff]  }
0x1199   : > { %7036 = vmatprep.subr.bf16.mxu0 %v12690_v23  ;;  %v12709_v23 = vld [vmem:[#allocation43 + $0x90] ss:$8 sps:$4 sm:$0xff]   ;;  %v12748_v47 = vld [vmem:[#allocation43 + $0x260] ss:$8 sps:$4 sm:$0xff]  }
0x119a   : > { %6853 = vmatprep.mubr.bf16.mxu0 %v6615_v7  ;;  %v12712_v7 = vld [vmem:[#allocation43 + $0xa0] ss:$8 sps:$4 sm:$0xff]  }
0x119b   : > { %6854 = vmatmul.mubr.bf16.gmra.mrb[124].mxu0 %v6614_v57 }
0x119c   : > { %7037 = vmatpush1.bf16.msra.mxu0 %v12688_v61  ;;  %v6605_v17 = vpop.f32.mrb[80].mxu1  ;;  %v15532_v45 = vpop.f32.mrb[116].mxu0 }
0x119d   : > { %7038 = vmatprep.subr.bf16.mxu0 %v12693_v12  ;;  %v6607_v63 = vpop.f32.mrb[81].mxu1  ;;  %v15534_v16 = vpop.f32.mrb[117].mxu0  ;;  %v6616_v20 = vpack.c.bf16 %v6605_v17, %v6605_v17  ;;  %v12717_v12 = vld [vmem:[#allocation43 + $0xb4] ss:$8 sps:$4 sm:$0xff]   ;;  %v12720_v17 = vld [vmem:[#allocation43 + $0xc4] ss:$8 sps:$4 sm:$0xff]  }
0x119e   : > { %v6617_v35 = vpack.c.bf16 %v6607_v63, %v6607_v63  ;;  %v6609_v18 = vpop.f32.mrb[82].mxu1  ;;  %v6482_v55 = vpop.f32.mrb[118].mxu0  ;;  %v12723_v63 = vld [vmem:[#allocation43 + $0xd4] ss:$8 sps:$4 sm:$0xff]  }
0x119f   : > { %v6610_v24 = vpop.f32.mrb[83].mxu1  ;;  %v6483_v2 = vpop.f32.mrb[119].mxu0  ;;  %v12726_v18 = vld [vmem:[#allocation43 + $0xe4] ss:$8 sps:$4 sm:$0xff]   ;;  %v12724_v55 = vld [vmem:[#allocation43 + $0xe0] ss:$8 sps:$4 sm:$0xff]  }
0x11a0   : > { %7039 = vmatpush1.bf16.msra.mxu0 %v12691_v1  ;;  %6863 = vmatprep.mubr.bf16.mxu0 %v6617_v35  ;;  %v12715_v1 = vld [vmem:[#allocation43 + $0xb0] ss:$8 sps:$4 sm:$0xff]   ;;  %v12732_v2 = vld [vmem:[#allocation43 + $0x204] ss:$8 sps:$4 sm:$0xff]  }
0x11a1   : > { %7040 = vmatprep.subr.bf16.mxu0 %v12696_v14  ;;  %v12718_v14 = vld [vmem:[#allocation43 + $0xc0] ss:$8 sps:$4 sm:$0xff]   ;;  %v12721_v35 = vld [vmem:[#allocation43 + $0xd0] ss:$8 sps:$4 sm:$0xff]  }
0x11a2   : > { %v12727_v24 = vld [vmem:[#allocation43 + $0xf0] ss:$8 sps:$4 sm:$0xff]  }
0x11a3   : > { %6864 = vmatmul.mubr.bf16.gmra.mrb[128].mxu0 %v6616_v20  ;;  %v12729_v20 = vld [vmem:[#allocation43 + $0xf4] ss:$8 sps:$4 sm:$0xff]  }
0x11a4   : > { %7041 = vmatpush1.bf16.msra.mxu0 %v12694_v5  ;;  %7064 = vmatprep.mubr.bf16.mxu0 %v6486_v39  ;;  %v15536_v26 = vpop.f32.mrb[84].mxu1  ;;  %v12730_v5 = vld [vmem:[#allocation43 + $0x200] ss:$8 sps:$4 sm:$0xff]  }
0x11a5   : > { %7042 = vmatprep.subr.bf16.mxu0 %v12699_v10  ;;  %v15538_v50 = vpop.f32.mrb[85].mxu1  ;;  %v12735_v10 = vld [vmem:[#allocation43 + $0x214] ss:$8 sps:$4 sm:$0xff]  }
0x11a6   : > { %v15540_v3 = vpop.f32.mrb[86].mxu1 }
0x11a7   : > { %v7182_v4 = vpack.c.bf16 %v15540_v3, %v15536_v26  ;;  %v15544_v11 = vpop.f32.mrb[87].mxu1 }
0x11a8   : > { %7043 = vmatpush1.bf16.msra.mxu0 %v12697_v25  ;;  %v7183_v0 = vpack.c.bf16 %v15544_v11, %v15538_v50  ;;  %v12733_v25 = vld [vmem:[#allocation43 + $0x210] ss:$8 sps:$4 sm:$0xff]   ;;  %v12760_v50 = vld [vmem:[#allocation43 + $0x2a0] ss:$8 sps:$4 sm:$0xff]   ;;  %v12765_v11 = vld [vmem:[#allocation43 + $0x2b4] ss:$8 sps:$4 sm:$0xff]  }
0x11a9   : > { %7044 = vmatprep.subr.bf16.mxu0 %v12702_v46  ;;  %v12738_v46 = vld [vmem:[#allocation43 + $0x224] ss:$8 sps:$4 sm:$0xff]  }
0x11ac   : > { %7045 = vmatpush1.bf16.msra.mxu0 %v12700_v53  ;;  %v15548_v31 = vpop.f32.mrb[88].mxu1  ;;  %v12736_v53 = vld [vmem:[#allocation43 + $0x220] ss:$8 sps:$4 sm:$0xff]  }
0x11ad   : > { %7046 = vmatprep.subr.bf16.mxu0 %v12705_v28  ;;  %v15550_v36 = vpop.f32.mrb[89].mxu1  ;;  %v6490_v28 = vpack.c.bf16 %v15534_v16, %v15534_v16  ;;  %v12751_v16 = vld [vmem:[#allocation43 + $0x270] ss:$8 sps:$4 sm:$0xff]  }
0x11ae   : > { %v15552_v37 = vpop.f32.mrb[90].mxu1 }
0x11af   : > { %v7184_v38 = vpack.c.bf16 %v15552_v37, %v15548_v31  ;;  %v15556_v39 = vpop.f32.mrb[91].mxu1 }
0x11b0   : > { %7047 = vmatpush1.bf16.msra.mxu0 %v12703_v29  ;;  %v7185_v41 = vpack.c.bf16 %v15556_v39, %v15550_v36  ;;  %v12741_v29 = vld [vmem:[#allocation43 + $0x234] ss:$8 sps:$4 sm:$0xff]  }
0x11b1   : > { %7048 = vmatprep.subr.bf16.mxu0 %v12708_v33  ;;  %v12754_v33 = vld [vmem:[#allocation43 + $0x280] ss:$8 sps:$4 sm:$0xff]  }
0x11b4   : > { %7049 = vmatpush1.bf16.msra.mxu0 %v12706_v40  ;;  %v15560_v43 = vpop.f32.mrb[92].mxu1  ;;  %v12759_v40 = vld [vmem:[#allocation43 + $0x294] ss:$8 sps:$4 sm:$0xff]  }
0x11b5   : > { %7050 = vmatprep.subr.bf16.mxu0 %v12711_v42  ;;  %v15562_v57 = vpop.f32.mrb[93].mxu1  ;;  %v12757_v42 = vld [vmem:[#allocation43 + $0x290] ss:$8 sps:$4 sm:$0xff]  }
0x11b6   : > { %v7179_v60 = vpop.f32.mrb[94].mxu1 }
0x11b7   : > { %v7180_v61 = vpop.f32.mrb[95].mxu1  ;;  %v12766_v60 = vld [vmem:[#allocation43 + $0x2c0] ss:$8 sps:$4 sm:$0xff]  }
0x11b8   : > { %7051 = vmatpush1.bf16.msra.mxu0 %v12709_v23  ;;  %v12762_v23 = vld [vmem:[#allocation43 + $0x2a4] ss:$8 sps:$4 sm:$0xff]   ;;  %v12771_v61 = vld [vmem:[#allocation43 + $0x2d4] ss:$8 sps:$4 sm:$0xff]  }
0x11b9   : > { %7052 = vmatprep.subr.bf16.mxu0 %v12714_v44  ;;  %v12768_v44 = vld [vmem:[#allocation43 + $0x2c4] ss:$8 sps:$4 sm:$0xff]  }
0x11bc   : > { %7053 = vmatpush1.bf16.msra.mxu0 %v12712_v7  ;;  %v12769_v7 = vld [vmem:[#allocation43 + $0x2d0] ss:$8 sps:$4 sm:$0xff]  }
0x11bd   : > { %7054 = vmatprep.subr.bf16.mxu0 %v12717_v12  ;;  %v12774_v12 = vld [vmem:[#allocation43 + $0x2e4] ss:$8 sps:$4 sm:$0xff]  }
0x11c0   : > { %7055 = vmatpush1.bf16.msra.mxu0 %v12715_v1  ;;  %v12772_v1 = vld [vmem:[#allocation43 + $0x2e0] ss:$8 sps:$4 sm:$0xff]  }
0x11c1   : > { %7056 = vmatprep.subr.bf16.mxu0 %v12720_v17  ;;  %v12777_v17 = vld [vmem:[#allocation43 + $0x2f4] ss:$8 sps:$4 sm:$0xff]  }
0x11c4   : > { %7057 = vmatpush1.bf16.msra.mxu0 %v12718_v14  ;;  %v12775_v14 = vld [vmem:[#allocation43 + $0x2f0] ss:$8 sps:$4 sm:$0xff]  }
0x11c5   : > { %7058 = vmatprep.subr.bf16.mxu0 %v12723_v63  ;;  %v7187_v63 = vpack.c.bf16 %v15562_v57, %v15562_v57 }
0x11c8   : > { %7059 = vmatpush1.bf16.msra.mxu0 %v12721_v35  ;;  %v7186_v35 = vpack.c.bf16 %v15560_v43, %v15560_v43 }
0x11c9   : > { %7060 = vmatprep.subr.bf16.mxu0 %v12726_v18 }
0x11cc   : > { %7061 = vmatpush1.bf16.msra.mxu0 %v12724_v55 }
0x11cd   : > { %7062 = vmatprep.subr.bf16.mxu0 %v12729_v20 }
0x11d0   : > { %7063 = vmatpush1.bf16.msra.mxu0 %v12727_v24  ;;  %v7452_v24 = vld [vmem:[#allocation45] sm:$0x3] }
0x11d1   : > { %7381 = vmatprep.subr.bf16.mxu0 %v12732_v2  ;;  %v7457_v31 = vrot.slane %v7452_v24, %v15168_v51  ;;  %v7461_v37 = vrot.slane %v7452_v24, %v15171_v54  ;;  %v8630_v24 = vpack.c.bf16 %v15480_v62, %v15480_v62  ;;  %v12787_v62 = vld [vmem:[%s16175_s17] sm:$0xff]  }
0x11d3   : > { %7065 = vmatmul.mubr.bf16.vlgmr.msra.gmra.mrb[120].mxu0 %v6485_v34  ;;  %v6489_v34 = vpack.c.bf16 %v15532_v45, %v15532_v45  ;;  %v12756_v45 = vld [vmem:[#allocation43 + $0x284] ss:$8 sps:$4 sm:$0xff]  }
0x11d4   : > { %7382 = vmatpush1.bf16.msra.mxu0 %v12730_v5  ;;  %7074 = vmatprep.mubr.bf16.mxu0 %v6488_v9  ;;  %v12745_v9 = vld [vmem:[#allocation43 + $0x250] ss:$8 sps:$4 sm:$0xff]  }
0x11d5   : > { %7383 = vmatprep.subr.bf16.mxu0 %v12735_v10 }
0x11d8   : > { %7384 = vmatpush1.bf16.msra.mxu0 %v12733_v25 }
0x11d9   : > { %7385 = vmatprep.subr.bf16.mxu0 %v12738_v46 }
0x11db   : > { %7075 = vmatmul.mubr.bf16.gmra.mrb[124].mxu0 %v6487_v48  ;;  %v12753_v48 = vld [vmem:[#allocation43 + $0x274] ss:$8 sps:$4 sm:$0xff]  }
0x11dc   : > { %7386 = vmatpush1.bf16.msra.mxu0 %v12736_v53  ;;  %7084 = vmatprep.mubr.bf16.mxu0 %v6490_v28 }
0x11dd   : > { %7387 = vmatprep.subr.bf16.mxu0 %v12741_v29 }
0x11e0   : > { %7388 = vmatpush1.bf16.msra.mxu0 %v12739_v27 }
0x11e1   : > { %7389 = vmatprep.subr.bf16.mxu0 %v12744_v30 }
0x11e3   : > { %7085 = vmatmul.mubr.bf16.gmra.mrb[132].mxu0 %v6489_v34 }
0x11e4   : > { %7390 = vmatpush1.bf16.msra.mxu0 %v12742_v32  ;;  %7413 = vmatprep.mubr.bf16.mxu0 %v7183_v0  ;;  %v12763_v0 = vld [vmem:[#allocation43 + $0x2b0] ss:$8 sps:$4 sm:$0xff]  }
0x11e5   : > { %7391 = vmatprep.subr.bf16.mxu0 %v12747_v56  ;;  %v12805_v32 = vld [vmem:[#allocation46 + $0x150] ss:$8 sps:$4 sm:$0xff]  }
0x11e8   : > { %7392 = vmatpush1.bf16.msra.mxu0 %v12745_v9 }
0x11e9   : > { %7393 = vmatprep.subr.bf16.mxu0 %v12750_v13 }
0x11ec   : > { %7394 = vmatpush1.bf16.msra.mxu0 %v12748_v47 }
0x11ed   : > { %7395 = vmatprep.subr.bf16.mxu0 %v12753_v48 }
0x11f0   : > { %7396 = vmatpush1.bf16.msra.mxu0 %v12751_v16 }
0x11f1   : > { %7397 = vmatprep.subr.bf16.mxu0 %v12756_v45 }
0x11f4   : > { %7398 = vmatpush1.bf16.msra.mxu0 %v12754_v33 }
0x11f5   : > { %7399 = vmatprep.subr.bf16.mxu0 %v12759_v40 }
0x11f8   : > { %7400 = vmatpush1.bf16.msra.mxu0 %v12757_v42 }
0x11f9   : > { %7401 = vmatprep.subr.bf16.mxu0 %v12762_v23 }
0x11fc   : > { %7402 = vmatpush1.bf16.msra.mxu0 %v12760_v50 }
0x11fd   : > { %7403 = vmatprep.subr.bf16.mxu0 %v12765_v11 }
0x1200   : > { %7404 = vmatpush1.bf16.msra.mxu0 %v12763_v0 }
0x1201   : > { %7405 = vmatprep.subr.bf16.mxu0 %v12768_v44  ;;  %v12831_v44 = vld [vmem:[#allocation46 + $0x1d4] ss:$8 sps:$4 sm:$0xff]  }
0x1204   : > { %7406 = vmatpush1.bf16.msra.mxu0 %v12766_v60 }
0x1205   : > { %7407 = vmatprep.subr.bf16.mxu0 %v12771_v61 }
0x1208   : > { %7408 = vmatpush1.bf16.msra.mxu0 %v12769_v7  ;;  %v15625_v7 = vadd.s32 32, %v14976_v52 }
0x1209   : > { %7409 = vmatprep.subr.bf16.mxu0 %v12774_v12 }
0x120a   : > { %vm7512_vm13 = vcmp.ne.s32.totalorder %v15625_v7, 35 }
0x120c   : > { %7410 = vmatpush1.bf16.msra.mxu0 %v12772_v1 }
0x120d   : > { %7411 = vmatprep.subr.bf16.mxu0 %v12777_v17 }
0x1210   : > { %7412 = vmatpush1.bf16.msra.mxu0 %v12775_v14 }
0x1213   : > { %7414 = vmatmul.mubr.bf16.vlgmr.msra.gmra.mrb[120].mxu0 %v7182_v4 }
0x1214   : > { %7423 = vmatprep.mubr.bf16.mxu0 %v7185_v41 }
0x121b   : > { %7424 = vmatmul.mubr.bf16.gmra.mrb[124].mxu0 %v7184_v38 }
0x121c   : > { %7433 = vmatprep.mubr.bf16.mxu0 %v7187_v63 }
0x1223   : > { %7434 = vmatmul.mubr.bf16.gmra.mrb[136].mxu0 %v7186_v35 }
0x1224   : > { %8296 = vmatprep.mubr.bf16.mxu0 %v14084_v21 }
0x1276   : > { %v6865_v26 = vpop.f32.mrb[128].mxu0 }
0x1277   : > { %v6867_v3 = vpop.f32.mrb[129].mxu0 }
0x1278   : > { %v6869_v4 = vpop.f32.mrb[130].mxu0 }
0x1279   : > { %v6870_v18 = vpop.f32.mrb[131].mxu0 }
0x12b6   : > { %v7086_v36 = vpop.f32.mrb[132].mxu0 }
0x12b7   : > { %v7087_v39 = vadd.f32 %v7086_v36, %v6865_v26  ;;  %v7088_v41 = vpop.f32.mrb[133].mxu0 }
0x12b8   : > { %v7089_v55 = vadd.f32 %v7088_v41, %v6867_v3  ;;  %v7090_v57 = vpop.f32.mrb[134].mxu0 }
0x12b9   : > { %v7091_v20 = vpop.f32.mrb[135].mxu0  ;;  %v12778_v57 = vld [vmem:[#allocation48] sm:$0xff]  }
0x12ba   : > { %v12779_v20 = vld [vmem:[#allocation48 + $0x28] sm:$0xff]  }
0x12e6   : > { %v7415_v38 = vpop.f32.mrb[120].mxu0 }
0x12e7   : > { %v7464_v43 = vadd.f32 %v7457_v31, %v7415_v38  ;;  %v7417_v2 = vpop.f32.mrb[121].mxu0  ;;  %v12795_v38 = vld [vmem:[#allocation46 + $0x114] ss:$8 sps:$4 sm:$0xff]  }
0x12e8   : > { %v7465_v5 = vadd.f32 %v7461_v37, %v7417_v2  ;;  %v7419_v10 = vpop.f32.mrb[122].mxu0  ;;  %v12798_v2 = vld [vmem:[#allocation46 + $0x124] ss:$8 sps:$4 sm:$0xff]  }
0x12e9   : > { %v7466_v25 = vadd.f32 %v7457_v31, %v7419_v10  ;;  %v7421_v46 = vpop.f32.mrb[123].mxu0  ;;  %v7474_v28 = vmax.f32 %v7464_v43, 0.0  ;;  %v12793_v43 = vld [vmem:[#allocation46 + $0x110] ss:$8 sps:$4 sm:$0xff]  }
0x12ea   : > { %v7467_v53 = vadd.f32 %v7461_v37, %v7421_v46  ;;  %v7475_v27 = vmax.f32 %v7465_v5, 0.0  ;;  %v12783_v5 = vld [vmem:[#allocation48 + $0x1c] sm:$0xff]  }
0x12eb   : > { %v7476_v29 = vmax.f32 %v7466_v25, 0.0  ;;  %v12788_v10 = vld [vmem:[%s16175_s17 + $0x8] sm:$0xff]  }
0x12ec   : > { %v7477_v30 = vmax.f32 %v7467_v53, 0.0  ;;  %v12796_v25 = vld [vmem:[#allocation46 + $0x120] ss:$8 sps:$4 sm:$0xff]   ;;  %v12801_v46 = vld [vmem:[#allocation46 + $0x134] ss:$8 sps:$4 sm:$0xff]  }
0x12ed   : > { %v10975_v34 = vpack.c.bf16 %v7476_v29, %v7474_v28  ;;  %v12799_v53 = vld [vmem:[#allocation46 + $0x130] ss:$8 sps:$4 sm:$0xff]   ;;  %v12804_v28 = vld [vmem:[#allocation46 + $0x144] ss:$8 sps:$4 sm:$0xff]  }
0x12ee   : > { %v10972_v56 = vpack.c.bf16 %v7477_v30, %v7475_v27  ;;  %v7425_v9 = vpop.f32.mrb[124].mxu0  ;;  %v12784_v29 = vld [vmem:[#allocation48 + $0x24] ss:$0 sps:$4 sm:$0x33]   ;;  %v12802_v30 = vld [vmem:[#allocation46 + $0x140] ss:$8 sps:$4 sm:$0xff]  }
0x12ef   : > { %v7468_v13 = vadd.f32 %v7457_v31, %v7425_v9  ;;  %v7427_v47 = vpop.f32.mrb[125].mxu0  ;;  %v12789_v27 = vld [vmem:[%s16175_s17 + $0x10] ss:$0 sps:$4 sm:$0x33]  }
0x12f0   : > { %v7469_v48 = vadd.f32 %v7461_v37, %v7427_v47  ;;  %v7429_v16 = vpop.f32.mrb[126].mxu0  ;;  %10973 = vmatprep.subr.msk.bf16.mxu1 %vm15599_vm5, %v10972_v56  ;;  %11075 = vmatprep.subr.msk.bf16.mxu0 %vm15599_vm5, %v10972_v56  ;;  %v12808_v9 = vld [vmem:[#allocation46 + $0x160] ss:$8 sps:$4 sm:$0xff]   ;;  %v12811_v47 = vld [vmem:[#allocation46 + $0x170] ss:$8 sps:$4 sm:$0xff]  }
0x12f1   : > { %v7470_v45 = vadd.f32 %v7457_v31, %v7429_v16  ;;  %v7431_v33 = vpop.f32.mrb[127].mxu0  ;;  %10976 = vmatpush1.bf16.msk.msra.mxu1 %vm15599_vm5, %v10975_v34  ;;  %11078 = vmatpush1.bf16.msk.msra.mxu0 %vm15599_vm5, %v10975_v34  ;;  %v7478_v6 = vmax.f32 %v7468_v13, 0.0  ;;  %v12813_v13 = vld [vmem:[#allocation46 + $0x174] ss:$8 sps:$4 sm:$0xff]   ;;  %v12814_v16 = vld [vmem:[#allocation46 + $0x180] ss:$8 sps:$4 sm:$0xff]  }
0x12f2   : > { %v7471_v40 = vadd.f32 %v7461_v37, %v7431_v33  ;;  %v7479_v50 = vmax.f32 %v7469_v48, 0.0  ;;  %v12816_v48 = vld [vmem:[#allocation46 + $0x184] ss:$8 sps:$4 sm:$0xff]   ;;  %v12817_v33 = vld [vmem:[#allocation46 + $0x190] ss:$8 sps:$4 sm:$0xff]  }
0x12f3   : > { %v7480_v23 = vmax.f32 %v7470_v45, 0.0  ;;  %v12819_v45 = vld [vmem:[#allocation46 + $0x194] ss:$8 sps:$4 sm:$0xff]  }
0x12f4   : > { %v7481_v11 = vmax.f32 %v7471_v40, 0.0  ;;  %v12820_v40 = vld [vmem:[#allocation46 + $0x1a0] ss:$8 sps:$4 sm:$0xff]  }
0x12f5   : > { %v10981_v0 = vpack.c.bf16 %v7480_v23, %v7478_v6  ;;  %v12822_v6 = vld [vmem:[#allocation46 + $0x1a4] ss:$8 sps:$4 sm:$0xff]   ;;  %v12825_v23 = vld [vmem:[#allocation46 + $0x1b4] ss:$8 sps:$4 sm:$0xff]  }
0x12f6   : > { %v10978_v60 = vpack.c.bf16 %v7481_v11, %v7479_v50  ;;  %v7435_v61 = vpop.f32.mrb[136].mxu0  ;;  %v12823_v50 = vld [vmem:[#allocation46 + $0x1b0] ss:$8 sps:$4 sm:$0xff]   ;;  %v12826_v11 = vld [vmem:[#allocation46 + $0x1c0] ss:$8 sps:$4 sm:$0xff]  }
0x12f7   : > { %v7450_v12 = vadd.f32 %v7435_v61, %v7087_v39  ;;  %v7437_v1 = vpop.f32.mrb[137].mxu0  ;;  %v12832_v61 = vld [vmem:[#allocation46 + $0x1e0] ss:$8 sps:$4 sm:$0xff]  }
0x12f8   : > { %v7451_v17 = vadd.f32 %v7437_v1, %v7089_v55  ;;  %v7439_v14 = vpop.f32.mrb[138].mxu0  ;;  %10979 = vmatprep.subr.msk.bf16.mxu1 %vm15620_vm2, %v10978_v60  ;;  %11081 = vmatprep.subr.msk.bf16.mxu0 %vm15620_vm2, %v10978_v60  ;;  %v12837_v1 = vld [vmem:[#allocation46 + $0x1f4] ss:$8 sps:$4 sm:$0xff]  }
0x12f9   : > { %v7472_v63 = vadd.f32 %v7457_v31, %v7450_v12  ;;  %v7440_v35 = vpop.f32.mrb[139].mxu0  ;;  %10982 = vmatpush1.bf16.msk.msra.mxu1 %vm15620_vm2, %v10981_v0  ;;  %11084 = vmatpush1.bf16.msk.msra.mxu0 %vm15620_vm2, %v10981_v0  ;;  %v8629_v31 = vpack.c.bf16 %v15476_v19, %v15476_v19  ;;  %v12782_v19 = vld [vmem:[#allocation48 + $0x14] sm:$0xff]   ;;  %v12834_v12 = vld [vmem:[#allocation46 + $0x1e4] ss:$8 sps:$4 sm:$0xff]  }
0x12fa   : > { %v7473_v26 = vadd.f32 %v7461_v37, %v7451_v17  ;;  %v12790_v37 = vld [vmem:[#allocation46 + $0x100] ss:$8 sps:$4 sm:$0xff]   ;;  %v12835_v17 = vld [vmem:[#allocation46 + $0x1f0] ss:$8 sps:$4 sm:$0xff]   ;;  %v12840_v14 = vld [vmem:[#allocation46 + $0x4] ss:$8 sps:$4 sm:$0xff]  }
0x12fb   : > { %v7482_v3 = vmax.f32 %v7472_v63, 0.0  ;;  %v8659_v22 = vsel %vm1694_vm1, %v8629_v31, 0  ;;  %v12883_v63 = vld [vmem:[#allocation51] ss:$8 sps:$4 sm:$0xff]   ;;  %v12885_v35 = vld [vmem:[#allocation51 + $0x4] ss:$8 sps:$4 sm:$0xff]  }
0x12fc   : > { %v7483_v4 = vmax.f32 %v7473_v26, 0.0  ;;  %v12889_v26 = vld [vmem:[#allocation51 + $0x10] ss:$8 sps:$4 sm:$0xff]   ;;  %v12921_v31 = vld [vmem:[#allocation51 + $0x64] ss:$8 sps:$4 sm:$0xff]  }
0x12fd   : > { %v7526_v18 = vsel %vm7512_vm13, %v7482_v3, 0.0  ;;  %v12891_v3 = vld [vmem:[#allocation51 + $0x14] ss:$8 sps:$4 sm:$0xff]  }
0x12fe   : > { %v7532_v36 = vpack.c.bf16 %v7526_v18, %v7526_v18  ;;  %v7527_v39 = vsel %vm7512_vm13, %v7483_v4, 0.0  ;;  %v12895_v4 = vld [vmem:[#allocation51 + $0x20] ss:$8 sps:$4 sm:$0xff]   ;;  %v12897_v18 = vld [vmem:[#allocation51 + $0x24] ss:$8 sps:$4 sm:$0xff]  }
0x12ff   : > { %v7533_v41 = vpack.c.bf16 %v7527_v39, %v7527_v39  ;;  %v12903_v39 = vld [vmem:[#allocation51 + $0x34] ss:$8 sps:$4 sm:$0xff]  }
0x1300   : > { %v7562_v55 = vsel %vm1694_vm1, %v7532_v36, 0  ;;  %v12901_v36 = vld [vmem:[#allocation51 + $0x30] ss:$8 sps:$4 sm:$0xff]  }
0x1301   : > { %10983 = vmatprep.subr.msk.bf16.mxu1 %vm1694_vm1, %v7533_v41  ;;  %11085 = vmatprep.subr.msk.bf16.mxu0 %vm1694_vm1, %v7533_v41 }
0x1302   : > { %7572 = vmatpush1.bf16.msra.mxu1 %v7562_v55  ;;  %8269 = vmatpush1.bf16.msra.mxu0 %v7562_v55 }
0x1303   : > { %10992 = vmatprep.subr.msk.bf16.mxu1 %vm15599_vm5, %v10972_v56  ;;  %8664 = vmatprep.subr.bf16.mxu0 %v8628_v15  ;;  %v12785_v15 = vld [vmem:[#allocation48 + $0x30] sm:$0xff]   ;;  %v12810_v56 = vld [vmem:[#allocation46 + $0x164] ss:$8 sps:$4 sm:$0xff]  }
0x1305   : > { %10984 = vmatmul.mubr.msk.bf16.vlgmr.msra.gmra.mrb[96].mxu1 %vm1816_vm4, %v12778_v57  ;;  %11086 = vmatmul.mubr.msk.bf16.vlgmr.msra.gmra.mrb[140].mxu0 %vm1816_vm4, %v12779_v20  ;;  %v12913_v57 = vld [vmem:[#allocation51 + $0x50] ss:$8 sps:$4 sm:$0xff]   ;;  %v12915_v20 = vld [vmem:[#allocation51 + $0x54] ss:$8 sps:$4 sm:$0xff]  }
0x1306   : > { %10995 = vmatpush1.bf16.msk.msra.mxu1 %vm15599_vm5, %v10975_v34  ;;  %8665 = vmatpush1.bf16.msra.mxu0 %v8627_v49  ;;  %v12786_v49 = vld [vmem:[#allocation48 + $0x38] ss:$0 sps:$4 sm:$0x33]   ;;  %v12807_v34 = vld [vmem:[#allocation46 + $0x154] ss:$8 sps:$4 sm:$0xff]  }
0x1307   : > { %10998 = vmatprep.subr.msk.bf16.mxu1 %vm15620_vm2, %v10978_v60  ;;  %11124 = vmatprep.subr.msk.bf16.mxu0 %vm1694_vm1, %v8630_v24  ;;  %v12829_v60 = vld [vmem:[#allocation46 + $0x1d0] ss:$8 sps:$4 sm:$0xff]   ;;  %v12919_v24 = vld [vmem:[#allocation51 + $0x60] ss:$8 sps:$4 sm:$0xff]  }
0x1308   : > { %7609 = vmatprep.mubr.bf16.mxu1 %v14084_v21  ;;  %8306 = vmatprep.mubr.bf16.mxu0 %v14084_v21 }
0x130a   : > { %11001 = vmatpush1.bf16.msk.msra.mxu1 %vm15620_vm2, %v10981_v0  ;;  %8667 = vmatpush1.bf16.msra.mxu0 %v8659_v22  ;;  %v12828_v0 = vld [vmem:[#allocation46 + $0x1c4] ss:$8 sps:$4 sm:$0xff]  }
0x130b   : > { %11002 = vmatprep.subr.msk.bf16.mxu1 %vm1694_vm1, %v7533_v41  ;;  %8935 = vmatprep.subr.bf16.mxu0 %v12885_v35  ;;  %v12907_v41 = vld [vmem:[#allocation51 + $0x40] ss:$8 sps:$4 sm:$0xff]   ;;  %v12925_v22 = vld [vmem:[#allocation51 + $0x70] ss:$8 sps:$4 sm:$0xff]  }
0x130d   : > { %10985 = vmatmul.mubr.msk.bf16.gmra.mrb[100].mxu1 %vm1816_vm4, %v12780_v8  ;;  %11087 = vmatmul.mubr.msk.bf16.gmra.mrb[144].mxu0 %vm1816_vm4, %v12785_v15  ;;  %v12927_v8 = vld [vmem:[#allocation51 + $0x74] ss:$8 sps:$4 sm:$0xff]   ;;  %v12931_v15 = vld [vmem:[#allocation51 + $0x80] ss:$8 sps:$4 sm:$0xff]  }
0x130e   : > { %7699 = vmatpush1.bf16.msra.mxu1 %v7562_v55  ;;  %7619 = vmatprep.mubr.bf16.mxu1 %v14084_v21  ;;  %v12909_v55 = vld [vmem:[#allocation51 + $0x44] ss:$8 sps:$4 sm:$0xff]  }
0x130f   : > { %8316 = vmatprep.mubr.bf16.mxu0 %v14084_v21  ;;  %7954 = vmatprep.subr.bf16.mxu1 %v12792_v59  ;;  %v12933_v59 = vld [vmem:[#allocation51 + $0x84] ss:$8 sps:$4 sm:$0xff]  }
0x1315   : > { %10986 = vmatmul.mubr.msk.bf16.gmra.mrb[104].mxu1 %vm1816_vm4, %v12781_v58  ;;  %11088 = vmatmul.mubr.msk.bf16.gmra.mrb[148].mxu0 %vm1816_vm4, %v12786_v49  ;;  %v12937_v58 = vld [vmem:[#allocation51 + $0x90] ss:$8 sps:$4 sm:$0xff]   ;;  %v12939_v49 = vld [vmem:[#allocation51 + $0x94] ss:$8 sps:$4 sm:$0xff]  }
0x1316   : > { %7726 = vmatprep.mubr.bf16.mxu1 %v14084_v21  ;;  %8696 = vmatprep.mubr.bf16.mxu0 %v14084_v21 }
0x131d   : > { %11003 = vmatmul.mubr.msk.bf16.vlgmr.msra.gmra.mrb[108].mxu1 %vm1816_vm4, %v12782_v19  ;;  %11125 = vmatmul.mubr.msk.bf16.vlgmr.msra.gmra.mrb[152].mxu0 %vm2409_vm8, %v12787_v62 }
0x131e   : > { %7736 = vmatprep.mubr.bf16.mxu1 %v14084_v21  ;;  %8706 = vmatprep.mubr.bf16.mxu0 %v14084_v21 }
0x131f   : > { %7955 = vmatpush1.bf16.msra.mxu1 %v12790_v37  ;;  %8936 = vmatpush1.bf16.msra.mxu0 %v12883_v63  ;;  %v12943_v37 = vld [vmem:[#allocation51 + $0xa0] ss:$8 sps:$4 sm:$0xff]  }
0x1320   : > { %7956 = vmatprep.subr.bf16.mxu1 %v12795_v38  ;;  %8937 = vmatprep.subr.bf16.mxu0 %v12891_v3  ;;  %v12945_v38 = vld [vmem:[#allocation51 + $0xa4] ss:$8 sps:$4 sm:$0xff]  }
0x1323   : > { %7957 = vmatpush1.bf16.msra.mxu1 %v12793_v43  ;;  %8938 = vmatpush1.bf16.msra.mxu0 %v12889_v26 }
0x1324   : > { %7958 = vmatprep.subr.bf16.mxu1 %v12798_v2  ;;  %8939 = vmatprep.subr.bf16.mxu0 %v12897_v18  ;;  %v12975_v18 = vld [vmem:[#allocation51 + $0xf4] ss:$8 sps:$4 sm:$0xff]  }
0x1325   : > { %11004 = vmatmul.mubr.msk.bf16.gmra.mrb[112].mxu1 %vm1816_vm4, %v12783_v5  ;;  %11126 = vmatmul.mubr.msk.bf16.gmra.mrb[156].mxu0 %vm2409_vm8, %v12788_v10 }
0x1326   : > { %7746 = vmatprep.mubr.bf16.mxu1 %v14084_v21  ;;  %8716 = vmatprep.mubr.bf16.mxu0 %v14084_v21 }
0x1327   : > { %7959 = vmatpush1.bf16.msra.mxu1 %v12796_v25  ;;  %8940 = vmatpush1.bf16.msra.mxu0 %v12895_v4  ;;  %v12973_v4 = vld [vmem:[#allocation51 + $0xf0] ss:$8 sps:$4 sm:$0xff]  }
0x1328   : > { %7960 = vmatprep.subr.bf16.mxu1 %v12801_v46  ;;  %8941 = vmatprep.subr.bf16.mxu0 %v12903_v39 }
0x132b   : > { %7961 = vmatpush1.bf16.msra.mxu1 %v12799_v53  ;;  %8942 = vmatpush1.bf16.msra.mxu0 %v12901_v36 }
0x132c   : > { %7962 = vmatprep.subr.bf16.mxu1 %v12804_v28  ;;  %8943 = vmatprep.subr.bf16.mxu0 %v12909_v55 }
0x132d   : > { %11005 = vmatmul.mubr.msk.bf16.gmra.mrb[116].mxu1 %vm1816_vm4, %v12784_v29  ;;  %11127 = vmatmul.mubr.msk.bf16.gmra.mrb[160].mxu0 %vm2409_vm8, %v12789_v27 }
0x132f   : > { %7963 = vmatpush1.bf16.msra.mxu1 %v12802_v30  ;;  %8944 = vmatpush1.bf16.msra.mxu0 %v12907_v41  ;;  %v12949_v30 = vld [vmem:[#allocation51 + $0xb0] ss:$8 sps:$4 sm:$0xff]  }
0x1330   : > { %7964 = vmatprep.subr.bf16.mxu1 %v12807_v34  ;;  %8945 = vmatprep.subr.bf16.mxu0 %v12915_v20  ;;  %v12951_v34 = vld [vmem:[#allocation51 + $0xb4] ss:$8 sps:$4 sm:$0xff]  }
0x1333   : > { %7965 = vmatpush1.bf16.msra.mxu1 %v12805_v32  ;;  %8946 = vmatpush1.bf16.msra.mxu0 %v12913_v57 }
0x1334   : > { %7966 = vmatprep.subr.bf16.mxu1 %v12810_v56  ;;  %8947 = vmatprep.subr.bf16.mxu0 %v12921_v31 }
0x1337   : > { %7967 = vmatpush1.bf16.msra.mxu1 %v12808_v9  ;;  %8948 = vmatpush1.bf16.msra.mxu0 %v12919_v24  ;;  %v12955_v9 = vld [vmem:[#allocation51 + $0xc0] ss:$8 sps:$4 sm:$0xff]  }
0x1338   : > { %7968 = vmatprep.subr.bf16.mxu1 %v12813_v13  ;;  %8949 = vmatprep.subr.bf16.mxu0 %v12927_v8  ;;  %v12957_v13 = vld [vmem:[#allocation51 + $0xc4] ss:$8 sps:$4 sm:$0xff]  }
0x133b   : > { %7969 = vmatpush1.bf16.msra.mxu1 %v12811_v47  ;;  %8950 = vmatpush1.bf16.msra.mxu0 %v12925_v22 }
0x133c   : > { %7970 = vmatprep.subr.bf16.mxu1 %v12816_v48  ;;  %8951 = vmatprep.subr.bf16.mxu0 %v12933_v59  ;;  %v12838_v59 = vld [vmem:[#allocation46] ss:$8 sps:$4 sm:$0xff]  }
0x133f   : > { %7971 = vmatpush1.bf16.msra.mxu1 %v12814_v16  ;;  %8952 = vmatpush1.bf16.msra.mxu0 %v12931_v15 }
0x1340   : > { %7972 = vmatprep.subr.bf16.mxu1 %v12819_v45  ;;  %8953 = vmatprep.subr.bf16.mxu0 %v12939_v49  ;;  %v12843_v49 = vld [vmem:[#allocation46 + $0x14] ss:$8 sps:$4 sm:$0xff]  }
0x1343   : > { %7973 = vmatpush1.bf16.msra.mxu1 %v12817_v33  ;;  %8954 = vmatpush1.bf16.msra.mxu0 %v12937_v58 }
0x1344   : > { %7974 = vmatprep.subr.bf16.mxu1 %v12822_v6  ;;  %8955 = vmatprep.subr.bf16.mxu0 %v12945_v38  ;;  %v12841_v38 = vld [vmem:[#allocation46 + $0x10] ss:$8 sps:$4 sm:$0xff]  }
0x1347   : > { %7975 = vmatpush1.bf16.msra.mxu1 %v12820_v40  ;;  %8956 = vmatpush1.bf16.msra.mxu0 %v12943_v37 }
0x1348   : > { %7976 = vmatprep.subr.bf16.mxu1 %v12825_v23  ;;  %8957 = vmatprep.subr.bf16.mxu0 %v12951_v34 }
0x134b   : > { %7977 = vmatpush1.bf16.msra.mxu1 %v12823_v50  ;;  %8958 = vmatpush1.bf16.msra.mxu0 %v12949_v30 }
0x134c   : > { %7978 = vmatprep.subr.bf16.mxu1 %v12828_v0  ;;  %8959 = vmatprep.subr.bf16.mxu0 %v12957_v13  ;;  %v12961_v0 = vld [vmem:[#allocation51 + $0xd0] ss:$8 sps:$4 sm:$0xff]  }
0x134f   : > { %7979 = vmatpush1.bf16.msra.mxu1 %v12826_v11  ;;  %8960 = vmatpush1.bf16.msra.mxu0 %v12955_v9  ;;  %v12846_v9 = vld [vmem:[#allocation46 + $0x24] ss:$8 sps:$4 sm:$0xff]  }
0x1350   : > { %7980 = vmatprep.subr.bf16.mxu1 %v12831_v44  ;;  %v12963_v44 = vld [vmem:[#allocation51 + $0xd4] ss:$8 sps:$4 sm:$0xff]  }
0x1351   : > { %8961 = vmatprep.subr.bf16.mxu0 %v12963_v44 }
0x1353   : > { %7981 = vmatpush1.bf16.msra.mxu1 %v12829_v60  ;;  %8962 = vmatpush1.bf16.msra.mxu0 %v12961_v0 }
0x1354   : > { %7982 = vmatprep.subr.bf16.mxu1 %v12834_v12  ;;  %v12967_v12 = vld [vmem:[#allocation51 + $0xe0] ss:$8 sps:$4 sm:$0xff]  }
0x1357   : > { %7983 = vmatpush1.bf16.msra.mxu1 %v12832_v61 }
0x1358   : > { %7984 = vmatprep.subr.bf16.mxu1 %v12837_v1  ;;  %v12969_v1 = vld [vmem:[#allocation51 + $0xe4] ss:$8 sps:$4 sm:$0xff]  }
0x1359   : > { %8963 = vmatprep.subr.bf16.mxu0 %v12969_v1 }
0x135a   : > { %8964 = vmatpush1.bf16.msra.mxu0 %v12967_v12 }
0x135b   : > { %7985 = vmatpush1.bf16.msra.mxu1 %v12835_v17  ;;  %8965 = vmatprep.subr.bf16.mxu0 %v12975_v18  ;;  %v12849_v18 = vld [vmem:[#allocation46 + $0x34] ss:$8 sps:$4 sm:$0xff]  }
0x135c   : > { %8175 = vmatprep.subr.bf16.mxu1 %v12840_v14 }
0x135e   : > { %8966 = vmatpush1.bf16.msra.mxu0 %v12973_v4 }
0x13d8   : > { %v15689_v19 = vpop.f32.mrb[96].mxu1  ;;  %v15691_v62 = vpop.f32.mrb[140].mxu0 }
0x13d9   : > { %v15693_v43 = vpop.f32.mrb[97].mxu1  ;;  %v15695_v2 = vpop.f32.mrb[141].mxu0 }
0x13da   : > { %v15697_v5 = vpop.f32.mrb[98].mxu1  ;;  %v15699_v10 = vpop.f32.mrb[142].mxu0 }
0x13db   : > { %v7628_v25 = vpack.c.bf16 %v15697_v5, %v15689_v19  ;;  %v15703_v46 = vpop.f32.mrb[99].mxu1  ;;  %v8325_v53 = vpack.c.bf16 %v15699_v10, %v15691_v62  ;;  %v15707_v28 = vpop.f32.mrb[143].mxu0  ;;  %v12910_v19 = vld [vmem:[#allocation46 + $0x230] ss:$8 sps:$4 sm:$0xff]   ;;  %v12918_v5 = vld [vmem:[#allocation46 + $0x244] ss:$8 sps:$4 sm:$0xff]  }
0x13dc   : > { %v7629_v29 = vpack.c.bf16 %v15703_v46, %v15693_v43  ;;  %v8326_v27 = vpack.c.bf16 %v15707_v28, %v15695_v2  ;;  %v12870_v43 = vld [vmem:[#allocation46 + $0xa4] ss:$8 sps:$4 sm:$0xff]   ;;  %v12868_v46 = vld [vmem:[#allocation46 + $0xa0] ss:$8 sps:$4 sm:$0xff]   ;;  %v12960_v28 = vld [vmem:[#allocation46 + $0x2b4] ss:$8 sps:$4 sm:$0xff]  }
0x13dd   : > { %v12952_v2 = vld [vmem:[#allocation46 + $0x2a0] ss:$8 sps:$4 sm:$0xff]   ;;  %v12982_v62 = vld [vmem:[%s14288_s3 + $0xc0] sm:$0xff]  }
0x13de   : > { %v12983_v10 = vld [vmem:[%s14288_s3 + $0x80] sm:$0xff]   ;;  %11435 = vmatprep.subr.bf16.mxu0 %v12982_v62 }
0x13e0   : > { %v15713_v32 = vpop.f32.mrb[100].mxu1  ;;  %v15715_v56 = vpop.f32.mrb[144].mxu0 }
0x13e1   : > { %v15717_v47 = vpop.f32.mrb[101].mxu1  ;;  %v15719_v48 = vpop.f32.mrb[145].mxu0 }
0x13e2   : > { %v15721_v16 = vpop.f32.mrb[102].mxu1  ;;  %v15723_v45 = vpop.f32.mrb[146].mxu0 }
0x13e3   : > { %v7630_v33 = vpack.c.bf16 %v15721_v16, %v15713_v32  ;;  %v15727_v40 = vpop.f32.mrb[103].mxu1  ;;  %v8327_v6 = vpack.c.bf16 %v15723_v45, %v15715_v56  ;;  %v15731_v23 = vpop.f32.mrb[147].mxu0  ;;  %v12930_v32 = vld [vmem:[#allocation46 + $0x264] ss:$8 sps:$4 sm:$0xff]   ;;  %v12928_v16 = vld [vmem:[#allocation46 + $0x260] ss:$8 sps:$4 sm:$0xff]  }
0x13e4   : > { %v7631_v50 = vpack.c.bf16 %v15727_v40, %v15717_v47  ;;  %v8328_v11 = vpack.c.bf16 %v15731_v23, %v15719_v48  ;;  %v12924_v40 = vld [vmem:[#allocation46 + $0x254] ss:$8 sps:$4 sm:$0xff]   ;;  %v12986_v56 = vld [vmem:[%s14288_s3 + $0xd0] sm:$0xff]   ;;  %v12989_v23 = vld [vmem:[%s14288_s3 + $0x98] sm:$0xff]  }
0x13e5   : > { %v12985_v48 = vld [vmem:[%s14288_s3 + $0x88] sm:$0xff]   ;;  %v12987_v45 = vld [vmem:[%s14288_s3 + $0x90] sm:$0xff]  }
0x13e8   : > { %v15737_v60 = vpop.f32.mrb[104].mxu1  ;;  %v15739_v61 = vpop.f32.mrb[148].mxu0 }
0x13e9   : > { %v15741_v17 = vpop.f32.mrb[105].mxu1  ;;  %v15743_v14 = vpop.f32.mrb[149].mxu0  ;;  %v7632_v47 = vpack.c.bf16 %v15737_v60, %v15737_v60  ;;  %v12940_v60 = vld [vmem:[#allocation46 + $0x280] ss:$8 sps:$4 sm:$0xff]  }
0x13ea   : > { %v7625_v63 = vpop.f32.mrb[106].mxu1  ;;  %v8322_v35 = vpop.f32.mrb[150].mxu0 }
0x13eb   : > { %v7626_v26 = vpop.f32.mrb[107].mxu1  ;;  %v8323_v3 = vpop.f32.mrb[151].mxu0 }
0x13ec   : > { %v12844_v3 = vld [vmem:[#allocation46 + $0x20] ss:$8 sps:$4 sm:$0xff]  }
0x13f0   : > { %v7728_v36 = vpop.f32.mrb[108].mxu1  ;;  %v8698_v39 = vpop.f32.mrb[152].mxu0 }
0x13f1   : > { %v7730_v41 = vpop.f32.mrb[109].mxu1  ;;  %v8700_v55 = vpop.f32.mrb[153].mxu0 }
0x13f2   : > { %v7732_v57 = vpop.f32.mrb[110].mxu1  ;;  %v8702_v20 = vpop.f32.mrb[154].mxu0 }
0x13f3   : > { %v7755_v24 = vpack.c.bf16 %v7732_v57, %v7728_v36  ;;  %v7734_v31 = vpop.f32.mrb[111].mxu1  ;;  %v8725_v22 = vpack.c.bf16 %v8702_v20, %v8698_v39  ;;  %v8704_v8 = vpop.f32.mrb[155].mxu0  ;;  %v12847_v39 = vld [vmem:[#allocation46 + $0x30] ss:$8 sps:$4 sm:$0xff]   ;;  %v12852_v57 = vld [vmem:[#allocation46 + $0x44] ss:$8 sps:$4 sm:$0xff]  }
0x13f4   : > { %v7756_v15 = vpack.c.bf16 %v7734_v31, %v7730_v41  ;;  %v8726_v58 = vpack.c.bf16 %v8704_v8, %v8700_v55 }
0x13f6   : > { %7986 = vmatprep.mubr.bf16.mxu1 %v7756_v15  ;;  %8967 = vmatprep.mubr.bf16.mxu0 %v8726_v58 }
0x13f7   : > { %7987 = vmatmul.mubr.bf16.vlgmr.msra.gmra.mrb[120].mxu1 %v7755_v24  ;;  %8968 = vmatmul.mubr.bf16.vlgmr.msra.gmra.mrb[164].mxu0 %v8725_v22 }
0x13f8   : > { %8176 = vmatpush1.bf16.msra.mxu1 %v12838_v59  ;;  %v7738_v37 = vpop.f32.mrb[112].mxu1  ;;  %v8708_v30 = vpop.f32.mrb[156].mxu0  ;;  %11436 = vmatpush3.bf16.msra.mxu0 %v12983_v10 }
0x13f9   : > { %v7740_v34 = vpop.f32.mrb[113].mxu1  ;;  %8177 = vmatprep.subr.bf16.mxu1 %v12843_v49  ;;  %v8710_v13 = vpop.f32.mrb[157].mxu0 }
0x13fa   : > { %v7742_v0 = vpop.f32.mrb[114].mxu1  ;;  %v8712_v44 = vpop.f32.mrb[158].mxu0 }
0x13fb   : > { %v7757_v12 = vpack.c.bf16 %v7742_v0, %v7738_v37  ;;  %v7744_v1 = vpop.f32.mrb[115].mxu1  ;;  %v8727_v63 = vpack.c.bf16 %v8712_v44, %v8708_v30  ;;  %v8714_v35 = vpop.f32.mrb[159].mxu0  ;;  %v12850_v37 = vld [vmem:[#allocation46 + $0x40] ss:$8 sps:$4 sm:$0xff]   ;;  %v12853_v30 = vld [vmem:[#allocation46 + $0x50] ss:$8 sps:$4 sm:$0xff]  }
0x13fc   : > { %v7758_v26 = vpack.c.bf16 %v7744_v1, %v7740_v34  ;;  %8178 = vmatpush1.bf16.msra.mxu1 %v12841_v38  ;;  %v8728_v4 = vpack.c.bf16 %v8714_v35, %v8710_v13  ;;  %v12855_v38 = vld [vmem:[#allocation46 + $0x54] ss:$8 sps:$4 sm:$0xff]   ;;  %v12858_v34 = vld [vmem:[#allocation46 + $0x64] ss:$8 sps:$4 sm:$0xff]   ;;  %v12859_v0 = vld [vmem:[#allocation46 + $0x70] ss:$8 sps:$4 sm:$0xff]  }
0x13fd   : > { %8179 = vmatprep.subr.bf16.mxu1 %v12846_v9  ;;  %v12856_v9 = vld [vmem:[#allocation46 + $0x60] ss:$8 sps:$4 sm:$0xff]   ;;  %v12861_v13 = vld [vmem:[#allocation46 + $0x74] ss:$8 sps:$4 sm:$0xff]   ;;  %v12864_v44 = vld [vmem:[#allocation46 + $0x84] ss:$8 sps:$4 sm:$0xff]  }
0x13fe   : > { %7996 = vmatprep.mubr.bf16.mxu1 %v7758_v26  ;;  %8977 = vmatprep.mubr.bf16.mxu0 %v8728_v4  ;;  %v12867_v1 = vld [vmem:[#allocation46 + $0x94] ss:$8 sps:$4 sm:$0xff]   ;;  %v12871_v35 = vld [vmem:[#allocation46 + $0xb0] ss:$8 sps:$4 sm:$0xff]   ;;  %v12876_v26 = vld [vmem:[#allocation46 + $0xc4] ss:$8 sps:$4 sm:$0xff]  }
0x13ff   : > { %7997 = vmatmul.mubr.bf16.gmra.mrb[124].mxu1 %v7757_v12  ;;  %8978 = vmatmul.mubr.bf16.gmra.mrb[168].mxu0 %v8727_v63  ;;  %v12862_v12 = vld [vmem:[#allocation46 + $0x80] ss:$8 sps:$4 sm:$0xff]   ;;  %v12865_v63 = vld [vmem:[#allocation46 + $0x90] ss:$8 sps:$4 sm:$0xff]   ;;  %v12879_v4 = vld [vmem:[#allocation46 + $0xd4] ss:$8 sps:$4 sm:$0xff]  }
0x1400   : > { %8180 = vmatpush1.bf16.msra.mxu1 %v12844_v3  ;;  %v7748_v36 = vpop.f32.mrb[116].mxu1  ;;  %v8718_v41 = vpop.f32.mrb[160].mxu0  ;;  %v12874_v3 = vld [vmem:[#allocation46 + $0xc0] ss:$8 sps:$4 sm:$0xff]  }
0x1401   : > { %8181 = vmatprep.subr.bf16.mxu1 %v12849_v18  ;;  %v7750_v55 = vpop.f32.mrb[117].mxu1  ;;  %v8720_v20 = vpop.f32.mrb[161].mxu0  ;;  %v7759_v15 = vpack.c.bf16 %v7748_v36, %v7748_v36  ;;  %v8729_v58 = vpack.c.bf16 %v8718_v41, %v8718_v41  ;;  %v12877_v18 = vld [vmem:[#allocation46 + $0xd0] ss:$8 sps:$4 sm:$0xff]   ;;  %v12882_v36 = vld [vmem:[#allocation46 + $0xe4] ss:$8 sps:$4 sm:$0xff]  }
0x1402   : > { %v7760_v24 = vpack.c.bf16 %v7750_v55, %v7750_v55  ;;  %v7752_v31 = vpop.f32.mrb[118].mxu1  ;;  %v8730_v22 = vpack.c.bf16 %v8720_v20, %v8720_v20  ;;  %v8722_v8 = vpop.f32.mrb[162].mxu0  ;;  %v12888_v41 = vld [vmem:[#allocation46 + $0xf4] ss:$8 sps:$4 sm:$0xff]   ;;  %v12886_v55 = vld [vmem:[#allocation46 + $0xf0] ss:$8 sps:$4 sm:$0xff]  }
0x1403   : > { %v7753_v59 = vpop.f32.mrb[119].mxu1  ;;  %v8723_v49 = vpop.f32.mrb[163].mxu0  ;;  %v12892_v20 = vld [vmem:[#allocation46 + $0x200] ss:$8 sps:$4 sm:$0xff]   ;;  %v12898_v31 = vld [vmem:[#allocation46 + $0x210] ss:$8 sps:$4 sm:$0xff]  }
0x1404   : > { %8182 = vmatpush1.bf16.msra.mxu1 %v12847_v39  ;;  %8006 = vmatprep.mubr.bf16.mxu1 %v7760_v24  ;;  %v12880_v39 = vld [vmem:[#allocation46 + $0xe0] ss:$8 sps:$4 sm:$0xff]   ;;  %v12900_v24 = vld [vmem:[#allocation46 + $0x214] ss:$8 sps:$4 sm:$0xff]   ;;  %v7633_v59 = vpack.c.bf16 %v15741_v17, %v15741_v17  ;;  %v12934_v17 = vld [vmem:[#allocation46 + $0x270] ss:$8 sps:$4 sm:$0xff]  }
0x1405   : > { %8183 = vmatprep.subr.bf16.mxu1 %v12852_v57  ;;  %8987 = vmatprep.mubr.bf16.mxu0 %v8730_v22  ;;  %v12894_v57 = vld [vmem:[#allocation46 + $0x204] ss:$8 sps:$4 sm:$0xff]   ;;  %v12904_v8 = vld [vmem:[#allocation46 + $0x220] ss:$8 sps:$4 sm:$0xff]   ;;  %v12948_v49 = vld [vmem:[#allocation46 + $0x294] ss:$8 sps:$4 sm:$0xff]  }
0x1406   : > { %v12906_v22 = vld [vmem:[#allocation46 + $0x224] ss:$8 sps:$4 sm:$0xff]  }
0x1407   : > { %8007 = vmatmul.mubr.bf16.gmra.mrb[128].mxu1 %v7759_v15  ;;  %8988 = vmatmul.mubr.bf16.gmra.mrb[172].mxu0 %v8729_v58  ;;  %v12912_v15 = vld [vmem:[#allocation46 + $0x234] ss:$8 sps:$4 sm:$0xff]   ;;  %v12942_v58 = vld [vmem:[#allocation46 + $0x284] ss:$8 sps:$4 sm:$0xff]  }
0x1408   : > { %8184 = vmatpush1.bf16.msra.mxu1 %v12850_v37  ;;  %8207 = vmatprep.mubr.bf16.mxu1 %v7629_v29  ;;  %v12873_v29 = vld [vmem:[#allocation46 + $0xb4] ss:$8 sps:$4 sm:$0xff]   ;;  %v12946_v37 = vld [vmem:[#allocation46 + $0x290] ss:$8 sps:$4 sm:$0xff]  }
0x1409   : > { %8185 = vmatprep.subr.bf16.mxu1 %v12855_v38  ;;  %v12954_v38 = vld [vmem:[#allocation46 + $0x2a4] ss:$8 sps:$4 sm:$0xff]  }
0x140c   : > { %8186 = vmatpush1.bf16.msra.mxu1 %v12853_v30  ;;  %v12966_v30 = vld [vmem:[#allocation46 + $0x2c4] ss:$8 sps:$4 sm:$0xff]  }
0x140d   : > { %8187 = vmatprep.subr.bf16.mxu1 %v12858_v34  ;;  %v12964_v34 = vld [vmem:[#allocation46 + $0x2c0] ss:$8 sps:$4 sm:$0xff]  }
0x1410   : > { %8188 = vmatpush1.bf16.msra.mxu1 %v12856_v9  ;;  %v12972_v9 = vld [vmem:[#allocation46 + $0x2d4] ss:$8 sps:$4 sm:$0xff]  }
0x1411   : > { %8189 = vmatprep.subr.bf16.mxu1 %v12861_v13  ;;  %v12970_v13 = vld [vmem:[#allocation46 + $0x2d0] ss:$8 sps:$4 sm:$0xff]  }
0x1414   : > { %8190 = vmatpush1.bf16.msra.mxu1 %v12859_v0  ;;  %v12978_v0 = vld [vmem:[#allocation46 + $0x2e4] ss:$8 sps:$4 sm:$0xff]  }
0x1415   : > { %8191 = vmatprep.subr.bf16.mxu1 %v12864_v44  ;;  %v12976_v44 = vld [vmem:[#allocation46 + $0x2e0] ss:$8 sps:$4 sm:$0xff]  }
0x1418   : > { %8192 = vmatpush1.bf16.msra.mxu1 %v12862_v12  ;;  %v12981_v12 = vld [vmem:[#allocation46 + $0x2f4] ss:$8 sps:$4 sm:$0xff]  }
0x1419   : > { %8193 = vmatprep.subr.bf16.mxu1 %v12867_v1  ;;  %v12979_v1 = vld [vmem:[#allocation46 + $0x2f0] ss:$8 sps:$4 sm:$0xff]  }
0x141c   : > { %8194 = vmatpush1.bf16.msra.mxu1 %v12865_v63  ;;  %v8330_v63 = vpack.c.bf16 %v15743_v14, %v15743_v14 }
0x141d   : > { %8195 = vmatprep.subr.bf16.mxu1 %v12870_v43  ;;  %v8329_v43 = vpack.c.bf16 %v15739_v61, %v15739_v61  ;;  %v12991_v61 = vld [vmem:[%s14288_s3 + $0xa0] sm:$0xff]  }
0x1420   : > { %8196 = vmatpush1.bf16.msra.mxu1 %v12868_v46  ;;  %v12992_v46 = vld [vmem:[%s14288_s3 + $0xe8] sm:$0xff]  }
0x1421   : > { %8197 = vmatprep.subr.bf16.mxu1 %v12873_v29 }
0x1424   : > { %8198 = vmatpush1.bf16.msra.mxu1 %v12871_v35  ;;  %v12993_v35 = vld [vmem:[%s14288_s3 + $0xa8] sm:$0xff]  }
0x1425   : > { %8199 = vmatprep.subr.bf16.mxu1 %v12876_v26 }
0x1428   : > { %8200 = vmatpush1.bf16.msra.mxu1 %v12874_v3 }
0x1429   : > { %8201 = vmatprep.subr.bf16.mxu1 %v12879_v4  ;;  %v12994_v4 = vld [vmem:[%s14288_s3 + $0xf0] sm:$0xff]  }
0x142c   : > { %8202 = vmatpush1.bf16.msra.mxu1 %v12877_v18  ;;  %v12995_v18 = vld [vmem:[%s14288_s3 + $0xb0] sm:$0xff]  }
0x142d   : > { %8203 = vmatprep.subr.bf16.mxu1 %v12882_v36 }
0x1430   : > { %8204 = vmatpush1.bf16.msra.mxu1 %v12880_v39  ;;  %v12996_v39 = vld [vmem:[%s14288_s3 + $0xf8] sm:$0xff]  }
0x1431   : > { %8205 = vmatprep.subr.bf16.mxu1 %v12888_v41 }
0x1434   : > { %8206 = vmatpush1.bf16.msra.mxu1 %v12886_v55  ;;  %v12997_v55 = vld [vmem:[%s14288_s3 + $0xb8] sm:$0xff]  }
0x1435   : > { %8524 = vmatprep.subr.bf16.mxu1 %v12894_v57 }
0x1437   : > { %8208 = vmatmul.mubr.bf16.vlgmr.msra.gmra.mrb[120].mxu1 %v7628_v25  ;;  %v12916_v25 = vld [vmem:[#allocation46 + $0x240] ss:$8 sps:$4 sm:$0xff]  }
0x1438   : > { %8217 = vmatprep.mubr.bf16.mxu1 %v7631_v50  ;;  %8525 = vmatpush1.bf16.msra.mxu1 %v12892_v20  ;;  %v12922_v50 = vld [vmem:[#allocation46 + $0x250] ss:$8 sps:$4 sm:$0xff]  }
0x1439   : > { %8526 = vmatprep.subr.bf16.mxu1 %v12900_v24 }
0x143c   : > { %8527 = vmatpush1.bf16.msra.mxu1 %v12898_v31 }
0x143d   : > { %8528 = vmatprep.subr.bf16.mxu1 %v12906_v22 }
0x143f   : > { %8218 = vmatmul.mubr.bf16.gmra.mrb[124].mxu1 %v7630_v33  ;;  %v12936_v33 = vld [vmem:[#allocation46 + $0x274] ss:$8 sps:$4 sm:$0xff]  }
0x1440   : > { %8227 = vmatprep.mubr.bf16.mxu1 %v7633_v59  ;;  %8529 = vmatpush1.bf16.msra.mxu1 %v12904_v8 }
0x1441   : > { %8530 = vmatprep.subr.bf16.mxu1 %v12912_v15 }
0x1444   : > { %8531 = vmatpush1.bf16.msra.mxu1 %v12910_v19 }
0x1445   : > { %8532 = vmatprep.subr.bf16.mxu1 %v12918_v5 }
0x1447   : > { %8228 = vmatmul.mubr.bf16.gmra.mrb[132].mxu1 %v7632_v47 }
0x1448   : > { %8533 = vmatpush1.bf16.msra.mxu1 %v12916_v25  ;;  %8556 = vmatprep.mubr.bf16.mxu1 %v8326_v27  ;;  %v12958_v27 = vld [vmem:[#allocation46 + $0x2b0] ss:$8 sps:$4 sm:$0xff]  }
0x1449   : > { %8534 = vmatprep.subr.bf16.mxu1 %v12924_v40 }
0x144c   : > { %8535 = vmatpush1.bf16.msra.mxu1 %v12922_v50 }
0x144d   : > { %8536 = vmatprep.subr.bf16.mxu1 %v12930_v32 }
0x1450   : > { %8537 = vmatpush1.bf16.msra.mxu1 %v12928_v16 }
0x1451   : > { %8538 = vmatprep.subr.bf16.mxu1 %v12936_v33  ;;  %v8763_v33 = vld [vmem:[#allocation52] sm:$0x3] }
0x1454   : > { %8539 = vmatpush1.bf16.msra.mxu1 %v12934_v17  ;;  %v8768_v17 = vrot.slane %v8763_v33, %v15168_v51 }
0x1455   : > { %8540 = vmatprep.subr.bf16.mxu1 %v12942_v58  ;;  %v8595_v58 = vld [vmem:[#allocation49] sm:$0x3] }
0x1458   : > { %8541 = vmatpush1.bf16.msra.mxu1 %v12940_v60  ;;  %v8772_v60 = vrot.slane %v8763_v33, %v15171_v54 }
0x1459   : > { %8542 = vmatprep.subr.bf16.mxu1 %v12948_v49  ;;  %v15805_v49 = vrot.slane %v8595_v58, %v15168_v51 }
0x145c   : > { %8543 = vmatpush1.bf16.msra.mxu1 %v12946_v37 }
0x145d   : > { %8544 = vmatprep.subr.bf16.mxu1 %v12954_v38  ;;  %v15808_v38 = vrot.slane %v8595_v58, %v15171_v54 }
0x1460   : > { %8545 = vmatpush1.bf16.msra.mxu1 %v12952_v2 }
0x1461   : > { %8546 = vmatprep.subr.bf16.mxu1 %v12960_v28 }
0x1464   : > { %8547 = vmatpush1.bf16.msra.mxu1 %v12958_v27 }
0x1465   : > { %8548 = vmatprep.subr.bf16.mxu1 %v12966_v30 }
0x1468   : > { %8549 = vmatpush1.bf16.msra.mxu1 %v12964_v34 }
0x1469   : > { %8550 = vmatprep.subr.bf16.mxu1 %v12972_v9 }
0x146c   : > { %8551 = vmatpush1.bf16.msra.mxu1 %v12970_v13 }
0x146d   : > { %8552 = vmatprep.subr.bf16.mxu1 %v12978_v0 }
0x1470   : > { %8553 = vmatpush1.bf16.msra.mxu1 %v12976_v44 }
0x1471   : > { %8554 = vmatprep.subr.bf16.mxu1 %v12981_v12 }
0x1474   : > { %8555 = vmatpush1.bf16.msra.mxu1 %v12979_v1 }
0x1477   : > { %8557 = vmatmul.mubr.bf16.vlgmr.msra.gmra.mrb[120].mxu1 %v8325_v53  ;;  %v12984_v53 = vld [vmem:[%s14288_s3 + $0xc8] sm:$0xff]  }
0x1478   : > { %8566 = vmatprep.mubr.bf16.mxu1 %v8328_v11  ;;  %11437 = vmatprep.subr.bf16.mxu0 %v12984_v53  ;;  %v12990_v11 = vld [vmem:[%s14288_s3 + $0xe0] sm:$0xff]  }
0x1479   : > { %11438 = vmatpush3.bf16.msra.mxu0 %v12985_v48 }
0x147a   : > { %11439 = vmatprep.subr.bf16.mxu0 %v12986_v56 }
0x147d   : > { %11440 = vmatpush3.bf16.msra.mxu0 %v12987_v45 }
0x147f   : > { %8567 = vmatmul.mubr.bf16.gmra.mrb[124].mxu1 %v8327_v6  ;;  %v12988_v6 = vld [vmem:[%s14288_s3 + $0xd8] sm:$0xff]  }
0x1480   : > { %8576 = vmatprep.mubr.bf16.mxu1 %v8330_v63  ;;  %11441 = vmatprep.subr.bf16.mxu0 %v12988_v6 }
0x1481   : > { %11442 = vmatpush3.bf16.msra.mxu0 %v12989_v23 }
0x1482   : > { %11443 = vmatprep.subr.bf16.mxu0 %v12990_v11 }
0x1485   : > { %11444 = vmatpush3.bf16.msra.mxu0 %v12991_v61 }
0x1486   : > { %11445 = vmatprep.subr.bf16.mxu0 %v12992_v46 }
0x1487   : > { %8577 = vmatmul.mubr.bf16.gmra.mrb[136].mxu1 %v8329_v43 }
0x1488   : > { %9097 = vmatprep.mubr.bf16.mxu1 %v14084_v21 }
0x1489   : > { %11446 = vmatpush3.bf16.msra.mxu0 %v12993_v35 }
0x148a   : > { %11447 = vmatprep.subr.bf16.mxu0 %v12994_v4 }
0x148d   : > { %11448 = vmatpush3.bf16.msra.mxu0 %v12995_v18 }
0x148e   : > { %11449 = vmatprep.subr.bf16.mxu0 %v12996_v39 }
0x1491   : > { %11450 = vmatpush3.bf16.msra.mxu0 %v12997_v55 }
0x14ca   : > { %v8969_v14 = vpop.f32.mrb[164].mxu0 }
0x14cb   : > { %v8971_v29 = vpop.f32.mrb[165].mxu0  ;;  %v8970_v37 = vadd.f32 %v8969_v14, %v8768_v17 }
0x14cc   : > { %v8973_v26 = vpop.f32.mrb[166].mxu0  ;;  %v8972_v2 = vadd.f32 %v8971_v29, %v8772_v60 }
0x14cd   : > { %v8975_v3 = vpop.f32.mrb[167].mxu0  ;;  %v8996_v34 = vsel %vm2376_vm3, %v8970_v37, 0.0  ;;  %v8974_v51 = vadd.f32 %v8973_v26, %v8768_v17 }
0x14ce   : > { %v8997_v0 = vsel %vm2376_vm3, %v8972_v2, 0.0  ;;  %v8976_v1 = vadd.f32 %v8975_v3, %v8772_v60 }
0x14d2   : > { %v8979_v36 = vpop.f32.mrb[168].mxu0 }
0x14d3   : > { %v8981_v41 = vpop.f32.mrb[169].mxu0  ;;  %v8980_v56 = vadd.f32 %v8979_v36, %v8768_v17 }
0x14d4   : > { %v8983_v57 = vpop.f32.mrb[170].mxu0  ;;  %v8982_v11 = vadd.f32 %v8981_v41, %v8772_v60 }
0x14d5   : > { %v8985_v20 = vpop.f32.mrb[171].mxu0  ;;  %v9000_v26 = vsel %vm15613_vm12, %v8980_v56, 0.0  ;;  %v8984_v39 = vadd.f32 %v8983_v57, %v8768_v17  ;;  %v13007_v56 = vld [vmem:[%s14288_s3 + $0x8] sm:$0xff]  }
0x14d6   : > { %v9001_v36 = vsel %vm15613_vm12, %v8982_v11, 0.0  ;;  %v13010_v11 = vld [vmem:[%s14288_s3 + $0x58] sm:$0xff]  }
0x14da   : > { %v8008_v24 = vpop.f32.mrb[128].mxu1  ;;  %v15794_v31 = vpop.f32.mrb[172].mxu0 }
0x14db   : > { %v8010_v22 = vpop.f32.mrb[129].mxu1  ;;  %v15796_v8 = vpop.f32.mrb[173].mxu0 }
0x14dc   : > { %v8012_v15 = vpop.f32.mrb[130].mxu1  ;;  %v8993_v59 = vpop.f32.mrb[174].mxu0 }
0x14dd   : > { %v8013_v19 = vpop.f32.mrb[131].mxu1  ;;  %v8994_v5 = vpop.f32.mrb[175].mxu0 }
0x151a   : > { %v8229_v25 = vpop.f32.mrb[132].mxu1 }
0x151b   : > { %v15798_v47 = vadd.f32 %v8229_v25, %v8008_v24  ;;  %v8231_v40 = vpop.f32.mrb[133].mxu1 }
0x151c   : > { %v15800_v50 = vadd.f32 %v8231_v40, %v8010_v22  ;;  %v8233_v32 = vpop.f32.mrb[134].mxu1  ;;  %v8986_v22 = vadd.f32 %v8985_v20, %v8772_v60  ;;  %v8990_v20 = vadd.f32 %v15794_v31, %v8768_v17 }
0x151d   : > { %v8234_v16 = vpop.f32.mrb[135].mxu1 }
0x151e   : > { %v9004_v31 = vsel %vm7512_vm13, %v8990_v20, 0.0 }
0x154a   : > { %v8558_v28 = vpop.f32.mrb[120].mxu1 }
0x154b   : > { %v8607_v27 = vadd.f32 %v15805_v49, %v8558_v28  ;;  %v8560_v30 = vpop.f32.mrb[121].mxu1 }
0x154c   : > { %v8608_v9 = vadd.f32 %v15808_v38, %v8560_v30  ;;  %v8562_v13 = vpop.f32.mrb[122].mxu1 }
0x154d   : > { %v8617_v44 = vsel %vm2376_vm3, %v8607_v27, 0.0  ;;  %v8609_v54 = vadd.f32 %v15805_v49, %v8562_v13  ;;  %v8564_v12 = vpop.f32.mrb[123].mxu1  ;;  %v8992_v27 = vadd.f32 %v15796_v8, %v8772_v60 }
0x154e   : > { %v9006_v63 = vadd.f32 %v8996_v34, %v8617_v44  ;;  %v8618_v43 = vsel %vm2376_vm3, %v8608_v9, 0.0  ;;  %v8610_v62 = vadd.f32 %v15808_v38, %v8564_v12 }
0x154f   : > { %v9007_v10 = vadd.f32 %v8997_v0, %v8618_v43  ;;  %v9008_v53 = vadd.f32 %v8974_v51, %v8609_v54  ;;  %v9005_v8 = vsel %vm7512_vm13, %v8992_v27, 0.0  ;;  %v13004_v43 = vld [vmem:[%s14288_s3 + $0x40] sm:$0xff]  }
0x1550   : > { %v9016_v48 = vmax.f32 %v9006_v63, 0.0  ;;  %v9009_v45 = vadd.f32 %v8976_v1, %v8610_v62  ;;  %v12998_v1 = vld [vmem:[#allocation54] sm:$0xff]   ;;  %v12999_v63 = vld [vmem:[#allocation54 + $0x8] sm:$0xff]   ;;  %v13000_v62 = vld [vmem:[#allocation54 + $0x10] ss:$0 sps:$4 sm:$0x33]  }
0x1551   : > { %v9017_v6 = vmax.f32 %v9007_v10, 0.0  ;;  %v9018_v23 = vmax.f32 %v9008_v53, 0.0  ;;  %v13001_v10 = vld [vmem:[#allocation54 + $0x14] sm:$0xff]  }
0x1552   : > { %v9019_v61 = vmax.f32 %v9009_v45, 0.0  ;;  %v8568_v14 = vpop.f32.mrb[124].mxu1  ;;  %v13005_v53 = vld [vmem:[%s14288_s3] sm:$0xff]   ;;  %v13008_v45 = vld [vmem:[%s14288_s3 + $0x50] sm:$0xff]  }
0x1553   : > { %v15822_v46 = vpack.c.bf16 %v9018_v23, %v9016_v48  ;;  %v8611_v29 = vadd.f32 %v15805_v49, %v8568_v14  ;;  %v8570_v35 = vpop.f32.mrb[125].mxu1  ;;  %v13006_v48 = vld [vmem:[%s14288_s3 + $0x48] sm:$0xff]   ;;  %v13009_v23 = vld [vmem:[%s14288_s3 + $0x10] sm:$0xff]   ;;  %v13012_v14 = vld [vmem:[%s14288_s3 + $0x60] sm:$0xff]  }
0x1554   : > { %v8612_v3 = vadd.f32 %v15808_v38, %v8570_v35  ;;  %v8572_v4 = vpop.f32.mrb[126].mxu1  ;;  %v9027_v18 = vpack.c.bf16 %v9019_v61, %v9017_v6  ;;  %v13002_v6 = vld [vmem:[#allocation54 + $0x1c] sm:$0xff]   ;;  %v13011_v61 = vld [vmem:[%s14288_s3 + $0x18] sm:$0xff]   ;;  %v13013_v35 = vld [vmem:[%s14288_s3 + $0x20] sm:$0xff]  }
0x1555   : > { %v8621_v41 = vsel %vm15613_vm12, %v8611_v29, 0.0  ;;  %v8613_v55 = vadd.f32 %v15805_v49, %v8572_v4  ;;  %v8574_v24 = vpop.f32.mrb[127].mxu1  ;;  %v13003_v29 = vld [vmem:[#allocation54 + $0x24] ss:$0 sps:$4 sm:$0x33]  }
0x1556   : > { %v9010_v15 = vadd.f32 %v9000_v26, %v8621_v41  ;;  %v8622_v59 = vsel %vm15613_vm12, %v8612_v3, 0.0  ;;  %v8614_v19 = vadd.f32 %v15808_v38, %v8574_v24  ;;  %9065 = vmatprep.subr.bf16.mxu1 %v9027_v18  ;;  %9624 = vmatprep.subr.bf16.mxu0 %v9027_v18  ;;  %v13014_v26 = vld [vmem:[%s14288_s3 + $0x68] sm:$0xff]   ;;  %v13016_v4 = vld [vmem:[%s14288_s3 + $0x70] sm:$0xff]  }
0x1557   : > { %v9011_v5 = vadd.f32 %v9001_v36, %v8622_v59  ;;  %v9012_v25 = vadd.f32 %v8984_v39, %v8613_v55  ;;  %9066 = vmatpush1.bf16.msra.mxu1 %v15822_v46  ;;  %v13015_v3 = vld [vmem:[%s14288_s3 + $0x28] sm:$0xff]   ;;  %v13018_v36 = vld [vmem:[%s14288_s3 + $0x78] sm:$0xff]  }
0x1558   : > { %v9020_v57 = vmax.f32 %v9010_v15, 0.0  ;;  %v9013_v40 = vadd.f32 %v8986_v22, %v8614_v19  ;;  %v13019_v39 = vld [vmem:[%s14288_s3 + $0x38] sm:$0xff]  }
0x1559   : > { %v9021_v32 = vmax.f32 %v9011_v5, 0.0  ;;  %v9022_v16 = vmax.f32 %v9012_v25, 0.0 }
0x155a   : > { %v9023_v33 = vmax.f32 %v9013_v40, 0.0  ;;  %v8578_v58 = vpop.f32.mrb[136].mxu1 }
0x155b   : > { %v15837_v37 = vpack.c.bf16 %v9022_v16, %v9020_v57  ;;  %v8593_v2 = vadd.f32 %v8578_v58, %v15798_v47  ;;  %v8580_v28 = vpop.f32.mrb[137].mxu1 }
0x155c   : > { %v8594_v30 = vadd.f32 %v8580_v28, %v15800_v50  ;;  %v8582_v34 = vpop.f32.mrb[138].mxu1  ;;  %v15843_v9 = vpack.c.bf16 %v9023_v33, %v9021_v32 }
0x155d   : > { %v8615_v13 = vadd.f32 %v15805_v49, %v8593_v2  ;;  %v8583_v0 = vpop.f32.mrb[139].mxu1 }
0x155e   : > { %v8616_v51 = vadd.f32 %v15808_v38, %v8594_v30  ;;  %9067 = vmatprep.subr.bf16.mxu1 %v15843_v9 }
0x155f   : > { %v8625_v47 = vsel %vm7512_vm13, %v8615_v13, 0.0  ;;  %9068 = vmatpush1.bf16.msra.mxu1 %v15837_v37 }
0x1560   : > { %v9014_v50 = vadd.f32 %v9004_v31, %v8625_v47  ;;  %v8626_v17 = vsel %vm7512_vm13, %v8616_v51, 0.0 }
0x1561   : > { %v9015_v60 = vadd.f32 %v9005_v8, %v8626_v17 }
0x1562   : > { %v9024_v49 = vmax.f32 %v9014_v50, 0.0 }
0x1563   : > { %v9025_v38 = vmax.f32 %v9015_v60, 0.0 }
0x1564   : > { %v9030_v44 = vpack.c.bf16 %v9024_v49, %v9024_v49 }
0x1565   : > { %v15857_v54 = vpack.c.bf16 %v9025_v38, %v9025_v38 }
0x1566   : > { %v15860_v12 = vsel %vm1694_vm1, %v9030_v44, 0 }
0x1567   : > { %11163 = vmatprep.subr.msk.bf16.mxu1 %vm1694_vm1, %v15857_v54 }
0x1568   : > { %9070 = vmatpush1.bf16.msra.mxu1 %v15860_v12 }
0x1569   : > { %9192 = vmatprep.subr.bf16.mxu1 %v9027_v18  ;;  %v13017_v18 = vld [vmem:[%s14288_s3 + $0x30] sm:$0xff]  }
0x156b   : > { %11164 = vmatmul.mubr.msk.bf16.vlgmr.msra.gmra.mrb[140].mxu1 %vm1816_vm4, %v12998_v1 }
0x156c   : > { %9193 = vmatpush1.bf16.msra.mxu1 %v15822_v46  ;;  %9107 = vmatprep.mubr.bf16.mxu1 %v14084_v21 }
0x156d   : > { %9194 = vmatprep.subr.bf16.mxu1 %v15843_v9 }
0x1570   : > { %9195 = vmatpush1.bf16.msra.mxu1 %v15837_v37 }
0x1571   : > { %11170 = vmatprep.subr.msk.bf16.mxu1 %vm1694_vm1, %v15857_v54 }
0x1573   : > { %11165 = vmatmul.mubr.msk.bf16.gmra.mrb[144].mxu1 %vm1816_vm4, %v12999_v63  ;;  %v13023_v63 = vld [vmem:[%s14288_s3 + $0x140] sm:$0xff]  }
0x1574   : > { %9197 = vmatpush1.bf16.msra.mxu1 %v15860_v12  ;;  %9117 = vmatprep.mubr.bf16.mxu1 %v14084_v21 }
0x1575   : > { %11469 = vmatprep.subr.bf16.mxu1 %v13004_v43  ;;  %v13024_v43 = vld [vmem:[%s14288_s3 + $0x100] sm:$0xff]  }
0x157b   : > { %11166 = vmatmul.mubr.msk.bf16.gmra.mrb[148].mxu1 %vm1816_vm4, %v13000_v62  ;;  %v13025_v62 = vld [vmem:[%s14288_s3 + $0x148] sm:$0xff]  }
0x157c   : > { %9224 = vmatprep.mubr.bf16.mxu1 %v14084_v21 }
0x1583   : > { %11171 = vmatmul.mubr.msk.bf16.vlgmr.msra.gmra.mrb[152].mxu1 %vm1816_vm4, %v13001_v10  ;;  %v13026_v10 = vld [vmem:[%s14288_s3 + $0x108] sm:$0xff]  }
0x1584   : > { %9234 = vmatprep.mubr.bf16.mxu1 %v14084_v21  ;;  %11470 = vmatpush3.bf16.msra.mxu1 %v13005_v53  ;;  %v13027_v53 = vld [vmem:[%s14288_s3 + $0x150] sm:$0xff]  }
0x1585   : > { %11471 = vmatprep.subr.bf16.mxu1 %v13006_v48  ;;  %v13028_v48 = vld [vmem:[%s14288_s3 + $0x110] sm:$0xff]  }
0x1588   : > { %11472 = vmatpush3.bf16.msra.mxu1 %v13007_v56  ;;  %v13030_v56 = vld [vmem:[%s14288_s3 + $0x118] sm:$0xff]  }
0x1589   : > { %11473 = vmatprep.subr.bf16.mxu1 %v13008_v45  ;;  %v13031_v45 = vld [vmem:[%s14288_s3 + $0x160] sm:$0xff]  }
0x158b   : > { %11172 = vmatmul.mubr.msk.bf16.gmra.mrb[156].mxu1 %vm1816_vm4, %v13002_v6  ;;  %v13032_v6 = vld [vmem:[%s14288_s3 + $0x120] sm:$0xff]  }
0x158c   : > { %9244 = vmatprep.mubr.bf16.mxu1 %v14084_v21  ;;  %11474 = vmatpush3.bf16.msra.mxu1 %v13009_v23  ;;  %v13033_v23 = vld [vmem:[%s14288_s3 + $0x168] sm:$0xff]  }
0x158d   : > { %11475 = vmatprep.subr.bf16.mxu1 %v13010_v11  ;;  %v13034_v11 = vld [vmem:[%s14288_s3 + $0x128] sm:$0xff]  }
0x1590   : > { %11476 = vmatpush3.bf16.msra.mxu1 %v13011_v61  ;;  %v13035_v61 = vld [vmem:[%s14288_s3 + $0x170] sm:$0xff]  }
0x1591   : > { %11477 = vmatprep.subr.bf16.mxu1 %v13012_v14  ;;  %v13036_v14 = vld [vmem:[%s14288_s3 + $0x130] sm:$0xff]  }
0x1593   : > { %11173 = vmatmul.mubr.msk.bf16.gmra.mrb[160].mxu1 %vm1816_vm4, %v13003_v29  ;;  %v13037_v29 = vld [vmem:[%s14288_s3 + $0x178] sm:$0xff]  }
0x1594   : > { %11478 = vmatpush3.bf16.msra.mxu1 %v13013_v35  ;;  %v13038_v35 = vld [vmem:[%s14288_s3 + $0x138] sm:$0xff]  }
0x1595   : > { %11479 = vmatprep.subr.bf16.mxu1 %v13014_v26 }
0x1598   : > { %11480 = vmatpush3.bf16.msra.mxu1 %v13015_v3 }
0x1599   : > { %11481 = vmatprep.subr.bf16.mxu1 %v13016_v4 }
0x159c   : > { %11482 = vmatpush3.bf16.msra.mxu1 %v13017_v18 }
0x159d   : > { %11483 = vmatprep.subr.bf16.mxu1 %v13018_v36 }
0x15a0   : > { %11484 = vmatpush3.bf16.msra.mxu1 %v13019_v39 }
0x15a1   : > { %11503 = vmatprep.subr.bf16.mxu1 %v13023_v63 }
0x163e   : > { %v9099_v41 = vpop.f32.mrb[140].mxu1 }
0x163f   : > { %v9101_v55 = vpop.f32.mrb[141].mxu1 }
0x1640   : > { %v9103_v24 = vpop.f32.mrb[142].mxu1 }
0x1641   : > { %v9126_v22 = vpack.c.bf16 %v9103_v24, %v9099_v41  ;;  %v9105_v15 = vpop.f32.mrb[143].mxu1 }
0x1642   : > { %v9127_v59 = vpack.c.bf16 %v9105_v15, %v9101_v55 }
0x1644   : > { %9572 = vmatprep.mubr.bf16.mxu1 %v9127_v59 }
0x1645   : > { %9573 = vmatmul.mubr.bf16.vlgmr.msra.gmra.mrb[164].mxu1 %v9126_v22 }
0x1646   : > { %v9109_v19 = vpop.f32.mrb[144].mxu1  ;;  %11504 = vmatpush3.bf16.msra.mxu1 %v13024_v43 }
0x1647   : > { %v9111_v5 = vpop.f32.mrb[145].mxu1  ;;  %11505 = vmatprep.subr.bf16.mxu1 %v13025_v62 }
0x1648   : > { %v9113_v25 = vpop.f32.mrb[146].mxu1 }
0x1649   : > { %v9128_v57 = vpack.c.bf16 %v9113_v25, %v9109_v19  ;;  %v9115_v40 = vpop.f32.mrb[147].mxu1 }
0x164a   : > { %v9129_v32 = vpack.c.bf16 %v9115_v40, %v9111_v5  ;;  %11506 = vmatpush3.bf16.msra.mxu1 %v13026_v10 }
0x164b   : > { %11507 = vmatprep.subr.bf16.mxu1 %v13027_v53 }
0x164c   : > { %9580 = vmatprep.mubr.bf16.mxu1 %v9129_v32 }
0x164d   : > { %9581 = vmatmul.mubr.bf16.gmra.mrb[168].mxu1 %v9128_v57 }
0x164e   : > { %v9119_v16 = vpop.f32.mrb[148].mxu1  ;;  %11508 = vmatpush3.bf16.msra.mxu1 %v13028_v48 }
0x164f   : > { %v9121_v33 = vpop.f32.mrb[149].mxu1  ;;  %v9130_v28 = vpack.c.bf16 %v9119_v16, %v9119_v16 }
0x1650   : > { %v9131_v58 = vpack.c.bf16 %v9121_v33, %v9121_v33  ;;  %v9123_v20 = vpop.f32.mrb[150].mxu1 }
0x1651   : > { %v9124_v2 = vpop.f32.mrb[151].mxu1 }
0x1652   : > { %9588 = vmatprep.mubr.bf16.mxu1 %v9131_v58 }
0x1655   : > { %9589 = vmatmul.mubr.bf16.gmra.mrb[172].mxu1 %v9130_v28 }
0x1656   : > { %v9226_v27 = vpop.f32.mrb[152].mxu1 }
0x1657   : > { %v9228_v30 = vpop.f32.mrb[153].mxu1 }
0x1658   : > { %v9230_v34 = vpop.f32.mrb[154].mxu1 }
0x1659   : > { %v9253_v13 = vpack.c.bf16 %v9230_v34, %v9226_v27  ;;  %v9232_v0 = vpop.f32.mrb[155].mxu1 }
0x165a   : > { %v9254_v51 = vpack.c.bf16 %v9232_v0, %v9228_v30 }
0x165c   : > { %9420 = vmatprep.mubr.bf16.mxu0 %v9254_v51 }
0x165d   : > { %9421 = vmatmul.mubr.bf16.vlgmr.msra.gmra.mrb[176].mxu0 %v9253_v13 }
0x165e   : > { %9625 = vmatpush1.bf16.msra.mxu0 %v15822_v46  ;;  %v9236_v31 = vpop.f32.mrb[156].mxu1 }
0x165f   : > { %9626 = vmatprep.subr.bf16.mxu0 %v15843_v9  ;;  %v9238_v47 = vpop.f32.mrb[157].mxu1 }
0x1660   : > { %v9240_v8 = vpop.f32.mrb[158].mxu1 }
0x1661   : > { %v9255_v50 = vpack.c.bf16 %v9240_v8, %v9236_v31  ;;  %v9242_v17 = vpop.f32.mrb[159].mxu1 }
0x1662   : > { %v9256_v60 = vpack.c.bf16 %v9242_v17, %v9238_v47  ;;  %9627 = vmatpush1.bf16.msra.mxu0 %v15837_v37  ;;  %v13020_v37 = vld [vmem:[#allocation54 + $0x28] sm:$0xff]  }
0x1663   : > { %11241 = vmatprep.subr.msk.bf16.mxu0 %vm1694_vm1, %v15857_v54  ;;  %v13021_v54 = vld [vmem:[#allocation54 + $0x30] sm:$0xff]  }
0x1664   : > { %9428 = vmatprep.mubr.bf16.mxu0 %v9256_v60 }
0x1665   : > { %9429 = vmatmul.mubr.bf16.gmra.mrb[180].mxu0 %v9255_v50 }
0x1666   : > { %9629 = vmatpush1.bf16.msra.mxu0 %v15860_v12  ;;  %v9246_v49 = vpop.f32.mrb[160].mxu1  ;;  %v13022_v12 = vld [vmem:[#allocation54 + $0x38] ss:$0 sps:$4 sm:$0x33]  }
0x1667   : > { %v9248_v38 = vpop.f32.mrb[161].mxu1  ;;  %v9257_v1 = vpack.c.bf16 %v9246_v49, %v9246_v49 }
0x1668   : > { %v9258_v46 = vpack.c.bf16 %v9248_v38, %v9248_v38  ;;  %v9250_v44 = vpop.f32.mrb[162].mxu1 }
0x1669   : > { %v9251_v9 = vpop.f32.mrb[163].mxu1 }
0x166a   : > { %9436 = vmatprep.mubr.bf16.mxu0 %v9258_v46 }
0x166d   : > { %9437 = vmatmul.mubr.bf16.gmra.mrb[184].mxu0 %v9257_v1 }
0x166e   : > { %9656 = vmatprep.mubr.bf16.mxu0 %v14084_v21 }
0x1675   : > { %11242 = vmatmul.mubr.msk.bf16.vlgmr.msra.gmra.mrb[188].mxu0 %vm1816_vm4, %v13020_v37 }
0x1676   : > { %9666 = vmatprep.mubr.bf16.mxu0 %v14084_v21 }
0x167d   : > { %11243 = vmatmul.mubr.msk.bf16.gmra.mrb[192].mxu0 %vm1816_vm4, %v13021_v54 }
0x167e   : > { %9676 = vmatprep.mubr.bf16.mxu0 %v14084_v21  ;;  %v13029_v21 = vld [vmem:[%s14288_s3 + $0x158] sm:$0xff]  }
0x167f   : > { %11509 = vmatprep.subr.bf16.mxu1 %v13029_v21 }
0x1680   : > { %11510 = vmatpush3.bf16.msra.mxu1 %v13030_v56 }
0x1681   : > { %11511 = vmatprep.subr.bf16.mxu1 %v13031_v45 }
0x1684   : > { %11512 = vmatpush3.bf16.msra.mxu1 %v13032_v6 }
0x1685   : > { %11244 = vmatmul.mubr.msk.bf16.gmra.mrb[196].mxu0 %vm1816_vm4, %v13022_v12  ;;  %11513 = vmatprep.subr.bf16.mxu1 %v13033_v23 }
0x1688   : > { %11514 = vmatpush3.bf16.msra.mxu1 %v13034_v11 }
0x1689   : > { %11515 = vmatprep.subr.bf16.mxu1 %v13035_v61 }
0x168c   : > { %11516 = vmatpush3.bf16.msra.mxu1 %v13036_v14 }
0x168d   : > { %11517 = vmatprep.subr.bf16.mxu1 %v13037_v29 }
0x1690   : > { %11518 = vmatpush3.bf16.msra.mxu1 %v13038_v35 }
0x1718   : > { %v11485_v26 = vpop.f32.mrb[164].mxu1 }
0x1719   : > { %v11486_v3 = vpop.f32.mrb[165].mxu1 }
0x171a   : > { %v11487_v4 = vadd.f32 %v11486_v3, %v11485_v26  ;;  %v11488_v18 = vpop.f32.mrb[166].mxu1  ;;  %v11293_v26 = vld [vmem:[%s14298_s1] ss:$0 sm:$0xff] }
0x171b   : > { %v11489_v36 = vpop.f32.mrb[167].mxu1 }
0x171c   : > { %v11490_v39 = vadd.f32 %v11489_v36, %v11488_v18 }
0x1720   : > { %v11491_v41 = vpop.f32.mrb[168].mxu1 }
0x1721   : > { %v11492_v55 = vpop.f32.mrb[169].mxu1 }
0x1722   : > { %v11493_v24 = vadd.f32 %v11492_v55, %v11491_v41  ;;  %v11494_v22 = vpop.f32.mrb[170].mxu1 }
0x1723   : > { %v11495_v15 = vpop.f32.mrb[171].mxu1 }
0x1724   : > { %v11496_v59 = vadd.f32 %v11495_v15, %v11494_v22 }
0x1728   : > { %v11497_v19 = vpop.f32.mrb[172].mxu1 }
0x1729   : > { %v11498_v5 = vpop.f32.mrb[173].mxu1 }
0x172a   : > { %v11499_v25 = vadd.f32 %v11498_v5, %v11497_v19  ;;  %v11500_v57 = vpop.f32.mrb[174].mxu1 }
0x172b   : > { %v11501_v40 = vpop.f32.mrb[175].mxu1 }
0x1730   : > { %v11451_v32 = vpop.f32.mrb[176].mxu0 }
0x1731   : > { %v11452_v16 = vpop.f32.mrb[177].mxu0 }
0x1732   : > { %v11453_v33 = vadd.f32 %v11452_v16, %v11451_v32  ;;  %v11454_v58 = vpop.f32.mrb[178].mxu0 }
0x1733   : > { %v11455_v20 = vpop.f32.mrb[179].mxu0 }
0x1734   : > { %v9575_v2 = vadd.f32 %v11487_v4, %v11453_v33  ;;  %v11456_v28 = vadd.f32 %v11455_v20, %v11454_v58 }
0x1736   : > { %v9578_v27 = vadd.f32 %v11490_v39, %v11456_v28 }
0x1738   : > { %v11457_v30 = vpop.f32.mrb[180].mxu0 }
0x1739   : > { %v11458_v34 = vpop.f32.mrb[181].mxu0 }
0x173a   : > { %v11459_v13 = vadd.f32 %v11458_v34, %v11457_v30  ;;  %v11460_v0 = vpop.f32.mrb[182].mxu0 }
0x173b   : > { %v11461_v51 = vpop.f32.mrb[183].mxu0 }
0x173c   : > { %v9583_v31 = vadd.f32 %v11493_v24, %v11459_v13  ;;  %v11462_v47 = vadd.f32 %v11461_v51, %v11460_v0 }
0x173e   : > { %v9586_v8 = vadd.f32 %v11496_v59, %v11462_v47 }
0x1740   : > { %v11463_v50 = vpop.f32.mrb[184].mxu0 }
0x1741   : > { %v11464_v17 = vpop.f32.mrb[185].mxu0 }
0x1742   : > { %v11465_v60 = vadd.f32 %v11464_v17, %v11463_v50  ;;  %v11466_v49 = vpop.f32.mrb[186].mxu0 }
0x1743   : > { %v11467_v38 = vpop.f32.mrb[187].mxu0 }
0x1744   : > { %v9591_v46 = vadd.f32 %v11499_v25, %v11465_v60 }
0x1748   : > { %v9658_v44 = vpop.f32.mrb[188].mxu0 }
0x1749   : > { %v9660_v9 = vpop.f32.mrb[189].mxu0 }
0x174a   : > { %v9662_v1 = vpop.f32.mrb[190].mxu0 }
0x174b   : > { %v9685_v37 = vpack.c.bf16 %v9662_v1, %v9658_v44  ;;  %v9664_v54 = vpop.f32.mrb[191].mxu0 }
0x174c   : > { %v9686_v12 = vpack.c.bf16 %v9664_v54, %v9660_v9 }
0x174e   : > { %9852 = vmatprep.mubr.bf16.mxu1 %v9686_v12 }
0x174f   : > { %9853 = vmatmul.mubr.bf16.vlgmr.msra.gmra.mrb[176].mxu1 %v9685_v37 }
0x1750   : > { %v9668_v63 = vpop.f32.mrb[192].mxu0 }
0x1751   : > { %v9670_v43 = vpop.f32.mrb[193].mxu0 }
0x1752   : > { %v9672_v62 = vpop.f32.mrb[194].mxu0 }
0x1753   : > { %v9687_v10 = vpack.c.bf16 %v9672_v62, %v9668_v63  ;;  %v9674_v53 = vpop.f32.mrb[195].mxu0 }
0x1754   : > { %v9688_v48 = vpack.c.bf16 %v9674_v53, %v9670_v43 }
0x1756   : > { %9860 = vmatprep.mubr.bf16.mxu1 %v9688_v48 }
0x1757   : > { %9861 = vmatmul.mubr.bf16.gmra.mrb[180].mxu1 %v9687_v10 }
0x1758   : > { %v9678_v21 = vpop.f32.mrb[196].mxu0 }
0x1759   : > { %v9680_v56 = vpop.f32.mrb[197].mxu0  ;;  %v9689_v11 = vpack.c.bf16 %v9678_v21, %v9678_v21 }
0x175a   : > { %v9690_v45 = vpack.c.bf16 %v9680_v56, %v9680_v56  ;;  %v9682_v6 = vpop.f32.mrb[198].mxu0 }
0x175b   : > { %v9683_v23 = vpop.f32.mrb[199].mxu0 }
0x175c   : > { %9868 = vmatprep.mubr.bf16.mxu1 %v9690_v45 }
0x175f   : > { %9869 = vmatmul.mubr.bf16.gmra.mrb[184].mxu1 %v9689_v11 }
0x1822   : > { %v11519_v61 = vpop.f32.mrb[176].mxu1 }
0x1823   : > { %v11520_v14 = vpop.f32.mrb[177].mxu1 }
0x1824   : > { %v11521_v29 = vadd.f32 %v11520_v14, %v11519_v61  ;;  %v11522_v35 = vpop.f32.mrb[178].mxu1 }
0x1825   : > { %v11523_v3 = vpop.f32.mrb[179].mxu1 }
0x1826   : > { %v9876_v4 = vadd.f32 %v11521_v29, %v9575_v2  ;;  %v11524_v18 = vadd.f32 %v11523_v3, %v11522_v35 }
0x1828   : > { %v9888_v36 = vadd.f32 %v11293_v26, %v9876_v4  ;;  %v9877_v39 = vadd.f32 %v11524_v18, %v9578_v27 }
0x182a   : > { %v9893_v41 = vsel %vm2376_vm3, %v9888_v36, 0.0  ;;  %v9889_v55 = vadd.f32 %v11293_v26, %v9877_v39  ;;  %v11525_v24 = vpop.f32.mrb[180].mxu1 }
0x182b   : > { %13047 = vtanh.f32 %v9893_v41  ;;  %v11526_v22 = vpop.f32.mrb[181].mxu1 }
0x182c   : > { %13049 = vtanh.f32 %v9889_v55  ;;  %v11527_v15 = vadd.f32 %v11526_v22, %v11525_v24  ;;  %v11528_v59 = vpop.f32.mrb[182].mxu1 }
0x182d   : > { %v11529_v19 = vpop.f32.mrb[183].mxu1 }
0x182e   : > { %v9878_v5 = vadd.f32 %v11527_v15, %v9583_v31  ;;  %v11530_v25 = vadd.f32 %v11529_v19, %v11528_v59 }
0x1830   : > { %v9890_v57 = vadd.f32 %v11293_v26, %v9878_v5  ;;  %v9879_v40 = vadd.f32 %v11530_v25, %v9586_v8 }
0x1832   : > { %v9895_v32 = vsel %vm15613_vm12, %v9890_v57, 0.0  ;;  %v9891_v16 = vadd.f32 %v11293_v26, %v9879_v40  ;;  %v11531_v52 = vpop.f32.mrb[184].mxu1 }
0x1833   : > { %13051 = vtanh.f32 %v9895_v32  ;;  %v11532_v33 = vpop.f32.mrb[185].mxu1 }
0x1834   : > { %13053 = vtanh.f32 %v9891_v16  ;;  %v11533_v58 = vadd.f32 %v11532_v33, %v11531_v52  ;;  %v11534_v20 = vpop.f32.mrb[186].mxu1 }
0x1835   : > { %v13048_v2 = vpop.eup %13047  ;;  %v11535_v28 = vpop.f32.mrb[187].mxu1 }
0x1836   : > { %v13050_v27 = vpop.eup %13049  ;;  %9903 = vst [vmem:[%s14925_s19] sm:$0xff] %v13048_v2  ;;  %9908 = vst [vmem:[#allocation4] sm:$0xff] %v13048_v2  ;;  %v9880_v30 = vadd.f32 %v11533_v58, %v9591_v46 }
0x1837   : > { %9904 = vst [vmem:[%s14925_s19 + $0x8] sm:$0xff] %v13050_v27  ;;  %9909 = vst [vmem:[#allocation4 + $0x8] sm:$0xff] %v13050_v27 }
0x1838   : > { %v9892_v42 = vadd.f32 %v11293_v26, %v9880_v30 }
0x183a   : > { %v9897_v34 = vsel %vm7512_vm13, %v9892_v42, 0.0 }
0x183b   : > { %13055 = vtanh.f32 %v9897_v34 }
0x183d   : > { %v13052_v13 = vpop.eup %13051 }
0x183e   : > { %v13054_v0 = vpop.eup %13053  ;;  %9905 = vst [vmem:[%s14925_s19 + $0x10] sm:$0xff] %v13052_v13  ;;  %9910 = vst [vmem:[#allocation4 + $0x10] sm:$0xff] %v13052_v13 }
0x183f   : > { %9906 = vst [vmem:[%s14925_s19 + $0x18] sm:$0xff] %v13054_v0  ;;  %9911 = vst [vmem:[#allocation4 + $0x18] sm:$0xff] %v13054_v0 }
0x1845   : > { %v13056_v7 = vpop.eup %13055 }
0x1846   : > { %9907 = vst [vmem:[%s14925_s19 + $0x20] sm:$0xf] %v13056_v7  ;;  %9912 = vst [vmem:[#allocation4 + $0x20] sm:$0xf] %v13056_v7 }
0x1847   : > { %13887 = shalt.err (!%p13884_p8)
}
0x1848   : > { %s13888_s19 = scalar_lea.hbm %s15940_s24, 640  ;;  %s13892_s21 = scalar_lea.hbm %s16176_s16, 1920 }
0x1849   : > { %p13889_p0 = scmp.ne.s32.totalorder %s15940_s24, %s13888_s19  ;;  %p13893_p4 = scmp.lt.u32.totalorder %s15940_s24, %s16176_s16 }
0x184a   : > { %p13894_p13 = scmp.lt.u32.totalorder %s13892_s21, %s13888_s19  ;;  %p13896_p7 = scmp.lt.u32.totalorder %s13888_s19, %s15940_s24 }
0x184b   : > { %p13890_p2 = pnand %p13889_p0, %p16177_p10 }
0x184c   : > { %p13895_p5 = por %p13894_p13, %p13893_p4 }
0x184d   : > { %p13891_p1 = pneg %p13890_p2 }
0x184e   : > { %p13897_p11 = por %p13896_p7, %p13895_p5 }
0x1850   : > { %p13898_p6 = pnand %p13897_p11, %p13891_p1 }
0x1852   : > { %13901 = shalt.err (!%p13898_p6)
}
0x1853   : > { %s14088_s6 = smov 128   ;;  %s14089_s2 = smov 8  }
0x1854   : > { %11910 = dma.vmem_to_hbm [thread:$0]  (%p16177_p10), %s15942_s22, 640, %s15940_s24, %s9925_s12, %s14088_s6, %s14088_s6, %s14089_s2  }
0x1855 PF: > { %p12060_p3 = scmp.ge.s32.totalorder %s14000_s7, 2  ;;  %s9953_s4 = sand.u32 1, %s13988_s0  }
0x1856   : > { %p16178_p9 = scmp.ne.s32.totalorder %s16119_s9, 0  ;;  %s9954_s15 = scalar_lea.sflag [#allocation12], %s9953_s4 }
0x1858   : > { %p12002_p12 = pnand %p12060_p3, %p16178_p9 }
0x185a   : > { %13983 = dma.done.wait (!%p12002_p12), %s9954_s15, 640  }
0x185b   : > { %13985 = vsyncadd (!%p12002_p12), %s9954_s15, 4294966656  ;;  %p113_p8 = scmp.ge.s32.totalorder %s14737_s11, 5   ;;  %s16179_s0 = smov %s13992_s5 }
0x185c   : > { %s16180_s5 = smov %s13996_s14  ;;  %s16181_s14 = smov %s14749_s13 }
0x185d   : > { %s16182_s7 = smov %s14737_s11  ;;  %115 = sbr.rel (!%p113_p8) target bundleno = 105 (0x69), region = 434 }
0x1864   :  { %9959 = vsyncpa [#allocation11], 1 }
0x1865   :  { %9961 = vsyncpa [#allocation11 + $0x1], 1 }
0x1866   :  { %9962 = vsyncpa [#allocation14], 1 }
0x1867   :  { %9964 = vsyncpa [#allocation14 + $0x1], 1 }
0x1868   :  { %9965 = vsyncpa [#allocation17], 1 }
0x1869   :  { %9966 = vsyncpa [#allocation20], 1 }
0x186a   :  { %9967 = vsyncpa [#allocation23], 1 }
0x186b   :  { %9968 = vsyncpa [#allocation26], 1 }
0x186c   :  { %9969 = vsyncpa [#allocation29], 1 }
0x186d   :  { %9970 = vsyncpa [#allocation32], 1 }
0x186e   :  { %9971 = vsyncpa [#allocation35], 1 }
0x186f   :  { %9972 = vsyncpa [#allocation38], 1 }
0x1870   :  { %9973 = vsyncpa [#allocation41], 1 }
0x1871   :  { %9974 = vsyncpa [#allocation44], 1 }
0x1872   :  { %9975 = vsyncpa [#allocation47], 1 }
0x1873   :  { %9976 = vsyncpa [#allocation50], 1 }
0x1874   :  { %9977 = vsyncpa [#allocation53], 1 }
0x1875   :  { %9978 = vsyncpa [#allocation12], 1 }
0x1876   :  { %9980 = vsyncpa [#allocation12 + $0x1], 1 }

</bundles_post_ra>
